<compile_context>
chip_gen: v6e
topology: v6e:2x2x1
jax: 0.10.0
libtpu: 0.0.40
codegen_flags: <defaults>
</compile_context>

<pallas_src>
import functools

import jax
import jax.numpy as jnp
from jax.experimental import pallas as pl
from jax.experimental.pallas import tpu as pltpu

ENC = [4, 8]
DEC = [8, 4]
Z_DIM = 8
NUM_TARGET_N = 4
NHID = 8 * 7 * 7  # 392
EMSIZE = (8, 7, 7)
BN_EPS = 1e-5

_COMPILER_PARAMS = pltpu.CompilerParams(dimension_semantics=("arbitrary",))


def _round_up(n, m):
    return ((n + m - 1) // m) * m


def _full_spec(shape):
    nd = len(shape)
    return pl.BlockSpec(tuple(shape), lambda *_: (0,) * nd)


# --------------------------------------------------------------------------- #
# Pallas kernels
# --------------------------------------------------------------------------- #
def _conv_bn_act_kernel(x_ref, w_ref, g_ref, bt_ref, m_ref, o_ref, slab_ref,
                        *, cin, k, wp, cnt, act):
    """Fused conv (in-kernel im2col + one MXU matmul) -> BN (batch stats) -> ReLU (-> Tanh).

    x_ref   : (Cin, Lin)  bf16  zero-padded input frame, flat (b, h, w) on lanes
    w_ref   : (Cout, K)   bf16  conv weight matrix, K = k*k*Cin rows ordered (di, dj, cin)
    g_ref   : (Cout, 1)   f32   BN gamma
    bt_ref  : (Cout, 1)   f32   BN beta
    m_ref   : (1, NFp)    f32   1.0 on valid output columns, 0.0 on frame garbage / lane pad
    o_ref   : (Cout, NFp)       full-frame activation map (lane axis = multiple of 128)
    slab_ref: (K, NFp)    bf16  VMEM scratch: im2col slab gathered in-kernel
    """
    nfp = o_ref.shape[-1]

    # In-kernel tap gather: every (di, dj) tap is a statically shifted lane view
    # of the VMEM-resident frame (no HBM patch expansion, no XLA im2col glue).
    for di in range(k):
        for dj in range(k):
            t = di * k + dj
            off = di * wp + dj
            slab_ref[t * cin:(t + 1) * cin, :] = x_ref[:, off:off + nfp]

    # One wide MXU matmul per block (bf16 operands, f32 accumulation).
    y = jnp.dot(w_ref[...], slab_ref[...], preferred_element_type=jnp.float32)

    # Train-mode BatchNorm statistics over the valid conv outputs only.
    # Conv bias is omitted: a per-channel constant cancels exactly here.
    m = m_ref[...]
    ym = y * m
    mean = jnp.sum(ym, axis=1, keepdims=True) / cnt
    var = jnp.sum(ym * y, axis=1, keepdims=True) / cnt - mean * mean
    var = jnp.maximum(var, 0.0)                       # guard single-pass cancellation
    scale = g_ref[...] * jax.lax.rsqrt(var + BN_EPS)
    shift = bt_ref[...] - mean * scale

    out = jnp.maximum(y * scale + shift, 0.0)         # BN + ReLU
    if act == "relu_tanh":
        out = jnp.tanh(out)
    o_ref[...] = out.astype(o_ref.dtype)


def _heads_kernel(flat_ref, wml_ref, bml_ref, eps_ref, lab_ref, wz_ref, wl_ref,
                  bfc_ref, mu_ref, lv_ref, h_ref):
    """Fused fc_mean + fc_logvar (single matmul) + reparameterization + conditional fc."""
    ml = (jnp.dot(flat_ref[...], wml_ref[...], preferred_element_type=jnp.float32)
          + bml_ref[...])                             # (B, 2*z_dim)
    mu = ml[:, :Z_DIM]
    lv = ml[:, Z_DIM:]
    mu_ref[...] = mu
    lv_ref[...] = lv
    z = mu + jnp.exp(0.5 * lv) * eps_ref[...]
    # concat([z, label_emb]) @ fc_w  ==  z @ fc_w[:z_dim] + label_emb @ fc_w[z_dim:]
    h_ref[...] = (jnp.dot(z.astype(jnp.bfloat16), wz_ref[...],
                          preferred_element_type=jnp.float32)
                  + jnp.dot(lab_ref[...], wl_ref[...],
                            preferred_element_type=jnp.float32)
                  + bfc_ref[...])


# --------------------------------------------------------------------------- #
# Block wrappers (tiny XLA layout glue around the kernels)
# --------------------------------------------------------------------------- #
def _valid_mask(b, hp, wp, oh, ow, nfp):
    idx = jnp.arange(nfp, dtype=jnp.int32)
    local = idx % (hp * wp)
    ok = (idx < b * hp * wp) & (local // wp < oh) & (local % wp < ow)
    return ok.astype(jnp.float32).reshape(1, nfp)


def _conv_w_mat(w):
    """PyTorch Conv2d weight (Cout, Cin, k, k) -> (Cout, k*k*Cin), rows (di, dj, cin)."""
    return jnp.transpose(w, (0, 2, 3, 1)).reshape(w.shape[0], -1).astype(jnp.bfloat16)


def _deconv_w_mat(w_t):
    """PyTorch ConvTranspose2d weight (Cin, Cout, k, k) -> equivalent-conv matrix."""
    w_eq = jnp.transpose(jnp.flip(w_t, axis=(2, 3)), (1, 0, 2, 3))  # (Cout, Cin, k, k)
    return _conv_w_mat(w_eq)


def conv_block(x, w_mat, gamma, beta, *, k, pad, dilate, pool, act, out_dtype):
    """x: (Cin, B, H, W).  Returns block output in (Cout, B, H', W') layout."""
    cin, b, h, w = x.shape
    cout = w_mat.shape[0]
    x = x.astype(jnp.bfloat16)                 # cast once, before any layout glue
    if dilate > 1:                             # zero-dilation for the strided deconv
        hd, wd = (h - 1) * dilate + 1, (w - 1) * dilate + 1
        x = jnp.zeros((cin, b, hd, wd), x.dtype).at[:, :, ::dilate, ::dilate].set(x)
        h, w = hd, wd
    x = jnp.pad(x, ((0, 0), (0, 0), (pad, pad), (pad, pad)))
    hp, wp = h + 2 * pad, w + 2 * pad
    oh, ow = hp - k + 1, wp - k + 1
    nf = b * hp * wp                           # frame size (flat (b, h, w) lanes)
    nfp = _round_up(nf, 128)                   # lane-dense compute / store width
    lin = _round_up(nfp + (k - 1) * (wp + 1), 128)   # frame + max tap shift, zero-filled
    frame = jnp.pad(x.reshape(cin, nf), ((0, 0), (0, lin - nf)))
    mask = _valid_mask(b, hp, wp, oh, ow, nfp)
    kdim = k * k * cin

    args = (frame, w_mat,
            gamma.reshape(cout, 1).astype(jnp.float32),
            beta.reshape(cout, 1).astype(jnp.float32),
            mask)
    out = pl.pallas_call(
        functools.partial(_conv_bn_act_kernel, cin=cin, k=k, wp=wp,
                          cnt=float(b * oh * ow), act=act),
        grid=(1,),
        in_specs=[_full_spec(a.shape) for a in args],
        out_specs=_full_spec((cout, nfp)),
        out_shape=jax.ShapeDtypeStruct((cout, nfp), out_dtype),
        scratch_shapes=[pltpu.VMEM((kdim, nfp), jnp.bfloat16)],
        compiler_params=_COMPILER_PARAMS,
    )(*args)

    y = out[:, :nf].reshape(cout, b, hp, wp)[:, :, :oh, :ow]
    if pool:  # 2x2 / stride-2 max-pool: tiny layout glue on a <30 KB array
        y = jnp.maximum(jnp.maximum(y[:, :, 0::2, 0::2], y[:, :, 0::2, 1::2]),
                        jnp.maximum(y[:, :, 1::2, 0::2], y[:, :, 1::2, 1::2]))
    return y


def heads_block(flat, wml, bml, eps, lab, wz, wl, bfc):
    bsz, nhid = flat.shape
    args = (flat.astype(jnp.bfloat16), wml, bml, eps, lab.astype(jnp.bfloat16),
            wz, wl, bfc)
    return pl.pallas_call(
        _heads_kernel,
        grid=(1,),
        in_specs=[_full_spec(a.shape) for a in args],
        out_specs=(_full_spec((bsz, Z_DIM)), _full_spec((bsz, Z_DIM)),
                   _full_spec((bsz, nhid))),
        out_shape=(jax.ShapeDtypeStruct((bsz, Z_DIM), jnp.float32),
                   jax.ShapeDtypeStruct((bsz, Z_DIM), jnp.float32),
                   jax.ShapeDtypeStruct((bsz, nhid), jnp.float32)),
        compiler_params=_COMPILER_PARAMS,
    )(*args)


# --------------------------------------------------------------------------- #
# VAE parameters and forward
# --------------------------------------------------------------------------- #
def init_params(key):
    ks = jax.random.split(key, 20)
    n = lambda k, s, sc=0.1: (sc * jax.random.normal(k, s)).astype(jnp.float32)
    return {
        # encoder block 1: Conv2d(2 -> 4, k=3, s=1, p=1) + BN
        "enc1_w": n(ks[0], (ENC[0], 2, 3, 3)),
        "enc1_b": n(ks[1], (ENC[0],)),   # unused: constant bias cancels under train-mode BN
        "enc1_g": jnp.ones((ENC[0],), jnp.float32),
        "enc1_beta": jnp.zeros((ENC[0],), jnp.float32),
        # encoder block 2: Conv2d(4 -> 8) + BN
        "enc2_w": n(ks[2], (ENC[1], ENC[0], 3, 3)),
        "enc2_b": n(ks[3], (ENC[1],)),   # unused (see above)
        "enc2_g": jnp.ones((ENC[1],), jnp.float32),
        "enc2_beta": jnp.zeros((ENC[1],), jnp.float32),
        # heads (stored as (in, out))
        "fc_mean_w": n(ks[4], (NHID, Z_DIM)),
        "fc_mean_b": n(ks[5], (Z_DIM,)),
        "fc_logvar_w": n(ks[6], (NHID, Z_DIM)),
        "fc_logvar_b": n(ks[7], (Z_DIM,)),
        "emb": n(ks[8], (10, NUM_TARGET_N)),
        "fc_w": n(ks[9], (Z_DIM + NUM_TARGET_N, NHID)),
        "fc_b": n(ks[10], (NHID,)),
        # decoder block 1: ConvTranspose2d(8 -> 8, k=6, s=1, p=1) + BN
        "dec1_w": n(ks[11], (EMSIZE[0], DEC[0], 6, 6)),
        "dec1_b": n(ks[12], (DEC[0],)),  # unused (see above)
        "dec1_g": jnp.ones((DEC[0],), jnp.float32),
        "dec1_beta": jnp.zeros((DEC[0],), jnp.float32),
        # decoder block 2: ConvTranspose2d(8 -> 4, k=6, s=2, p=1) + BN (+ Tanh)
        "dec2_w": n(ks[13], (DEC[0], DEC[1], 6, 6)),
        "dec2_b": n(ks[14], (DEC[1],)),  # unused (see above)
        "dec2_g": jnp.ones((DEC[1],), jnp.float32),
        "dec2_beta": jnp.zeros((DEC[1],), jnp.float32),
    }


def vae_forward(params, x_nchw, label, eps_key):
    bsz = x_nchw.shape[0]
    x = jnp.transpose(x_nchw.astype(jnp.float32), (1, 0, 2, 3))   # (C, B, H, W)

    # ---- encoder: conv + BN + ReLU kernels (pool = tiny XLA glue) ----
    h = conv_block(x, _conv_w_mat(params["enc1_w"]), params["enc1_g"],
                   params["enc1_beta"], k=3, pad=1, dilate=1, pool=True,
                   act="relu", out_dtype=jnp.bfloat16)            # (4, B, 14, 14)
    h = conv_block(h, _conv_w_mat(params["enc2_w"]), params["enc2_g"],
                   params["enc2_beta"], k=3, pad=1, dilate=1, pool=True,
                   act="relu", out_dtype=jnp.bfloat16)            # (8, B, 7, 7)
    flat = jnp.transpose(h, (1, 0, 2, 3)).reshape(bsz, NHID)      # PyTorch Flatten order

    # ---- fc_mean + fc_logvar + reparameterization + conditional fc ----
    epsilon = jax.random.normal(eps_key, (bsz, Z_DIM), jnp.float32)
    lab = params["emb"][label]                                    # embedding gather (glue)
    wml = jnp.concatenate([params["fc_mean_w"], params["fc_logvar_w"]],
                          axis=1).astype(jnp.bfloat16)            # (nhid, 2*z_dim)
    bml = jnp.concatenate([params["fc_mean_b"],
                           params["fc_logvar_b"]]).reshape(1, 2 * Z_DIM)
    wz = params["fc_w"][:Z_DIM].astype(jnp.bfloat16)              # (z_dim, nhid)
    wl = params["fc_w"][Z_DIM:].astype(jnp.bfloat16)              # (num_targetN, nhid)
    mu, logvar, hfc = heads_block(flat, wml, bml, epsilon, lab, wz, wl,
                                  params["fc_b"].reshape(1, NHID))

    # ---- decoder: deconv + BN + ReLU (+ Tanh) kernels ----
    hd = jnp.transpose(hfc.reshape(bsz, *EMSIZE), (1, 0, 2, 3))   # UnFlatten -> (8, B, 7, 7)
    hd = conv_block(hd, _deconv_w_mat(params["dec1_w"]), params["dec1_g"],
                    params["dec1_beta"], k=6, pad=4, dilate=1, pool=False,
                    act="relu", out_dtype=jnp.bfloat16)           # (8, B, 10, 10)
    out = conv_block(hd, _deconv_w_mat(params["dec2_w"]), params["dec2_g"],
                     params["dec2_beta"], k=6, pad=4, dilate=2, pool=False,
                     act="relu_tanh", out_dtype=jnp.float32)      # (4, B, 22, 22)
    return jnp.transpose(out, (1, 0, 2, 3)), mu, logvar


# --------------------------------------------------------------------------- #
if __name__ == "__main__":
    key = jax.random.PRNGKey(0)
    k_param, k_x, k_label, k_eps = jax.random.split(key, 4)

    params = init_params(k_param)
    # conditional VAE input: (B, 2, 28, 28) NCHW, labels in [0, 10)
    x = jax.random.normal(k_x, (2, 2, 28, 28), jnp.float32)
    label = jax.random.randint(k_label, (2,), 0, 10)

    fwd = jax.jit(vae_forward)
    recon, mu, logvar = fwd(params, x, label, k_eps)
    jax.block_until_ready((recon, mu, logvar))

    assert recon.shape == (2, 4, 22, 22), recon.shape
    assert mu.shape == (2, Z_DIM) and logvar.shape == (2, Z_DIM)
    assert bool(jnp.all(jnp.isfinite(recon)))
    assert bool(jnp.all(jnp.isfinite(mu))) and bool(jnp.all(jnp.isfinite(logvar)))
    print("KERNEL_OK")
</pallas_src>

<mosaic_0001>
module attributes {stable_mosaic.version = 11 : i64} {
  func.func @_conv_bn_act_kernel(%arg0: i32, %arg1: memref<2x2048xbf16, #tpu.memory_space<vmem>>, %arg2: memref<4x18xbf16, #tpu.memory_space<vmem>>, %arg3: memref<4x1xf32, #tpu.memory_space<vmem>>, %arg4: memref<4x1xf32, #tpu.memory_space<vmem>>, %arg5: memref<1x1920xf32, #tpu.memory_space<vmem>>, %arg6: memref<4x1920xbf16, #tpu.memory_space<vmem>>, %arg7: memref<18x1920xbf16, #tpu.memory_space<vmem>>) attributes {dimension_semantics = [#tpu.dimension_semantics<arbitrary>], iteration_bounds = array<i64: 1>, scalar_prefetch = 0 : i64, scratch_operands = 1 : i64, tpu.core_type = #tpu.core_type<tc>, window_params = [{pipeline_mode = #tpu.pipeline_mode<synchronous>, transform_indices = @transform_0, window_bounds = array<i64: 2, 2048>}, {pipeline_mode = #tpu.pipeline_mode<synchronous>, transform_indices = @transform_1, window_bounds = array<i64: 4, 18>}, {pipeline_mode = #tpu.pipeline_mode<synchronous>, transform_indices = @transform_2, window_bounds = array<i64: 4, 1>}, {pipeline_mode = #tpu.pipeline_mode<synchronous>, transform_indices = @transform_3, window_bounds = array<i64: 4, 1>}, {pipeline_mode = #tpu.pipeline_mode<synchronous>, transform_indices = @transform_4, window_bounds = array<i64: 1, 1920>}, {pipeline_mode = #tpu.pipeline_mode<synchronous>, transform_indices = @transform_5, window_bounds = array<i64: 4, 1920>}]} {
    %c0 = arith.constant 0 : index
    %c0_0 = arith.constant 0 : index
    %0 = vector.load %arg1[%c0, %c0_0] : memref<2x2048xbf16, #tpu.memory_space<vmem>>, vector<2x1920xbf16>
    %c0_1 = arith.constant 0 : index
    %c0_2 = arith.constant 0 : index
    %1 = vector.load %arg7[%c0_1, %c0_2] : memref<18x1920xbf16, #tpu.memory_space<vmem>>, vector<2x1920xbf16>
    tpu.vector_store %arg7[%c0_1, %c0_2], %0 {strides = array<i32>} : memref<18x1920xbf16, #tpu.memory_space<vmem>>, vector<2x1920xbf16>,
    %c0_3 = arith.constant 0 : index
    %c1 = arith.constant 1 : index
    %2 = vector.load %arg1[%c0_3, %c1] : memref<2x2048xbf16, #tpu.memory_space<vmem>>, vector<2x1920xbf16>
    %c2 = arith.constant 2 : index
    %c0_4 = arith.constant 0 : index
    %3 = vector.load %arg7[%c2, %c0_4] : memref<18x1920xbf16, #tpu.memory_space<vmem>>, vector<2x1920xbf16>
    tpu.vector_store %arg7[%c2, %c0_4], %2 {strides = array<i32>} : memref<18x1920xbf16, #tpu.memory_space<vmem>>, vector<2x1920xbf16>,
    %c0_5 = arith.constant 0 : index
    %c2_6 = arith.constant 2 : index
    %4 = vector.load %arg1[%c0_5, %c2_6] : memref<2x2048xbf16, #tpu.memory_space<vmem>>, vector<2x1920xbf16>
    %c4 = arith.constant 4 : index
    %c0_7 = arith.constant 0 : index
    %5 = vector.load %arg7[%c4, %c0_7] : memref<18x1920xbf16, #tpu.memory_space<vmem>>, vector<2x1920xbf16>
    tpu.vector_store %arg7[%c4, %c0_7], %4 {strides = array<i32>} : memref<18x1920xbf16, #tpu.memory_space<vmem>>, vector<2x1920xbf16>,
    %c0_8 = arith.constant 0 : index
    %c30 = arith.constant 30 : index
    %6 = vector.load %arg1[%c0_8, %c30] : memref<2x2048xbf16, #tpu.memory_space<vmem>>, vector<2x1920xbf16>
    %c6 = arith.constant 6 : index
    %c0_9 = arith.constant 0 : index
    %7 = vector.load %arg7[%c6, %c0_9] : memref<18x1920xbf16, #tpu.memory_space<vmem>>, vector<2x1920xbf16>
    tpu.vector_store %arg7[%c6, %c0_9], %6 {strides = array<i32>} : memref<18x1920xbf16, #tpu.memory_space<vmem>>, vector<2x1920xbf16>,
    %c0_10 = arith.constant 0 : index
    %c31 = arith.constant 31 : index
    %8 = vector.load %arg1[%c0_10, %c31] : memref<2x2048xbf16, #tpu.memory_space<vmem>>, vector<2x1920xbf16>
    %c8 = arith.constant 8 : index
    %c0_11 = arith.constant 0 : index
    %9 = vector.load %arg7[%c8, %c0_11] : memref<18x1920xbf16, #tpu.memory_space<vmem>>, vector<2x1920xbf16>
    tpu.vector_store %arg7[%c8, %c0_11], %8 {strides = array<i32>} : memref<18x1920xbf16, #tpu.memory_space<vmem>>, vector<2x1920xbf16>,
    %c0_12 = arith.constant 0 : index
    %c32 = arith.constant 32 : index
    %10 = vector.load %arg1[%c0_12, %c32] : memref<2x2048xbf16, #tpu.memory_space<vmem>>, vector<2x1920xbf16>
    %c10 = arith.constant 10 : index
    %c0_13 = arith.constant 0 : index
    %11 = vector.load %arg7[%c10, %c0_13] : memref<18x1920xbf16, #tpu.memory_space<vmem>>, vector<2x1920xbf16>
    tpu.vector_store %arg7[%c10, %c0_13], %10 {strides = array<i32>} : memref<18x1920xbf16, #tpu.memory_space<vmem>>, vector<2x1920xbf16>,
    %c0_14 = arith.constant 0 : index
    %c60 = arith.constant 60 : index
    %12 = vector.load %arg1[%c0_14, %c60] : memref<2x2048xbf16, #tpu.memory_space<vmem>>, vector<2x1920xbf16>
    %c12 = arith.constant 12 : index
    %c0_15 = arith.constant 0 : index
    %13 = vector.load %arg7[%c12, %c0_15] : memref<18x1920xbf16, #tpu.memory_space<vmem>>, vector<2x1920xbf16>
    tpu.vector_store %arg7[%c12, %c0_15], %12 {strides = array<i32>} : memref<18x1920xbf16, #tpu.memory_space<vmem>>, vector<2x1920xbf16>,
    %c0_16 = arith.constant 0 : index
    %c61 = arith.constant 61 : index
    %14 = vector.load %arg1[%c0_16, %c61] : memref<2x2048xbf16, #tpu.memory_space<vmem>>, vector<2x1920xbf16>
    %c14 = arith.constant 14 : index
    %c0_17 = arith.constant 0 : index
    %15 = vector.load %arg7[%c14, %c0_17] : memref<18x1920xbf16, #tpu.memory_space<vmem>>, vector<2x1920xbf16>
    tpu.vector_store %arg7[%c14, %c0_17], %14 {strides = array<i32>} : memref<18x1920xbf16, #tpu.memory_space<vmem>>, vector<2x1920xbf16>,
    %c0_18 = arith.constant 0 : index
    %c62 = arith.constant 62 : index
    %16 = vector.load %arg1[%c0_18, %c62] : memref<2x2048xbf16, #tpu.memory_space<vmem>>, vector<2x1920xbf16>
    %c16 = arith.constant 16 : index
    %c0_19 = arith.constant 0 : index
    %17 = vector.load %arg7[%c16, %c0_19] : memref<18x1920xbf16, #tpu.memory_space<vmem>>, vector<2x1920xbf16>
    tpu.vector_store %arg7[%c16, %c0_19], %16 {strides = array<i32>} : memref<18x1920xbf16, #tpu.memory_space<vmem>>, vector<2x1920xbf16>,
    %c0_20 = arith.constant 0 : index
    %c0_21 = arith.constant 0 : index
    %18 = vector.load %arg2[%c0_20, %c0_21] : memref<4x18xbf16, #tpu.memory_space<vmem>>, vector<4x18xbf16>
    %c0_22 = arith.constant 0 : index
    %c0_23 = arith.constant 0 : index
    %19 = vector.load %arg7[%c0_22, %c0_23] : memref<18x1920xbf16, #tpu.memory_space<vmem>>, vector<18x1920xbf16>
    %cst = arith.constant dense<0.000000e+00> : vector<4x1920xf32>
    %20 = tpu.matmul %18, %19, %cst {dimension_numbers = #tpu.dot_dimension_numbers<[1], [0], [0], [1], [0, 0, 1, 1], [], []>} : vector<4x18xbf16>, vector<18x1920xbf16>, vector<4x1920xf32> -> vector<4x1920xf32>
    %c0_24 = arith.constant 0 : index
    %c0_25 = arith.constant 0 : index
    %21 = vector.load %arg5[%c0_24, %c0_25] : memref<1x1920xf32, #tpu.memory_space<vmem>>, vector<1x1920xf32>
    %22 = vector.broadcast %21 : vector<1x1920xf32> to vector<4x1920xf32>
    %23 = arith.mulf %20, %22 : vector<4x1920xf32>
    %cst_26 = arith.constant dense<0.000000e+00> : vector<4xf32>
    %24 = vector.multi_reduction <add>, %23, %cst_26 [1] : vector<4x1920xf32> to vector<4xf32>
    %25 = vector.shape_cast %24 : vector<4xf32> to vector<4x1xf32>
    %cst_27 = arith.constant 1.568000e+03 : f32
    %26 = vector.broadcast %cst_27 : f32 to vector<4x1xf32>
    %27 = arith.divf %25, %26 : vector<4x1xf32>
    %28 = arith.mulf %23, %20 : vector<4x1920xf32>
    %cst_28 = arith.constant dense<0.000000e+00> : vector<4xf32>
    %29 = vector.multi_reduction <add>, %28, %cst_28 [1] : vector<4x1920xf32> to vector<4xf32>
    %30 = vector.shape_cast %29 : vector<4xf32> to vector<4x1xf32>
    %cst_29 = arith.constant 1.568000e+03 : f32
    %31 = vector.broadcast %cst_29 : f32 to vector<4x1xf32>
    %32 = arith.divf %30, %31 : vector<4x1xf32>
    %33 = arith.mulf %27, %27 : vector<4x1xf32>
    %34 = arith.subf %32, %33 : vector<4x1xf32>
    %cst_30 = arith.constant 0.000000e+00 : f32
    %35 = vector.broadcast %cst_30 : f32 to vector<4x1xf32>
    %36 = arith.maximumf %34, %35 : vector<4x1xf32>
    %c0_31 = arith.constant 0 : index
    %c0_32 = arith.constant 0 : index
    %37 = vector.load %arg3[%c0_31, %c0_32] : memref<4x1xf32, #tpu.memory_space<vmem>>, vector<4x1xf32>
    %cst_33 = arith.constant 9.99999974E-6 : f32
    %38 = vector.broadcast %cst_33 : f32 to vector<4x1xf32>
    %39 = arith.addf %36, %38 : vector<4x1xf32>
    %40 = math.rsqrt %39 : vector<4x1xf32>
    %41 = arith.mulf %37, %40 : vector<4x1xf32>
    %c0_34 = arith.constant 0 : index
    %c0_35 = arith.constant 0 : index
    %42 = vector.load %arg4[%c0_34, %c0_35] : memref<4x1xf32, #tpu.memory_space<vmem>>, vector<4x1xf32>
    %43 = arith.mulf %27, %41 : vector<4x1xf32>
    %44 = arith.subf %42, %43 : vector<4x1xf32>
    %45 = vector.broadcast %41 : vector<4x1xf32> to vector<4x1920xf32>
    %46 = arith.mulf %20, %45 : vector<4x1920xf32>
    %47 = vector.broadcast %44 : vector<4x1xf32> to vector<4x1920xf32>
    %48 = arith.addf %46, %47 : vector<4x1920xf32>
    %cst_36 = arith.constant 0.000000e+00 : f32
    %49 = vector.broadcast %cst_36 : f32 to vector<4x1920xf32>
    %50 = arith.maximumf %48, %49 : vector<4x1920xf32>
    %51 = arith.truncf %50 : vector<4x1920xf32> to vector<4x1920xbf16>
    %c0_37 = arith.constant 0 : index
    %c0_38 = arith.constant 0 : index
    %52 = vector.load %arg6[%c0_37, %c0_38] : memref<4x1920xbf16, #tpu.memory_space<vmem>>, vector<4x1920xbf16>
    tpu.vector_store %arg6[%c0_37, %c0_38], %51 {strides = array<i32>} : memref<4x1920xbf16, #tpu.memory_space<vmem>>, vector<4x1920xbf16>,
    return
  }
  func.func @transform_0(%arg0: i32) -> (i32, i32) {
    %c0_i32 = arith.constant 0 : i32
    %c0_i32_0 = arith.constant 0 : i32
    %c0_i32_1 = arith.constant 0 : i32
    return %c0_i32, %c0_i32_0 : i32, i32
  }
  func.func @transform_1(%arg0: i32) -> (i32, i32) {
    %c0_i32 = arith.constant 0 : i32
    %c0_i32_0 = arith.constant 0 : i32
    %c0_i32_1 = arith.constant 0 : i32
    return %c0_i32, %c0_i32_0 : i32, i32
  }
  func.func @transform_2(%arg0: i32) -> (i32, i32) {
    %c0_i32 = arith.constant 0 : i32
    %c0_i32_0 = arith.constant 0 : i32
    %c0_i32_1 = arith.constant 0 : i32
    return %c0_i32, %c0_i32_0 : i32, i32
  }
  func.func @transform_3(%arg0: i32) -> (i32, i32) {
    %c0_i32 = arith.constant 0 : i32
    %c0_i32_0 = arith.constant 0 : i32
    %c0_i32_1 = arith.constant 0 : i32
    return %c0_i32, %c0_i32_0 : i32, i32
  }
  func.func @transform_4(%arg0: i32) -> (i32, i32) {
    %c0_i32 = arith.constant 0 : i32
    %c0_i32_0 = arith.constant 0 : i32
    %c0_i32_1 = arith.constant 0 : i32
    return %c0_i32, %c0_i32_0 : i32, i32
  }
  func.func @transform_5(%arg0: i32) -> (i32, i32) {
    %c0_i32 = arith.constant 0 : i32
    %c0_i32_0 = arith.constant 0 : i32
    %c0_i32_1 = arith.constant 0 : i32
    return %c0_i32, %c0_i32_0 : i32, i32
  }
}

module attributes {stable_mosaic.version = 11 : i64} {
  func.func @_conv_bn_act_kernel(%arg0: i32, %arg1: memref<4x640xbf16, #tpu.memory_space<vmem>>, %arg2: memref<8x36xbf16, #tpu.memory_space<vmem>>, %arg3: memref<8x1xf32, #tpu.memory_space<vmem>>, %arg4: memref<8x1xf32, #tpu.memory_space<vmem>>, %arg5: memref<1x512xf32, #tpu.memory_space<vmem>>, %arg6: memref<8x512xbf16, #tpu.memory_space<vmem>>, %arg7: memref<36x512xbf16, #tpu.memory_space<vmem>>) attributes {dimension_semantics = [#tpu.dimension_semantics<arbitrary>], iteration_bounds = array<i64: 1>, scalar_prefetch = 0 : i64, scratch_operands = 1 : i64, tpu.core_type = #tpu.core_type<tc>, window_params = [{pipeline_mode = #tpu.pipeline_mode<synchronous>, transform_indices = @transform_0, window_bounds = array<i64: 4, 640>}, {pipeline_mode = #tpu.pipeline_mode<synchronous>, transform_indices = @transform_1, window_bounds = array<i64: 8, 36>}, {pipeline_mode = #tpu.pipeline_mode<synchronous>, transform_indices = @transform_2, window_bounds = array<i64: 8, 1>}, {pipeline_mode = #tpu.pipeline_mode<synchronous>, transform_indices = @transform_3, window_bounds = array<i64: 8, 1>}, {pipeline_mode = #tpu.pipeline_mode<synchronous>, transform_indices = @transform_4, window_bounds = array<i64: 1, 512>}, {pipeline_mode = #tpu.pipeline_mode<synchronous>, transform_indices = @transform_5, window_bounds = array<i64: 8, 512>}]} {
    %c0 = arith.constant 0 : index
    %c0_0 = arith.constant 0 : index
    %0 = vector.load %arg1[%c0, %c0_0] : memref<4x640xbf16, #tpu.memory_space<vmem>>, vector<4x512xbf16>
    %c0_1 = arith.constant 0 : index
    %c0_2 = arith.constant 0 : index
    %1 = vector.load %arg7[%c0_1, %c0_2] : memref<36x512xbf16, #tpu.memory_space<vmem>>, vector<4x512xbf16>
    tpu.vector_store %arg7[%c0_1, %c0_2], %0 {strides = array<i32>} : memref<36x512xbf16, #tpu.memory_space<vmem>>, vector<4x512xbf16>,
    %c0_3 = arith.constant 0 : index
    %c1 = arith.constant 1 : index
    %2 = vector.load %arg1[%c0_3, %c1] : memref<4x640xbf16, #tpu.memory_space<vmem>>, vector<4x512xbf16>
    %c4 = arith.constant 4 : index
    %c0_4 = arith.constant 0 : index
    %3 = vector.load %arg7[%c4, %c0_4] : memref<36x512xbf16, #tpu.memory_space<vmem>>, vector<4x512xbf16>
    tpu.vector_store %arg7[%c4, %c0_4], %2 {strides = array<i32>} : memref<36x512xbf16, #tpu.memory_space<vmem>>, vector<4x512xbf16>,
    %c0_5 = arith.constant 0 : index
    %c2 = arith.constant 2 : index
    %4 = vector.load %arg1[%c0_5, %c2] : memref<4x640xbf16, #tpu.memory_space<vmem>>, vector<4x512xbf16>
    %c8 = arith.constant 8 : index
    %c0_6 = arith.constant 0 : index
    %5 = vector.load %arg7[%c8, %c0_6] : memref<36x512xbf16, #tpu.memory_space<vmem>>, vector<4x512xbf16>
    tpu.vector_store %arg7[%c8, %c0_6], %4 {strides = array<i32>} : memref<36x512xbf16, #tpu.memory_space<vmem>>, vector<4x512xbf16>,
    %c0_7 = arith.constant 0 : index
    %c16 = arith.constant 16 : index
    %6 = vector.load %arg1[%c0_7, %c16] : memref<4x640xbf16, #tpu.memory_space<vmem>>, vector<4x512xbf16>
    %c12 = arith.constant 12 : index
    %c0_8 = arith.constant 0 : index
    %7 = vector.load %arg7[%c12, %c0_8] : memref<36x512xbf16, #tpu.memory_space<vmem>>, vector<4x512xbf16>
    tpu.vector_store %arg7[%c12, %c0_8], %6 {strides = array<i32>} : memref<36x512xbf16, #tpu.memory_space<vmem>>, vector<4x512xbf16>,
    %c0_9 = arith.constant 0 : index
    %c17 = arith.constant 17 : index
    %8 = vector.load %arg1[%c0_9, %c17] : memref<4x640xbf16, #tpu.memory_space<vmem>>, vector<4x512xbf16>
    %c16_10 = arith.constant 16 : index
    %c0_11 = arith.constant 0 : index
    %9 = vector.load %arg7[%c16_10, %c0_11] : memref<36x512xbf16, #tpu.memory_space<vmem>>, vector<4x512xbf16>
    tpu.vector_store %arg7[%c16_10, %c0_11], %8 {strides = array<i32>} : memref<36x512xbf16, #tpu.memory_space<vmem>>, vector<4x512xbf16>,
    %c0_12 = arith.constant 0 : index
    %c18 = arith.constant 18 : index
    %10 = vector.load %arg1[%c0_12, %c18] : memref<4x640xbf16, #tpu.memory_space<vmem>>, vector<4x512xbf16>
    %c20 = arith.constant 20 : index
    %c0_13 = arith.constant 0 : index
    %11 = vector.load %arg7[%c20, %c0_13] : memref<36x512xbf16, #tpu.memory_space<vmem>>, vector<4x512xbf16>
    tpu.vector_store %arg7[%c20, %c0_13], %10 {strides = array<i32>} : memref<36x512xbf16, #tpu.memory_space<vmem>>, vector<4x512xbf16>,
    %c0_14 = arith.constant 0 : index
    %c32 = arith.constant 32 : index
    %12 = vector.load %arg1[%c0_14, %c32] : memref<4x640xbf16, #tpu.memory_space<vmem>>, vector<4x512xbf16>
    %c24 = arith.constant 24 : index
    %c0_15 = arith.constant 0 : index
    %13 = vector.load %arg7[%c24, %c0_15] : memref<36x512xbf16, #tpu.memory_space<vmem>>, vector<4x512xbf16>
    tpu.vector_store %arg7[%c24, %c0_15], %12 {strides = array<i32>} : memref<36x512xbf16, #tpu.memory_space<vmem>>, vector<4x512xbf16>,
    %c0_16 = arith.constant 0 : index
    %c33 = arith.constant 33 : index
    %14 = vector.load %arg1[%c0_16, %c33] : memref<4x640xbf16, #tpu.memory_space<vmem>>, vector<4x512xbf16>
    %c28 = arith.constant 28 : index
    %c0_17 = arith.constant 0 : index
    %15 = vector.load %arg7[%c28, %c0_17] : memref<36x512xbf16, #tpu.memory_space<vmem>>, vector<4x512xbf16>
    tpu.vector_store %arg7[%c28, %c0_17], %14 {strides = array<i32>} : memref<36x512xbf16, #tpu.memory_space<vmem>>, vector<4x512xbf16>,
    %c0_18 = arith.constant 0 : index
    %c34 = arith.constant 34 : index
    %16 = vector.load %arg1[%c0_18, %c34] : memref<4x640xbf16, #tpu.memory_space<vmem>>, vector<4x512xbf16>
    %c32_19 = arith.constant 32 : index
    %c0_20 = arith.constant 0 : index
    %17 = vector.load %arg7[%c32_19, %c0_20] : memref<36x512xbf16, #tpu.memory_space<vmem>>, vector<4x512xbf16>
    tpu.vector_store %arg7[%c32_19, %c0_20], %16 {strides = array<i32>} : memref<36x512xbf16, #tpu.memory_space<vmem>>, vector<4x512xbf16>,
    %c0_21 = arith.constant 0 : index
    %c0_22 = arith.constant 0 : index
    %18 = vector.load %arg2[%c0_21, %c0_22] : memref<8x36xbf16, #tpu.memory_space<vmem>>, vector<8x36xbf16>
    %c0_23 = arith.constant 0 : index
    %c0_24 = arith.constant 0 : index
    %19 = vector.load %arg7[%c0_23, %c0_24] : memref<36x512xbf16, #tpu.memory_space<vmem>>, vector<36x512xbf16>
    %cst = arith.constant dense<0.000000e+00> : vector<8x512xf32>
    %20 = tpu.matmul %18, %19, %cst {dimension_numbers = #tpu.dot_dimension_numbers<[1], [0], [0], [1], [0, 0, 1, 1], [], []>} : vector<8x36xbf16>, vector<36x512xbf16>, vector<8x512xf32> -> vector<8x512xf32>
    %c0_25 = arith.constant 0 : index
    %c0_26 = arith.constant 0 : index
    %21 = vector.load %arg5[%c0_25, %c0_26] : memref<1x512xf32, #tpu.memory_space<vmem>>, vector<1x512xf32>
    %22 = vector.broadcast %21 : vector<1x512xf32> to vector<8x512xf32>
    %23 = arith.mulf %20, %22 : vector<8x512xf32>
    %cst_27 = arith.constant dense<0.000000e+00> : vector<8xf32>
    %24 = vector.multi_reduction <add>, %23, %cst_27 [1] : vector<8x512xf32> to vector<8xf32>
    %25 = vector.shape_cast %24 : vector<8xf32> to vector<8x1xf32>
    %cst_28 = arith.constant 3.920000e+02 : f32
    %26 = vector.broadcast %cst_28 : f32 to vector<8x1xf32>
    %27 = arith.divf %25, %26 : vector<8x1xf32>
    %28 = arith.mulf %23, %20 : vector<8x512xf32>
    %cst_29 = arith.constant dense<0.000000e+00> : vector<8xf32>
    %29 = vector.multi_reduction <add>, %28, %cst_29 [1] : vector<8x512xf32> to vector<8xf32>
    %30 = vector.shape_cast %29 : vector<8xf32> to vector<8x1xf32>
    %cst_30 = arith.constant 3.920000e+02 : f32
    %31 = vector.broadcast %cst_30 : f32 to vector<8x1xf32>
    %32 = arith.divf %30, %31 : vector<8x1xf32>
    %33 = arith.mulf %27, %27 : vector<8x1xf32>
    %34 = arith.subf %32, %33 : vector<8x1xf32>
    %cst_31 = arith.constant 0.000000e+00 : f32
    %35 = vector.broadcast %cst_31 : f32 to vector<8x1xf32>
    %36 = arith.maximumf %34, %35 : vector<8x1xf32>
    %c0_32 = arith.constant 0 : index
    %c0_33 = arith.constant 0 : index
    %37 = vector.load %arg3[%c0_32, %c0_33] : memref<8x1xf32, #tpu.memory_space<vmem>>, vector<8x1xf32>
    %cst_34 = arith.constant 9.99999974E-6 : f32
    %38 = vector.broadcast %cst_34 : f32 to vector<8x1xf32>
    %39 = arith.addf %36, %38 : vector<8x1xf32>
    %40 = math.rsqrt %39 : vector<8x1xf32>
    %41 = arith.mulf %37, %40 : vector<8x1xf32>
    %c0_35 = arith.constant 0 : index
    %c0_36 = arith.constant 0 : index
    %42 = vector.load %arg4[%c0_35, %c0_36] : memref<8x1xf32, #tpu.memory_space<vmem>>, vector<8x1xf32>
    %43 = arith.mulf %27, %41 : vector<8x1xf32>
    %44 = arith.subf %42, %43 : vector<8x1xf32>
    %45 = vector.broadcast %41 : vector<8x1xf32> to vector<8x512xf32>
    %46 = arith.mulf %20, %45 : vector<8x512xf32>
    %47 = vector.broadcast %44 : vector<8x1xf32> to vector<8x512xf32>
    %48 = arith.addf %46, %47 : vector<8x512xf32>
    %cst_37 = arith.constant 0.000000e+00 : f32
    %49 = vector.broadcast %cst_37 : f32 to vector<8x512xf32>
    %50 = arith.maximumf %48, %49 : vector<8x512xf32>
    %51 = arith.truncf %50 : vector<8x512xf32> to vector<8x512xbf16>
    %c0_38 = arith.constant 0 : index
    %c0_39 = arith.constant 0 : index
    %52 = vector.load %arg6[%c0_38, %c0_39] : memref<8x512xbf16, #tpu.memory_space<vmem>>, vector<8x512xbf16>
    tpu.vector_store %arg6[%c0_38, %c0_39], %51 {strides = array<i32>} : memref<8x512xbf16, #tpu.memory_space<vmem>>, vector<8x512xbf16>,
    return
  }
  func.func @transform_0(%arg0: i32) -> (i32, i32) {
    %c0_i32 = arith.constant 0 : i32
    %c0_i32_0 = arith.constant 0 : i32
    %c0_i32_1 = arith.constant 0 : i32
    return %c0_i32, %c0_i32_0 : i32, i32
  }
  func.func @transform_1(%arg0: i32) -> (i32, i32) {
    %c0_i32 = arith.constant 0 : i32
    %c0_i32_0 = arith.constant 0 : i32
    %c0_i32_1 = arith.constant 0 : i32
    return %c0_i32, %c0_i32_0 : i32, i32
  }
  func.func @transform_2(%arg0: i32) -> (i32, i32) {
    %c0_i32 = arith.constant 0 : i32
    %c0_i32_0 = arith.constant 0 : i32
    %c0_i32_1 = arith.constant 0 : i32
    return %c0_i32, %c0_i32_0 : i32, i32
  }
  func.func @transform_3(%arg0: i32) -> (i32, i32) {
    %c0_i32 = arith.constant 0 : i32
    %c0_i32_0 = arith.constant 0 : i32
    %c0_i32_1 = arith.constant 0 : i32
    return %c0_i32, %c0_i32_0 : i32, i32
  }
  func.func @transform_4(%arg0: i32) -> (i32, i32) {
    %c0_i32 = arith.constant 0 : i32
    %c0_i32_0 = arith.constant 0 : i32
    %c0_i32_1 = arith.constant 0 : i32
    return %c0_i32, %c0_i32_0 : i32, i32
  }
  func.func @transform_5(%arg0: i32) -> (i32, i32) {
    %c0_i32 = arith.constant 0 : i32
    %c0_i32_0 = arith.constant 0 : i32
    %c0_i32_1 = arith.constant 0 : i32
    return %c0_i32, %c0_i32_0 : i32, i32
  }
}

module attributes {stable_mosaic.version = 11 : i64} {
  func.func @_heads_kernel(%arg0: i32, %arg1: memref<2x392xbf16, #tpu.memory_space<vmem>>, %arg2: memref<392x16xbf16, #tpu.memory_space<vmem>>, %arg3: memref<1x16xf32, #tpu.memory_space<vmem>>, %arg4: memref<2x8xf32, #tpu.memory_space<vmem>>, %arg5: memref<2x4xbf16, #tpu.memory_space<vmem>>, %arg6: memref<8x392xbf16, #tpu.memory_space<vmem>>, %arg7: memref<4x392xbf16, #tpu.memory_space<vmem>>, %arg8: memref<1x392xf32, #tpu.memory_space<vmem>>, %arg9: memref<2x8xf32, #tpu.memory_space<vmem>>, %arg10: memref<2x8xf32, #tpu.memory_space<vmem>>, %arg11: memref<2x392xf32, #tpu.memory_space<vmem>>) attributes {dimension_semantics = [#tpu.dimension_semantics<arbitrary>], iteration_bounds = array<i64: 1>, scalar_prefetch = 0 : i64, scratch_operands = 0 : i64, tpu.core_type = #tpu.core_type<tc>, window_params = [{pipeline_mode = #tpu.pipeline_mode<synchronous>, transform_indices = @transform_0, window_bounds = array<i64: 2, 392>}, {pipeline_mode = #tpu.pipeline_mode<synchronous>, transform_indices = @transform_1, window_bounds = array<i64: 392, 16>}, {pipeline_mode = #tpu.pipeline_mode<synchronous>, transform_indices = @transform_2, window_bounds = array<i64: 1, 16>}, {pipeline_mode = #tpu.pipeline_mode<synchronous>, transform_indices = @transform_3, window_bounds = array<i64: 2, 8>}, {pipeline_mode = #tpu.pipeline_mode<synchronous>, transform_indices = @transform_4, window_bounds = array<i64: 2, 4>}, {pipeline_mode = #tpu.pipeline_mode<synchronous>, transform_indices = @transform_5, window_bounds = array<i64: 8, 392>}, {pipeline_mode = #tpu.pipeline_mode<synchronous>, transform_indices = @transform_6, window_bounds = array<i64: 4, 392>}, {pipeline_mode = #tpu.pipeline_mode<synchronous>, transform_indices = @transform_7, window_bounds = array<i64: 1, 392>}, {pipeline_mode = #tpu.pipeline_mode<synchronous>, transform_indices = @transform_8, window_bounds = array<i64: 2, 8>}, {pipeline_mode = #tpu.pipeline_mode<synchronous>, transform_indices = @transform_9, window_bounds = array<i64: 2, 8>}, {pipeline_mode = #tpu.pipeline_mode<synchronous>, transform_indices = @transform_10, window_bounds = array<i64: 2, 392>}]} {
    %c0 = arith.constant 0 : index
    %c0_0 = arith.constant 0 : index
    %0 = vector.load %arg1[%c0, %c0_0] : memref<2x392xbf16, #tpu.memory_space<vmem>>, vector<2x392xbf16>
    %c0_1 = arith.constant 0 : index
    %c0_2 = arith.constant 0 : index
    %1 = vector.load %arg2[%c0_1, %c0_2] : memref<392x16xbf16, #tpu.memory_space<vmem>>, vector<392x16xbf16>
    %cst = arith.constant dense<0.000000e+00> : vector<2x16xf32>
    %2 = tpu.matmul %0, %1, %cst {dimension_numbers = #tpu.dot_dimension_numbers<[1], [0], [0], [1], [0, 0, 1, 1], [], []>} : vector<2x392xbf16>, vector<392x16xbf16>, vector<2x16xf32> -> vector<2x16xf32>
    %c0_3 = arith.constant 0 : index
    %c0_4 = arith.constant 0 : index
    %3 = vector.load %arg3[%c0_3, %c0_4] : memref<1x16xf32, #tpu.memory_space<vmem>>, vector<1x16xf32>
    %4 = vector.broadcast %3 : vector<1x16xf32> to vector<2x16xf32>
    %5 = arith.addf %2, %4 : vector<2x16xf32>
    %6 = vector.extract_strided_slice %5 {offsets = [0, 0], sizes = [2, 8], strides = [1, 1]} : vector<2x16xf32> to vector<2x8xf32>
    %7 = vector.extract_strided_slice %5 {offsets = [0, 8], sizes = [2, 8], strides = [1, 1]} : vector<2x16xf32> to vector<2x8xf32>
    %c0_5 = arith.constant 0 : index
    %c0_6 = arith.constant 0 : index
    %8 = vector.load %arg9[%c0_5, %c0_6] : memref<2x8xf32, #tpu.memory_space<vmem>>, vector<2x8xf32>
    tpu.vector_store %arg9[%c0_5, %c0_6], %6 {strides = array<i32>} : memref<2x8xf32, #tpu.memory_space<vmem>>, vector<2x8xf32>,
    %c0_7 = arith.constant 0 : index
    %c0_8 = arith.constant 0 : index
    %9 = vector.load %arg10[%c0_7, %c0_8] : memref<2x8xf32, #tpu.memory_space<vmem>>, vector<2x8xf32>
    tpu.vector_store %arg10[%c0_7, %c0_8], %7 {strides = array<i32>} : memref<2x8xf32, #tpu.memory_space<vmem>>, vector<2x8xf32>,
    %cst_9 = arith.constant 5.000000e-01 : f32
    %10 = vector.broadcast %cst_9 : f32 to vector<2x8xf32>
    %11 = arith.mulf %10, %7 : vector<2x8xf32>
    %12 = math.exp %11 : vector<2x8xf32>
    %c0_10 = arith.constant 0 : index
    %c0_11 = arith.constant 0 : index
    %13 = vector.load %arg4[%c0_10, %c0_11] : memref<2x8xf32, #tpu.memory_space<vmem>>, vector<2x8xf32>
    %14 = arith.mulf %12, %13 : vector<2x8xf32>
    %15 = arith.addf %6, %14 : vector<2x8xf32>
    %16 = arith.truncf %15 : vector<2x8xf32> to vector<2x8xbf16>
    %c0_12 = arith.constant 0 : index
    %c0_13 = arith.constant 0 : index
    %17 = vector.load %arg6[%c0_12, %c0_13] : memref<8x392xbf16, #tpu.memory_space<vmem>>, vector<8x392xbf16>
    %cst_14 = arith.constant dense<0.000000e+00> : vector<2x392xf32>
    %18 = tpu.matmul %16, %17, %cst_14 {dimension_numbers = #tpu.dot_dimension_numbers<[1], [0], [0], [1], [0, 0, 1, 1], [], []>} : vector<2x8xbf16>, vector<8x392xbf16>, vector<2x392xf32> -> vector<2x392xf32>
    %c0_15 = arith.constant 0 : index
    %c0_16 = arith.constant 0 : index
    %19 = vector.load %arg5[%c0_15, %c0_16] : memref<2x4xbf16, #tpu.memory_space<vmem>>, vector<2x4xbf16>
    %c0_17 = arith.constant 0 : index
    %c0_18 = arith.constant 0 : index
    %20 = vector.load %arg7[%c0_17, %c0_18] : memref<4x392xbf16, #tpu.memory_space<vmem>>, vector<4x392xbf16>
    %cst_19 = arith.constant dense<0.000000e+00> : vector<2x392xf32>
    %21 = tpu.matmul %19, %20, %cst_19 {dimension_numbers = #tpu.dot_dimension_numbers<[1], [0], [0], [1], [0, 0, 1, 1], [], []>} : vector<2x4xbf16>, vector<4x392xbf16>, vector<2x392xf32> -> vector<2x392xf32>
    %22 = arith.addf %18, %21 : vector<2x392xf32>
    %c0_20 = arith.constant 0 : index
    %c0_21 = arith.constant 0 : index
    %23 = vector.load %arg8[%c0_20, %c0_21] : memref<1x392xf32, #tpu.memory_space<vmem>>, vector<1x392xf32>
    %24 = vector.broadcast %23 : vector<1x392xf32> to vector<2x392xf32>
    %25 = arith.addf %22, %24 : vector<2x392xf32>
    %c0_22 = arith.constant 0 : index
    %c0_23 = arith.constant 0 : index
    %26 = vector.load %arg11[%c0_22, %c0_23] : memref<2x392xf32, #tpu.memory_space<vmem>>, vector<2x392xf32>
    tpu.vector_store %arg11[%c0_22, %c0_23], %25 {strides = array<i32>} : memref<2x392xf32, #tpu.memory_space<vmem>>, vector<2x392xf32>,
    return
  }
  func.func @transform_0(%arg0: i32) -> (i32, i32) {
    %c0_i32 = arith.constant 0 : i32
    %c0_i32_0 = arith.constant 0 : i32
    %c0_i32_1 = arith.constant 0 : i32
    return %c0_i32, %c0_i32_0 : i32, i32
  }
  func.func @transform_1(%arg0: i32) -> (i32, i32) {
    %c0_i32 = arith.constant 0 : i32
    %c0_i32_0 = arith.constant 0 : i32
    %c0_i32_1 = arith.constant 0 : i32
    return %c0_i32, %c0_i32_0 : i32, i32
  }
  func.func @transform_2(%arg0: i32) -> (i32, i32) {
    %c0_i32 = arith.constant 0 : i32
    %c0_i32_0 = arith.constant 0 : i32
    %c0_i32_1 = arith.constant 0 : i32
    return %c0_i32, %c0_i32_0 : i32, i32
  }
  func.func @transform_3(%arg0: i32) -> (i32, i32) {
    %c0_i32 = arith.constant 0 : i32
    %c0_i32_0 = arith.constant 0 : i32
    %c0_i32_1 = arith.constant 0 : i32
    return %c0_i32, %c0_i32_0 : i32, i32
  }
  func.func @transform_4(%arg0: i32) -> (i32, i32) {
    %c0_i32 = arith.constant 0 : i32
    %c0_i32_0 = arith.constant 0 : i32
    %c0_i32_1 = arith.constant 0 : i32
    return %c0_i32, %c0_i32_0 : i32, i32
  }
  func.func @transform_5(%arg0: i32) -> (i32, i32) {
    %c0_i32 = arith.constant 0 : i32
    %c0_i32_0 = arith.constant 0 : i32
    %c0_i32_1 = arith.constant 0 : i32
    return %c0_i32, %c0_i32_0 : i32, i32
  }
  func.func @transform_6(%arg0: i32) -> (i32, i32) {
    %c0_i32 = arith.constant 0 : i32
    %c0_i32_0 = arith.constant 0 : i32
    %c0_i32_1 = arith.constant 0 : i32
    return %c0_i32, %c0_i32_0 : i32, i32
  }
  func.func @transform_7(%arg0: i32) -> (i32, i32) {
    %c0_i32 = arith.constant 0 : i32
    %c0_i32_0 = arith.constant 0 : i32
    %c0_i32_1 = arith.constant 0 : i32
    return %c0_i32, %c0_i32_0 : i32, i32
  }
  func.func @transform_8(%arg0: i32) -> (i32, i32) {
    %c0_i32 = arith.constant 0 : i32
    %c0_i32_0 = arith.constant 0 : i32
    %c0_i32_1 = arith.constant 0 : i32
    return %c0_i32, %c0_i32_0 : i32, i32
  }
  func.func @transform_9(%arg0: i32) -> (i32, i32) {
    %c0_i32 = arith.constant 0 : i32
    %c0_i32_0 = arith.constant 0 : i32
    %c0_i32_1 = arith.constant 0 : i32
    return %c0_i32, %c0_i32_0 : i32, i32
  }
  func.func @transform_10(%arg0: i32) -> (i32, i32) {
    %c0_i32 = arith.constant 0 : i32
    %c0_i32_0 = arith.constant 0 : i32
    %c0_i32_1 = arith.constant 0 : i32
    return %c0_i32, %c0_i32_0 : i32, i32
  }
}

module attributes {stable_mosaic.version = 11 : i64} {
  func.func @_conv_bn_act_kernel(%arg0: i32, %arg1: memref<8x640xbf16, #tpu.memory_space<vmem>>, %arg2: memref<8x288xbf16, #tpu.memory_space<vmem>>, %arg3: memref<8x1xf32, #tpu.memory_space<vmem>>, %arg4: memref<8x1xf32, #tpu.memory_space<vmem>>, %arg5: memref<1x512xf32, #tpu.memory_space<vmem>>, %arg6: memref<8x512xbf16, #tpu.memory_space<vmem>>, %arg7: memref<288x512xbf16, #tpu.memory_space<vmem>>) attributes {dimension_semantics = [#tpu.dimension_semantics<arbitrary>], iteration_bounds = array<i64: 1>, scalar_prefetch = 0 : i64, scratch_operands = 1 : i64, tpu.core_type = #tpu.core_type<tc>, window_params = [{pipeline_mode = #tpu.pipeline_mode<synchronous>, transform_indices = @transform_0, window_bounds = array<i64: 8, 640>}, {pipeline_mode = #tpu.pipeline_mode<synchronous>, transform_indices = @transform_1, window_bounds = array<i64: 8, 288>}, {pipeline_mode = #tpu.pipeline_mode<synchronous>, transform_indices = @transform_2, window_bounds = array<i64: 8, 1>}, {pipeline_mode = #tpu.pipeline_mode<synchronous>, transform_indices = @transform_3, window_bounds = array<i64: 8, 1>}, {pipeline_mode = #tpu.pipeline_mode<synchronous>, transform_indices = @transform_4, window_bounds = array<i64: 1, 512>}, {pipeline_mode = #tpu.pipeline_mode<synchronous>, transform_indices = @transform_5, window_bounds = array<i64: 8, 512>}]} {
    %c0 = arith.constant 0 : index
    %c0_0 = arith.constant 0 : index
    %0 = vector.load %arg1[%c0, %c0_0] : memref<8x640xbf16, #tpu.memory_space<vmem>>, vector<8x512xbf16>
    %c0_1 = arith.constant 0 : index
    %c0_2 = arith.constant 0 : index
    %1 = vector.load %arg7[%c0_1, %c0_2] : memref<288x512xbf16, #tpu.memory_space<vmem>>, vector<8x512xbf16>
    tpu.vector_store %arg7[%c0_1, %c0_2], %0 {strides = array<i32>} : memref<288x512xbf16, #tpu.memory_space<vmem>>, vector<8x512xbf16>,
    %c0_3 = arith.constant 0 : index
    %c1 = arith.constant 1 : index
    %2 = vector.load %arg1[%c0_3, %c1] : memref<8x640xbf16, #tpu.memory_space<vmem>>, vector<8x512xbf16>
    %c8 = arith.constant 8 : index
    %c0_4 = arith.constant 0 : index
    %3 = vector.load %arg7[%c8, %c0_4] : memref<288x512xbf16, #tpu.memory_space<vmem>>, vector<8x512xbf16>
    tpu.vector_store %arg7[%c8, %c0_4], %2 {strides = array<i32>} : memref<288x512xbf16, #tpu.memory_space<vmem>>, vector<8x512xbf16>,
    %c0_5 = arith.constant 0 : index
    %c2 = arith.constant 2 : index
    %4 = vector.load %arg1[%c0_5, %c2] : memref<8x640xbf16, #tpu.memory_space<vmem>>, vector<8x512xbf16>
    %c16 = arith.constant 16 : index
    %c0_6 = arith.constant 0 : index
    %5 = vector.load %arg7[%c16, %c0_6] : memref<288x512xbf16, #tpu.memory_space<vmem>>, vector<8x512xbf16>
    tpu.vector_store %arg7[%c16, %c0_6], %4 {strides = array<i32>} : memref<288x512xbf16, #tpu.memory_space<vmem>>, vector<8x512xbf16>,
    %c0_7 = arith.constant 0 : index
    %c3 = arith.constant 3 : index
    %6 = vector.load %arg1[%c0_7, %c3] : memref<8x640xbf16, #tpu.memory_space<vmem>>, vector<8x512xbf16>
    %c24 = arith.constant 24 : index
    %c0_8 = arith.constant 0 : index
    %7 = vector.load %arg7[%c24, %c0_8] : memref<288x512xbf16, #tpu.memory_space<vmem>>, vector<8x512xbf16>
    tpu.vector_store %arg7[%c24, %c0_8], %6 {strides = array<i32>} : memref<288x512xbf16, #tpu.memory_space<vmem>>, vector<8x512xbf16>,
    %c0_9 = arith.constant 0 : index
    %c4 = arith.constant 4 : index
    %8 = vector.load %arg1[%c0_9, %c4] : memref<8x640xbf16, #tpu.memory_space<vmem>>, vector<8x512xbf16>
    %c32 = arith.constant 32 : index
    %c0_10 = arith.constant 0 : index
    %9 = vector.load %arg7[%c32, %c0_10] : memref<288x512xbf16, #tpu.memory_space<vmem>>, vector<8x512xbf16>
    tpu.vector_store %arg7[%c32, %c0_10], %8 {strides = array<i32>} : memref<288x512xbf16, #tpu.memory_space<vmem>>, vector<8x512xbf16>,
    %c0_11 = arith.constant 0 : index
    %c5 = arith.constant 5 : index
    %10 = vector.load %arg1[%c0_11, %c5] : memref<8x640xbf16, #tpu.memory_space<vmem>>, vector<8x512xbf16>
    %c40 = arith.constant 40 : index
    %c0_12 = arith.constant 0 : index
    %11 = vector.load %arg7[%c40, %c0_12] : memref<288x512xbf16, #tpu.memory_space<vmem>>, vector<8x512xbf16>
    tpu.vector_store %arg7[%c40, %c0_12], %10 {strides = array<i32>} : memref<288x512xbf16, #tpu.memory_space<vmem>>, vector<8x512xbf16>,
    %c0_13 = arith.constant 0 : index
    %c15 = arith.constant 15 : index
    %12 = vector.load %arg1[%c0_13, %c15] : memref<8x640xbf16, #tpu.memory_space<vmem>>, vector<8x512xbf16>
    %c48 = arith.constant 48 : index
    %c0_14 = arith.constant 0 : index
    %13 = vector.load %arg7[%c48, %c0_14] : memref<288x512xbf16, #tpu.memory_space<vmem>>, vector<8x512xbf16>
    tpu.vector_store %arg7[%c48, %c0_14], %12 {strides = array<i32>} : memref<288x512xbf16, #tpu.memory_space<vmem>>, vector<8x512xbf16>,
    %c0_15 = arith.constant 0 : index
    %c16_16 = arith.constant 16 : index
    %14 = vector.load %arg1[%c0_15, %c16_16] : memref<8x640xbf16, #tpu.memory_space<vmem>>, vector<8x512xbf16>
    %c56 = arith.constant 56 : index
    %c0_17 = arith.constant 0 : index
    %15 = vector.load %arg7[%c56, %c0_17] : memref<288x512xbf16, #tpu.memory_space<vmem>>, vector<8x512xbf16>
    tpu.vector_store %arg7[%c56, %c0_17], %14 {strides = array<i32>} : memref<288x512xbf16, #tpu.memory_space<vmem>>, vector<8x512xbf16>,
    %c0_18 = arith.constant 0 : index
    %c17 = arith.constant 17 : index
    %16 = vector.load %arg1[%c0_18, %c17] : memref<8x640xbf16, #tpu.memory_space<vmem>>, vector<8x512xbf16>
    %c64 = arith.constant 64 : index
    %c0_19 = arith.constant 0 : index
    %17 = vector.load %arg7[%c64, %c0_19] : memref<288x512xbf16, #tpu.memory_space<vmem>>, vector<8x512xbf16>
    tpu.vector_store %arg7[%c64, %c0_19], %16 {strides = array<i32>} : memref<288x512xbf16, #tpu.memory_space<vmem>>, vector<8x512xbf16>,
    %c0_20 = arith.constant 0 : index
    %c18 = arith.constant 18 : index
    %18 = vector.load %arg1[%c0_20, %c18] : memref<8x640xbf16, #tpu.memory_space<vmem>>, vector<8x512xbf16>
    %c72 = arith.constant 72 : index
    %c0_21 = arith.constant 0 : index
    %19 = vector.load %arg7[%c72, %c0_21] : memref<288x512xbf16, #tpu.memory_space<vmem>>, vector<8x512xbf16>
    tpu.vector_store %arg7[%c72, %c0_21], %18 {strides = array<i32>} : memref<288x512xbf16, #tpu.memory_space<vmem>>, vector<8x512xbf16>,
    %c0_22 = arith.constant 0 : index
    %c19 = arith.constant 19 : index
    %20 = vector.load %arg1[%c0_22, %c19] : memref<8x640xbf16, #tpu.memory_space<vmem>>, vector<8x512xbf16>
    %c80 = arith.constant 80 : index
    %c0_23 = arith.constant 0 : index
    %21 = vector.load %arg7[%c80, %c0_23] : memref<288x512xbf16, #tpu.memory_space<vmem>>, vector<8x512xbf16>
    tpu.vector_store %arg7[%c80, %c0_23], %20 {strides = array<i32>} : memref<288x512xbf16, #tpu.memory_space<vmem>>, vector<8x512xbf16>,
    %c0_24 = arith.constant 0 : index
    %c20 = arith.constant 20 : index
    %22 = vector.load %arg1[%c0_24, %c20] : memref<8x640xbf16, #tpu.memory_space<vmem>>, vector<8x512xbf16>
    %c88 = arith.constant 88 : index
    %c0_25 = arith.constant 0 : index
    %23 = vector.load %arg7[%c88, %c0_25] : memref<288x512xbf16, #tpu.memory_space<vmem>>, vector<8x512xbf16>
    tpu.vector_store %arg7[%c88, %c0_25], %22 {strides = array<i32>} : memref<288x512xbf16, #tpu.memory_space<vmem>>, vector<8x512xbf16>,
    %c0_26 = arith.constant 0 : index
    %c30 = arith.constant 30 : index
    %24 = vector.load %arg1[%c0_26, %c30] : memref<8x640xbf16, #tpu.memory_space<vmem>>, vector<8x512xbf16>
    %c96 = arith.constant 96 : index
    %c0_27 = arith.constant 0 : index
    %25 = vector.load %arg7[%c96, %c0_27] : memref<288x512xbf16, #tpu.memory_space<vmem>>, vector<8x512xbf16>
    tpu.vector_store %arg7[%c96, %c0_27], %24 {strides = array<i32>} : memref<288x512xbf16, #tpu.memory_space<vmem>>, vector<8x512xbf16>,
    %c0_28 = arith.constant 0 : index
    %c31 = arith.constant 31 : index
    %26 = vector.load %arg1[%c0_28, %c31] : memref<8x640xbf16, #tpu.memory_space<vmem>>, vector<8x512xbf16>
    %c104 = arith.constant 104 : index
    %c0_29 = arith.constant 0 : index
    %27 = vector.load %arg7[%c104, %c0_29] : memref<288x512xbf16, #tpu.memory_space<vmem>>, vector<8x512xbf16>
    tpu.vector_store %arg7[%c104, %c0_29], %26 {strides = array<i32>} : memref<288x512xbf16, #tpu.memory_space<vmem>>, vector<8x512xbf16>,
    %c0_30 = arith.constant 0 : index
    %c32_31 = arith.constant 32 : index
    %28 = vector.load %arg1[%c0_30, %c32_31] : memref<8x640xbf16, #tpu.memory_space<vmem>>, vector<8x512xbf16>
    %c112 = arith.constant 112 : index
    %c0_32 = arith.constant 0 : index
    %29 = vector.load %arg7[%c112, %c0_32] : memref<288x512xbf16, #tpu.memory_space<vmem>>, vector<8x512xbf16>
    tpu.vector_store %arg7[%c112, %c0_32], %28 {strides = array<i32>} : memref<288x512xbf16, #tpu.memory_space<vmem>>, vector<8x512xbf16>,
    %c0_33 = arith.constant 0 : index
    %c33 = arith.constant 33 : index
    %30 = vector.load %arg1[%c0_33, %c33] : memref<8x640xbf16, #tpu.memory_space<vmem>>, vector<8x512xbf16>
    %c120 = arith.constant 120 : index
    %c0_34 = arith.constant 0 : index
    %31 = vector.load %arg7[%c120, %c0_34] : memref<288x512xbf16, #tpu.memory_space<vmem>>, vector<8x512xbf16>
    tpu.vector_store %arg7[%c120, %c0_34], %30 {strides = array<i32>} : memref<288x512xbf16, #tpu.memory_space<vmem>>, vector<8x512xbf16>,
    %c0_35 = arith.constant 0 : index
    %c34 = arith.constant 34 : index
    %32 = vector.load %arg1[%c0_35, %c34] : memref<8x640xbf16, #tpu.memory_space<vmem>>, vector<8x512xbf16>
    %c128 = arith.constant 128 : index
    %c0_36 = arith.constant 0 : index
    %33 = vector.load %arg7[%c128, %c0_36] : memref<288x512xbf16, #tpu.memory_space<vmem>>, vector<8x512xbf16>
    tpu.vector_store %arg7[%c128, %c0_36], %32 {strides = array<i32>} : memref<288x512xbf16, #tpu.memory_space<vmem>>, vector<8x512xbf16>,
    %c0_37 = arith.constant 0 : index
    %c35 = arith.constant 35 : index
    %34 = vector.load %arg1[%c0_37, %c35] : memref<8x640xbf16, #tpu.memory_space<vmem>>, vector<8x512xbf16>
    %c136 = arith.constant 136 : index
    %c0_38 = arith.constant 0 : index
    %35 = vector.load %arg7[%c136, %c0_38] : memref<288x512xbf16, #tpu.memory_space<vmem>>, vector<8x512xbf16>
    tpu.vector_store %arg7[%c136, %c0_38], %34 {strides = array<i32>} : memref<288x512xbf16, #tpu.memory_space<vmem>>, vector<8x512xbf16>,
    %c0_39 = arith.constant 0 : index
    %c45 = arith.constant 45 : index
    %36 = vector.load %arg1[%c0_39, %c45] : memref<8x640xbf16, #tpu.memory_space<vmem>>, vector<8x512xbf16>
    %c144 = arith.constant 144 : index
    %c0_40 = arith.constant 0 : index
    %37 = vector.load %arg7[%c144, %c0_40] : memref<288x512xbf16, #tpu.memory_space<vmem>>, vector<8x512xbf16>
    tpu.vector_store %arg7[%c144, %c0_40], %36 {strides = array<i32>} : memref<288x512xbf16, #tpu.memory_space<vmem>>, vector<8x512xbf16>,
    %c0_41 = arith.constant 0 : index
    %c46 = arith.constant 46 : index
    %38 = vector.load %arg1[%c0_41, %c46] : memref<8x640xbf16, #tpu.memory_space<vmem>>, vector<8x512xbf16>
    %c152 = arith.constant 152 : index
    %c0_42 = arith.constant 0 : index
    %39 = vector.load %arg7[%c152, %c0_42] : memref<288x512xbf16, #tpu.memory_space<vmem>>, vector<8x512xbf16>
    tpu.vector_store %arg7[%c152, %c0_42], %38 {strides = array<i32>} : memref<288x512xbf16, #tpu.memory_space<vmem>>, vector<8x512xbf16>,
    %c0_43 = arith.constant 0 : index
    %c47 = arith.constant 47 : index
    %40 = vector.load %arg1[%c0_43, %c47] : memref<8x640xbf16, #tpu.memory_space<vmem>>, vector<8x512xbf16>
    %c160 = arith.constant 160 : index
    %c0_44 = arith.constant 0 : index
    %41 = vector.load %arg7[%c160, %c0_44] : memref<288x512xbf16, #tpu.memory_space<vmem>>, vector<8x512xbf16>
    tpu.vector_store %arg7[%c160, %c0_44], %40 {strides = array<i32>} : memref<288x512xbf16, #tpu.memory_space<vmem>>, vector<8x512xbf16>,
    %c0_45 = arith.constant 0 : index
    %c48_46 = arith.constant 48 : index
    %42 = vector.load %arg1[%c0_45, %c48_46] : memref<8x640xbf16, #tpu.memory_space<vmem>>, vector<8x512xbf16>
    %c168 = arith.constant 168 : index
    %c0_47 = arith.constant 0 : index
    %43 = vector.load %arg7[%c168, %c0_47] : memref<288x512xbf16, #tpu.memory_space<vmem>>, vector<8x512xbf16>
    tpu.vector_store %arg7[%c168, %c0_47], %42 {strides = array<i32>} : memref<288x512xbf16, #tpu.memory_space<vmem>>, vector<8x512xbf16>,
    %c0_48 = arith.constant 0 : index
    %c49 = arith.constant 49 : index
    %44 = vector.load %arg1[%c0_48, %c49] : memref<8x640xbf16, #tpu.memory_space<vmem>>, vector<8x512xbf16>
    %c176 = arith.constant 176 : index
    %c0_49 = arith.constant 0 : index
    %45 = vector.load %arg7[%c176, %c0_49] : memref<288x512xbf16, #tpu.memory_space<vmem>>, vector<8x512xbf16>
    tpu.vector_store %arg7[%c176, %c0_49], %44 {strides = array<i32>} : memref<288x512xbf16, #tpu.memory_space<vmem>>, vector<8x512xbf16>,
    %c0_50 = arith.constant 0 : index
    %c50 = arith.constant 50 : index
    %46 = vector.load %arg1[%c0_50, %c50] : memref<8x640xbf16, #tpu.memory_space<vmem>>, vector<8x512xbf16>
    %c184 = arith.constant 184 : index
    %c0_51 = arith.constant 0 : index
    %47 = vector.load %arg7[%c184, %c0_51] : memref<288x512xbf16, #tpu.memory_space<vmem>>, vector<8x512xbf16>
    tpu.vector_store %arg7[%c184, %c0_51], %46 {strides = array<i32>} : memref<288x512xbf16, #tpu.memory_space<vmem>>, vector<8x512xbf16>,
    %c0_52 = arith.constant 0 : index
    %c60 = arith.constant 60 : index
    %48 = vector.load %arg1[%c0_52, %c60] : memref<8x640xbf16, #tpu.memory_space<vmem>>, vector<8x512xbf16>
    %c192 = arith.constant 192 : index
    %c0_53 = arith.constant 0 : index
    %49 = vector.load %arg7[%c192, %c0_53] : memref<288x512xbf16, #tpu.memory_space<vmem>>, vector<8x512xbf16>
    tpu.vector_store %arg7[%c192, %c0_53], %48 {strides = array<i32>} : memref<288x512xbf16, #tpu.memory_space<vmem>>, vector<8x512xbf16>,
    %c0_54 = arith.constant 0 : index
    %c61 = arith.constant 61 : index
    %50 = vector.load %arg1[%c0_54, %c61] : memref<8x640xbf16, #tpu.memory_space<vmem>>, vector<8x512xbf16>
    %c200 = arith.constant 200 : index
    %c0_55 = arith.constant 0 : index
    %51 = vector.load %arg7[%c200, %c0_55] : memref<288x512xbf16, #tpu.memory_space<vmem>>, vector<8x512xbf16>
    tpu.vector_store %arg7[%c200, %c0_55], %50 {strides = array<i32>} : memref<288x512xbf16, #tpu.memory_space<vmem>>, vector<8x512xbf16>,
    %c0_56 = arith.constant 0 : index
    %c62 = arith.constant 62 : index
    %52 = vector.load %arg1[%c0_56, %c62] : memref<8x640xbf16, #tpu.memory_space<vmem>>, vector<8x512xbf16>
    %c208 = arith.constant 208 : index
    %c0_57 = arith.constant 0 : index
    %53 = vector.load %arg7[%c208, %c0_57] : memref<288x512xbf16, #tpu.memory_space<vmem>>, vector<8x512xbf16>
    tpu.vector_store %arg7[%c208, %c0_57], %52 {strides = array<i32>} : memref<288x512xbf16, #tpu.memory_space<vmem>>, vector<8x512xbf16>,
    %c0_58 = arith.constant 0 : index
    %c63 = arith.constant 63 : index
    %54 = vector.load %arg1[%c0_58, %c63] : memref<8x640xbf16, #tpu.memory_space<vmem>>, vector<8x512xbf16>
    %c216 = arith.constant 216 : index
    %c0_59 = arith.constant 0 : index
    %55 = vector.load %arg7[%c216, %c0_59] : memref<288x512xbf16, #tpu.memory_space<vmem>>, vector<8x512xbf16>
    tpu.vector_store %arg7[%c216, %c0_59], %54 {strides = array<i32>} : memref<288x512xbf16, #tpu.memory_space<vmem>>, vector<8x512xbf16>,
    %c0_60 = arith.constant 0 : index
    %c64_61 = arith.constant 64 : index
    %56 = vector.load %arg1[%c0_60, %c64_61] : memref<8x640xbf16, #tpu.memory_space<vmem>>, vector<8x512xbf16>
    %c224 = arith.constant 224 : index
    %c0_62 = arith.constant 0 : index
    %57 = vector.load %arg7[%c224, %c0_62] : memref<288x512xbf16, #tpu.memory_space<vmem>>, vector<8x512xbf16>
    tpu.vector_store %arg7[%c224, %c0_62], %56 {strides = array<i32>} : memref<288x512xbf16, #tpu.memory_space<vmem>>, vector<8x512xbf16>,
    %c0_63 = arith.constant 0 : index
    %c65 = arith.constant 65 : index
    %58 = vector.load %arg1[%c0_63, %c65] : memref<8x640xbf16, #tpu.memory_space<vmem>>, vector<8x512xbf16>
    %c232 = arith.constant 232 : index
    %c0_64 = arith.constant 0 : index
    %59 = vector.load %arg7[%c232, %c0_64] : memref<288x512xbf16, #tpu.memory_space<vmem>>, vector<8x512xbf16>
    tpu.vector_store %arg7[%c232, %c0_64], %58 {strides = array<i32>} : memref<288x512xbf16, #tpu.memory_space<vmem>>, vector<8x512xbf16>,
    %c0_65 = arith.constant 0 : index
    %c75 = arith.constant 75 : index
    %60 = vector.load %arg1[%c0_65, %c75] : memref<8x640xbf16, #tpu.memory_space<vmem>>, vector<8x512xbf16>
    %c240 = arith.constant 240 : index
    %c0_66 = arith.constant 0 : index
    %61 = vector.load %arg7[%c240, %c0_66] : memref<288x512xbf16, #tpu.memory_space<vmem>>, vector<8x512xbf16>
    tpu.vector_store %arg7[%c240, %c0_66], %60 {strides = array<i32>} : memref<288x512xbf16, #tpu.memory_space<vmem>>, vector<8x512xbf16>,
    %c0_67 = arith.constant 0 : index
    %c76 = arith.constant 76 : index
    %62 = vector.load %arg1[%c0_67, %c76] : memref<8x640xbf16, #tpu.memory_space<vmem>>, vector<8x512xbf16>
    %c248 = arith.constant 248 : index
    %c0_68 = arith.constant 0 : index
    %63 = vector.load %arg7[%c248, %c0_68] : memref<288x512xbf16, #tpu.memory_space<vmem>>, vector<8x512xbf16>
    tpu.vector_store %arg7[%c248, %c0_68], %62 {strides = array<i32>} : memref<288x512xbf16, #tpu.memory_space<vmem>>, vector<8x512xbf16>,
    %c0_69 = arith.constant 0 : index
    %c77 = arith.constant 77 : index
    %64 = vector.load %arg1[%c0_69, %c77] : memref<8x640xbf16, #tpu.memory_space<vmem>>, vector<8x512xbf16>
    %c256 = arith.constant 256 : index
    %c0_70 = arith.constant 0 : index
    %65 = vector.load %arg7[%c256, %c0_70] : memref<288x512xbf16, #tpu.memory_space<vmem>>, vector<8x512xbf16>
    tpu.vector_store %arg7[%c256, %c0_70], %64 {strides = array<i32>} : memref<288x512xbf16, #tpu.memory_space<vmem>>, vector<8x512xbf16>,
    %c0_71 = arith.constant 0 : index
    %c78 = arith.constant 78 : index
    %66 = vector.load %arg1[%c0_71, %c78] : memref<8x640xbf16, #tpu.memory_space<vmem>>, vector<8x512xbf16>
    %c264 = arith.constant 264 : index
    %c0_72 = arith.constant 0 : index
    %67 = vector.load %arg7[%c264, %c0_72] : memref<288x512xbf16, #tpu.memory_space<vmem>>, vector<8x512xbf16>
    tpu.vector_store %arg7[%c264, %c0_72], %66 {strides = array<i32>} : memref<288x512xbf16, #tpu.memory_space<vmem>>, vector<8x512xbf16>,
    %c0_73 = arith.constant 0 : index
    %c79 = arith.constant 79 : index
    %68 = vector.load %arg1[%c0_73, %c79] : memref<8x640xbf16, #tpu.memory_space<vmem>>, vector<8x512xbf16>
    %c272 = arith.constant 272 : index
    %c0_74 = arith.constant 0 : index
    %69 = vector.load %arg7[%c272, %c0_74] : memref<288x512xbf16, #tpu.memory_space<vmem>>, vector<8x512xbf16>
    tpu.vector_store %arg7[%c272, %c0_74], %68 {strides = array<i32>} : memref<288x512xbf16, #tpu.memory_space<vmem>>, vector<8x512xbf16>,
    %c0_75 = arith.constant 0 : index
    %c80_76 = arith.constant 80 : index
    %70 = vector.load %arg1[%c0_75, %c80_76] : memref<8x640xbf16, #tpu.memory_space<vmem>>, vector<8x512xbf16>
    %c280 = arith.constant 280 : index
    %c0_77 = arith.constant 0 : index
    %71 = vector.load %arg7[%c280, %c0_77] : memref<288x512xbf16, #tpu.memory_space<vmem>>, vector<8x512xbf16>
    tpu.vector_store %arg7[%c280, %c0_77], %70 {strides = array<i32>} : memref<288x512xbf16, #tpu.memory_space<vmem>>, vector<8x512xbf16>,
    %c0_78 = arith.constant 0 : index
    %c0_79 = arith.constant 0 : index
    %72 = vector.load %arg2[%c0_78, %c0_79] : memref<8x288xbf16, #tpu.memory_space<vmem>>, vector<8x288xbf16>
    %c0_80 = arith.constant 0 : index
    %c0_81 = arith.constant 0 : index
    %73 = vector.load %arg7[%c0_80, %c0_81] : memref<288x512xbf16, #tpu.memory_space<vmem>>, vector<288x512xbf16>
    %cst = arith.constant dense<0.000000e+00> : vector<8x512xf32>
    %74 = tpu.matmul %72, %73, %cst {dimension_numbers = #tpu.dot_dimension_numbers<[1], [0], [0], [1], [0, 0, 1, 1], [], []>} : vector<8x288xbf16>, vector<288x512xbf16>, vector<8x512xf32> -> vector<8x512xf32>
    %c0_82 = arith.constant 0 : index
    %c0_83 = arith.constant 0 : index
    %75 = vector.load %arg5[%c0_82, %c0_83] : memref<1x512xf32, #tpu.memory_space<vmem>>, vector<1x512xf32>
    %76 = vector.broadcast %75 : vector<1x512xf32> to vector<8x512xf32>
    %77 = arith.mulf %74, %76 : vector<8x512xf32>
    %cst_84 = arith.constant dense<0.000000e+00> : vector<8xf32>
    %78 = vector.multi_reduction <add>, %77, %cst_84 [1] : vector<8x512xf32> to vector<8xf32>
    %79 = vector.shape_cast %78 : vector<8xf32> to vector<8x1xf32>
    %cst_85 = arith.constant 2.000000e+02 : f32
    %80 = vector.broadcast %cst_85 : f32 to vector<8x1xf32>
    %81 = arith.divf %79, %80 : vector<8x1xf32>
    %82 = arith.mulf %77, %74 : vector<8x512xf32>
    %cst_86 = arith.constant dense<0.000000e+00> : vector<8xf32>
    %83 = vector.multi_reduction <add>, %82, %cst_86 [1] : vector<8x512xf32> to vector<8xf32>
    %84 = vector.shape_cast %83 : vector<8xf32> to vector<8x1xf32>
    %cst_87 = arith.constant 2.000000e+02 : f32
    %85 = vector.broadcast %cst_87 : f32 to vector<8x1xf32>
    %86 = arith.divf %84, %85 : vector<8x1xf32>
    %87 = arith.mulf %81, %81 : vector<8x1xf32>
    %88 = arith.subf %86, %87 : vector<8x1xf32>
    %cst_88 = arith.constant 0.000000e+00 : f32
    %89 = vector.broadcast %cst_88 : f32 to vector<8x1xf32>
    %90 = arith.maximumf %88, %89 : vector<8x1xf32>
    %c0_89 = arith.constant 0 : index
    %c0_90 = arith.constant 0 : index
    %91 = vector.load %arg3[%c0_89, %c0_90] : memref<8x1xf32, #tpu.memory_space<vmem>>, vector<8x1xf32>
    %cst_91 = arith.constant 9.99999974E-6 : f32
    %92 = vector.broadcast %cst_91 : f32 to vector<8x1xf32>
    %93 = arith.addf %90, %92 : vector<8x1xf32>
    %94 = math.rsqrt %93 : vector<8x1xf32>
    %95 = arith.mulf %91, %94 : vector<8x1xf32>
    %c0_92 = arith.constant 0 : index
    %c0_93 = arith.constant 0 : index
    %96 = vector.load %arg4[%c0_92, %c0_93] : memref<8x1xf32, #tpu.memory_space<vmem>>, vector<8x1xf32>
    %97 = arith.mulf %81, %95 : vector<8x1xf32>
    %98 = arith.subf %96, %97 : vector<8x1xf32>
    %99 = vector.broadcast %95 : vector<8x1xf32> to vector<8x512xf32>
    %100 = arith.mulf %74, %99 : vector<8x512xf32>
    %101 = vector.broadcast %98 : vector<8x1xf32> to vector<8x512xf32>
    %102 = arith.addf %100, %101 : vector<8x512xf32>
    %cst_94 = arith.constant 0.000000e+00 : f32
    %103 = vector.broadcast %cst_94 : f32 to vector<8x512xf32>
    %104 = arith.maximumf %102, %103 : vector<8x512xf32>
    %105 = arith.truncf %104 : vector<8x512xf32> to vector<8x512xbf16>
    %c0_95 = arith.constant 0 : index
    %c0_96 = arith.constant 0 : index
    %106 = vector.load %arg6[%c0_95, %c0_96] : memref<8x512xbf16, #tpu.memory_space<vmem>>, vector<8x512xbf16>
    tpu.vector_store %arg6[%c0_95, %c0_96], %105 {strides = array<i32>} : memref<8x512xbf16, #tpu.memory_space<vmem>>, vector<8x512xbf16>,
    return
  }
  func.func @transform_0(%arg0: i32) -> (i32, i32) {
    %c0_i32 = arith.constant 0 : i32
    %c0_i32_0 = arith.constant 0 : i32
    %c0_i32_1 = arith.constant 0 : i32
    return %c0_i32, %c0_i32_0 : i32, i32
  }
  func.func @transform_1(%arg0: i32) -> (i32, i32) {
    %c0_i32 = arith.constant 0 : i32
    %c0_i32_0 = arith.constant 0 : i32
    %c0_i32_1 = arith.constant 0 : i32
    return %c0_i32, %c0_i32_0 : i32, i32
  }
  func.func @transform_2(%arg0: i32) -> (i32, i32) {
    %c0_i32 = arith.constant 0 : i32
    %c0_i32_0 = arith.constant 0 : i32
    %c0_i32_1 = arith.constant 0 : i32
    return %c0_i32, %c0_i32_0 : i32, i32
  }
  func.func @transform_3(%arg0: i32) -> (i32, i32) {
    %c0_i32 = arith.constant 0 : i32
    %c0_i32_0 = arith.constant 0 : i32
    %c0_i32_1 = arith.constant 0 : i32
    return %c0_i32, %c0_i32_0 : i32, i32
  }
  func.func @transform_4(%arg0: i32) -> (i32, i32) {
    %c0_i32 = arith.constant 0 : i32
    %c0_i32_0 = arith.constant 0 : i32
    %c0_i32_1 = arith.constant 0 : i32
    return %c0_i32, %c0_i32_0 : i32, i32
  }
  func.func @transform_5(%arg0: i32) -> (i32, i32) {
    %c0_i32 = arith.constant 0 : i32
    %c0_i32_0 = arith.constant 0 : i32
    %c0_i32_1 = arith.constant 0 : i32
    return %c0_i32, %c0_i32_0 : i32, i32
  }
}

module attributes {stable_mosaic.version = 11 : i64} {
  func.func @_conv_bn_act_kernel(%arg0: i32, %arg1: memref<8x1792xbf16, #tpu.memory_space<vmem>>, %arg2: memref<4x288xbf16, #tpu.memory_space<vmem>>, %arg3: memref<4x1xf32, #tpu.memory_space<vmem>>, %arg4: memref<4x1xf32, #tpu.memory_space<vmem>>, %arg5: memref<1x1536xf32, #tpu.memory_space<vmem>>, %arg6: memref<4x1536xf32, #tpu.memory_space<vmem>>, %arg7: memref<288x1536xbf16, #tpu.memory_space<vmem>>) attributes {dimension_semantics = [#tpu.dimension_semantics<arbitrary>], iteration_bounds = array<i64: 1>, scalar_prefetch = 0 : i64, scratch_operands = 1 : i64, tpu.core_type = #tpu.core_type<tc>, window_params = [{pipeline_mode = #tpu.pipeline_mode<synchronous>, transform_indices = @transform_0, window_bounds = array<i64: 8, 1792>}, {pipeline_mode = #tpu.pipeline_mode<synchronous>, transform_indices = @transform_1, window_bounds = array<i64: 4, 288>}, {pipeline_mode = #tpu.pipeline_mode<synchronous>, transform_indices = @transform_2, window_bounds = array<i64: 4, 1>}, {pipeline_mode = #tpu.pipeline_mode<synchronous>, transform_indices = @transform_3, window_bounds = array<i64: 4, 1>}, {pipeline_mode = #tpu.pipeline_mode<synchronous>, transform_indices = @transform_4, window_bounds = array<i64: 1, 1536>}, {pipeline_mode = #tpu.pipeline_mode<synchronous>, transform_indices = @transform_5, window_bounds = array<i64: 4, 1536>}]} {
    %c0 = arith.constant 0 : index
    %c0_0 = arith.constant 0 : index
    %0 = vector.load %arg1[%c0, %c0_0] : memref<8x1792xbf16, #tpu.memory_space<vmem>>, vector<8x1536xbf16>
    %c0_1 = arith.constant 0 : index
    %c0_2 = arith.constant 0 : index
    %1 = vector.load %arg7[%c0_1, %c0_2] : memref<288x1536xbf16, #tpu.memory_space<vmem>>, vector<8x1536xbf16>
    tpu.vector_store %arg7[%c0_1, %c0_2], %0 {strides = array<i32>} : memref<288x1536xbf16, #tpu.memory_space<vmem>>, vector<8x1536xbf16>,
    %c0_3 = arith.constant 0 : index
    %c1 = arith.constant 1 : index
    %2 = vector.load %arg1[%c0_3, %c1] : memref<8x1792xbf16, #tpu.memory_space<vmem>>, vector<8x1536xbf16>
    %c8 = arith.constant 8 : index
    %c0_4 = arith.constant 0 : index
    %3 = vector.load %arg7[%c8, %c0_4] : memref<288x1536xbf16, #tpu.memory_space<vmem>>, vector<8x1536xbf16>
    tpu.vector_store %arg7[%c8, %c0_4], %2 {strides = array<i32>} : memref<288x1536xbf16, #tpu.memory_space<vmem>>, vector<8x1536xbf16>,
    %c0_5 = arith.constant 0 : index
    %c2 = arith.constant 2 : index
    %4 = vector.load %arg1[%c0_5, %c2] : memref<8x1792xbf16, #tpu.memory_space<vmem>>, vector<8x1536xbf16>
    %c16 = arith.constant 16 : index
    %c0_6 = arith.constant 0 : index
    %5 = vector.load %arg7[%c16, %c0_6] : memref<288x1536xbf16, #tpu.memory_space<vmem>>, vector<8x1536xbf16>
    tpu.vector_store %arg7[%c16, %c0_6], %4 {strides = array<i32>} : memref<288x1536xbf16, #tpu.memory_space<vmem>>, vector<8x1536xbf16>,
    %c0_7 = arith.constant 0 : index
    %c3 = arith.constant 3 : index
    %6 = vector.load %arg1[%c0_7, %c3] : memref<8x1792xbf16, #tpu.memory_space<vmem>>, vector<8x1536xbf16>
    %c24 = arith.constant 24 : index
    %c0_8 = arith.constant 0 : index
    %7 = vector.load %arg7[%c24, %c0_8] : memref<288x1536xbf16, #tpu.memory_space<vmem>>, vector<8x1536xbf16>
    tpu.vector_store %arg7[%c24, %c0_8], %6 {strides = array<i32>} : memref<288x1536xbf16, #tpu.memory_space<vmem>>, vector<8x1536xbf16>,
    %c0_9 = arith.constant 0 : index
    %c4 = arith.constant 4 : index
    %8 = vector.load %arg1[%c0_9, %c4] : memref<8x1792xbf16, #tpu.memory_space<vmem>>, vector<8x1536xbf16>
    %c32 = arith.constant 32 : index
    %c0_10 = arith.constant 0 : index
    %9 = vector.load %arg7[%c32, %c0_10] : memref<288x1536xbf16, #tpu.memory_space<vmem>>, vector<8x1536xbf16>
    tpu.vector_store %arg7[%c32, %c0_10], %8 {strides = array<i32>} : memref<288x1536xbf16, #tpu.memory_space<vmem>>, vector<8x1536xbf16>,
    %c0_11 = arith.constant 0 : index
    %c5 = arith.constant 5 : index
    %10 = vector.load %arg1[%c0_11, %c5] : memref<8x1792xbf16, #tpu.memory_space<vmem>>, vector<8x1536xbf16>
    %c40 = arith.constant 40 : index
    %c0_12 = arith.constant 0 : index
    %11 = vector.load %arg7[%c40, %c0_12] : memref<288x1536xbf16, #tpu.memory_space<vmem>>, vector<8x1536xbf16>
    tpu.vector_store %arg7[%c40, %c0_12], %10 {strides = array<i32>} : memref<288x1536xbf16, #tpu.memory_space<vmem>>, vector<8x1536xbf16>,
    %c0_13 = arith.constant 0 : index
    %c27 = arith.constant 27 : index
    %12 = vector.load %arg1[%c0_13, %c27] : memref<8x1792xbf16, #tpu.memory_space<vmem>>, vector<8x1536xbf16>
    %c48 = arith.constant 48 : index
    %c0_14 = arith.constant 0 : index
    %13 = vector.load %arg7[%c48, %c0_14] : memref<288x1536xbf16, #tpu.memory_space<vmem>>, vector<8x1536xbf16>
    tpu.vector_store %arg7[%c48, %c0_14], %12 {strides = array<i32>} : memref<288x1536xbf16, #tpu.memory_space<vmem>>, vector<8x1536xbf16>,
    %c0_15 = arith.constant 0 : index
    %c28 = arith.constant 28 : index
    %14 = vector.load %arg1[%c0_15, %c28] : memref<8x1792xbf16, #tpu.memory_space<vmem>>, vector<8x1536xbf16>
    %c56 = arith.constant 56 : index
    %c0_16 = arith.constant 0 : index
    %15 = vector.load %arg7[%c56, %c0_16] : memref<288x1536xbf16, #tpu.memory_space<vmem>>, vector<8x1536xbf16>
    tpu.vector_store %arg7[%c56, %c0_16], %14 {strides = array<i32>} : memref<288x1536xbf16, #tpu.memory_space<vmem>>, vector<8x1536xbf16>,
    %c0_17 = arith.constant 0 : index
    %c29 = arith.constant 29 : index
    %16 = vector.load %arg1[%c0_17, %c29] : memref<8x1792xbf16, #tpu.memory_space<vmem>>, vector<8x1536xbf16>
    %c64 = arith.constant 64 : index
    %c0_18 = arith.constant 0 : index
    %17 = vector.load %arg7[%c64, %c0_18] : memref<288x1536xbf16, #tpu.memory_space<vmem>>, vector<8x1536xbf16>
    tpu.vector_store %arg7[%c64, %c0_18], %16 {strides = array<i32>} : memref<288x1536xbf16, #tpu.memory_space<vmem>>, vector<8x1536xbf16>,
    %c0_19 = arith.constant 0 : index
    %c30 = arith.constant 30 : index
    %18 = vector.load %arg1[%c0_19, %c30] : memref<8x1792xbf16, #tpu.memory_space<vmem>>, vector<8x1536xbf16>
    %c72 = arith.constant 72 : index
    %c0_20 = arith.constant 0 : index
    %19 = vector.load %arg7[%c72, %c0_20] : memref<288x1536xbf16, #tpu.memory_space<vmem>>, vector<8x1536xbf16>
    tpu.vector_store %arg7[%c72, %c0_20], %18 {strides = array<i32>} : memref<288x1536xbf16, #tpu.memory_space<vmem>>, vector<8x1536xbf16>,
    %c0_21 = arith.constant 0 : index
    %c31 = arith.constant 31 : index
    %20 = vector.load %arg1[%c0_21, %c31] : memref<8x1792xbf16, #tpu.memory_space<vmem>>, vector<8x1536xbf16>
    %c80 = arith.constant 80 : index
    %c0_22 = arith.constant 0 : index
    %21 = vector.load %arg7[%c80, %c0_22] : memref<288x1536xbf16, #tpu.memory_space<vmem>>, vector<8x1536xbf16>
    tpu.vector_store %arg7[%c80, %c0_22], %20 {strides = array<i32>} : memref<288x1536xbf16, #tpu.memory_space<vmem>>, vector<8x1536xbf16>,
    %c0_23 = arith.constant 0 : index
    %c32_24 = arith.constant 32 : index
    %22 = vector.load %arg1[%c0_23, %c32_24] : memref<8x1792xbf16, #tpu.memory_space<vmem>>, vector<8x1536xbf16>
    %c88 = arith.constant 88 : index
    %c0_25 = arith.constant 0 : index
    %23 = vector.load %arg7[%c88, %c0_25] : memref<288x1536xbf16, #tpu.memory_space<vmem>>, vector<8x1536xbf16>
    tpu.vector_store %arg7[%c88, %c0_25], %22 {strides = array<i32>} : memref<288x1536xbf16, #tpu.memory_space<vmem>>, vector<8x1536xbf16>,
    %c0_26 = arith.constant 0 : index
    %c54 = arith.constant 54 : index
    %24 = vector.load %arg1[%c0_26, %c54] : memref<8x1792xbf16, #tpu.memory_space<vmem>>, vector<8x1536xbf16>
    %c96 = arith.constant 96 : index
    %c0_27 = arith.constant 0 : index
    %25 = vector.load %arg7[%c96, %c0_27] : memref<288x1536xbf16, #tpu.memory_space<vmem>>, vector<8x1536xbf16>
    tpu.vector_store %arg7[%c96, %c0_27], %24 {strides = array<i32>} : memref<288x1536xbf16, #tpu.memory_space<vmem>>, vector<8x1536xbf16>,
    %c0_28 = arith.constant 0 : index
    %c55 = arith.constant 55 : index
    %26 = vector.load %arg1[%c0_28, %c55] : memref<8x1792xbf16, #tpu.memory_space<vmem>>, vector<8x1536xbf16>
    %c104 = arith.constant 104 : index
    %c0_29 = arith.constant 0 : index
    %27 = vector.load %arg7[%c104, %c0_29] : memref<288x1536xbf16, #tpu.memory_space<vmem>>, vector<8x1536xbf16>
    tpu.vector_store %arg7[%c104, %c0_29], %26 {strides = array<i32>} : memref<288x1536xbf16, #tpu.memory_space<vmem>>, vector<8x1536xbf16>,
    %c0_30 = arith.constant 0 : index
    %c56_31 = arith.constant 56 : index
    %28 = vector.load %arg1[%c0_30, %c56_31] : memref<8x1792xbf16, #tpu.memory_space<vmem>>, vector<8x1536xbf16>
    %c112 = arith.constant 112 : index
    %c0_32 = arith.constant 0 : index
    %29 = vector.load %arg7[%c112, %c0_32] : memref<288x1536xbf16, #tpu.memory_space<vmem>>, vector<8x1536xbf16>
    tpu.vector_store %arg7[%c112, %c0_32], %28 {strides = array<i32>} : memref<288x1536xbf16, #tpu.memory_space<vmem>>, vector<8x1536xbf16>,
    %c0_33 = arith.constant 0 : index
    %c57 = arith.constant 57 : index
    %30 = vector.load %arg1[%c0_33, %c57] : memref<8x1792xbf16, #tpu.memory_space<vmem>>, vector<8x1536xbf16>
    %c120 = arith.constant 120 : index
    %c0_34 = arith.constant 0 : index
    %31 = vector.load %arg7[%c120, %c0_34] : memref<288x1536xbf16, #tpu.memory_space<vmem>>, vector<8x1536xbf16>
    tpu.vector_store %arg7[%c120, %c0_34], %30 {strides = array<i32>} : memref<288x1536xbf16, #tpu.memory_space<vmem>>, vector<8x1536xbf16>,
    %c0_35 = arith.constant 0 : index
    %c58 = arith.constant 58 : index
    %32 = vector.load %arg1[%c0_35, %c58] : memref<8x1792xbf16, #tpu.memory_space<vmem>>, vector<8x1536xbf16>
    %c128 = arith.constant 128 : index
    %c0_36 = arith.constant 0 : index
    %33 = vector.load %arg7[%c128, %c0_36] : memref<288x1536xbf16, #tpu.memory_space<vmem>>, vector<8x1536xbf16>
    tpu.vector_store %arg7[%c128, %c0_36], %32 {strides = array<i32>} : memref<288x1536xbf16, #tpu.memory_space<vmem>>, vector<8x1536xbf16>,
    %c0_37 = arith.constant 0 : index
    %c59 = arith.constant 59 : index
    %34 = vector.load %arg1[%c0_37, %c59] : memref<8x1792xbf16, #tpu.memory_space<vmem>>, vector<8x1536xbf16>
    %c136 = arith.constant 136 : index
    %c0_38 = arith.constant 0 : index
    %35 = vector.load %arg7[%c136, %c0_38] : memref<288x1536xbf16, #tpu.memory_space<vmem>>, vector<8x1536xbf16>
    tpu.vector_store %arg7[%c136, %c0_38], %34 {strides = array<i32>} : memref<288x1536xbf16, #tpu.memory_space<vmem>>, vector<8x1536xbf16>,
    %c0_39 = arith.constant 0 : index
    %c81 = arith.constant 81 : index
    %36 = vector.load %arg1[%c0_39, %c81] : memref<8x1792xbf16, #tpu.memory_space<vmem>>, vector<8x1536xbf16>
    %c144 = arith.constant 144 : index
    %c0_40 = arith.constant 0 : index
    %37 = vector.load %arg7[%c144, %c0_40] : memref<288x1536xbf16, #tpu.memory_space<vmem>>, vector<8x1536xbf16>
    tpu.vector_store %arg7[%c144, %c0_40], %36 {strides = array<i32>} : memref<288x1536xbf16, #tpu.memory_space<vmem>>, vector<8x1536xbf16>,
    %c0_41 = arith.constant 0 : index
    %c82 = arith.constant 82 : index
    %38 = vector.load %arg1[%c0_41, %c82] : memref<8x1792xbf16, #tpu.memory_space<vmem>>, vector<8x1536xbf16>
    %c152 = arith.constant 152 : index
    %c0_42 = arith.constant 0 : index
    %39 = vector.load %arg7[%c152, %c0_42] : memref<288x1536xbf16, #tpu.memory_space<vmem>>, vector<8x1536xbf16>
    tpu.vector_store %arg7[%c152, %c0_42], %38 {strides = array<i32>} : memref<288x1536xbf16, #tpu.memory_space<vmem>>, vector<8x1536xbf16>,
    %c0_43 = arith.constant 0 : index
    %c83 = arith.constant 83 : index
    %40 = vector.load %arg1[%c0_43, %c83] : memref<8x1792xbf16, #tpu.memory_space<vmem>>, vector<8x1536xbf16>
    %c160 = arith.constant 160 : index
    %c0_44 = arith.constant 0 : index
    %41 = vector.load %arg7[%c160, %c0_44] : memref<288x1536xbf16, #tpu.memory_space<vmem>>, vector<8x1536xbf16>
    tpu.vector_store %arg7[%c160, %c0_44], %40 {strides = array<i32>} : memref<288x1536xbf16, #tpu.memory_space<vmem>>, vector<8x1536xbf16>,
    %c0_45 = arith.constant 0 : index
    %c84 = arith.constant 84 : index
    %42 = vector.load %arg1[%c0_45, %c84] : memref<8x1792xbf16, #tpu.memory_space<vmem>>, vector<8x1536xbf16>
    %c168 = arith.constant 168 : index
    %c0_46 = arith.constant 0 : index
    %43 = vector.load %arg7[%c168, %c0_46] : memref<288x1536xbf16, #tpu.memory_space<vmem>>, vector<8x1536xbf16>
    tpu.vector_store %arg7[%c168, %c0_46], %42 {strides = array<i32>} : memref<288x1536xbf16, #tpu.memory_space<vmem>>, vector<8x1536xbf16>,
    %c0_47 = arith.constant 0 : index
    %c85 = arith.constant 85 : index
    %44 = vector.load %arg1[%c0_47, %c85] : memref<8x1792xbf16, #tpu.memory_space<vmem>>, vector<8x1536xbf16>
    %c176 = arith.constant 176 : index
    %c0_48 = arith.constant 0 : index
    %45 = vector.load %arg7[%c176, %c0_48] : memref<288x1536xbf16, #tpu.memory_space<vmem>>, vector<8x1536xbf16>
    tpu.vector_store %arg7[%c176, %c0_48], %44 {strides = array<i32>} : memref<288x1536xbf16, #tpu.memory_space<vmem>>, vector<8x1536xbf16>,
    %c0_49 = arith.constant 0 : index
    %c86 = arith.constant 86 : index
    %46 = vector.load %arg1[%c0_49, %c86] : memref<8x1792xbf16, #tpu.memory_space<vmem>>, vector<8x1536xbf16>
    %c184 = arith.constant 184 : index
    %c0_50 = arith.constant 0 : index
    %47 = vector.load %arg7[%c184, %c0_50] : memref<288x1536xbf16, #tpu.memory_space<vmem>>, vector<8x1536xbf16>
    tpu.vector_store %arg7[%c184, %c0_50], %46 {strides = array<i32>} : memref<288x1536xbf16, #tpu.memory_space<vmem>>, vector<8x1536xbf16>,
    %c0_51 = arith.constant 0 : index
    %c108 = arith.constant 108 : index
    %48 = vector.load %arg1[%c0_51, %c108] : memref<8x1792xbf16, #tpu.memory_space<vmem>>, vector<8x1536xbf16>
    %c192 = arith.constant 192 : index
    %c0_52 = arith.constant 0 : index
    %49 = vector.load %arg7[%c192, %c0_52] : memref<288x1536xbf16, #tpu.memory_space<vmem>>, vector<8x1536xbf16>
    tpu.vector_store %arg7[%c192, %c0_52], %48 {strides = array<i32>} : memref<288x1536xbf16, #tpu.memory_space<vmem>>, vector<8x1536xbf16>,
    %c0_53 = arith.constant 0 : index
    %c109 = arith.constant 109 : index
    %50 = vector.load %arg1[%c0_53, %c109] : memref<8x1792xbf16, #tpu.memory_space<vmem>>, vector<8x1536xbf16>
    %c200 = arith.constant 200 : index
    %c0_54 = arith.constant 0 : index
    %51 = vector.load %arg7[%c200, %c0_54] : memref<288x1536xbf16, #tpu.memory_space<vmem>>, vector<8x1536xbf16>
    tpu.vector_store %arg7[%c200, %c0_54], %50 {strides = array<i32>} : memref<288x1536xbf16, #tpu.memory_space<vmem>>, vector<8x1536xbf16>,
    %c0_55 = arith.constant 0 : index
    %c110 = arith.constant 110 : index
    %52 = vector.load %arg1[%c0_55, %c110] : memref<8x1792xbf16, #tpu.memory_space<vmem>>, vector<8x1536xbf16>
    %c208 = arith.constant 208 : index
    %c0_56 = arith.constant 0 : index
    %53 = vector.load %arg7[%c208, %c0_56] : memref<288x1536xbf16, #tpu.memory_space<vmem>>, vector<8x1536xbf16>
    tpu.vector_store %arg7[%c208, %c0_56], %52 {strides = array<i32>} : memref<288x1536xbf16, #tpu.memory_space<vmem>>, vector<8x1536xbf16>,
    %c0_57 = arith.constant 0 : index
    %c111 = arith.constant 111 : index
    %54 = vector.load %arg1[%c0_57, %c111] : memref<8x1792xbf16, #tpu.memory_space<vmem>>, vector<8x1536xbf16>
    %c216 = arith.constant 216 : index
    %c0_58 = arith.constant 0 : index
    %55 = vector.load %arg7[%c216, %c0_58] : memref<288x1536xbf16, #tpu.memory_space<vmem>>, vector<8x1536xbf16>
    tpu.vector_store %arg7[%c216, %c0_58], %54 {strides = array<i32>} : memref<288x1536xbf16, #tpu.memory_space<vmem>>, vector<8x1536xbf16>,
    %c0_59 = arith.constant 0 : index
    %c112_60 = arith.constant 112 : index
    %56 = vector.load %arg1[%c0_59, %c112_60] : memref<8x1792xbf16, #tpu.memory_space<vmem>>, vector<8x1536xbf16>
    %c224 = arith.constant 224 : index
    %c0_61 = arith.constant 0 : index
    %57 = vector.load %arg7[%c224, %c0_61] : memref<288x1536xbf16, #tpu.memory_space<vmem>>, vector<8x1536xbf16>
    tpu.vector_store %arg7[%c224, %c0_61], %56 {strides = array<i32>} : memref<288x1536xbf16, #tpu.memory_space<vmem>>, vector<8x1536xbf16>,
    %c0_62 = arith.constant 0 : index
    %c113 = arith.constant 113 : index
    %58 = vector.load %arg1[%c0_62, %c113] : memref<8x1792xbf16, #tpu.memory_space<vmem>>, vector<8x1536xbf16>
    %c232 = arith.constant 232 : index
    %c0_63 = arith.constant 0 : index
    %59 = vector.load %arg7[%c232, %c0_63] : memref<288x1536xbf16, #tpu.memory_space<vmem>>, vector<8x1536xbf16>
    tpu.vector_store %arg7[%c232, %c0_63], %58 {strides = array<i32>} : memref<288x1536xbf16, #tpu.memory_space<vmem>>, vector<8x1536xbf16>,
    %c0_64 = arith.constant 0 : index
    %c135 = arith.constant 135 : index
    %60 = vector.load %arg1[%c0_64, %c135] : memref<8x1792xbf16, #tpu.memory_space<vmem>>, vector<8x1536xbf16>
    %c240 = arith.constant 240 : index
    %c0_65 = arith.constant 0 : index
    %61 = vector.load %arg7[%c240, %c0_65] : memref<288x1536xbf16, #tpu.memory_space<vmem>>, vector<8x1536xbf16>
    tpu.vector_store %arg7[%c240, %c0_65], %60 {strides = array<i32>} : memref<288x1536xbf16, #tpu.memory_space<vmem>>, vector<8x1536xbf16>,
    %c0_66 = arith.constant 0 : index
    %c136_67 = arith.constant 136 : index
    %62 = vector.load %arg1[%c0_66, %c136_67] : memref<8x1792xbf16, #tpu.memory_space<vmem>>, vector<8x1536xbf16>
    %c248 = arith.constant 248 : index
    %c0_68 = arith.constant 0 : index
    %63 = vector.load %arg7[%c248, %c0_68] : memref<288x1536xbf16, #tpu.memory_space<vmem>>, vector<8x1536xbf16>
    tpu.vector_store %arg7[%c248, %c0_68], %62 {strides = array<i32>} : memref<288x1536xbf16, #tpu.memory_space<vmem>>, vector<8x1536xbf16>,
    %c0_69 = arith.constant 0 : index
    %c137 = arith.constant 137 : index
    %64 = vector.load %arg1[%c0_69, %c137] : memref<8x1792xbf16, #tpu.memory_space<vmem>>, vector<8x1536xbf16>
    %c256 = arith.constant 256 : index
    %c0_70 = arith.constant 0 : index
    %65 = vector.load %arg7[%c256, %c0_70] : memref<288x1536xbf16, #tpu.memory_space<vmem>>, vector<8x1536xbf16>
    tpu.vector_store %arg7[%c256, %c0_70], %64 {strides = array<i32>} : memref<288x1536xbf16, #tpu.memory_space<vmem>>, vector<8x1536xbf16>,
    %c0_71 = arith.constant 0 : index
    %c138 = arith.constant 138 : index
    %66 = vector.load %arg1[%c0_71, %c138] : memref<8x1792xbf16, #tpu.memory_space<vmem>>, vector<8x1536xbf16>
    %c264 = arith.constant 264 : index
    %c0_72 = arith.constant 0 : index
    %67 = vector.load %arg7[%c264, %c0_72] : memref<288x1536xbf16, #tpu.memory_space<vmem>>, vector<8x1536xbf16>
    tpu.vector_store %arg7[%c264, %c0_72], %66 {strides = array<i32>} : memref<288x1536xbf16, #tpu.memory_space<vmem>>, vector<8x1536xbf16>,
    %c0_73 = arith.constant 0 : index
    %c139 = arith.constant 139 : index
    %68 = vector.load %arg1[%c0_73, %c139] : memref<8x1792xbf16, #tpu.memory_space<vmem>>, vector<8x1536xbf16>
    %c272 = arith.constant 272 : index
    %c0_74 = arith.constant 0 : index
    %69 = vector.load %arg7[%c272, %c0_74] : memref<288x1536xbf16, #tpu.memory_space<vmem>>, vector<8x1536xbf16>
    tpu.vector_store %arg7[%c272, %c0_74], %68 {strides = array<i32>} : memref<288x1536xbf16, #tpu.memory_space<vmem>>, vector<8x1536xbf16>,
    %c0_75 = arith.constant 0 : index
    %c140 = arith.constant 140 : index
    %70 = vector.load %arg1[%c0_75, %c140] : memref<8x1792xbf16, #tpu.memory_space<vmem>>, vector<8x1536xbf16>
    %c280 = arith.constant 280 : index
    %c0_76 = arith.constant 0 : index
    %71 = vector.load %arg7[%c280, %c0_76] : memref<288x1536xbf16, #tpu.memory_space<vmem>>, vector<8x1536xbf16>
    tpu.vector_store %arg7[%c280, %c0_76], %70 {strides = array<i32>} : memref<288x1536xbf16, #tpu.memory_space<vmem>>, vector<8x1536xbf16>,
    %c0_77 = arith.constant 0 : index
    %c0_78 = arith.constant 0 : index
    %72 = vector.load %arg2[%c0_77, %c0_78] : memref<4x288xbf16, #tpu.memory_space<vmem>>, vector<4x288xbf16>
    %c0_79 = arith.constant 0 : index
    %c0_80 = arith.constant 0 : index
    %73 = vector.load %arg7[%c0_79, %c0_80] : memref<288x1536xbf16, #tpu.memory_space<vmem>>, vector<288x1536xbf16>
    %cst = arith.constant dense<0.000000e+00> : vector<4x1536xf32>
    %74 = tpu.matmul %72, %73, %cst {dimension_numbers = #tpu.dot_dimension_numbers<[1], [0], [0], [1], [0, 0, 1, 1], [], []>} : vector<4x288xbf16>, vector<288x1536xbf16>, vector<4x1536xf32> -> vector<4x1536xf32>
    %c0_81 = arith.constant 0 : index
    %c0_82 = arith.constant 0 : index
    %75 = vector.load %arg5[%c0_81, %c0_82] : memref<1x1536xf32, #tpu.memory_space<vmem>>, vector<1x1536xf32>
    %76 = vector.broadcast %75 : vector<1x1536xf32> to vector<4x1536xf32>
    %77 = arith.mulf %74, %76 : vector<4x1536xf32>
    %cst_83 = arith.constant dense<0.000000e+00> : vector<4xf32>
    %78 = vector.multi_reduction <add>, %77, %cst_83 [1] : vector<4x1536xf32> to vector<4xf32>
    %79 = vector.shape_cast %78 : vector<4xf32> to vector<4x1xf32>
    %cst_84 = arith.constant 9.680000e+02 : f32
    %80 = vector.broadcast %cst_84 : f32 to vector<4x1xf32>
    %81 = arith.divf %79, %80 : vector<4x1xf32>
    %82 = arith.mulf %77, %74 : vector<4x1536xf32>
    %cst_85 = arith.constant dense<0.000000e+00> : vector<4xf32>
    %83 = vector.multi_reduction <add>, %82, %cst_85 [1] : vector<4x1536xf32> to vector<4xf32>
    %84 = vector.shape_cast %83 : vector<4xf32> to vector<4x1xf32>
    %cst_86 = arith.constant 9.680000e+02 : f32
    %85 = vector.broadcast %cst_86 : f32 to vector<4x1xf32>
    %86 = arith.divf %84, %85 : vector<4x1xf32>
    %87 = arith.mulf %81, %81 : vector<4x1xf32>
    %88 = arith.subf %86, %87 : vector<4x1xf32>
    %cst_87 = arith.constant 0.000000e+00 : f32
    %89 = vector.broadcast %cst_87 : f32 to vector<4x1xf32>
    %90 = arith.maximumf %88, %89 : vector<4x1xf32>
    %c0_88 = arith.constant 0 : index
    %c0_89 = arith.constant 0 : index
    %91 = vector.load %arg3[%c0_88, %c0_89] : memref<4x1xf32, #tpu.memory_space<vmem>>, vector<4x1xf32>
    %cst_90 = arith.constant 9.99999974E-6 : f32
    %92 = vector.broadcast %cst_90 : f32 to vector<4x1xf32>
    %93 = arith.addf %90, %92 : vector<4x1xf32>
    %94 = math.rsqrt %93 : vector<4x1xf32>
    %95 = arith.mulf %91, %94 : vector<4x1xf32>
    %c0_91 = arith.constant 0 : index
    %c0_92 = arith.constant 0 : index
    %96 = vector.load %arg4[%c0_91, %c0_92] : memref<4x1xf32, #tpu.memory_space<vmem>>, vector<4x1xf32>
    %97 = arith.mulf %81, %95 : vector<4x1xf32>
    %98 = arith.subf %96, %97 : vector<4x1xf32>
    %99 = vector.broadcast %95 : vector<4x1xf32> to vector<4x1536xf32>
    %100 = arith.mulf %74, %99 : vector<4x1536xf32>
    %101 = vector.broadcast %98 : vector<4x1xf32> to vector<4x1536xf32>
    %102 = arith.addf %100, %101 : vector<4x1536xf32>
    %cst_93 = arith.constant 0.000000e+00 : f32
    %103 = vector.broadcast %cst_93 : f32 to vector<4x1536xf32>
    %104 = arith.maximumf %102, %103 : vector<4x1536xf32>
    %105 = math.tanh %104 : vector<4x1536xf32>
    %c0_94 = arith.constant 0 : index
    %c0_95 = arith.constant 0 : index
    %106 = vector.load %arg6[%c0_94, %c0_95] : memref<4x1536xf32, #tpu.memory_space<vmem>>, vector<4x1536xf32>
    tpu.vector_store %arg6[%c0_94, %c0_95], %105 {strides = array<i32>} : memref<4x1536xf32, #tpu.memory_space<vmem>>, vector<4x1536xf32>,
    return
  }
  func.func @transform_0(%arg0: i32) -> (i32, i32) {
    %c0_i32 = arith.constant 0 : i32
    %c0_i32_0 = arith.constant 0 : i32
    %c0_i32_1 = arith.constant 0 : i32
    return %c0_i32, %c0_i32_0 : i32, i32
  }
  func.func @transform_1(%arg0: i32) -> (i32, i32) {
    %c0_i32 = arith.constant 0 : i32
    %c0_i32_0 = arith.constant 0 : i32
    %c0_i32_1 = arith.constant 0 : i32
    return %c0_i32, %c0_i32_0 : i32, i32
  }
  func.func @transform_2(%arg0: i32) -> (i32, i32) {
    %c0_i32 = arith.constant 0 : i32
    %c0_i32_0 = arith.constant 0 : i32
    %c0_i32_1 = arith.constant 0 : i32
    return %c0_i32, %c0_i32_0 : i32, i32
  }
  func.func @transform_3(%arg0: i32) -> (i32, i32) {
    %c0_i32 = arith.constant 0 : i32
    %c0_i32_0 = arith.constant 0 : i32
    %c0_i32_1 = arith.constant 0 : i32
    return %c0_i32, %c0_i32_0 : i32, i32
  }
  func.func @transform_4(%arg0: i32) -> (i32, i32) {
    %c0_i32 = arith.constant 0 : i32
    %c0_i32_0 = arith.constant 0 : i32
    %c0_i32_1 = arith.constant 0 : i32
    return %c0_i32, %c0_i32_0 : i32, i32
  }
  func.func @transform_5(%arg0: i32) -> (i32, i32) {
    %c0_i32 = arith.constant 0 : i32
    %c0_i32_0 = arith.constant 0 : i32
    %c0_i32_1 = arith.constant 0 : i32
    return %c0_i32, %c0_i32_0 : i32, i32
  }
}

</mosaic_0001>

<bundles_post_ra>
// kernel: vae_forward.5
= control target key start
LH: loop header
LB: loop body
LE: loop exit
PB: predicated region body
PF: predicated region fallthrough
CT: control target
= control target key end

     0   :  { %v29_v0 = vlaneseq  ;;  %v2325_v1 = vmov 1935823168   ;;  %s2326_s20 = smov 66   ;;  %s2327_s21 = smov 127   ;;  %v2334_v28 = vmov 0   ;;  %vm249_vm0 = vcmask 1043456   ;;  %s3012_s0 = inlined_call_operand.vmem [shape: bf16[2,2048], index: 0, kind: input, shape index: {}]   ;;  %s3013_s1 = inlined_call_operand.vmem [shape: bf16[4,18], index: 1, kind: input, shape index: {}]   ;;  %s3014_s4 = inlined_call_operand.vmem [shape: f32[1,1920], index: 4, kind: input, shape index: {}]   ;;  %s3015_s2 = inlined_call_operand.vmem [shape: f32[4,1], index: 2, kind: input, shape index: {}]   ;;  %s3016_s3 = inlined_call_operand.vmem [shape: f32[4,1], index: 3, kind: input, shape index: {}]   ;;  %s3017_s5 = inlined_call_operand.vmem [shape: bf16[4,1920], index: 5, kind: output, shape index: {}]  }
   0x1   :  { %v27_v2 = vunpack.c.l.s4 %v2325_v1  ;;  %v1182_v4 = vld [vmem:[%s3012_s0] sm:$0xff]  ;;  %s2328_s22 = smov 126   ;;  %s2329_s23 = smov 98   ;;  %v1183_v27 = vld [vmem:[%s3012_s0 + $0x8] sm:$0xff]  ;;  %1553 = vmatprep.mubr.bf16.mxu0 %v2334_v28  ;;  %1594 = vmatprep.mubr.bf16.mxu1 %v2334_v28  ;;  %vm1301_vm1 = vcmask 539648   ;;  %vm251_vm2 = vcmask 1039360  }
   0x2   :  { %v2368_v3 = vshrl.u32 %v29_v0, 7  ;;  %v286_v6 = vcombine.low %v1182_v4, %v1182_v4  ;;  %v1186_v8 = vcombine.high %v1182_v4, %v1182_v4  ;;  %s2330_s24 = smov 97   ;;  %s2331_s25 = smov 96   ;;  %2281 = vset.pattern.permute.xlu0 %v2334_v28  ;;  %2282 = vset.pattern.permute.xlu1 %v2334_v28  ;;  %v331_v30 = vcombine.low %v1183_v27, %v1183_v27  ;;  %v22_v39 = vld [vmem:[%s3012_s0 + $0x8] sm:$0x7f] }
   0x3   :  { %v28_v5 = vunpack.c.0.s8 %v27_v2  ;;  %s2332_s26 = smov 68   ;;  %s2333_s27 = smov 67   ;;  %v1231_v44 = vcombine.high %v1183_v27, %v1183_v27  ;;  %v70_v50 = vcombine.high %v22_v39, %v22_v39  ;;  %vm551_vm3 = vcmask 801792  }
   0x4   :  { %vm401_vm4 = vcmask 1031168   ;;  %vm701_vm5 = vcmask 793600   ;;  %vm851_vm6 = vcmask 785408   ;;  %vm1475_vm7 = vcmask 1040384  }
   0x5   :  { %v2374_v7 = vsub.s32 %v28_v5, %v2368_v3  ;;  %vm1001_vm8 = vcmask 556032   ;;  %vm1151_vm9 = vcmask 547840   ;;  %vm1471_vm10 = vcmask 146432  }
   0x6   :  { %vm2336_vm11 = vmmov 0  }
   0x7   :  { %v1193_v9 = vrot.slane %v1182_v4, %v2374_v7  ;;  %v293_v10 = vrot.slane %v286_v6, %v2374_v7  ;;  %v1200_v11 = vrot.slane %v1186_v8, %v2374_v7  ;;  %v1238_v29 = vrot.slane %v1183_v27, %v2374_v7 }
   0x8   :  { %v338_v32 = vrot.slane %v331_v30, %v2374_v7  ;;  %v77_v40 = vrot.slane %v22_v39, %v2374_v7  ;;  %v1245_v45 = vrot.slane %v1231_v44, %v2374_v7  ;;  %v84_v51 = vrot.slane %v70_v50, %v2374_v7 }
   0x9   :  { %v2380_v12 = vrot.slane %v1193_v9, %v2374_v7  ;;  %v1201_v13 = vcombine.high %v1193_v9, %v1193_v9  ;;  %2197 = vst.sshfl [vmem:[#allocation2] sm:$0x5 pattern:$0x75316420] %v1193_v9  ;;  %v150_v14 = vcombine.low %v1193_v9, %v1193_v9  ;;  %v309_v15 = vrot.slane %v293_v10, %v2374_v7 }
   0xa   :  { %2199 = vst.sshfl [vmem:[#allocation2 + $0x10] sm:$0x5 pattern:$0x75316420] %v1200_v11  ;;  %v451_v16 = vcombine.low %v293_v10, %v293_v10  ;;  %v1202_v17 = vcombine.high %v1200_v11, %v1200_v11  ;;  %v301_v20 = vcombine.high %v293_v10, %v293_v10  ;;  %v151_v23 = vcombine.low %v1200_v11, %v1200_v11 }
   0xb   :  { %1276 = vrot.lane.b32.xlu0 %v2380_v12, %s2326_s20  ;;  %227 = vrot.lane.b32.xlu1 %v2380_v12, %s2327_s21  ;;  %2198 = vst.sshfl [vmem:[#allocation2 + $0x8] sm:$0x5 pattern:$0x75316420] %v1201_v13  ;;  %v1216_v18 = vrot.slane %v1201_v13, %v2374_v7  ;;  %v158_v19 = vrot.slane %v150_v14, %v2374_v7 }
   0xc   :  { %2200 = vst.sshfl [vmem:[#allocation2 + $0x18] sm:$0x5 pattern:$0x75316420] %v1202_v17  ;;  %v459_v21 = vrot.slane %v451_v16, %v2374_v7  ;;  %v316_v22 = vrot.slane %v301_v20, %v2374_v7  ;;  %v1223_v24 = vrot.slane %v1200_v11, %v2374_v7  ;;  %v172_v25 = vrot.slane %v151_v23, %v2374_v7 }
   0xd   :  { %v1230_v26 = vrot.slane %v1202_v17, %v2374_v7  ;;  %v195_v31 = vcombine.low %v1238_v29, %v1238_v29  ;;  %v2440_v33 = vrot.slane %v1238_v29, %v2374_v7  ;;  %v496_v35 = vcombine.low %v338_v32, %v338_v32  ;;  %2201 = vst.sshfl [vmem:[#allocation2 + $0x20] sm:$0x5 pattern:$0x75316420] %v77_v40 }
   0xe   :  { %v354_v36 = vrot.slane %v338_v32, %v2374_v7  ;;  %v1246_v38 = vcombine.high %v1238_v29, %v1238_v29  ;;  %v346_v42 = vcombine.high %v338_v32, %v338_v32  ;;  %v196_v46 = vcombine.low %v1245_v45, %v1245_v45  ;;  %2203 = vst.sshfl [vmem:[#allocation2 + $0x30] sm:$0x5 pattern:$0x75316420] %v84_v51 }
   0xf   :  { %376 = vrot.lane.b32.xlu0 %v309_v15, %s2328_s22  ;;  %528 = vrot.lane.b32.xlu1 %v309_v15, %s2329_s23  ;;  %v203_v34 = vrot.slane %v195_v31, %v2374_v7  ;;  %v504_v37 = vrot.slane %v496_v35, %v2374_v7  ;;  %v85_v47 = vcombine.high %v77_v40, %v77_v40 }
  0x10   :  { %v1261_v41 = vrot.slane %v1246_v38, %v2374_v7  ;;  %v361_v43 = vrot.slane %v346_v42, %v2374_v7  ;;  %v1268_v48 = vrot.slane %v1245_v45, %v2374_v7  ;;  %v217_v49 = vrot.slane %v196_v46, %v2374_v7 }
  0x11   :  { %2202 = vst.sshfl [vmem:[#allocation2 + $0x28] sm:$0x5 pattern:$0x75316420] %v85_v47  ;;  %v1247_v52 = vcombine.high %v1245_v45, %v1245_v45  ;;  %v86_v53 = vcombine.high %v84_v51, %v84_v51 }
  0x13   :  { %1278 = vrot.lane.b32.xlu0 %v1216_v18, %s2326_s20  ;;  %225 = vrot.lane.b32.xlu1 %v158_v19, %s2327_s21  ;;  %2204 = vst.sshfl [vmem:[#allocation2 + $0x38] sm:$0x1 pattern:$0x75316420] %v86_v53  ;;  %v1275_v54 = vrot.slane %v1247_v52, %v2374_v7 }
  0x17   :  { %526 = vrot.lane.b32.xlu0 %v459_v21, %s2329_s23  ;;  %378 = vrot.lane.b32.xlu1 %v316_v22, %s2328_s22 }
  0x1b   :  { %676 = vrot.lane.b32.xlu0 %v2380_v12, %s2330_s24  ;;  %678 = vrot.lane.b32.xlu1 %v1216_v18, %s2330_s24 }
  0x1f   :  { %826 = vrot.lane.b32.xlu0 %v158_v19, %s2331_s25  ;;  %828 = vrot.lane.b32.xlu1 %v2380_v12, %s2331_s25 }
  0x23   :  { %976 = vrot.lane.b32.xlu0 %v309_v15, %s2332_s26  ;;  %978 = vrot.lane.b32.xlu1 %v316_v22, %s2332_s26 }
  0x27   :  { %1126 = vrot.lane.b32.xlu0 %v459_v21, %s2333_s27  ;;  %1128 = vrot.lane.b32.xlu1 %v309_v15, %s2333_s27 }
  0x2b   :  { %1280 = vrot.lane.b32.xlu0 %v1223_v24, %s2326_s20  ;;  %229 = vrot.lane.b32.xlu1 %v172_v25, %s2327_s21 }
  0x2f   :  { %380 = vrot.lane.b32.xlu0 %v2380_v12, %s2328_s22  ;;  %530 = vrot.lane.b32.xlu1 %v158_v19, %s2329_s23 }
  0x33   :  { %680 = vrot.lane.b32.xlu0 %v1223_v24, %s2330_s24  ;;  %830 = vrot.lane.b32.xlu1 %v172_v25, %s2331_s25 }
  0x37   :  { %980 = vrot.lane.b32.xlu0 %v2380_v12, %s2332_s26  ;;  %1130 = vrot.lane.b32.xlu1 %v158_v19, %s2333_s27 }
  0x3b   :  { %1282 = vrot.lane.b32.xlu0 %v1230_v26, %s2326_s20  ;;  %231 = vrot.lane.b32.xlu1 %v1223_v24, %s2327_s21 }
  0x3f   :  { %382 = vrot.lane.b32.xlu0 %v1216_v18, %s2328_s22  ;;  %532 = vrot.lane.b32.xlu1 %v2380_v12, %s2329_s23 }
  0x43   :  { %682 = vrot.lane.b32.xlu0 %v1230_v26, %s2330_s24  ;;  %832 = vrot.lane.b32.xlu1 %v1223_v24, %s2331_s25 }
  0x47   :  { %982 = vrot.lane.b32.xlu0 %v1216_v18, %s2332_s26  ;;  %1132 = vrot.lane.b32.xlu1 %v2380_v12, %s2333_s27 }
  0x4b   :  { %1284 = vrot.lane.b32.xlu0 %v2440_v33, %s2326_s20  ;;  %233 = vrot.lane.b32.xlu1 %v203_v34, %s2327_s21 }
  0x4f   :  { %384 = vrot.lane.b32.xlu0 %v354_v36, %s2328_s22  ;;  %534 = vrot.lane.b32.xlu1 %v504_v37, %s2329_s23 }
  0x53   :  { %684 = vrot.lane.b32.xlu0 %v2440_v33, %s2330_s24  ;;  %834 = vrot.lane.b32.xlu1 %v203_v34, %s2331_s25 }
  0x57   :  { %984 = vrot.lane.b32.xlu0 %v354_v36, %s2332_s26  ;;  %1134 = vrot.lane.b32.xlu1 %v504_v37, %s2333_s27 }
  0x5b   :  { %1286 = vrot.lane.b32.xlu0 %v1261_v41, %s2326_s20  ;;  %235 = vrot.lane.b32.xlu1 %v2440_v33, %s2327_s21 }
  0x5f   :  { %386 = vrot.lane.b32.xlu0 %v361_v43, %s2328_s22  ;;  %536 = vrot.lane.b32.xlu1 %v354_v36, %s2329_s23 }
  0x63   :  { %686 = vrot.lane.b32.xlu0 %v1261_v41, %s2330_s24  ;;  %836 = vrot.lane.b32.xlu1 %v2440_v33, %s2331_s25 }
  0x67   :  { %986 = vrot.lane.b32.xlu0 %v361_v43, %s2332_s26  ;;  %1136 = vrot.lane.b32.xlu1 %v354_v36, %s2333_s27 }
  0x6b   :  { %1288 = vrot.lane.b32.xlu0 %v1268_v48, %s2326_s20  ;;  %237 = vrot.lane.b32.xlu1 %v217_v49, %s2327_s21 }
  0x6f   :  { %388 = vrot.lane.b32.xlu0 %v2440_v33, %s2328_s22  ;;  %538 = vrot.lane.b32.xlu1 %v203_v34, %s2329_s23 }
  0x73   :  { %688 = vrot.lane.b32.xlu0 %v1268_v48, %s2330_s24  ;;  %838 = vrot.lane.b32.xlu1 %v217_v49, %s2331_s25 }
  0x77   :  { %988 = vrot.lane.b32.xlu0 %v2440_v33, %s2332_s26  ;;  %1138 = vrot.lane.b32.xlu1 %v203_v34, %s2333_s27 }
  0x7b   :  { %1290 = vrot.lane.b32.xlu0 %v1275_v54, %s2326_s20  ;;  %239 = vrot.lane.b32.xlu1 %v1268_v48, %s2327_s21 }
  0x7d   :  { %v1277_v55 = vpop.permute.xlu0 %1276  ;;  %v2488_v56 = vpop.permute.xlu1 %227 }
  0x7e   :  { %v1292_v61 = vrot.slane %v1277_v55, 4  ;;  %v242_v62 = vrot.slane %v2488_v56, 4 }
  0x7f   :  { %390 = vrot.lane.b32.xlu0 %v1261_v41, %s2328_s22  ;;  %540 = vrot.lane.b32.xlu1 %v2440_v33, %s2329_s23 }
  0x81   :  { %v377_v57 = vpop.permute.xlu0 %376  ;;  %v2493_v58 = vpop.permute.xlu1 %528 }
  0x82   :  { %v392_v8 = vrot.slane %v377_v57, 4  ;;  %v543_v9 = vrot.slane %v2493_v58, 4 }
  0x83   :  { %690 = vrot.lane.b32.xlu0 %v1275_v54, %s2330_s24  ;;  %840 = vrot.lane.b32.xlu1 %v1268_v48, %s2331_s25 }
  0x85   :  { %v2497_v59 = vpop.permute.xlu0 %1278  ;;  %v226_v60 = vpop.permute.xlu1 %225 }
  0x86   :  { %v1293_v63 = vrot.slane %v2497_v59, 4  ;;  %v241_v0 = vrot.slane %v226_v60, 4 }
  0x87   :  { %990 = vrot.lane.b32.xlu0 %v1261_v41, %s2332_s26  ;;  %1140 = vrot.lane.b32.xlu1 %v2440_v33, %s2333_s27 }
  0x88   :  { %v1300_v1 = vsel %vm249_vm0, %v1292_v61, %v1293_v63  ;;  %v250_v2 = vsel %vm249_vm0, %v241_v0, %v242_v62 }
  0x89   :  { %v1302_v4 = vsel %vm1301_vm1, %v1277_v55, %v1300_v1  ;;  %v252_v5 = vsel %vm251_vm2, %v226_v60, %v250_v2  ;;  %v527_v6 = vpop.permute.xlu0 %526  ;;  %v2512_v7 = vpop.permute.xlu1 %378 }
  0x8a   :  { %1324 = vst [vmem:[#allocation2 + $0x78] sm:$0x11] %v1302_v4  ;;  %274 = vst [vmem:[#allocation2] sm:$0x22] %v252_v5  ;;  %v542_v10 = vrot.slane %v527_v6, 4  ;;  %v393_v11 = vrot.slane %v2512_v7, 4 }
  0x8c   :  { %v550_v12 = vsel %vm249_vm0, %v542_v10, %v543_v9  ;;  %v400_v13 = vsel %vm249_vm0, %v392_v8, %v393_v11  ;;  %v2586_v8 = vld [vmem:[%s3013_s1] sm:$0x3] }
  0x8d   :  { %v552_v14 = vsel %vm551_vm3, %v527_v6, %v550_v12  ;;  %v402_v15 = vsel %vm401_vm4, %v377_v57, %v400_v13  ;;  %v677_v16 = vpop.permute.xlu0 %676  ;;  %v2522_v17 = vpop.permute.xlu1 %678 }
  0x8e   :  { %574 = vst [vmem:[#allocation2] sm:$0x88] %v552_v14  ;;  %424 = vst [vmem:[#allocation2] sm:$0x44] %v402_v15  ;;  %v692_v18 = vrot.slane %v677_v16, 4  ;;  %v693_v19 = vrot.slane %v2522_v17, 4 }
  0x90   :  { %v700_v20 = vsel %vm249_vm0, %v692_v18, %v693_v19 }
  0x91   :  { %v702_v21 = vsel %vm701_vm5, %v677_v16, %v700_v20  ;;  %v827_v22 = vpop.permute.xlu0 %826  ;;  %v2529_v23 = vpop.permute.xlu1 %828  ;;  %v1349_v24 = vld [vmem:[#allocation2 + $0x78] sm:$0x11] }
  0x92   :  { %724 = vst [vmem:[#allocation2 + $0x3c] sm:$0x11] %v702_v21  ;;  %v842_v25 = vrot.slane %v827_v22, 4  ;;  %v843_v26 = vrot.slane %v2529_v23, 4  ;;  %v2221_v27 = vcombine.high %v1349_v24, %v1349_v24  ;;  %v2220_v29 = vcombine.low %v1349_v24, %v1349_v24 }
  0x94   :  { %v850_v30 = vsel %vm249_vm0, %v842_v25, %v843_v26  ;;  %2235 = vmatprep.subr.msk.bf16.mxu0 %vm1475_vm7, %v2221_v27  ;;  %v1477_v31 = vsel %vm1475_vm7, %v2220_v29, 0 }
  0x95   :  { %v852_v32 = vsel %vm851_vm6, %v827_v22, %v850_v30  ;;  %1534 = vmatpush1.bf16.msra.mxu0 %v1477_v31  ;;  %v977_v33 = vpop.permute.xlu0 %976  ;;  %v2536_v34 = vpop.permute.xlu1 %978  ;;  %v1333_v0 = vld [vmem:[#allocation2] sm:$0xff] }
  0x96   :  { %874 = vst [vmem:[#allocation2 + $0x3c] sm:$0x22] %v852_v32  ;;  %v992_v35 = vrot.slane %v977_v33, 4  ;;  %v993_v36 = vrot.slane %v2536_v34, 4 }
  0x98   :  { %v1000_v37 = vsel %vm249_vm0, %v992_v35, %v993_v36 }
  0x99   :  { %v1002_v38 = vsel %vm1001_vm8, %v977_v33, %v1000_v37  ;;  %v1127_v39 = vpop.permute.xlu0 %1126  ;;  %v1129_v40 = vpop.permute.xlu1 %1128 }
  0x9a   :  { %1024 = vst [vmem:[#allocation2 + $0x3c] sm:$0x44] %v1002_v38  ;;  %v1142_v41 = vrot.slane %v1127_v39, 4  ;;  %v1143_v42 = vrot.slane %v1129_v40, 4 }
  0x9c   :  { %v1150_v43 = vsel %vm249_vm0, %v1142_v41, %v1143_v42 }
  0x9d   :  { %v1152_v44 = vsel %vm1151_vm9, %v1127_v39, %v1150_v43  ;;  %v2543_v45 = vpop.permute.xlu0 %1280  ;;  %v2545_v46 = vpop.permute.xlu1 %229 }
  0x9e   :  { %1174 = vst [vmem:[#allocation2 + $0x3c] sm:$0x88] %v1152_v44  ;;  %v1294_v47 = vrot.slane %v2543_v45, 4  ;;  %v243_v48 = vrot.slane %v2545_v46, 4 }
  0xa0   :  { %v1303_v49 = vsel %vm249_vm0, %v1293_v63, %v1294_v47  ;;  %v253_v50 = vsel %vm249_vm0, %v242_v62, %v243_v48 }
  0xa1   :  { %v1304_v51 = vsel %vm1301_vm1, %v2497_v59, %v1303_v49  ;;  %v254_v52 = vsel %vm251_vm2, %v2488_v56, %v253_v50  ;;  %v2559_v53 = vpop.permute.xlu0 %380  ;;  %v2561_v54 = vpop.permute.xlu1 %530 }
  0xa2   :  { %1325 = vst [vmem:[#allocation2 + $0x80] sm:$0x11] %v1304_v51  ;;  %275 = vst [vmem:[#allocation2 + $0x8] sm:$0x22] %v254_v52  ;;  %v394_v55 = vrot.slane %v2559_v53, 4  ;;  %v544_v57 = vrot.slane %v2561_v54, 4 }
  0xa4   :  { %v403_v60 = vsel %vm249_vm0, %v393_v11, %v394_v55  ;;  %v553_v61 = vsel %vm249_vm0, %v543_v9, %v544_v57 }
  0xa5   :  { %v404_v59 = vsel %vm401_vm4, %v2512_v7, %v403_v60  ;;  %v554_v56 = vsel %vm551_vm3, %v2493_v58, %v553_v61  ;;  %v2573_v62 = vpop.permute.xlu0 %680  ;;  %v2575_v63 = vpop.permute.xlu1 %830  ;;  %v1341_v1 = vld [vmem:[#allocation2 + $0x3c] sm:$0xff] }
  0xa6   :  { %v2289_v2 = vld [vmem:[#allocation2 + $0x4] ss:$60 sps:$4 sm:$0xff]   ;;  %425 = vst [vmem:[#allocation2 + $0x8] sm:$0x44] %v404_v59  ;;  %575 = vst [vmem:[#allocation2 + $0x8] sm:$0x88] %v554_v56  ;;  %v2205_v6 = vcombine.low %v1333_v0, %v1341_v1 }
  0xa7   :  { %v694_v4 = vrot.slane %v2573_v62, 4  ;;  %v844_v5 = vrot.slane %v2575_v63, 4  ;;  %1535 = vmatprep.subr.bf16.mxu0 %v2289_v2 }
  0xa8   :  { %1536 = vmatpush1.bf16.msra.mxu0 %v2205_v6 }
  0xa9   :  { %v703_v7 = vsel %vm249_vm0, %v693_v19, %v694_v4  ;;  %v853_v58 = vsel %vm249_vm0, %v843_v26, %v844_v5  ;;  %v2592_v11 = vpop.permute.xlu0 %980  ;;  %v2594_v12 = vpop.permute.xlu1 %1130  ;;  %v1350_v13 = vld [vmem:[#allocation2 + $0x80] sm:$0x11] }
  0xaa   :  { %v704_v9 = vsel %vm701_vm5, %v2522_v17, %v703_v7  ;;  %v854_v10 = vsel %vm851_vm6, %v2529_v23, %v853_v58  ;;  %v994_v14 = vrot.slane %v2592_v11, 4  ;;  %v1144_v15 = vrot.slane %v2594_v12, 4 }
  0xab   :  { %725 = vst [vmem:[#allocation2 + $0x44] sm:$0x11] %v704_v9  ;;  %875 = vst [vmem:[#allocation2 + $0x44] sm:$0x22] %v854_v10  ;;  %v2223_v16 = vcombine.high %v1350_v13, %v1350_v13  ;;  %v2222_v18 = vcombine.low %v1350_v13, %v1350_v13  ;;  %2236 = vmatmul.mubr.msk.bf16.vlgmr.msra.gmra.mxu0 %vm1471_vm10, %v2586_v8 }
  0xac   :  { %v1003_v17 = vsel %vm249_vm0, %v993_v36, %v994_v14  ;;  %v1153_v19 = vsel %vm249_vm0, %v1143_v42, %v1144_v15  ;;  %1635 = vmatprep.mubr.bf16.mxu0 %v2334_v28 }
  0xad   :  { %2237 = vmatprep.subr.msk.bf16.mxu1 %vm1475_vm7, %v2223_v16  ;;  %v1483_v20 = vsel %vm1475_vm7, %v2222_v18, 0  ;;  %v1004_v21 = vsel %vm1001_vm8, %v2536_v34, %v1003_v17  ;;  %v1154_v22 = vsel %vm1151_vm9, %v1129_v40, %v1153_v19  ;;  %v2608_v23 = vpop.permute.xlu0 %1282  ;;  %v2610_v24 = vpop.permute.xlu1 %231  ;;  %v1334_v42 = vld [vmem:[#allocation2 + $0x8] sm:$0xff] }
  0xae   :  { %1575 = vmatpush1.bf16.msra.mxu1 %v1483_v20  ;;  %1025 = vst [vmem:[#allocation2 + $0x44] sm:$0x44] %v1004_v21  ;;  %1175 = vst [vmem:[#allocation2 + $0x44] sm:$0x88] %v1154_v22  ;;  %v1295_v25 = vrot.slane %v2608_v23, 4  ;;  %v244_v26 = vrot.slane %v2610_v24, 4 }
  0xb0   :  { %v1305_v27 = vsel %vm249_vm0, %v1294_v47, %v1295_v25  ;;  %v255_v29 = vsel %vm249_vm0, %v243_v48, %v244_v26 }
  0xb1   :  { %v1306_v30 = vsel %vm1301_vm1, %v2543_v45, %v1305_v27  ;;  %v256_v31 = vsel %vm251_vm2, %v2545_v46, %v255_v29  ;;  %v2620_v32 = vpop.permute.xlu0 %382  ;;  %v2622_v33 = vpop.permute.xlu1 %532 }
  0xb2   :  { %1326 = vst [vmem:[#allocation2 + $0x88] sm:$0x11] %v1306_v30  ;;  %276 = vst [vmem:[#allocation2 + $0x10] sm:$0x22] %v256_v31  ;;  %v395_v34 = vrot.slane %v2620_v32, 4  ;;  %v545_v35 = vrot.slane %v2622_v33, 4 }
  0xb4   :  { %v405_v36 = vsel %vm249_vm0, %v394_v55, %v395_v34  ;;  %v555_v37 = vsel %vm249_vm0, %v544_v57, %v545_v35 }
  0xb5   :  { %v406_v38 = vsel %vm401_vm4, %v2559_v53, %v405_v36  ;;  %v556_v39 = vsel %vm551_vm3, %v2561_v54, %v555_v37  ;;  %v2632_v40 = vpop.permute.xlu0 %682  ;;  %v2634_v41 = vpop.permute.xlu1 %832  ;;  %v1342_v43 = vld [vmem:[#allocation2 + $0x44] sm:$0xff] }
  0xb6   :  { %v2293_v44 = vld [vmem:[#allocation2 + $0xc] ss:$60 sps:$4 sm:$0xff]   ;;  %426 = vst [vmem:[#allocation2 + $0x10] sm:$0x44] %v406_v38  ;;  %576 = vst [vmem:[#allocation2 + $0x10] sm:$0x88] %v556_v39  ;;  %v2207_v47 = vcombine.low %v1334_v42, %v1342_v43 }
  0xb7   :  { %v695_v45 = vrot.slane %v2632_v40, 4  ;;  %v845_v46 = vrot.slane %v2634_v41, 4  ;;  %1576 = vmatprep.subr.bf16.mxu1 %v2293_v44 }
  0xb8   :  { %1577 = vmatpush1.bf16.msra.mxu1 %v2207_v47 }
  0xb9   :  { %v705_v48 = vsel %vm249_vm0, %v694_v4, %v695_v45  ;;  %v855_v49 = vsel %vm249_vm0, %v844_v5, %v845_v46  ;;  %v2644_v52 = vpop.permute.xlu0 %982  ;;  %v2646_v53 = vpop.permute.xlu1 %1132  ;;  %v1351_v54 = vld [vmem:[#allocation2 + $0x88] sm:$0x11] }
  0xba   :  { %v706_v50 = vsel %vm701_vm5, %v2573_v62, %v705_v48  ;;  %v856_v51 = vsel %vm851_vm6, %v2575_v63, %v855_v49  ;;  %v995_v55 = vrot.slane %v2644_v52, 4  ;;  %v1145_v57 = vrot.slane %v2646_v53, 4 }
  0xbb   :  { %726 = vst [vmem:[#allocation2 + $0x4c] sm:$0x11] %v706_v50  ;;  %876 = vst [vmem:[#allocation2 + $0x4c] sm:$0x22] %v856_v51  ;;  %v2225_v60 = vcombine.high %v1351_v54, %v1351_v54  ;;  %v2224_v61 = vcombine.low %v1351_v54, %v1351_v54  ;;  %2238 = vmatmul.mubr.msk.bf16.vlgmr.msra.gmra.mxu1 %vm1471_vm10, %v2586_v8 }
  0xbc   :  { %v1005_v59 = vsel %vm249_vm0, %v994_v14, %v995_v55  ;;  %v1155_v56 = vsel %vm249_vm0, %v1144_v15, %v1145_v57  ;;  %1676 = vmatprep.mubr.bf16.mxu1 %v2334_v28 }
  0xbd   :  { %2239 = vmatprep.subr.msk.bf16.mxu0 %vm1475_vm7, %v2225_v60  ;;  %v1489_v62 = vsel %vm1475_vm7, %v2224_v61, 0  ;;  %v1006_v63 = vsel %vm1001_vm8, %v2592_v11, %v1005_v59  ;;  %v1156_v0 = vsel %vm1151_vm9, %v2594_v12, %v1155_v56  ;;  %v1285_v1 = vpop.permute.xlu0 %1284  ;;  %v234_v2 = vpop.permute.xlu1 %233 }
  0xbe   :  { %1616 = vmatpush1.bf16.msra.mxu0 %v1489_v62  ;;  %1026 = vst [vmem:[#allocation2 + $0x4c] sm:$0x44] %v1006_v63  ;;  %1176 = vst [vmem:[#allocation2 + $0x4c] sm:$0x88] %v1156_v0  ;;  %v1296_v4 = vrot.slane %v1285_v1, 4  ;;  %v245_v5 = vrot.slane %v234_v2, 4 }
  0xc0   :  { %v1307_v6 = vsel %vm249_vm0, %v1295_v25, %v1296_v4  ;;  %v257_v7 = vsel %vm249_vm0, %v244_v26, %v245_v5 }
  0xc1   :  { %v1308_v58 = vsel %vm1301_vm1, %v2608_v23, %v1307_v6  ;;  %v258_v9 = vsel %vm251_vm2, %v2610_v24, %v257_v7  ;;  %v385_v10 = vpop.permute.xlu0 %384  ;;  %v535_v11 = vpop.permute.xlu1 %534 }
  0xc2   :  { %1327 = vst [vmem:[#allocation2 + $0x90] sm:$0x11] %v1308_v58  ;;  %277 = vst [vmem:[#allocation2 + $0x18] sm:$0x22] %v258_v9  ;;  %v396_v12 = vrot.slane %v385_v10, 4  ;;  %v546_v13 = vrot.slane %v535_v11, 4 }
  0xc4   :  { %v407_v14 = vsel %vm249_vm0, %v395_v34, %v396_v12  ;;  %v557_v15 = vsel %vm249_vm0, %v545_v35, %v546_v13 }
  0xc5   :  { %v408_v16 = vsel %vm401_vm4, %v2620_v32, %v407_v14  ;;  %v558_v18 = vsel %vm551_vm3, %v2622_v33, %v557_v15  ;;  %v2673_v17 = vpop.permute.xlu0 %684  ;;  %v2675_v19 = vpop.permute.xlu1 %834  ;;  %v2297_v20 = vld [vmem:[#allocation2 + $0x10] ss:$60 sps:$4 sm:$0xff]  }
  0xc6   :  { %v2299_v21 = vld [vmem:[#allocation2 + $0x14] ss:$60 sps:$4 sm:$0xff]   ;;  %427 = vst [vmem:[#allocation2 + $0x18] sm:$0x44] %v408_v16  ;;  %577 = vst [vmem:[#allocation2 + $0x18] sm:$0x88] %v558_v18 }
  0xc7   :  { %v696_v22 = vrot.slane %v2673_v17, 4  ;;  %v846_v23 = vrot.slane %v2675_v19, 4  ;;  %1617 = vmatprep.subr.bf16.mxu0 %v2299_v21 }
  0xc8   :  { %1618 = vmatpush1.bf16.msra.mxu0 %v2297_v20 }
  0xc9   :  { %v707_v24 = vsel %vm249_vm0, %v695_v45, %v696_v22  ;;  %v857_v25 = vsel %vm249_vm0, %v845_v46, %v846_v23  ;;  %v2685_v29 = vpop.permute.xlu0 %984  ;;  %v2687_v30 = vpop.permute.xlu1 %1134  ;;  %v1352_v31 = vld [vmem:[#allocation2 + $0x90] sm:$0x11] }
  0xca   :  { %v708_v26 = vsel %vm701_vm5, %v2632_v40, %v707_v24  ;;  %v858_v27 = vsel %vm851_vm6, %v2634_v41, %v857_v25  ;;  %v996_v32 = vrot.slane %v2685_v29, 4  ;;  %v1146_v33 = vrot.slane %v2687_v30, 4 }
  0xcb   :  { %727 = vst [vmem:[#allocation2 + $0x54] sm:$0x11] %v708_v26  ;;  %877 = vst [vmem:[#allocation2 + $0x54] sm:$0x22] %v858_v27  ;;  %v2227_v34 = vcombine.high %v1352_v31, %v1352_v31  ;;  %v2226_v35 = vcombine.low %v1352_v31, %v1352_v31  ;;  %2240 = vmatmul.mubr.msk.bf16.vlgmr.msra.gmra.mxu0 %vm1471_vm10, %v2586_v8 }
  0xcc   :  { %v1007_v36 = vsel %vm249_vm0, %v995_v55, %v996_v32  ;;  %v1157_v37 = vsel %vm249_vm0, %v1145_v57, %v1146_v33  ;;  %1717 = vmatprep.mubr.bf16.mxu0 %v2334_v28 }
  0xcd   :  { %2241 = vmatprep.subr.msk.bf16.mxu1 %vm1475_vm7, %v2227_v34  ;;  %v1495_v38 = vsel %vm1475_vm7, %v2226_v35, 0  ;;  %v1008_v39 = vsel %vm1001_vm8, %v2644_v52, %v1007_v36  ;;  %v1158_v40 = vsel %vm1151_vm9, %v2646_v53, %v1157_v37  ;;  %v1287_v41 = vpop.permute.xlu0 %1286  ;;  %v236_v42 = vpop.permute.xlu1 %235 }
  0xce   :  { %1657 = vmatpush1.bf16.msra.mxu1 %v1495_v38  ;;  %1027 = vst [vmem:[#allocation2 + $0x54] sm:$0x44] %v1008_v39  ;;  %1177 = vst [vmem:[#allocation2 + $0x54] sm:$0x88] %v1158_v40  ;;  %v1297_v43 = vrot.slane %v1287_v41, 4  ;;  %v246_v44 = vrot.slane %v236_v42, 4 }
  0xd0   :  { %v1309_v45 = vsel %vm249_vm0, %v1296_v4, %v1297_v43  ;;  %v259_v46 = vsel %vm249_vm0, %v245_v5, %v246_v44 }
  0xd1   :  { %v1310_v47 = vsel %vm1301_vm1, %v1285_v1, %v1309_v45  ;;  %v260_v48 = vsel %vm251_vm2, %v234_v2, %v259_v46  ;;  %v387_v49 = vpop.permute.xlu0 %386  ;;  %v537_v50 = vpop.permute.xlu1 %536 }
  0xd2   :  { %1328 = vst [vmem:[#allocation2 + $0x98] sm:$0x11] %v1310_v47  ;;  %278 = vst [vmem:[#allocation2 + $0x20] sm:$0x22] %v260_v48  ;;  %v397_v51 = vrot.slane %v387_v49, 4  ;;  %v547_v52 = vrot.slane %v537_v50, 4 }
  0xd4   :  { %v409_v53 = vsel %vm249_vm0, %v396_v12, %v397_v51  ;;  %v559_v54 = vsel %vm249_vm0, %v546_v13, %v547_v52 }
  0xd5   :  { %v410_v55 = vsel %vm401_vm4, %v385_v10, %v409_v53  ;;  %v560_v57 = vsel %vm551_vm3, %v535_v11, %v559_v54  ;;  %v2710_v60 = vpop.permute.xlu0 %686  ;;  %v2712_v61 = vpop.permute.xlu1 %836  ;;  %v2302_v59 = vld [vmem:[#allocation2 + $0x18] ss:$60 sps:$4 sm:$0xff]  }
  0xd6   :  { %v2304_v56 = vld [vmem:[#allocation2 + $0x1c] ss:$60 sps:$4 sm:$0xff]   ;;  %428 = vst [vmem:[#allocation2 + $0x20] sm:$0x44] %v410_v55  ;;  %578 = vst [vmem:[#allocation2 + $0x20] sm:$0x88] %v560_v57 }
  0xd7   :  { %v697_v62 = vrot.slane %v2710_v60, 4  ;;  %v847_v63 = vrot.slane %v2712_v61, 4  ;;  %1658 = vmatprep.subr.bf16.mxu1 %v2304_v56 }
  0xd8   :  { %1659 = vmatpush1.bf16.msra.mxu1 %v2302_v59 }
  0xd9   :  { %v709_v0 = vsel %vm249_vm0, %v696_v22, %v697_v62  ;;  %v859_v1 = vsel %vm249_vm0, %v846_v23, %v847_v63  ;;  %v2722_v5 = vpop.permute.xlu0 %986  ;;  %v2724_v6 = vpop.permute.xlu1 %1136  ;;  %v1353_v7 = vld [vmem:[#allocation2 + $0x98] sm:$0x11] }
  0xda   :  { %v710_v2 = vsel %vm701_vm5, %v2673_v17, %v709_v0  ;;  %v860_v4 = vsel %vm851_vm6, %v2675_v19, %v859_v1  ;;  %v997_v58 = vrot.slane %v2722_v5, 4  ;;  %v1147_v9 = vrot.slane %v2724_v6, 4 }
  0xdb   :  { %728 = vst [vmem:[#allocation2 + $0x5c] sm:$0x11] %v710_v2  ;;  %878 = vst [vmem:[#allocation2 + $0x5c] sm:$0x22] %v860_v4  ;;  %v2229_v10 = vcombine.high %v1353_v7, %v1353_v7  ;;  %v2228_v11 = vcombine.low %v1353_v7, %v1353_v7  ;;  %2242 = vmatmul.mubr.msk.bf16.vlgmr.msra.gmra.mxu1 %vm1471_vm10, %v2586_v8 }
  0xdc   :  { %v1009_v12 = vsel %vm249_vm0, %v996_v32, %v997_v58  ;;  %v1159_v13 = vsel %vm249_vm0, %v1146_v33, %v1147_v9  ;;  %1758 = vmatprep.mubr.bf16.mxu1 %v2334_v28 }
  0xdd   :  { %2243 = vmatprep.subr.msk.bf16.mxu0 %vm1475_vm7, %v2229_v10  ;;  %v1501_v14 = vsel %vm1475_vm7, %v2228_v11, 0  ;;  %v1010_v15 = vsel %vm1001_vm8, %v2685_v29, %v1009_v12  ;;  %v1160_v16 = vsel %vm1151_vm9, %v2687_v30, %v1159_v13  ;;  %v2739_v18 = vpop.permute.xlu0 %1288  ;;  %v2741_v17 = vpop.permute.xlu1 %237 }
  0xde   :  { %1698 = vmatpush1.bf16.msra.mxu0 %v1501_v14  ;;  %1028 = vst [vmem:[#allocation2 + $0x5c] sm:$0x44] %v1010_v15  ;;  %1178 = vst [vmem:[#allocation2 + $0x5c] sm:$0x88] %v1160_v16  ;;  %v1298_v19 = vrot.slane %v2739_v18, 4  ;;  %v247_v20 = vrot.slane %v2741_v17, 4 }
  0xe0   :  { %v1311_v21 = vsel %vm249_vm0, %v1297_v43, %v1298_v19  ;;  %v261_v22 = vsel %vm249_vm0, %v246_v44, %v247_v20 }
  0xe1   :  { %v1312_v23 = vsel %vm1301_vm1, %v1287_v41, %v1311_v21  ;;  %v262_v24 = vsel %vm251_vm2, %v236_v42, %v261_v22  ;;  %v2749_v25 = vpop.permute.xlu0 %388  ;;  %v2751_v26 = vpop.permute.xlu1 %538 }
  0xe2   :  { %1329 = vst [vmem:[#allocation2 + $0xa0] sm:$0x11] %v1312_v23  ;;  %279 = vst [vmem:[#allocation2 + $0x28] sm:$0x22] %v262_v24  ;;  %v398_v27 = vrot.slane %v2749_v25, 4  ;;  %v548_v29 = vrot.slane %v2751_v26, 4 }
  0xe4   :  { %v411_v30 = vsel %vm249_vm0, %v397_v51, %v398_v27  ;;  %v561_v31 = vsel %vm249_vm0, %v547_v52, %v548_v29 }
  0xe5   :  { %v412_v32 = vsel %vm401_vm4, %v387_v49, %v411_v30  ;;  %v562_v33 = vsel %vm551_vm3, %v537_v50, %v561_v31  ;;  %v2759_v34 = vpop.permute.xlu0 %688  ;;  %v2761_v35 = vpop.permute.xlu1 %838  ;;  %v2308_v36 = vld [vmem:[#allocation2 + $0x20] ss:$60 sps:$4 sm:$0xff]   ;;  %v2335_v30 = vmov 0.0  }
  0xe6   :  { %v2310_v37 = vld [vmem:[#allocation2 + $0x24] ss:$60 sps:$4 sm:$0xff]   ;;  %429 = vst [vmem:[#allocation2 + $0x28] sm:$0x44] %v412_v32  ;;  %579 = vst [vmem:[#allocation2 + $0x28] sm:$0x88] %v562_v33 }
  0xe7   :  { %v698_v38 = vrot.slane %v2759_v34, 4  ;;  %v848_v39 = vrot.slane %v2761_v35, 4  ;;  %1699 = vmatprep.subr.bf16.mxu0 %v2310_v37 }
  0xe8   :  { %1700 = vmatpush1.bf16.msra.mxu0 %v2308_v36 }
  0xe9   :  { %v711_v40 = vsel %vm249_vm0, %v697_v62, %v698_v38  ;;  %v861_v41 = vsel %vm249_vm0, %v847_v63, %v848_v39  ;;  %v2775_v44 = vpop.permute.xlu0 %988  ;;  %v2777_v45 = vpop.permute.xlu1 %1138  ;;  %v1354_v46 = vld [vmem:[#allocation2 + $0xa0] sm:$0x11] }
  0xea   :  { %v712_v42 = vsel %vm701_vm5, %v2710_v60, %v711_v40  ;;  %v862_v43 = vsel %vm851_vm6, %v2712_v61, %v861_v41  ;;  %v998_v47 = vrot.slane %v2775_v44, 4  ;;  %v1148_v48 = vrot.slane %v2777_v45, 4 }
  0xeb   :  { %729 = vst [vmem:[#allocation2 + $0x64] sm:$0x11] %v712_v42  ;;  %879 = vst [vmem:[#allocation2 + $0x64] sm:$0x22] %v862_v43  ;;  %v2231_v49 = vcombine.high %v1354_v46, %v1354_v46  ;;  %v2230_v50 = vcombine.low %v1354_v46, %v1354_v46  ;;  %2244 = vmatmul.mubr.msk.bf16.vlgmr.msra.gmra.mxu0 %vm1471_vm10, %v2586_v8 }
  0xec   :  { %v1011_v51 = vsel %vm249_vm0, %v997_v58, %v998_v47  ;;  %v1161_v52 = vsel %vm249_vm0, %v1147_v9, %v1148_v48  ;;  %1799 = vmatprep.mubr.bf16.mxu0 %v2334_v28 }
  0xed   :  { %2245 = vmatprep.subr.msk.bf16.mxu1 %vm1475_vm7, %v2231_v49  ;;  %v1507_v53 = vsel %vm1475_vm7, %v2230_v50, 0  ;;  %v1012_v54 = vsel %vm1001_vm8, %v2722_v5, %v1011_v51  ;;  %v1162_v55 = vsel %vm1151_vm9, %v2724_v6, %v1161_v52  ;;  %v1291_v57 = vpop.permute.xlu0 %1290  ;;  %v240_v60 = vpop.permute.xlu1 %239 }
  0xee   :  { %1739 = vmatpush1.bf16.msra.mxu1 %v1507_v53  ;;  %1029 = vst [vmem:[#allocation2 + $0x64] sm:$0x44] %v1012_v54  ;;  %1179 = vst [vmem:[#allocation2 + $0x64] sm:$0x88] %v1162_v55  ;;  %v1299_v61 = vrot.slane %v1291_v57, 4  ;;  %v248_v59 = vrot.slane %v240_v60, 4 }
  0xf0   :  { %v1313_v56 = vsel %vm249_vm0, %v1298_v19, %v1299_v61  ;;  %v1315_v62 = vsel %vm1301_vm1, %v1291_v57, %v1299_v61  ;;  %v263_v63 = vsel %vm249_vm0, %v247_v20, %v248_v59  ;;  %v265_v28 = vsel %vm251_vm2, %v240_v60, %v248_v59  ;;  %v1848_v59 = vld [vmem:[%s3014_s4] sm:$0xff] }
  0xf1   :  { %v1314_v0 = vsel %vm1301_vm1, %v2739_v18, %v1313_v56  ;;  %1331 = vst [vmem:[#allocation2 + $0xb0] sm:$0x1] %v1315_v62  ;;  %v264_v1 = vsel %vm251_vm2, %v2741_v17, %v263_v63  ;;  %281 = vst [vmem:[#allocation2 + $0x38] sm:$0x2] %v265_v28  ;;  %v391_v2 = vpop.permute.xlu0 %390  ;;  %v541_v4 = vpop.permute.xlu1 %540  ;;  %v1858_v61 = vsub.s32 1, %v2368_v3  ;;  %v1862_v63 = vsub.s32 2, %v2368_v3 }
  0xf2   :  { %1330 = vst [vmem:[#allocation2 + $0xa8] sm:$0x11] %v1314_v0  ;;  %280 = vst [vmem:[#allocation2 + $0x30] sm:$0x22] %v264_v1  ;;  %v399_v5 = vrot.slane %v391_v2, 4  ;;  %v549_v6 = vrot.slane %v541_v4, 4 }
  0xf3   :  { %v1859_v62 = vrot.slane %v1848_v59, %v1858_v61 }
  0xf4   :  { %v413_v7 = vsel %vm249_vm0, %v398_v27, %v399_v5  ;;  %v415_v58 = vsel %vm401_vm4, %v391_v2, %v399_v5  ;;  %v563_v9 = vsel %vm249_vm0, %v548_v29, %v549_v6  ;;  %v565_v10 = vsel %vm551_vm3, %v541_v4, %v549_v6 }
  0xf5   :  { %v414_v11 = vsel %vm401_vm4, %v2749_v25, %v413_v7  ;;  %431 = vst [vmem:[#allocation2 + $0x38] sm:$0x4] %v415_v58  ;;  %v564_v12 = vsel %vm551_vm3, %v2751_v26, %v563_v9  ;;  %581 = vst [vmem:[#allocation2 + $0x38] sm:$0x8] %v565_v10  ;;  %v691_v13 = vpop.permute.xlu0 %690  ;;  %v841_v14 = vpop.permute.xlu1 %840  ;;  %v2313_v15 = vld [vmem:[#allocation2 + $0x28] ss:$60 sps:$4 sm:$0xff]   ;;  %v1863_v2 = vrot.slane %v1848_v59, %v1862_v63 }
  0xf6   :  { %v2315_v16 = vld [vmem:[#allocation2 + $0x2c] ss:$60 sps:$4 sm:$0xff]   ;;  %430 = vst [vmem:[#allocation2 + $0x30] sm:$0x44] %v414_v11  ;;  %580 = vst [vmem:[#allocation2 + $0x30] sm:$0x88] %v564_v12 }
  0xf7   :  { %v699_v18 = vrot.slane %v691_v13, 4  ;;  %v849_v17 = vrot.slane %v841_v14, 4  ;;  %1740 = vmatprep.subr.bf16.mxu1 %v2315_v16  ;;  %v1866_v4 = vsub.s32 3, %v2368_v3  ;;  %v1870_v6 = vsub.s32 4, %v2368_v3 }
  0xf8   :  { %1741 = vmatpush1.bf16.msra.mxu1 %v2313_v15  ;;  %v2318_v23 = vld [vmem:[#allocation2 + $0xb0] ss:$0 sps:$4 sm:$0x11]   ;;  %v1874_v16 = vsub.s32 5, %v2368_v3 }
  0xf9   :  { %v713_v19 = vsel %vm249_vm0, %v698_v38, %v699_v18  ;;  %v715_v20 = vsel %vm701_vm5, %v691_v13, %v699_v18  ;;  %v863_v21 = vsel %vm249_vm0, %v848_v39, %v849_v17  ;;  %v865_v22 = vsel %vm851_vm6, %v841_v14, %v849_v17  ;;  %v991_v26 = vpop.permute.xlu0 %990  ;;  %v1141_v27 = vpop.permute.xlu1 %1140  ;;  %v1355_v29 = vld [vmem:[#allocation2 + $0xa8] sm:$0x11]  ;;  %2260 = vmatprep.subr.bf16.mxu1 %v2335_v30 }
  0xfa   :  { %v714_v24 = vsel %vm701_vm5, %v2759_v34, %v713_v19  ;;  %731 = vst [vmem:[#allocation2 + $0x74] sm:$0x1] %v715_v20  ;;  %v864_v25 = vsel %vm851_vm6, %v2761_v35, %v863_v21  ;;  %881 = vst [vmem:[#allocation2 + $0x74] sm:$0x2] %v865_v22  ;;  %v999_v31 = vrot.slane %v991_v26, 4  ;;  %v1149_v32 = vrot.slane %v1141_v27, 4 }
  0xfb   :  { %730 = vst [vmem:[#allocation2 + $0x6c] sm:$0x11] %v714_v24  ;;  %880 = vst [vmem:[#allocation2 + $0x6c] sm:$0x22] %v864_v25  ;;  %v2233_v33 = vcombine.high %v1355_v29, %v1355_v29  ;;  %v2232_v36 = vcombine.low %v1355_v29, %v1355_v29  ;;  %2246 = vmatmul.mubr.msk.bf16.vlgmr.msra.gmra.mxu1 %vm1471_vm10, %v2586_v8  ;;  %v1519_v34 = vsel %vm1475_vm7, %v2318_v23, 0  ;;  %v1878_v24 = vsub.s32 6, %v2368_v3 }
  0xfc   :  { %v1013_v35 = vsel %vm249_vm0, %v998_v47, %v999_v31  ;;  %v1015_v37 = vsel %vm1001_vm8, %v991_v26, %v999_v31  ;;  %v1163_v38 = vsel %vm249_vm0, %v1148_v48, %v1149_v32  ;;  %v1165_v39 = vsel %vm1151_vm9, %v1141_v27, %v1149_v32  ;;  %2261 = vmatpush3.bf16.msra.mxu1 %v1519_v34 }
  0xfd   :  { %2247 = vmatprep.subr.msk.bf16.mxu0 %vm1475_vm7, %v2233_v33  ;;  %v1014_v40 = vsel %vm1001_vm8, %v2775_v44, %v1013_v35  ;;  %1031 = vst [vmem:[#allocation2 + $0x74] sm:$0x4] %v1015_v37  ;;  %v1164_v41 = vsel %vm1151_vm9, %v2777_v45, %v1163_v38  ;;  %1181 = vst [vmem:[#allocation2 + $0x74] sm:$0x8] %v1165_v39  ;;  %v1513_v42 = vsel %vm1475_vm7, %v2232_v36, 0  ;;  %2264 = vmatprep.mubr.msk.bf16.mxu1 %vm2336_vm11, %v2335_v30 }
  0xfe   :  { %1030 = vst [vmem:[#allocation2 + $0x6c] sm:$0x44] %v1014_v40  ;;  %1180 = vst [vmem:[#allocation2 + $0x6c] sm:$0x88] %v1164_v41  ;;  %1780 = vmatpush1.bf16.msra.mxu0 %v1513_v42  ;;  %2262 = vmatprep.subr.bf16.mxu1 %v2335_v30  ;;  %v1867_v11 = vrot.slane %v1848_v59, %v1866_v4  ;;  %v1871_v15 = vrot.slane %v1848_v59, %v1870_v6  ;;  %v1882_v38 = vsub.s32 7, %v2368_v3 }
  0xff   :  { %v1875_v29 = vrot.slane %v1848_v59, %v1874_v16  ;;  %v1879_v33 = vrot.slane %v1848_v59, %v1878_v24 }
 0x104   :  { %v2319_v43 = vld [vmem:[#allocation2 + $0x38] ss:$60 sps:$4 sm:$0xff]  }
 0x105   :  { %v2320_v46 = vld [vmem:[#allocation2 + $0x30] ss:$60 sps:$4 sm:$0xff]   ;;  %2263 = vmatpush3.bf16.msra.mxu1 %v2319_v43 }
 0x106   :  { %v2322_v47 = vld [vmem:[#allocation2 + $0x34] ss:$60 sps:$4 sm:$0xff]  }
 0x107   :  { %1781 = vmatprep.subr.bf16.mxu0 %v2322_v47 }
 0x108   :  { %1782 = vmatpush1.bf16.msra.mxu0 %v2320_v46  ;;  %2265 = vmatmul.mubr.msk.bf16.vlgmr.msra.gmra.mxu1 %vm1471_vm10, %v2586_v8 }
 0x10b   :  { %2248 = vmatmul.mubr.msk.bf16.vlgmr.msra.gmra.mxu0 %vm1471_vm10, %v2586_v8  ;;  %v1854_v8 = vsub.s32 0, %v2368_v3 }
 0x10d   :  { %v1855_v56 = vrot.slane %v1848_v59, %v1854_v8 }
 0x16b   :  { %v2845_v44 = vpop.f32.mrf.mxu0 }
 0x16c   :  { %v1927_v0 = vmul.f32 %v1855_v56, %v2845_v44 }
 0x16d   :  { %v2847_v45 = vpop.f32.mrf.mxu0 }
 0x16e   :  { %v1928_v1 = vmul.f32 %v1859_v62, %v2847_v45  ;;  %v1976_v58 = vmul.f32 %v1927_v0, %v2845_v44  ;;  %v1943_v13 = vsel %vm249_vm0, %v1927_v0, 0.0 }
 0x16f   :  { %v1559_v48 = vpop.f32.mrf.mxu0 }
 0x170   :  { %v1977_v9 = vmul.f32 %v1928_v1, %v2847_v45  ;;  %v1944_v14 = vsel %vm249_vm0, %v1928_v1, 0.0  ;;  %v1991_v18 = vsel %vm249_vm0, %v1976_v58, 0.0 }
 0x171   :  { %v1560_v49 = vpop.f32.mrf.mxu0  ;;  %v1945_v21 = vadd.f32 %v1944_v14, %v1943_v13 }
 0x172   :  { %v1992_v17 = vsel %vm249_vm0, %v1977_v9, 0.0  ;;  %v1883_v49 = vrot.slane %v1848_v59, %v1882_v38 }
 0x173   :  { %v1993_v23 = vadd.f32 %v1992_v17, %v1991_v18 }
 0x17b   :  { %v2849_v50 = vpop.f32.mrf.mxu1 }
 0x17c   :  { %v1929_v10 = vmul.f32 %v1863_v2, %v2849_v50 }
 0x17d   :  { %v2851_v51 = vpop.f32.mrf.mxu1 }
 0x17e   :  { %v1978_v19 = vmul.f32 %v1929_v10, %v2849_v50  ;;  %v1930_v20 = vmul.f32 %v1867_v11, %v2851_v51  ;;  %v1946_v22 = vsel %vm249_vm0, %v1929_v10, 0.0 }
 0x17f   :  { %v1600_v52 = vpop.f32.mrf.mxu1  ;;  %v1947_v30 = vadd.f32 %v1946_v22, %v1945_v21 }
 0x180   :  { %v1994_v25 = vsel %vm249_vm0, %v1978_v19, 0.0  ;;  %v1979_v26 = vmul.f32 %v1930_v20, %v2851_v51  ;;  %v1948_v31 = vsel %vm249_vm0, %v1930_v20, 0.0 }
 0x181   :  { %v1601_v53 = vpop.f32.mrf.mxu1  ;;  %v1995_v32 = vadd.f32 %v1994_v25, %v1993_v23  ;;  %v1949_v39 = vadd.f32 %v1948_v31, %v1947_v30 }
 0x182   :  { %v1996_v34 = vsel %vm249_vm0, %v1979_v26, 0.0  ;;  %v1849_v53 = vld [vmem:[%s3014_s4 + $0x8] sm:$0xff] }
 0x183   :  { %v1997_v42 = vadd.f32 %v1996_v34, %v1995_v32  ;;  %v1887_v2 = vrot.slane %v1849_v53, %v1854_v8  ;;  %v1895_v20 = vrot.slane %v1849_v53, %v1862_v63  ;;  %v1899_v30 = vrot.slane %v1849_v53, %v1866_v4 }
 0x18b   :  { %v2853_v54 = vpop.f32.mrf.mxu0 }
 0x18c   :  { %v1931_v27 = vmul.f32 %v1871_v15, %v2853_v54 }
 0x18d   :  { %v2855_v55 = vpop.f32.mrf.mxu0 }
 0x18e   :  { %v1980_v35 = vmul.f32 %v1931_v27, %v2853_v54  ;;  %v1932_v37 = vmul.f32 %v1875_v29, %v2855_v55  ;;  %v1950_v41 = vsel %vm249_vm0, %v1931_v27, 0.0 }
 0x18f   :  { %v1641_v57 = vpop.f32.mrf.mxu0  ;;  %v1951_v52 = vadd.f32 %v1950_v41, %v1949_v39 }
 0x190   :  { %v1998_v46 = vsel %vm249_vm0, %v1980_v35, 0.0  ;;  %v1981_v47 = vmul.f32 %v1932_v37, %v2855_v55 }
 0x191   :  { %v1642_v60 = vpop.f32.mrf.mxu0  ;;  %v1999_v56 = vadd.f32 %v1998_v46, %v1997_v42  ;;  %v1911_v42 = vrot.slane %v1849_v53, %v1878_v24  ;;  %v1903_v46 = vrot.slane %v1849_v53, %v1870_v6 }
 0x192   :  { %v1952_v60 = vsel %vm249_vm0, %v1932_v37, 0.0  ;;  %v2000_v62 = vsel %vm249_vm0, %v1981_v47, 0.0 }
 0x193   :  { %v2001_v59 = vadd.f32 %v2000_v62, %v1999_v56 }
 0x19b   :  { %v2865_v28 = vpop.f32.mrf.mxu1 }
 0x19c   :  { %v1933_v48 = vmul.f32 %v1879_v33, %v2865_v28 }
 0x19d   :  { %v2872_v5 = vpop.f32.mrf.mxu1 }
 0x19e   :  { %v1982_v0 = vmul.f32 %v1933_v48, %v2865_v28  ;;  %v1934_v1 = vmul.f32 %v1883_v49, %v2872_v5  ;;  %v1954_v58 = vsel %vm249_vm0, %v1933_v48, 0.0 }
 0x19f   :  { %v1682_v7 = vpop.f32.mrf.mxu1 }
 0x1a0   :  { %v1953_v7 = vadd.f32 %v1952_v60, %v1951_v52  ;;  %v2002_v9 = vsel %vm249_vm0, %v1982_v0, 0.0  ;;  %v1983_v10 = vmul.f32 %v1934_v1, %v2872_v5  ;;  %v1956_v14 = vsel %vm249_vm0, %v1934_v1, 0.0 }
 0x1a1   :  { %v1683_v12 = vpop.f32.mrf.mxu1  ;;  %v2003_v15 = vadd.f32 %v2002_v9, %v2001_v59  ;;  %v1907_v52 = vrot.slane %v1849_v53, %v1874_v16 }
 0x1a2   :  { %v1891_v12 = vrot.slane %v1849_v53, %v1858_v61  ;;  %v1955_v13 = vadd.f32 %v1954_v58, %v1953_v7  ;;  %v2004_v8 = vsel %vm249_vm0, %v1983_v10, 0.0 }
 0x1a3   :  { %v2005_v23 = vadd.f32 %v2004_v8, %v2003_v15 }
 0x1a4   :  { %v1957_v21 = vadd.f32 %v1956_v14, %v1955_v13 }
 0x1ab   :  { %v2899_v36 = vpop.f32.mrf.mxu0 }
 0x1ac   :  { %v1935_v11 = vmul.f32 %v1887_v2, %v2899_v36 }
 0x1ad   :  { %v2905_v40 = vpop.f32.mrf.mxu0 }
 0x1ae   :  { %v1984_v17 = vmul.f32 %v1935_v11, %v2899_v36  ;;  %v1936_v19 = vmul.f32 %v1891_v12, %v2905_v40  ;;  %v1958_v61 = vsel %vm249_vm0, %v1935_v11, 0.0 }
 0x1af   :  { %v1723_v43 = vpop.f32.mrf.mxu0  ;;  %v1959_v31 = vadd.f32 %v1958_v61, %v1957_v21 }
 0x1b0   :  { %v2006_v26 = vsel %vm249_vm0, %v1984_v17, 0.0  ;;  %v1985_v27 = vmul.f32 %v1936_v19, %v2905_v40  ;;  %v1960_v63 = vsel %vm249_vm0, %v1936_v19, 0.0 }
 0x1b1   :  { %v1724_v57 = vpop.f32.mrf.mxu0  ;;  %v2007_v33 = vadd.f32 %v2006_v26, %v2005_v23  ;;  %v1961_v38 = vadd.f32 %v1960_v63, %v1959_v31 }
 0x1b2   :  { %v2008_v34 = vsel %vm249_vm0, %v1985_v27, 0.0 }
 0x1b3   :  { %v2009_v41 = vadd.f32 %v2008_v34, %v2007_v33  ;;  %v2026_v34 = vld [vmem:[%s3015_s2] sm:$0xf] }
 0x1bb   :  { %v2925_v18 = vpop.f32.mrf.mxu1 }
 0x1bc   :  { %v1937_v29 = vmul.f32 %v1895_v20, %v2925_v18 }
 0x1bd   :  { %v2932_v22 = vpop.f32.mrf.mxu1 }
 0x1be   :  { %v1986_v35 = vmul.f32 %v1937_v29, %v2925_v18  ;;  %v1938_v37 = vmul.f32 %v1899_v30, %v2932_v22  ;;  %v1962_v39 = vsel %vm249_vm0, %v1937_v29, 0.0 }
 0x1bf   :  { %v1764_v25 = vpop.f32.mrf.mxu1  ;;  %v1963_v47 = vadd.f32 %v1962_v39, %v1961_v38  ;;  %v2030_v38 = vld [vmem:[%s3016_s3] sm:$0xf] }
 0x1c0   :  { %v2010_v4 = vsel %vm249_vm0, %v1986_v35, 0.0  ;;  %v1987_v43 = vmul.f32 %v1938_v37, %v2932_v22  ;;  %v1964_v49 = vsel %vm249_vm0, %v1938_v37, 0.0 }
 0x1c1   :  { %v1765_v32 = vpop.f32.mrf.mxu1  ;;  %v2011_v57 = vadd.f32 %v2010_v4, %v2009_v41  ;;  %v1965_v1 = vadd.f32 %v1964_v49, %v1963_v47 }
 0x1c2   :  { %v2012_v62 = vsel %vm249_vm0, %v1987_v43, 0.0 }
 0x1c3   :  { %v2013_v9 = vadd.f32 %v2012_v62, %v2011_v57 }
 0x1c8   :  { %v2951_v48 = vpop.f32.mrf.mxu1 }
 0x1c9   :  { %v1941_v60 = vmul.f32 %v1911_v42, %v2951_v48  ;;  %v2337_v42 = vmov 1983009808  }
 0x1ca   :  { %v2266_v24 = vpop.f32.mrf.mxu1  ;;  %v2121_v4 = vunpack.c.l.s4 %v2337_v42 }
 0x1cb   :  { %v2957_v56 = vpop.f32.mrf.mxu0  ;;  %v1990_v16 = vmul.f32 %v1941_v60, %v2951_v48  ;;  %v1970_v15 = vsel %vm249_vm0, %v1941_v60, 0.0 }
 0x1cc   :  { %v1939_v0 = vmul.f32 %v1903_v46, %v2957_v56  ;;  %v1845_v2 = vpop.f32.mrf.mxu1  ;;  %v2122_v43 = vunpack.c.0.s8 %v2121_v4 }
 0x1cd   :  { %v1803_v6 = vpop.f32.mrf.mxu0  ;;  %v2018_v23 = vsel %vm249_vm0, %v1990_v16, 0.0 }
 0x1ce   :  { %v1966_v7 = vsel %vm249_vm0, %v1939_v0, 0.0  ;;  %v1988_v58 = vmul.f32 %v1939_v0, %v2957_v56  ;;  %v1940_v59 = vmul.f32 %v1907_v52, %v1803_v6  ;;  %v2267_v10 = vpop.f32.mrf.mxu1  ;;  %v2979_v57 = vsub.s32 %v2122_v43, %v2368_v3 }
 0x1cf   :  { %v1805_v53 = vpop.f32.mrf.mxu0  ;;  %v1967_v11 = vadd.f32 %v1966_v7, %v1965_v1 }
 0x1d0   :  { %v2014_v12 = vsel %vm249_vm0, %v1988_v58, 0.0  ;;  %v1989_v13 = vmul.f32 %v1940_v59, %v1803_v6  ;;  %v1968_v14 = vsel %vm249_vm0, %v1940_v59, 0.0 }
 0x1d1   :  { %v1806_v8 = vpop.f32.mrf.mxu0  ;;  %v1969_v17 = vadd.f32 %v1968_v14, %v1967_v11  ;;  %v2015_v19 = vadd.f32 %v2014_v12, %v2013_v9 }
 0x1d2   :  { %v2016_v20 = vsel %vm249_vm0, %v1989_v13, 0.0 }
 0x1d3   :  { %v1971_v21 = vadd.f32 %v1970_v15, %v1969_v17  ;;  %v2017_v61 = vadd.f32 %v2016_v20, %v2015_v19 }
 0x1d5   :  { %1972 = vadd.xlane.f32.xlu0 %v1971_v21  ;;  %v2019_v25 = vadd.f32 %v2018_v23, %v2017_v61 }
 0x1d7   :  { %2020 = vadd.xlane.f32.xlu1 %v2019_v25 }
 0x25e   :  { %v1973_v26 = vpop.xlane.xlu0 %1972 }
 0x25f   :  { %v1975_v27 = vmul.f32 0.0006377551, %v1973_v26 }
 0x260   :  { %v2021_v29 = vpop.xlane.xlu1 %2020 }
 0x261   :  { %v2023_v30 = vmul.f32 %v1975_v27, %v1975_v27  ;;  %v2022_v31 = vmul.f32 0.0006377551, %v2021_v29 }
 0x263   :  { %v2024_v32 = vsub.f32 %v2022_v31, %v2023_v30 }
 0x265   :  { %v2025_v63 = vmax.f32 %v2024_v32, 0.0 }
 0x267   :  { %v2027_v33 = vadd.f32 1e-05, %v2025_v63 }
 0x269   :  { %2323 = vrsqrt.f32 %v2027_v33 }
 0x276   :  { %v2324_v35 = vpop.eup %2323 }
 0x277   :  { %v2029_v37 = vmul.f32 %v2324_v35, %v2026_v34 }
 0x279   :  { %2035 = vperm.xlu0 %2281, %v2029_v37   ;;  %v2031_v39 = vmul.f32 %v2029_v37, %v1975_v27 }
 0x27b   :  { %v2032_v41 = vsub.f32 %v2030_v38, %v2031_v39 }
 0x27d   :  { %2055 = vperm.xlu1 %2282, %v2032_v41  }
 0x2f4   :  { %v2036_v46 = vpop.permute.xlu0 %2035 }
 0x2f5   :  { %v2038_v47 = vmul.f32 %v2036_v46, %v2845_v44  ;;  %v2039_v49 = vmul.f32 %v2036_v46, %v2847_v45  ;;  %v2040_v52 = vmul.f32 %v2036_v46, %v2849_v50  ;;  %v2041_v60 = vmul.f32 %v2036_v46, %v2851_v51 }
 0x2f6   :  { %v2042_v24 = vmul.f32 %v2036_v46, %v2853_v54  ;;  %v2043_v62 = vmul.f32 %v2036_v46, %v2855_v55  ;;  %v2044_v0 = vmul.f32 %v2036_v46, %v2865_v28  ;;  %v2045_v1 = vmul.f32 %v2036_v46, %v2872_v5 }
 0x2f7   :  { %v2046_v2 = vmul.f32 %v2036_v46, %v2899_v36  ;;  %v2047_v44 = vmul.f32 %v2036_v46, %v2905_v40  ;;  %v2048_v45 = vmul.f32 %v2036_v46, %v2925_v18  ;;  %v2049_v50 = vmul.f32 %v2036_v46, %v2932_v22 }
 0x2f8   :  { %v2050_v3 = vmul.f32 %v2036_v46, %v2957_v56  ;;  %v2051_v7 = vmul.f32 %v2036_v46, %v1803_v6  ;;  %v2052_v51 = vmul.f32 %v2036_v46, %v2951_v48  ;;  %v2056_v54 = vpop.permute.xlu1 %2055 }
 0x2f9   :  { %v2058_v58 = vadd.f32 %v2056_v54, %v2038_v47  ;;  %v2059_v55 = vadd.f32 %v2056_v54, %v2039_v49  ;;  %v2060_v59 = vadd.f32 %v2056_v54, %v2040_v52  ;;  %v2061_v28 = vadd.f32 %v2056_v54, %v2041_v60 }
 0x2fa   :  { %v2062_v9 = vadd.f32 %v2056_v54, %v2042_v24  ;;  %v2063_v5 = vadd.f32 %v2056_v54, %v2043_v62  ;;  %v2064_v16 = vadd.f32 %v2056_v54, %v2044_v0  ;;  %v2065_v36 = vadd.f32 %v2056_v54, %v2045_v1 }
 0x2fb   :  { %v2066_v53 = vadd.f32 %v2056_v54, %v2046_v2  ;;  %v2067_v40 = vadd.f32 %v2056_v54, %v2047_v44  ;;  %v2068_v10 = vadd.f32 %v2056_v54, %v2048_v45  ;;  %v2069_v18 = vadd.f32 %v2056_v54, %v2049_v50 }
 0x2fc   :  { %v2070_v11 = vadd.f32 %v2056_v54, %v2050_v3  ;;  %v2071_v22 = vadd.f32 %v2056_v54, %v2051_v7  ;;  %v2072_v12 = vadd.f32 %v2056_v54, %v2052_v51  ;;  %v2073_v56 = vmax.f32 %v2058_v58, 0.0 }
 0x2fd   :  { %v2074_v6 = vmax.f32 %v2059_v55, 0.0  ;;  %v2075_v13 = vmax.f32 %v2060_v59, 0.0  ;;  %v2076_v48 = vmax.f32 %v2061_v28, 0.0  ;;  %v2077_v14 = vmax.f32 %v2062_v9, 0.0 }
 0x2fe   :  { %v2078_v15 = vmax.f32 %v2063_v5, 0.0  ;;  %v2079_v8 = vmax.f32 %v2064_v16, 0.0  ;;  %v2080_v17 = vmax.f32 %v2065_v36, 0.0  ;;  %v2081_v19 = vmax.f32 %v2066_v53, 0.0 }
 0x2ff   :  { %v2082_v20 = vmax.f32 %v2067_v40, 0.0  ;;  %v2083_v21 = vmax.f32 %v2068_v10, 0.0  ;;  %v2084_v61 = vmax.f32 %v2069_v18, 0.0  ;;  %v2085_v23 = vmax.f32 %v2070_v11, 0.0 }
 0x300   :  { %v2086_v25 = vmax.f32 %v2071_v22, 0.0  ;;  %v2087_v26 = vmax.f32 %v2072_v12, 0.0  ;;  %v2250_v27 = vpack.c.bf16 %v2074_v6, %v2073_v56  ;;  %v2251_v29 = vpack.c.bf16 %v2076_v48, %v2075_v13 }
 0x301   :  { %v2252_v30 = vpack.c.bf16 %v2078_v15, %v2077_v14  ;;  %v2253_v31 = vpack.c.bf16 %v2080_v17, %v2079_v8  ;;  %v2254_v32 = vpack.c.bf16 %v2082_v20, %v2081_v19  ;;  %v2255_v63 = vpack.c.bf16 %v2084_v61, %v2083_v21 }
 0x302   :  { %v2102_v33 = vpack.c.bf16 %v2087_v26, %v2087_v26  ;;  %v2126_v34 = vrot.slane %v2250_v27, %v2979_v57  ;;  %v2133_v35 = vrot.slane %v2251_v29, %v2979_v57  ;;  %v2256_v37 = vpack.c.bf16 %v2086_v25, %v2085_v23 }
 0x303   :  { %v2143_v38 = vrot.slane %v2252_v30, %v2979_v57  ;;  %v2150_v39 = vrot.slane %v2253_v31, %v2979_v57  ;;  %v2160_v41 = vrot.slane %v2254_v32, %v2979_v57  ;;  %v2167_v42 = vrot.slane %v2255_v63, %v2979_v57 }
 0x304   :  { %v2134_v4 = vcombine.low %v2126_v34, %v2133_v35  ;;  %v2176_v43 = vrot.slane %v2256_v37, %v2979_v57  ;;  %v2183_v46 = vrot.slane %v2102_v33, %v2979_v57 }
 0x305   :  { %v2151_v47 = vcombine.low %v2143_v38, %v2150_v39  ;;  %v2168_v49 = vcombine.low %v2160_v41, %v2167_v42 }
 0x306   :  { %v2184_v52 = vcombine.low %v2176_v43, %v2183_v46  ;;  %2189 = vst [vmem:[%s3017_s5] sm:$0xff] %v2134_v4 }
 0x307   :  { %2190 = vst [vmem:[%s3017_s5 + $0x8] sm:$0xff] %v2151_v47  ;;  %2191 = vst [vmem:[%s3017_s5 + $0x10] sm:$0xff] %v2168_v49 }
 0x308   :  { %2192 = vst [vmem:[%s3017_s5 + $0x18] sm:$0x3f] %v2184_v52 }

// kernel: vae_forward.6
= control target key start
LH: loop header
LB: loop body
LE: loop exit
PB: predicated region body
PF: predicated region fallthrough
CT: control target
= control target key end

     0   :  { %v50_v0 = vlaneseq  ;;  %v718_v1 = vmov 1983009808   ;;  %s719_s20 = smov 94   ;;  %s720_s21 = smov 111   ;;  %v727_v20 = vmov 0   ;;  %vm78_vm0 = vcmask 1043456   ;;  %s873_s0 = inlined_call_operand.vmem [shape: bf16[4,640], index: 0, kind: input, shape index: {}]   ;;  %s874_s1 = inlined_call_operand.vmem [shape: bf16[8,36], index: 1, kind: input, shape index: {}]   ;;  %s875_s4 = inlined_call_operand.vmem [shape: f32[1,512], index: 4, kind: input, shape index: {}]   ;;  %s876_s2 = inlined_call_operand.vmem [shape: f32[8,1], index: 2, kind: input, shape index: {}]   ;;  %s877_s3 = inlined_call_operand.vmem [shape: f32[8,1], index: 3, kind: input, shape index: {}]   ;;  %s878_s5 = inlined_call_operand.vmem [shape: bf16[8,512], index: 5, kind: output, shape index: {}]  }
   0x1   :  { %v48_v2 = vunpack.c.l.s4 %v718_v1  ;;  %v355_v3 = vld [vmem:[%s873_s0] sm:$0xff]  ;;  %s721_s22 = smov 110   ;;  %s722_s23 = smov 96   ;;  %v696_v13 = vld [vmem:[%s873_s0 + $0x8] ss:$0 sps:$4 sm:$0x33]   ;;  %509 = vmatprep.mubr.bf16.mxu0 %v727_v20  ;;  %550 = vmatprep.mubr.bf16.mxu1 %v727_v20 }
   0x2   :  { %v761_v4 = vshrl.u32 %v50_v0, 7  ;;  %v359_v5 = vcombine.high %v355_v3, %v355_v3  ;;  %656 = vst.sshfl [vmem:[#allocation2] sm:$0xf pattern:$0x76325410] %v355_v3  ;;  %v225_v10 = vcombine.low %v355_v3, %v355_v3  ;;  %s723_s24 = smov 95   ;;  %692 = vset.pattern.permute.xlu0 %v727_v20  ;;  %693 = vset.pattern.permute.xlu1 %v727_v20 }
   0x3   :  { %v49_v6 = vunpack.c.0.s8 %v48_v2  ;;  %v661_v12 = vld.sshfl [vmem:[%s873_s0 + $0x8] sm:$0x3 pattern:$0x76325410]  ;;  %s724_s27 = smov 127   ;;  %s725_s28 = smov 126  }
   0x4   :  { %657 = vst.sshfl [vmem:[#allocation2 + $0x8] sm:$0xf pattern:$0x76325410] %v359_v5  ;;  %s726_s29 = smov 112   ;;  %vm391_vm1 = vcmask 769024  }
   0x5   :  { %v52_v7 = vsub.s32 %v49_v6, %v761_v4  ;;  %v697_v15 = vld [vmem:[%s873_s0 + $0x8] ss:$0 sps:$4 sm:$0x33]   ;;  %vm213_vm2 = vcmask 908288   ;;  %vm258_vm3 = vcmask 900096   ;;  %vm302_vm4 = vcmask 785408  }
   0x6   :  { %v698_v16 = vld [vmem:[%s873_s0 + $0x8] ss:$0 sps:$4 sm:$0x33]   ;;  %vm347_vm5 = vcmask 777216   ;;  %vm464_vm6 = vcmask 1041408   ;;  %vm80_vm7 = vcmask 1039360  }
   0x7   :  { %v366_v8 = vrot.slane %v355_v3, %v52_v7  ;;  %v373_v9 = vrot.slane %v359_v5, %v52_v7  ;;  %v232_v11 = vrot.slane %v225_v10, %v52_v7  ;;  %v247_v14 = vrot.slane %v696_v13, %v52_v7  ;;  %v699_v19 = vld [vmem:[%s873_s0 + $0x8] ss:$0 sps:$4 sm:$0x33]  }
   0x8   :  { %v336_v17 = vrot.slane %v697_v15, %v52_v7  ;;  %v68_v18 = vrot.slane %v698_v16, %v52_v7  ;;  %v158_v21 = vrot.slane %v699_v19, %v52_v7  ;;  %vm124_vm8 = vcmask 1031168  }
   0x9   :  { %381 = vrot.lane.b32.xlu0 %v366_v8, %s719_s20  ;;  %203 = vrot.lane.b32.xlu1 %v366_v8, %s720_s21  ;;  %vm169_vm9 = vcmask 916480   ;;  %vm460_vm10 = vcmask 293888  }
   0xd   :  { %383 = vrot.lane.b32.xlu0 %v373_v9, %s719_s20  ;;  %205 = vrot.lane.b32.xlu1 %v373_v9, %s720_s21 }
  0x11   :  { %248 = vrot.lane.b32.xlu0 %v232_v11, %s721_s22  ;;  %250 = vrot.lane.b32.xlu1 %v366_v8, %s721_s22 }
  0x15   :  { %292 = vrot.lane.b32.xlu0 %v366_v8, %s722_s23  ;;  %294 = vrot.lane.b32.xlu1 %v373_v9, %s722_s23 }
  0x19   :  { %337 = vrot.lane.b32.xlu0 %v232_v11, %s723_s24  ;;  %339 = vrot.lane.b32.xlu1 %v366_v8, %s723_s24 }
  0x1d   :  { %385 = vrot.lane.b32.xlu0 %v661_v12, %s719_s20  ;;  %69 = vrot.lane.b32.xlu1 %v232_v11, %s724_s27 }
  0x21   :  { %71 = vrot.lane.b32.xlu0 %v366_v8, %s724_s27  ;;  %114 = vrot.lane.b32.xlu1 %v366_v8, %s725_s28 }
  0x25   :  { %116 = vrot.lane.b32.xlu0 %v373_v9, %s725_s28  ;;  %159 = vrot.lane.b32.xlu1 %v232_v11, %s726_s29 }
  0x29   :  { %161 = vrot.lane.b32.xlu0 %v366_v8, %s726_s29  ;;  %207 = vrot.lane.b32.xlu1 %v661_v12, %s720_s21 }
  0x2d   :  { %252 = vrot.lane.b32.xlu0 %v247_v14, %s721_s22  ;;  %296 = vrot.lane.b32.xlu1 %v661_v12, %s722_s23 }
  0x31   :  { %341 = vrot.lane.b32.xlu0 %v336_v17, %s723_s24  ;;  %73 = vrot.lane.b32.xlu1 %v68_v18, %s724_s27 }
  0x35   :  { %118 = vrot.lane.b32.xlu0 %v661_v12, %s725_s28  ;;  %163 = vrot.lane.b32.xlu1 %v158_v21, %s726_s29 }
  0x7b   :  { %v382_v22 = vpop.permute.xlu0 %381  ;;  %v204_v23 = vpop.permute.xlu1 %203 }
  0x7c   :  { %v387_v26 = vrot.slane %v382_v22, 4  ;;  %v209_v27 = vrot.slane %v204_v23, 4 }
  0x7f   :  { %v384_v24 = vpop.permute.xlu0 %383  ;;  %v779_v25 = vpop.permute.xlu1 %205 }
  0x80   :  { %v388_v28 = vrot.slane %v384_v24, 4  ;;  %v210_v29 = vrot.slane %v779_v25, 4 }
  0x82   :  { %v390_v30 = vsel %vm78_vm0, %v387_v26, %v388_v28  ;;  %v212_v31 = vsel %vm78_vm0, %v209_v27, %v210_v29 }
  0x83   :  { %v392_v32 = vsel %vm391_vm1, %v382_v22, %v390_v30  ;;  %v214_v33 = vsel %vm213_vm2, %v204_v23, %v212_v31  ;;  %v249_v34 = vpop.permute.xlu0 %248  ;;  %v788_v35 = vpop.permute.xlu1 %250 }
  0x84   :  { %397 = vst [vmem:[#allocation2 + $0x40] sm:$0x33] %v392_v32  ;;  %219 = vst [vmem:[#allocation2 + $0x20] sm:$0x33] %v214_v33  ;;  %v254_v36 = vrot.slane %v249_v34, 4  ;;  %v255_v37 = vrot.slane %v788_v35, 4 }
  0x86   :  { %v257_v38 = vsel %vm78_vm0, %v254_v36, %v255_v37 }
  0x87   :  { %v259_v39 = vsel %vm258_vm3, %v249_v34, %v257_v38  ;;  %v293_v40 = vpop.permute.xlu0 %292  ;;  %v795_v41 = vpop.permute.xlu1 %294 }
  0x88   :  { %264 = vst [vmem:[#allocation2 + $0x20] sm:$0xcc] %v259_v39  ;;  %v298_v42 = vrot.slane %v293_v40, 4  ;;  %v299_v43 = vrot.slane %v795_v41, 4 }
  0x8a   :  { %v301_v44 = vsel %vm78_vm0, %v298_v42, %v299_v43 }
  0x8b   :  { %v303_v45 = vsel %vm302_vm4, %v293_v40, %v301_v44  ;;  %v338_v46 = vpop.permute.xlu0 %337  ;;  %v802_v47 = vpop.permute.xlu1 %339  ;;  %v408_v48 = vld [vmem:[#allocation2 + $0x40] sm:$0x33] }
  0x8c   :  { %308 = vst [vmem:[#allocation2 + $0x30] sm:$0x33] %v303_v45  ;;  %v343_v49 = vrot.slane %v338_v46, 4  ;;  %v344_v50 = vrot.slane %v802_v47, 4  ;;  %v671_v51 = vcombine.high %v408_v48, %v408_v48  ;;  %v670_v52 = vcombine.low %v408_v48, %v408_v48 }
  0x8e   :  { %v346_v53 = vsel %vm78_vm0, %v343_v49, %v344_v50  ;;  %674 = vmatprep.subr.msk.bf16.mxu0 %vm464_vm6, %v671_v51  ;;  %v466_v54 = vsel %vm464_vm6, %v670_v52, 0 }
  0x8f   :  { %v348_v55 = vsel %vm347_vm5, %v338_v46, %v346_v53  ;;  %488 = vmatpush1.bf16.msra.mxu0 %v466_v54  ;;  %v386_v56 = vpop.permute.xlu0 %385  ;;  %v70_v57 = vpop.permute.xlu1 %69 }
  0x90   :  { %353 = vst [vmem:[#allocation2 + $0x30] sm:$0xcc] %v348_v55  ;;  %v389_v58 = vrot.slane %v386_v56, 4  ;;  %v75_v63 = vrot.slane %v70_v57, 4  ;;  %v563_v56 = vsub.s32 0, %v761_v4 }
  0x92   :  { %v393_v59 = vsel %vm78_vm0, %v388_v28, %v389_v58 }
  0x93   :  { %v394_v60 = vsel %vm391_vm1, %v384_v24, %v393_v59  ;;  %v72_v61 = vpop.permute.xlu0 %71  ;;  %v115_v62 = vpop.permute.xlu1 %114  ;;  %v559_v59 = vld [vmem:[%s875_s4] sm:$0xf] }
  0x94   :  { %398 = vst [vmem:[#allocation2 + $0x48] sm:$0x33] %v394_v60  ;;  %v76_v0 = vrot.slane %v72_v61, 4  ;;  %v120_v8 = vrot.slane %v115_v62, 4 }
  0x96   :  { %v79_v1 = vsel %vm78_vm0, %v75_v63, %v76_v0 }
  0x97   :  { %v81_v2 = vsel %vm80_vm7, %v70_v57, %v79_v1  ;;  %v815_v3 = vpop.permute.xlu0 %116  ;;  %v160_v5 = vpop.permute.xlu1 %159  ;;  %v702_v6 = vld [vmem:[#allocation2 + $0x24] ss:$16 sps:$4 sm:$0xff]   ;;  %v704_v7 = vld [vmem:[#allocation2 + $0x20] ss:$16 sps:$4 sm:$0xff]   ;;  %v567_v57 = vsub.s32 1, %v761_v4 }
  0x98   :  { %86 = vst [vmem:[#allocation2] sm:$0xcc] %v81_v2  ;;  %v121_v9 = vrot.slane %v815_v3, 4  ;;  %489 = vmatprep.subr.bf16.mxu0 %v702_v6  ;;  %v165_v12 = vrot.slane %v160_v5, 4 }
  0x99   :  { %490 = vmatpush1.bf16.msra.mxu0 %v704_v7 }
  0x9a   :  { %v123_v10 = vsel %vm78_vm0, %v120_v8, %v121_v9 }
  0x9b   :  { %v125_v11 = vsel %vm124_vm8, %v115_v62, %v123_v10  ;;  %v162_v13 = vpop.permute.xlu0 %161  ;;  %v208_v14 = vpop.permute.xlu1 %207  ;;  %v409_v15 = vld [vmem:[#allocation2 + $0x48] sm:$0x33]  ;;  %v568_v62 = vrot.slane %v559_v59, %v567_v57 }
  0x9c   :  { %130 = vst [vmem:[#allocation2 + $0x10] sm:$0x33] %v125_v11  ;;  %v166_v16 = vrot.slane %v162_v13, 4  ;;  %v211_v17 = vrot.slane %v208_v14, 4  ;;  %v673_v18 = vcombine.high %v409_v15, %v409_v15  ;;  %v672_v19 = vcombine.low %v409_v15, %v409_v15 }
  0x9e   :  { %v168_v20 = vsel %vm78_vm0, %v165_v12, %v166_v16  ;;  %v215_v21 = vsel %vm78_vm0, %v210_v29, %v211_v17  ;;  %676 = vmatprep.subr.msk.bf16.mxu1 %vm464_vm6, %v673_v18  ;;  %v472_v22 = vsel %vm464_vm6, %v672_v19, 0 }
  0x9f   :  { %v170_v23 = vsel %vm169_vm9, %v160_v5, %v168_v20  ;;  %v216_v24 = vsel %vm213_vm2, %v779_v25, %v215_v21  ;;  %529 = vmatpush1.bf16.msra.mxu1 %v472_v22  ;;  %v253_v26 = vpop.permute.xlu0 %252  ;;  %v297_v27 = vpop.permute.xlu1 %296  ;;  %v575_v5 = vsub.s32 3, %v761_v4 }
  0xa0   :  { %175 = vst [vmem:[#allocation2 + $0x10] sm:$0xcc] %v170_v23  ;;  %220 = vst [vmem:[#allocation2 + $0x28] sm:$0x33] %v216_v24  ;;  %v256_v28 = vrot.slane %v253_v26, 4  ;;  %v300_v30 = vrot.slane %v297_v27, 4 }
  0xa2   :  { %v260_v29 = vsel %vm78_vm0, %v255_v37, %v256_v28  ;;  %v304_v31 = vsel %vm78_vm0, %v299_v43, %v300_v30 }
  0xa3   :  { %v261_v32 = vsel %vm258_vm3, %v788_v35, %v260_v29  ;;  %v305_v25 = vsel %vm302_vm4, %v795_v41, %v304_v31  ;;  %v342_v33 = vpop.permute.xlu0 %341  ;;  %v74_v34 = vpop.permute.xlu1 %73 }
  0xa4   :  { %265 = vst [vmem:[#allocation2 + $0x28] sm:$0xcc] %v261_v32  ;;  %309 = vst [vmem:[#allocation2 + $0x38] sm:$0x33] %v305_v25  ;;  %v345_v36 = vrot.slane %v342_v33, 4  ;;  %v77_v38 = vrot.slane %v74_v34, 4 }
  0xa5   :  { %v605_v32 = vld [vmem:[%s876_s2] sm:$0xff] }
  0xa6   :  { %v349_v37 = vsel %vm78_vm0, %v344_v50, %v345_v36  ;;  %v82_v39 = vsel %vm78_vm0, %v76_v0, %v77_v38  ;;  %v571_v0 = vsub.s32 2, %v761_v4  ;;  %v609_v34 = vld [vmem:[%s877_s3] sm:$0xff] }
  0xa7   :  { %v350_v40 = vsel %vm347_vm5, %v802_v47, %v349_v37  ;;  %v83_v35 = vsel %vm80_vm7, %v72_v61, %v82_v39  ;;  %v119_v42 = vpop.permute.xlu0 %118  ;;  %v164_v43 = vpop.permute.xlu1 %163  ;;  %v707_v41 = vld [vmem:[#allocation2 + $0x4] ss:$16 sps:$4 sm:$0xff]   ;;  %v709_v44 = vld [vmem:[#allocation2] ss:$16 sps:$4 sm:$0xff]   ;;  %v564_v61 = vrot.slane %v559_v59, %v563_v56 }
  0xa8   :  { %354 = vst [vmem:[#allocation2 + $0x38] sm:$0xcc] %v350_v40  ;;  %87 = vst [vmem:[#allocation2 + $0x8] sm:$0xcc] %v83_v35  ;;  %v122_v45 = vrot.slane %v119_v42, 4  ;;  %v167_v46 = vrot.slane %v164_v43, 4  ;;  %491 = vmatprep.subr.bf16.mxu0 %v707_v41  ;;  %v572_v6 = vrot.slane %v559_v59, %v571_v0 }
  0xa9   :  { %492 = vmatpush1.bf16.msra.mxu0 %v709_v44  ;;  %v399_v47 = vld [vmem:[%s874_s1] sm:$0xf] }
  0xaa   :  { %v126_v48 = vsel %vm78_vm0, %v121_v9, %v122_v45  ;;  %v171_v49 = vsel %vm78_vm0, %v166_v16, %v167_v46  ;;  %v576_v9 = vrot.slane %v559_v59, %v575_v5 }
  0xab   :  { %v127_v50 = vsel %vm124_vm8, %v815_v3, %v126_v48  ;;  %v172_v51 = vsel %vm169_vm9, %v162_v13, %v171_v49 }
  0xac   :  { %131 = vst [vmem:[#allocation2 + $0x18] sm:$0x33] %v127_v50  ;;  %176 = vst [vmem:[#allocation2 + $0x18] sm:$0xcc] %v172_v51  ;;  %675 = vmatmul.mubr.msk.bf16.vlgmr.msra.gmra.mxu0 %vm460_vm10, %v399_v47 }
  0xaf   :  { %v710_v52 = vld [vmem:[#allocation2 + $0x2c] ss:$16 sps:$4 sm:$0xff]   ;;  %v712_v53 = vld [vmem:[#allocation2 + $0x28] ss:$16 sps:$4 sm:$0xff]  }
  0xb0   :  { %530 = vmatprep.subr.bf16.mxu1 %v710_v52 }
  0xb1   :  { %531 = vmatpush1.bf16.msra.mxu1 %v712_v53 }
  0xb3   :  { %v713_v54 = vld [vmem:[#allocation2 + $0xc] ss:$16 sps:$4 sm:$0xff]   ;;  %v715_v55 = vld [vmem:[#allocation2 + $0x8] ss:$16 sps:$4 sm:$0xff]  }
  0xb4   :  { %532 = vmatprep.subr.bf16.mxu1 %v713_v54 }
  0xb5   :  { %533 = vmatpush1.bf16.msra.mxu1 %v715_v55 }
  0xb8   :  { %677 = vmatmul.mubr.msk.bf16.vlgmr.msra.gmra.mxu1 %vm460_vm10, %v399_v47 }
 0x16c   :  { %v511_v58 = vpop.f32.mrf.mxu0 }
 0x16d   :  { %v581_v2 = vmul.f32 %v564_v61, %v511_v58 }
 0x16e   :  { %v513_v60 = vpop.f32.mrf.mxu0 }
 0x16f   :  { %v582_v3 = vmul.f32 %v568_v62, %v513_v60  ;;  %v592_v7 = vmul.f32 %v581_v2, %v511_v58 }
 0x170   :  { %v515_v63 = vpop.f32.mrf.mxu0 }
 0x171   :  { %v593_v8 = vmul.f32 %v582_v3, %v513_v60  ;;  %v585_v12 = vadd.f32 %v582_v3, %v581_v2 }
 0x172   :  { %v516_v1 = vpop.f32.mrf.mxu0 }
 0x173   :  { %v596_v17 = vadd.f32 %v593_v8, %v592_v7 }
 0x178   :  { %v552_v10 = vpop.f32.mrf.mxu1 }
 0x179   :  { %v583_v11 = vmul.f32 %v572_v6, %v552_v10 }
 0x17a   :  { %v554_v13 = vpop.f32.mrf.mxu1 }
 0x17b   :  { %v594_v14 = vmul.f32 %v583_v11, %v552_v10  ;;  %v584_v15 = vmul.f32 %v576_v9, %v554_v13  ;;  %v586_v16 = vadd.f32 %v585_v12, %v583_v11 }
 0x17c   :  { %v556_v18 = vpop.f32.mrf.mxu1 }
 0x17d   :  { %v587_v19 = vadd.f32 %v586_v16, %v584_v15  ;;  %v595_v20 = vmul.f32 %v584_v15, %v554_v13  ;;  %v597_v21 = vadd.f32 %v596_v17, %v594_v14 }
 0x17e   :  { %v557_v22 = vpop.f32.mrf.mxu1 }
 0x17f   :  { %588 = vadd.xlane.f32.xlu0 %v587_v19  ;;  %v598_v23 = vadd.f32 %v597_v21, %v595_v20 }
 0x181   :  { %599 = vadd.xlane.f32.xlu1 %v598_v23 }
 0x208   :  { %v589_v4 = vpop.xlane.xlu0 %588 }
 0x209   :  { %v591_v24 = vmul.f32 0.0025510204, %v589_v4 }
 0x20a   :  { %v600_v26 = vpop.xlane.xlu1 %599 }
 0x20b   :  { %v602_v27 = vmul.f32 %v591_v24, %v591_v24  ;;  %v601_v28 = vmul.f32 0.0025510204, %v600_v26 }
 0x20d   :  { %v603_v30 = vsub.f32 %v601_v28, %v602_v27 }
 0x20f   :  { %v604_v29 = vmax.f32 %v603_v30, 0.0 }
 0x211   :  { %v606_v31 = vadd.f32 1e-05, %v604_v29 }
 0x213   :  { %716 = vrsqrt.f32 %v606_v31 }
 0x220   :  { %v717_v25 = vpop.eup %716 }
 0x221   :  { %v608_v33 = vmul.f32 %v717_v25, %v605_v32 }
 0x223   :  { %614 = vperm.xlu0 %692, %v608_v33   ;;  %v610_v36 = vmul.f32 %v608_v33, %v591_v24 }
 0x225   :  { %v611_v38 = vsub.f32 %v609_v34, %v610_v36 }
 0x227   :  { %623 = vperm.xlu1 %693, %v611_v38  }
 0x29e   :  { %v615_v37 = vpop.permute.xlu0 %614 }
 0x29f   :  { %v617_v39 = vmul.f32 %v615_v37, %v511_v58  ;;  %v618_v40 = vmul.f32 %v615_v37, %v513_v60  ;;  %v619_v35 = vmul.f32 %v615_v37, %v552_v10  ;;  %v620_v42 = vmul.f32 %v615_v37, %v554_v13 }
 0x2a2   :  { %v624_v43 = vpop.permute.xlu1 %623 }
 0x2a3   :  { %v626_v41 = vadd.f32 %v624_v43, %v617_v39  ;;  %v627_v44 = vadd.f32 %v624_v43, %v618_v40  ;;  %v628_v45 = vadd.f32 %v624_v43, %v619_v35  ;;  %v629_v46 = vadd.f32 %v624_v43, %v620_v42 }
 0x2a5   :  { %v630_v48 = vmax.f32 %v626_v41, 0.0  ;;  %v631_v49 = vmax.f32 %v627_v44, 0.0  ;;  %v632_v47 = vmax.f32 %v628_v45, 0.0  ;;  %v633_v50 = vmax.f32 %v629_v46, 0.0 }
 0x2a7   :  { %v680_v51 = vpack.c.bf16 %v631_v49, %v630_v48  ;;  %v681_v52 = vpack.c.bf16 %v633_v50, %v632_v47 }
 0x2a9   :  { %650 = vst [vmem:[%s878_s5] sm:$0xff] %v680_v51  ;;  %651 = vst [vmem:[%s878_s5 + $0x8] sm:$0xff] %v681_v52 }

// kernel: vae_forward.7
= control target key start
LH: loop header
LB: loop body
LE: loop exit
PB: predicated region body
PF: predicated region fallthrough
CT: control target
= control target key end

     0   :  { %16 = vsyncpa [#allocation3], 0  ;;  %v837_v1 = vmov 0   ;;  %v104_v20 = vlaneseq  ;;  %v838_v25 = vmov 1966171168   ;;  %s839_s21 = smov 8   ;;  %s1049_s0 = inlined_call_operand.vmem [shape: bf16[2,392], index: 0, kind: input, shape index: {}]   ;;  %s1050_s1 = inlined_call_operand.vmem [shape: bf16[392,16], index: 1, kind: input, shape index: {}]   ;;  %s1051_s2 = inlined_call_operand.vmem [shape: f32[1,16], index: 2, kind: input, shape index: {}]   ;;  %s1052_s3 = inlined_call_operand.vmem [shape: f32[2,8], index: 3, kind: input, shape index: {}]   ;;  %s1053_s4 = inlined_call_operand.vmem [shape: bf16[2,4], index: 4, kind: input, shape index: {}]   ;;  %s1054_s5 = inlined_call_operand.vmem [shape: bf16[8,392], index: 5, kind: input, shape index: {}]   ;;  %s1055_s6 = inlined_call_operand.vmem [shape: bf16[4,392], index: 6, kind: input, shape index: {}]   ;;  %s1056_s7 = inlined_call_operand.vmem [shape: f32[1,392], index: 7, kind: input, shape index: {}]   ;;  %s1057_s8 = inlined_call_operand.hbm [shape: f32[2,8], index: 8, kind: output, shape index: {0}]   ;;  %s1058_s9 = inlined_call_operand.hbm [shape: f32[2,8], index: 9, kind: output, shape index: {1}]   ;;  %s1059_s10 = inlined_call_operand.vmem [shape: f32[2,392], index: 10, kind: output, shape index: {2}]  }
   0x1   :  { %v761_v0 = vld [vmem:[%s1050_s1 + $0x78] sm:$0xff]   ;;  %315 = vmatprep.subr.bf16.mxu1 %v837_v1  ;;  %v764_v4 = vld [vmem:[%s1050_s1 + $0x70] sm:$0xff]   ;;  %v767_v7 = vld [vmem:[%s1050_s1 + $0x68] sm:$0xff]   ;;  %v102_v26 = vunpack.c.l.s4 %v838_v25 }
   0x2   :  { %v762_v2 = vld [vmem:[%s1050_s1 + $0xb8] sm:$0xff]   ;;  %732 = vmatprep.subr.bf16.mxu0 %v761_v0  ;;  %v765_v5 = vld [vmem:[%s1050_s1 + $0xb0] sm:$0xff]   ;;  %v768_v8 = vld [vmem:[%s1050_s1 + $0xa8] sm:$0xff]   ;;  %v975_v27 = vshrl.u32 %v104_v20, 7 }
   0x3   :  { %v763_v3 = vld [vmem:[%s1050_s1 + $0x38] sm:$0xff]   ;;  %316 = vmatpush1.bf16.msra.mxu1 %v762_v2  ;;  %v766_v6 = vld [vmem:[%s1050_s1 + $0x30] sm:$0xff]   ;;  %v769_v9 = vld [vmem:[%s1050_s1 + $0x28] sm:$0xff]  }
   0x4   :  { %733 = vmatpush3.bf16.msra.mxu0 %v763_v3  ;;  %317 = vmatprep.subr.bf16.mxu1 %v837_v1  ;;  %v770_v10 = vld [vmem:[%s1050_s1 + $0x60] sm:$0xff]   ;;  %v773_v13 = vld [vmem:[%s1050_s1 + $0x58] sm:$0xff]   ;;  %v776_v16 = vld [vmem:[%s1050_s1 + $0x50] sm:$0xff]  }
   0x5   :  { %734 = vmatprep.subr.bf16.mxu0 %v764_v4  ;;  %v771_v11 = vld [vmem:[%s1050_s1 + $0xa0] sm:$0xff]   ;;  %v774_v14 = vld [vmem:[%s1050_s1 + $0x98] sm:$0xff]   ;;  %v777_v17 = vld [vmem:[%s1050_s1 + $0x90] sm:$0xff]  }
   0x6   :  { %v772_v12 = vld [vmem:[%s1050_s1 + $0x20] sm:$0xff]   ;;  %v775_v15 = vld [vmem:[%s1050_s1 + $0x18] sm:$0xff]   ;;  %v778_v18 = vld [vmem:[%s1050_s1 + $0x10] sm:$0xff]  }
   0x7   :  { %318 = vmatpush1.bf16.msra.mxu1 %v765_v5  ;;  %v779_v19 = vld [vmem:[%s1050_s1 + $0x48] sm:$0xff]   ;;  %v693_v23 = vld.sshfl [vmem:[%s1049_s0] sm:$0x33 pattern:$0x75316420] }
   0x8   :  { %735 = vmatpush3.bf16.msra.mxu0 %v766_v6  ;;  %319 = vmatprep.subr.bf16.mxu1 %v837_v1  ;;  %v780_v21 = vld [vmem:[%s1050_s1 + $0x88] sm:$0xff]   ;;  %v782_v24 = vld [vmem:[%s1050_s1 + $0x40] sm:$0xff]  }
   0x9   :  { %736 = vmatprep.subr.bf16.mxu0 %v767_v7  ;;  %v781_v22 = vld [vmem:[%s1050_s1 + $0x8] sm:$0xff]   ;;  %v365_v28 = vld [vmem:[%s1052_s3] sm:$0x3] }
   0xa   :  { %367 = vrot.lane.b32.xlu0 %v365_v28, %s839_s21 }
   0xb   :  { %320 = vmatpush1.bf16.msra.mxu1 %v768_v8 }
   0xc   :  { %737 = vmatpush3.bf16.msra.mxu0 %v769_v9  ;;  %321 = vmatprep.subr.bf16.mxu1 %v837_v1 }
   0xd   :  { %738 = vmatprep.subr.bf16.mxu0 %v770_v10 }
   0xf   :  { %322 = vmatpush1.bf16.msra.mxu1 %v771_v11 }
  0x10   :  { %739 = vmatpush3.bf16.msra.mxu0 %v772_v12  ;;  %323 = vmatprep.subr.bf16.mxu1 %v837_v1 }
  0x11   :  { %740 = vmatprep.subr.bf16.mxu0 %v773_v13 }
  0x13   :  { %324 = vmatpush1.bf16.msra.mxu1 %v774_v14 }
  0x14   :  { %741 = vmatpush3.bf16.msra.mxu0 %v775_v15  ;;  %325 = vmatprep.subr.bf16.mxu1 %v837_v1 }
  0x15   :  { %742 = vmatprep.subr.bf16.mxu0 %v776_v16 }
  0x17   :  { %326 = vmatpush1.bf16.msra.mxu1 %v777_v17 }
  0x18   :  { %743 = vmatpush3.bf16.msra.mxu0 %v778_v18  ;;  %327 = vmatprep.subr.bf16.mxu1 %v837_v1 }
  0x19   :  { %744 = vmatprep.subr.bf16.mxu0 %v779_v19 }
  0x1a   :  { %17 = vsyncpa [#allocation5], 0  ;;  %v783_v29 = vld [vmem:[%s1050_s1 + $0x80] sm:$0xff]   ;;  %v100_v30 = vcombine.high %v693_v23, %v693_v23  ;;  %v103_v31 = vunpack.c.0.s8 %v102_v26  ;;  %vm271_vm0 = vcmask 1043456   ;;  %vm267_vm1 = vcmask 64512   ;;  %v378_v47 = vld [vmem:[%s1054_s5 + $0x8] sm:$0xff] }
  0x1b   :  { %328 = vmatpush1.bf16.msra.mxu1 %v780_v21  ;;  %v784_v32 = vld [vmem:[%s1050_s1] sm:$0xff]   ;;  %v840_v40 = vmov 1983009808   ;;  %vm403_vm2 = vcmask 1041408   ;;  %v727_v51 = vcombine.high %v378_v47, %v378_v47  ;;  %v726_v53 = vcombine.low %v378_v47, %v378_v47  ;;  %s843_s14 = smov [#allocation4]  }
  0x1c   :  { %745 = vmatpush3.bf16.msra.mxu0 %v781_v22  ;;  %329 = vmatprep.subr.bf16.mxu1 %v837_v1  ;;  %v785_v33 = vld [vmem:[%s1050_s1 + $0xc0] ss:$0 sps:$4 sm:$0xff]   ;;  %v106_v34 = vsub.s32 %v103_v31, %v975_v27  ;;  %v384_v41 = vunpack.c.l.s4 %v840_v40  ;;  %vm399_vm3 = vcmask 31744   ;;  %vm355_vm4 = vcmask 58368   ;;  %s676_s15 = sshll.u32 %s843_s14, 4  ;;  %s677_s15 = int_to_ptr.vmem [resolvable:$true] %s676_s15 }
  0x1d   :  { %746 = vmatprep.subr.bf16.mxu0 %v782_v24  ;;  %v273_v37 = vsel %vm271_vm0, %v785_v33, 0  ;;  %v380_v43 = vld [vmem:[%s1055_s6] sm:$0xff]  ;;  %v518_v3 = vsel %vm271_vm0, %v726_v53, 0 }
  0x1e   :  { %v114_v35 = vrot.slane %v100_v30, %v106_v34  ;;  %v107_v36 = vrot.slane %v693_v23, %v106_v34  ;;  %v385_v42 = vunpack.c.0.s8 %v384_v41  ;;  %v382_v45 = vcombine.high %v380_v43, %v380_v43  ;;  %v377_v46 = vld [vmem:[%s1054_s5] sm:$0xff] }
  0x1f   :  { %330 = vmatpush1.bf16.msra.mxu1 %v783_v29  ;;  %v725_v50 = vcombine.high %v377_v46, %v377_v46  ;;  %v724_v52 = vcombine.low %v377_v46, %v377_v46  ;;  %v692_v60 = vld [vmem:[%s1051_s2] ss:$0 sm:$0xff]  ;;  %s841_s2 = smov 120  }
  0x20   :  { %747 = vmatpush3.bf16.msra.mxu0 %v784_v32  ;;  %345 = vmatprep.subr.bf16.mxu1 %v837_v1  ;;  %v116_v38 = vcombine.high %v114_v35, %v114_v35  ;;  %v115_v39 = vcombine.high %v107_v36, %v107_v36  ;;  %v1000_v44 = vsub.s32 %v385_v42, %v975_v27  ;;  %v379_v63 = vld [vmem:[%s1053_s4] sm:$0x1]  ;;  %s842_s4 = smov [#allocation2]  }
  0x21   :  { %307 = vmatprep.mubr.bf16.mxu0 %v114_v35  ;;  %v512_v2 = vsel %vm271_vm0, %v724_v52, 0  ;;  %s666_s13 = sshll.u32 %s842_s4, 4  ;;  %s667_s13 = int_to_ptr.vmem [resolvable:$true] %s666_s13 }
  0x22   :  { %719 = vmatprep.mubr.msk.bf16.mxu1 %vm267_vm1, %v116_v38  ;;  %v389_v48 = vrot.slane %v380_v43, %v1000_v44  ;;  %v396_v49 = vrot.slane %v382_v45, %v1000_v44  ;;  %s793_s16 = scalar_lea.vmem %s667_s13, 32  ;;  %p798_p1 = scmp.lt.s32.totalorder %s667_s13, %s667_s13 }
  0x23   :  { %308 = vmatmul.mubr.bf16.vlgmr.msra.gmra.mxu0 %v107_v36  ;;  %346 = vmatpush2.bf16.msra.mxu1 %v273_v37  ;;  %p794_p0 = scmp.ne.s32.totalorder %s667_s13, %s793_s16  ;;  %p799_p2 = scmp.lt.s32.totalorder %s793_s16, %s793_s16 }
  0x24   :  { %448 = vmatprep.mubr.bf16.mxu0 %v837_v1  ;;  %v397_v55 = vcombine.high %v389_v48, %v389_v48  ;;  %v398_v56 = vcombine.high %v396_v49, %v396_v49  ;;  %v405_v57 = vsel %vm403_vm2, %v389_v48, 0  ;;  %v411_v58 = vsel %vm403_vm2, %v396_v49, 0 }
  0x25   :  { %p800_p3 = por %p799_p2, %p798_p1 }
  0x26   :  { %348 = vmatmul.mubr.bf16.vlgmr.msra.gmra.mxu1 %v115_v39  ;;  %720 = vmatprep.subr.msk.bf16.mxu0 %vm403_vm2, %v397_v55 }
  0x27   :  { %489 = vmatprep.mubr.bf16.mxu1 %v837_v1  ;;  %722 = vmatprep.subr.msk.bf16.mxu1 %vm403_vm2, %v398_v56  ;;  %p801_p4 = pnand %p800_p3, %p794_p0 }
  0x28   :  { %431 = vmatpush1.bf16.msra.mxu0 %v405_v57  ;;  %472 = vmatpush1.bf16.msra.mxu1 %v411_v58 }
  0x29   :  { %728 = vmatprep.subr.msk.bf16.mxu0 %vm271_vm0, %v725_v50  ;;  %730 = vmatprep.subr.msk.bf16.mxu1 %vm271_vm0, %v727_v51 }
  0x2b   :  { %721 = vmatmul.mubr.msk.bf16.vlgmr.msra.gmra.mxu0 %vm399_vm3, %v379_v63 }
  0x2c   :  { %538 = vmatpush1.bf16.msra.mxu0 %v512_v2  ;;  %555 = vmatprep.mubr.bf16.mxu0 %v837_v1 }
  0x2e   :  { %723 = vmatmul.mubr.msk.bf16.vlgmr.msra.gmra.mxu1 %vm399_vm3, %v379_v63 }
  0x2f   :  { %579 = vmatpush1.bf16.msra.mxu1 %v518_v3  ;;  %596 = vmatprep.mubr.bf16.mxu1 %v837_v1 }
  0x7c   :  { %v368_v12 = vpop.permute.xlu0 %367 }
  0xe3   :  { %v748_v54 = vpop.f32.mrf.mxu0 }
  0xe5   :  { %v749_v59 = vpop.f32.mrf.mxu0 }
  0xe6   :  { %v750_v61 = vadd.f32 %v749_v59, %v748_v54  ;;  %v349_v62 = vpop.f32.mrf.mxu1 }
  0xe7   :  { %v751_v0 = vpop.f32.mrf.mxu0 }
  0xe8   :  { %v310_v4 = vadd.f32 %v750_v61, %v692_v60  ;;  %v351_v5 = vpop.f32.mrf.mxu1 }
  0xe9   :  { %v752_v6 = vpop.f32.mrf.mxu0 }
  0xea   :  { %v350_v7 = vadd.f32 %v349_v62, %v310_v4  ;;  %v352_v8 = vpop.f32.mrf.mxu1 }
  0xeb   :  { %v450_v1 = vpop.f32.mrf.mxu0 }
  0xec   :  { %v362_v9 = vmul.f32 0.5, %v350_v7  ;;  %v353_v10 = vpop.f32.mrf.mxu1  ;;  %358 = vrot.lane.b32.xlu1 %v350_v7, %s841_s2  ;;  %356 = vst.msk [vmem:[#allocation2] sm:$0x3] %vm355_vm4, %v350_v7 }
  0xed   :  { %v452_v20 = vpop.f32.mrf.mxu0 }
  0xee   :  { %v363_v11 = vmul.f32 1.442695, %v362_v9  ;;  %v491_v19 = vpop.f32.mrf.mxu1 }
  0xef   :  { %v454_v22 = vpop.f32.mrf.mxu0 }
  0xf0   :  { %791 = vpow2.f32 %v363_v11  ;;  %v493_v21 = vpop.f32.mrf.mxu1 }
  0xf1   :  { %v455_v24 = vpop.f32.mrf.mxu0 }
  0xf2   :  { %v495_v23 = vpop.f32.mrf.mxu1 }
  0xf4   :  { %v496_v25 = vpop.f32.mrf.mxu1 }
  0xfd   :  { %v792_v13 = vpop.eup %791 }
  0xfe   :  { %v370_v14 = vmul.f32 %v792_v13, %v368_v12 }
 0x100   :  { %372 = vrot.lane.b32.xlu0 %v370_v14, %s841_s2 }
 0x15e   :  { %v359_v15 = vpop.permute.xlu1 %358 }
 0x15f   :  { %361 = vst.msk [vmem:[#allocation4] sm:$0x3] %vm355_vm4, %v359_v15 }
 0x172   :  { %v373_v16 = vpop.permute.xlu0 %372 }
 0x173   :  { %v375_v17 = vadd.f32 %v373_v16, %v350_v7 }
 0x175   :  { %v376_v18 = vpack.c.bf16 %v375_v17, %v375_v17 }
 0x177   :  { %729 = vmatmul.mubr.msk.bf16.vlgmr.msra.gmra.mxu0 %vm267_vm1, %v376_v18  ;;  %731 = vmatmul.mubr.msk.bf16.vlgmr.msra.gmra.mxu1 %vm267_vm1, %v376_v18 }
 0x178   :  { %804 = shalt.err (!%p801_p4)
}
 0x179   :  { %669 = dma.vmem_to_hbm [thread:$0]  %s667_s13, 32, %s1057_s8, [#allocation3]  }
 0x17a   :  { %s813_s19 = scalar_lea.vmem %s677_s15, 32  ;;  %p818_p6 = scmp.lt.s32.totalorder %s677_s15, %s677_s15 }
 0x17b   :  { %p814_p5 = scmp.ne.s32.totalorder %s677_s15, %s813_s19  ;;  %p819_p7 = scmp.lt.s32.totalorder %s813_s19, %s813_s19 }
 0x17d   :  { %p820_p8 = por %p819_p7, %p818_p6 }
 0x17f   :  { %p821_p9 = pnand %p820_p8, %p814_p5 }
 0x181   :  { %824 = shalt.err (!%p821_p9)
}
 0x182   :  { %679 = dma.vmem_to_hbm [thread:$0]  %s677_s15, 32, %s1058_s9, [#allocation5]   ;;  %v609_v26 = vsub.s32 0, %v975_v27  ;;  %v617_v28 = vsub.s32 2, %v975_v27  ;;  %v605_v29 = vld [vmem:[%s1056_s7] sm:$0xf] }
 0x183   :  { %v613_v30 = vsub.s32 1, %v975_v27  ;;  %v621_v31 = vsub.s32 3, %v975_v27  ;;  %vm653_vm5 = vcmask 1043458   ;;  %vm655_vm7 = vcmask 1045508  }
 0x184   :  { %v610_v33 = vrot.slane %v605_v29, %v609_v26  ;;  %v618_v35 = vrot.slane %v605_v29, %v617_v28  ;;  %vm654_vm6 = vmor %vm653_vm5, %vm403_vm2  ;;  %vm657_vm9 = vcmask 64518  }
 0x185   :  { %v614_v38 = vrot.slane %v605_v29, %v613_v30  ;;  %v622_v39 = vrot.slane %v605_v29, %v621_v31  ;;  %vm656_vm8 = vmor %vm655_vm7, %vm654_vm6 }
 0x186   :  { %vm658_vm10 = vmor %vm657_vm9, %vm656_vm8 }
 0x237   :  { %v557_v32 = vpop.f32.mrf.mxu0  ;;  %v598_v34 = vpop.f32.mrf.mxu1 }
 0x238   :  { %v558_v36 = vadd.f32 %v557_v32, %v450_v1  ;;  %v599_v37 = vadd.f32 %v598_v34, %v491_v19 }
 0x239   :  { %v559_v40 = vpop.f32.mrf.mxu0  ;;  %v600_v41 = vpop.f32.mrf.mxu1 }
 0x23a   :  { %v560_v42 = vadd.f32 %v559_v40, %v452_v20  ;;  %v601_v43 = vadd.f32 %v600_v41, %v493_v21  ;;  %v627_v47 = vadd.f32 %v610_v33, %v558_v36  ;;  %v629_v27 = vadd.f32 %v618_v35, %v599_v37 }
 0x23b   :  { %v561_v45 = vpop.f32.mrf.mxu0  ;;  %v602_v46 = vpop.f32.mrf.mxu1 }
 0x23c   :  { %v628_v48 = vadd.f32 %v614_v38, %v560_v42  ;;  %v630_v49 = vadd.f32 %v622_v39, %v601_v43 }
 0x23d   :  { %v562_v50 = vpop.f32.mrf.mxu0  ;;  %v603_v51 = vpop.f32.mrf.mxu1 }
 0x23e   :  { %v635_v52 = vcombine.low %v627_v47, %v628_v48  ;;  %v636_v53 = vcombine.low %v629_v27, %v630_v49 }
 0x240   :  { %v643_v54 = vrot.slane %v635_v52, %v1000_v44  ;;  %v650_v55 = vrot.slane %v636_v53, %v1000_v44 }
 0x242   :  { %v651_v56 = vcombine.low %v643_v54, %v650_v55 }
 0x244   :  { %659 = vst.msk [vmem:[%s1059_s10] sm:$0xff] %vm658_vm10, %v651_v56 }
 0x245   :  { %833 = dma.done.wait [#allocation3], 32  }
 0x246   :  { %834 = vsyncadd [#allocation3], 4294967264 }
 0x247   :  { %835 = dma.done.wait [#allocation5], 32  }
 0x248   :  { %836 = vsyncadd [#allocation5], 4294967264 }
 0x249   :  { %690 = vsyncpa [#allocation3], 1 }
 0x24a   :  { %691 = vsyncpa [#allocation5], 1 }

// kernel: vae_forward.8
= control target key start
LH: loop header
LB: loop body
LE: loop exit
PB: predicated region body
PF: predicated region fallthrough
CT: control target
= control target key end

     0   :  { %s1700_s20 = smov 95   ;;  %s1701_s21 = smov 96   ;;  %v1709_v2 = vmov 0   ;;  %vm40_vm0 = vcmask 1043456   ;;  %vm354_vm1 = vcmask 785408   ;;  %vm378_vm2 = vcmask 777216   ;;  %s2451_s0 = inlined_call_operand.vmem [shape: bf16[8,640], index: 0, kind: input, shape index: {}]   ;;  %s2452_s1 = inlined_call_operand.vmem [shape: bf16[8,288], index: 1, kind: input, shape index: {}]   ;;  %s2453_s4 = inlined_call_operand.vmem [shape: f32[1,512], index: 4, kind: input, shape index: {}]   ;;  %s2454_s2 = inlined_call_operand.vmem [shape: f32[8,1], index: 2, kind: input, shape index: {}]   ;;  %s2455_s3 = inlined_call_operand.vmem [shape: f32[8,1], index: 3, kind: input, shape index: {}]   ;;  %s2456_s5 = inlined_call_operand.vmem [shape: bf16[8,512], index: 5, kind: output, shape index: {}]  }
   0x1   :  { %v1769_v0 = vld [vmem:[%s2451_s0] sm:$0xff]  ;;  %v1778_v1 = vld [vmem:[%s2451_s0 + $0x8] sm:$0xff]  ;;  %s1702_s24 = smov 49   ;;  %s1703_s25 = smov 48   ;;  %1387 = vmatprep.mubr.bf16.mxu1 %v1709_v2  ;;  %1692 = vset.pattern.permute.xlu0 %v1709_v2  ;;  %v364_v3 = vld [vmem:[%s2451_s0 + $0x10] sm:$0xf] }
   0x2   :  { %368 = vrot.lane.b32.xlu1 %v1769_v0, %s1700_s20  ;;  %344 = vrot.lane.b32.xlu0 %v1769_v0, %s1701_s21  ;;  %s1704_s26 = smov 98   ;;  %s1705_s27 = smov 97   ;;  %v340_v4 = vld [vmem:[%s2451_s0 + $0x10] sm:$0xf]  ;;  %vm834_vm3 = vcmask 400384   ;;  %vm858_vm4 = vcmask 392192  }
   0x3   :  { %s1706_s28 = smov 51   ;;  %s1707_s29 = smov 50   ;;  %1693 = vset.pattern.permute.xlu1 %v1709_v2  ;;  %v316_v5 = vld [vmem:[%s2451_s0 + $0x10] sm:$0xf]  ;;  %vm306_vm5 = vcmask 801792   ;;  %vm330_vm6 = vcmask 793600  }
   0x4   :  { %s1708_s30 = smov 109   ;;  %s1710_s6 = smov 108   ;;  %v292_v6 = vld [vmem:[%s2451_s0 + $0x10] sm:$0xf]  ;;  %vm786_vm7 = vcmask 416768   ;;  %vm810_vm8 = vcmask 408576  }
   0x5   :  { %s1711_s11 = smov 111   ;;  %s1712_s12 = smov 110   ;;  %v268_v7 = vld [vmem:[%s2451_s0 + $0x10] sm:$0xf]  ;;  %vm258_vm9 = vcmask 891904   ;;  %vm1310_vm10 = vcmask 261120  }
   0x6   :  { %370 = vrot.lane.b32.xlu1 %v1778_v1, %s1700_s20  ;;  %346 = vrot.lane.b32.xlu0 %v1778_v1, %s1701_s21  ;;  %s1713_s17 = smov 113   ;;  %s1714_s18 = smov 112   ;;  %v244_v8 = vld [vmem:[%s2451_s0 + $0x10] sm:$0xf]  ;;  %vm282_vm11 = vcmask 883712   ;;  %vm210_vm12 = vcmask 908288  }
   0x7   :  { %s1715_s23 = smov 124   ;;  %v220_v9 = vld [vmem:[%s2451_s0 + $0x10] sm:$0xf]  ;;  %s1721_s7 = smov 52   ;;  %vm234_vm13 = vcmask 900096   ;;  %vm162_vm14 = vcmask 924672  }
   0x8   :  { %v196_v10 = vld [vmem:[%s2451_s0 + $0x10] sm:$0xf]  ;;  %s1722_s8 = smov 64   ;;  %s1723_s9 = smov 63   ;;  %vm186_vm15 = vcmask 916480  }
   0x9   :  { %v172_v11 = vld [vmem:[%s2451_s0 + $0x10] sm:$0xf]  ;;  %s1728_s22 = smov 79   ;;  %s1732_s15 = smov 83  }
   0xa   :  { %826 = vrot.lane.b32.xlu1 %v1778_v1, %s1702_s24  ;;  %824 = vrot.lane.b32.xlu0 %v1769_v0, %s1702_s24  ;;  %v148_v12 = vld [vmem:[%s2451_s0 + $0x10] sm:$0xf] }
   0xb   :  { %v124_v13 = vld [vmem:[%s2451_s0 + $0x10] sm:$0xf] }
   0xc   :  { %v100_v14 = vld [vmem:[%s2451_s0 + $0x10] sm:$0xf] }
   0xd   :  { %v76_v15 = vld [vmem:[%s2451_s0 + $0x10] sm:$0xf] }
   0xe   :  { %850 = vrot.lane.b32.xlu1 %v1778_v1, %s1703_s25  ;;  %848 = vrot.lane.b32.xlu0 %v1769_v0, %s1703_s25  ;;  %v52_v16 = vld [vmem:[%s2451_s0 + $0x10] sm:$0xf] }
   0xf   :  { %v27_v17 = vld [vmem:[%s2451_s0 + $0x10] sm:$0xf] }
  0x10   :  { %v724_v36 = vld [vmem:[%s2451_s0 + $0x10] sm:$0xf] }
  0x11   :  { %v748_v42 = vld [vmem:[%s2451_s0 + $0x10] sm:$0xf] }
  0x12   :  { %298 = vrot.lane.b32.xlu1 %v1778_v1, %s1704_s26  ;;  %296 = vrot.lane.b32.xlu0 %v1769_v0, %s1704_s26  ;;  %v676_v58 = vld [vmem:[%s2451_s0 + $0x10] sm:$0xf] }
  0x16   :  { %322 = vrot.lane.b32.xlu1 %v1778_v1, %s1705_s27  ;;  %320 = vrot.lane.b32.xlu0 %v1769_v0, %s1705_s27 }
  0x1a   :  { %778 = vrot.lane.b32.xlu1 %v1778_v1, %s1706_s28  ;;  %776 = vrot.lane.b32.xlu0 %v1769_v0, %s1706_s28 }
  0x1e   :  { %802 = vrot.lane.b32.xlu1 %v1778_v1, %s1707_s29  ;;  %800 = vrot.lane.b32.xlu0 %v1769_v0, %s1707_s29 }
  0x22   :  { %250 = vrot.lane.b32.xlu1 %v1778_v1, %s1708_s30  ;;  %248 = vrot.lane.b32.xlu0 %v1769_v0, %s1708_s30 }
  0x26   :  { %274 = vrot.lane.b32.xlu1 %v1778_v1, %s1710_s6  ;;  %272 = vrot.lane.b32.xlu0 %v1769_v0, %s1710_s6 }
  0x2a   :  { %372 = vrot.lane.b32.xlu1 %v364_v3, %s1700_s20  ;;  %348 = vrot.lane.b32.xlu0 %v340_v4, %s1701_s21  ;;  %s1734_s21 = smov 94  }
  0x2e   :  { %202 = vrot.lane.b32.xlu1 %v1778_v1, %s1711_s11  ;;  %200 = vrot.lane.b32.xlu0 %v1769_v0, %s1711_s11 }
  0x32   :  { %226 = vrot.lane.b32.xlu1 %v1778_v1, %s1712_s12  ;;  %224 = vrot.lane.b32.xlu0 %v1769_v0, %s1712_s12 }
  0x36   :  { %324 = vrot.lane.b32.xlu1 %v316_v5, %s1705_s27  ;;  %300 = vrot.lane.b32.xlu0 %v292_v6, %s1704_s26  ;;  %s1716_s26 = smov 123   ;;  %s1720_s27 = smov 53   ;;  %v700_v6 = vld [vmem:[%s2451_s0 + $0x10] sm:$0xf] }
  0x3a   :  { %154 = vrot.lane.b32.xlu1 %v1778_v1, %s1713_s17  ;;  %152 = vrot.lane.b32.xlu0 %v1769_v0, %s1713_s17 }
  0x3e   :  { %178 = vrot.lane.b32.xlu1 %v1778_v1, %s1714_s18  ;;  %176 = vrot.lane.b32.xlu0 %v1769_v0, %s1714_s18 }
  0x42   :  { %276 = vrot.lane.b32.xlu1 %v268_v7, %s1710_s6  ;;  %252 = vrot.lane.b32.xlu0 %v244_v8, %s1708_s30  ;;  %s1717_s30 = smov 126   ;;  %s1718_s6 = smov 125  }
  0x46   :  { %106 = vrot.lane.b32.xlu1 %v1778_v1, %s1715_s23  ;;  %104 = vrot.lane.b32.xlu0 %v1769_v0, %s1715_s23 }
  0x4a   :  { %130 = vrot.lane.b32.xlu1 %v1778_v1, %s1716_s26  ;;  %128 = vrot.lane.b32.xlu0 %v1769_v0, %s1716_s26 }
  0x4e   :  { %228 = vrot.lane.b32.xlu1 %v220_v9, %s1712_s12  ;;  %204 = vrot.lane.b32.xlu0 %v196_v10, %s1711_s11  ;;  %s1719_s11 = smov 127   ;;  %s1727_s12 = smov 67  }
  0x52   :  { %58 = vrot.lane.b32.xlu1 %v1778_v1, %s1717_s30  ;;  %56 = vrot.lane.b32.xlu0 %v1769_v0, %s1717_s30 }
  0x56   :  { %82 = vrot.lane.b32.xlu1 %v1778_v1, %s1718_s6  ;;  %80 = vrot.lane.b32.xlu0 %v1769_v0, %s1718_s6 }
  0x5a   :  { %180 = vrot.lane.b32.xlu1 %v172_v11, %s1714_s18  ;;  %156 = vrot.lane.b32.xlu0 %v148_v12, %s1713_s17  ;;  %s1729_s17 = smov 78  }
  0x5e   :  { %33 = vrot.lane.b32.xlu1 %v1778_v1, %s1719_s11  ;;  %31 = vrot.lane.b32.xlu0 %v1769_v0, %s1719_s11 }
  0x62   :  { %132 = vrot.lane.b32.xlu1 %v124_v13, %s1716_s26  ;;  %108 = vrot.lane.b32.xlu0 %v100_v14, %s1715_s23 }
  0x66   :  { %84 = vrot.lane.b32.xlu1 %v76_v15, %s1718_s6  ;;  %60 = vrot.lane.b32.xlu0 %v52_v16, %s1717_s30  ;;  %s1724_s30 = smov 66   ;;  %s1725_s6 = smov 65  }
  0x6a   :  { %730 = vrot.lane.b32.xlu1 %v1778_v1, %s1720_s27  ;;  %728 = vrot.lane.b32.xlu0 %v1769_v0, %s1720_s27 }
  0x6e   :  { %754 = vrot.lane.b32.xlu1 %v1778_v1, %s1721_s7  ;;  %752 = vrot.lane.b32.xlu0 %v1769_v0, %s1721_s7 }
  0x72   :  { %680 = vrot.lane.b32.xlu1 %v1769_v0, %s1722_s8  ;;  %35 = vrot.lane.b32.xlu0 %v27_v17, %s1719_s11  ;;  %s1726_s11 = smov 68  }
  0x74   :  { %v369_v18 = vpop.permute.xlu1 %368  ;;  %v345_v19 = vpop.permute.xlu0 %344 }
  0x75   :  { %v374_v20 = vrot.slane %v369_v18, 4  ;;  %v350_v23 = vrot.slane %v345_v19, 4 }
  0x76   :  { %704 = vrot.lane.b32.xlu1 %v1769_v0, %s1723_s9  ;;  %682 = vrot.lane.b32.xlu0 %v1778_v1, %s1722_s8 }
  0x78   :  { %v1899_v21 = vpop.permute.xlu1 %370  ;;  %v1901_v22 = vpop.permute.xlu0 %346 }
  0x79   :  { %v375_v24 = vrot.slane %v1899_v21, 4  ;;  %v351_v25 = vrot.slane %v1901_v22, 4 }
  0x7a   :  { %632 = vrot.lane.b32.xlu1 %v1769_v0, %s1724_s30  ;;  %706 = vrot.lane.b32.xlu0 %v1778_v1, %s1723_s9 }
  0x7b   :  { %v353_v26 = vsel %vm40_vm0, %v350_v23, %v351_v25  ;;  %v377_v27 = vsel %vm40_vm0, %v374_v20, %v375_v24  ;;  %v628_v23 = vld [vmem:[%s2451_s0 + $0x10] sm:$0xf] }
  0x7c   :  { %v1915_v28 = vpop.permute.xlu1 %826  ;;  %v825_v29 = vpop.permute.xlu0 %824  ;;  %v355_v30 = vsel %vm354_vm1, %v345_v19, %v353_v26  ;;  %v379_v31 = vsel %vm378_vm2, %v369_v18, %v377_v27  ;;  %v1694_v26 = vld [vmem:[%s2452_s1 + $0x8] ss:$0 sps:$4 sm:$0xff]  }
  0x7d   :  { %v831_v32 = vrot.slane %v1915_v28, 4  ;;  %v830_v33 = vrot.slane %v825_v29, 4  ;;  %v1607_v34 = vcombine.high %v355_v30, %v379_v31  ;;  %v1606_v35 = vcombine.low %v355_v30, %v379_v31 }
  0x7e   :  { %656 = vrot.lane.b32.xlu1 %v1769_v0, %s1725_s6  ;;  %634 = vrot.lane.b32.xlu0 %v1778_v1, %s1724_s30 }
  0x7f   :  { %1314 = vmatprep.subr.bf16.mxu0 %v1607_v34  ;;  %v833_v41 = vsel %vm40_vm0, %v830_v33, %v831_v32 }
  0x80   :  { %v1927_v37 = vpop.permute.xlu1 %850  ;;  %1315 = vmatpush1.bf16.msra.mxu0 %v1606_v35  ;;  %v849_v38 = vpop.permute.xlu0 %848  ;;  %v835_v46 = vsel %vm834_vm3, %v825_v29, %v833_v41  ;;  %v652_v35 = vld [vmem:[%s2451_s0 + $0x10] sm:$0xf] }
  0x81   :  { %v855_v39 = vrot.slane %v1927_v37, 4  ;;  %v854_v40 = vrot.slane %v849_v38, 4 }
  0x82   :  { %732 = vrot.lane.b32.xlu1 %v724_v36, %s1720_s27  ;;  %658 = vrot.lane.b32.xlu0 %v1778_v1, %s1725_s6 }
  0x83   :  { %v857_v43 = vsel %vm40_vm0, %v854_v40, %v855_v39 }
  0x84   :  { %v1942_v44 = vpop.permute.xlu1 %298  ;;  %v297_v45 = vpop.permute.xlu0 %296  ;;  %v859_v47 = vsel %vm858_vm4, %v849_v38, %v857_v43 }
  0x85   :  { %v303_v48 = vrot.slane %v1942_v44, 4  ;;  %v302_v49 = vrot.slane %v297_v45, 4  ;;  %v1647_v50 = vcombine.high %v835_v46, %v859_v47  ;;  %v1646_v51 = vcombine.low %v835_v46, %v859_v47 }
  0x86   :  { %584 = vrot.lane.b32.xlu1 %v1769_v0, %s1726_s11  ;;  %756 = vrot.lane.b32.xlu0 %v748_v42, %s1721_s7 }
  0x87   :  { %1367 = vmatprep.subr.bf16.mxu1 %v1647_v50  ;;  %v305_v54 = vsel %vm40_vm0, %v302_v49, %v303_v48 }
  0x88   :  { %1368 = vmatpush1.bf16.msra.mxu1 %v1646_v51  ;;  %v1950_v52 = vpop.permute.xlu1 %322  ;;  %v321_v53 = vpop.permute.xlu0 %320  ;;  %v307_v59 = vsel %vm306_vm5, %v297_v45, %v305_v54 }
  0x89   :  { %v327_v55 = vrot.slane %v1950_v52, 4  ;;  %v326_v56 = vrot.slane %v321_v53, 4 }
  0x8a   :  { %608 = vrot.lane.b32.xlu1 %v1769_v0, %s1727_s12  ;;  %586 = vrot.lane.b32.xlu0 %v1778_v1, %s1726_s11 }
  0x8b   :  { %v329_v57 = vsel %vm40_vm0, %v326_v56, %v327_v55 }
  0x8c   :  { %v331_v60 = vsel %vm330_vm6, %v321_v53, %v329_v57  ;;  %v1968_v61 = vpop.permute.xlu1 %778  ;;  %v777_v62 = vpop.permute.xlu0 %776 }
  0x8d   :  { %v783_v63 = vrot.slane %v1968_v61, 4  ;;  %v782_v3 = vrot.slane %v777_v62, 4  ;;  %v1603_v4 = vcombine.high %v307_v59, %v331_v60  ;;  %v1602_v5 = vcombine.low %v307_v59, %v331_v60 }
  0x8e   :  { %684 = vrot.lane.b32.xlu1 %v676_v58, %s1722_s8  ;;  %610 = vrot.lane.b32.xlu0 %v1778_v1, %s1727_s12 }
  0x8f   :  { %1316 = vmatprep.subr.bf16.mxu0 %v1603_v4  ;;  %v785_v9 = vsel %vm40_vm0, %v782_v3, %v783_v63  ;;  %v604_v4 = vld [vmem:[%s2451_s0 + $0x10] sm:$0xf] }
  0x90   :  { %v1977_v7 = vpop.permute.xlu1 %802  ;;  %1317 = vmatpush1.bf16.msra.mxu0 %v1602_v5  ;;  %v801_v8 = vpop.permute.xlu0 %800  ;;  %v787_v13 = vsel %vm786_vm7, %v777_v62, %v785_v9 }
  0x91   :  { %v807_v10 = vrot.slane %v1977_v7, 4  ;;  %v806_v11 = vrot.slane %v801_v8, 4 }
  0x92   :  { %536 = vrot.lane.b32.xlu1 %v1769_v0, %s1728_s22  ;;  %708 = vrot.lane.b32.xlu0 %v700_v6, %s1723_s9  ;;  %s1730_s9 = smov 81  }
  0x93   :  { %v809_v12 = vsel %vm40_vm0, %v806_v11, %v807_v10 }
  0x94   :  { %v811_v14 = vsel %vm810_vm8, %v801_v8, %v809_v12  ;;  %v1991_v15 = vpop.permute.xlu1 %250  ;;  %v249_v16 = vpop.permute.xlu0 %248 }
  0x95   :  { %v1642_v17 = vcombine.low %v787_v13, %v811_v14  ;;  %v1643_v18 = vcombine.high %v787_v13, %v811_v14  ;;  %v255_v19 = vrot.slane %v1991_v15, 4  ;;  %v254_v20 = vrot.slane %v249_v16, 4 }
  0x96   :  { %560 = vrot.lane.b32.xlu1 %v1769_v0, %s1729_s17  ;;  %538 = vrot.lane.b32.xlu0 %v1778_v1, %s1728_s22 }
  0x97   :  { %1369 = vmatprep.subr.bf16.mxu1 %v1643_v18  ;;  %v257_v30 = vsel %vm40_vm0, %v254_v20, %v255_v19 }
  0x98   :  { %1370 = vmatpush1.bf16.msra.mxu1 %v1642_v17  ;;  %v2004_v27 = vpop.permute.xlu1 %274  ;;  %v273_v29 = vpop.permute.xlu0 %272  ;;  %v259_v36 = vsel %vm258_vm9, %v249_v16, %v257_v30 }
  0x99   :  { %v279_v31 = vrot.slane %v2004_v27, 4  ;;  %v278_v33 = vrot.slane %v273_v29, 4 }
  0x9a   :  { %636 = vrot.lane.b32.xlu1 %v628_v23, %s1724_s30  ;;  %562 = vrot.lane.b32.xlu0 %v1778_v1, %s1729_s17  ;;  %s1731_s30 = smov 80  }
  0x9b   :  { %v281_v34 = vsel %vm40_vm0, %v278_v33, %v279_v31  ;;  %1650 = vmatmul.mubr.msk.bf16.vlgmr.msra.gmra.mxu1 %vm1310_vm10, %v1694_v26 }
  0x9c   :  { %v283_v38 = vsel %vm282_vm11, %v273_v29, %v281_v34  ;;  %v373_v40 = vpop.permute.xlu1 %372  ;;  %v349_v41 = vpop.permute.xlu0 %348 }
  0x9d   :  { %v1598_v42 = vcombine.low %v259_v36, %v283_v38  ;;  %v1599_v43 = vcombine.high %v259_v36, %v283_v38  ;;  %v376_v45 = vrot.slane %v373_v40, 4  ;;  %v352_v46 = vrot.slane %v349_v41, 4  ;;  %v556_v40 = vld [vmem:[%s2451_s0 + $0x10] sm:$0xf] }
  0x9e   :  { %488 = vrot.lane.b32.xlu1 %v1769_v0, %s1730_s9  ;;  %660 = vrot.lane.b32.xlu0 %v652_v35, %s1725_s6 }
  0x9f   :  { %v380_v47 = vsel %vm40_vm0, %v375_v24, %v376_v45  ;;  %v356_v49 = vsel %vm40_vm0, %v351_v25, %v352_v46  ;;  %1318 = vmatprep.subr.bf16.mxu0 %v1599_v43 }
  0xa0   :  { %1319 = vmatpush1.bf16.msra.mxu0 %v1598_v42  ;;  %v2031_v50 = vpop.permute.xlu1 %202  ;;  %v201_v51 = vpop.permute.xlu0 %200  ;;  %v357_v53 = vsel %vm354_vm1, %v1901_v22, %v356_v49  ;;  %v381_v54 = vsel %vm378_vm2, %v1899_v21, %v380_v47  ;;  %v580_v22 = vld [vmem:[%s2451_s0 + $0x10] sm:$0xf]  ;;  %vm114_vm1 = vcmask 1014784   ;;  %vm138_vm2 = vcmask 1006592  }
  0xa1   :  { %v207_v56 = vrot.slane %v2031_v50, 4  ;;  %v206_v57 = vrot.slane %v201_v51, 4  ;;  %v1608_v58 = vcombine.low %v357_v53, %v381_v54  ;;  %v1609_v24 = vcombine.high %v357_v53, %v381_v54 }
  0xa2   :  { %512 = vrot.lane.b32.xlu1 %v1769_v0, %s1731_s30  ;;  %490 = vrot.lane.b32.xlu0 %v1778_v1, %s1730_s9 }
  0xa3   :  { %1396 = vmatprep.subr.bf16.mxu1 %v1609_v24  ;;  %v209_v59 = vsel %vm40_vm0, %v206_v57, %v207_v56  ;;  %v2114_v57 = vld [vmem:[%s2452_s1] sm:$0xff] }
  0xa4   :  { %1397 = vmatpush1.bf16.msra.mxu1 %v1608_v58  ;;  %v2045_v21 = vpop.permute.xlu1 %226  ;;  %v225_v25 = vpop.permute.xlu0 %224  ;;  %v211_v5 = vsel %vm210_vm12, %v201_v51, %v209_v59 }
  0xa5   :  { %v231_v60 = vrot.slane %v2045_v21, 4  ;;  %v230_v62 = vrot.slane %v225_v25, 4 }
  0xa6   :  { %588 = vrot.lane.b32.xlu1 %v580_v22, %s1726_s11  ;;  %514 = vrot.lane.b32.xlu0 %v1778_v1, %s1731_s30  ;;  %s1733_s11 = smov 82  }
  0xa7   :  { %v233_v3 = vsel %vm40_vm0, %v230_v62, %v231_v60 }
  0xa8   :  { %v235_v6 = vsel %vm234_vm13, %v225_v25, %v233_v3  ;;  %v325_v8 = vpop.permute.xlu1 %324  ;;  %v301_v9 = vpop.permute.xlu0 %300  ;;  %v1576_v25 = vcombine.high %v2114_v57, %v2114_v57 }
  0xa9   :  { %v1594_v11 = vcombine.low %v211_v5, %v235_v6  ;;  %v1595_v12 = vcombine.high %v211_v5, %v235_v6  ;;  %v328_v13 = vrot.slane %v325_v8, 4  ;;  %v304_v14 = vrot.slane %v301_v9, 4 }
  0xaa   :  { %440 = vrot.lane.b32.xlu1 %v1769_v0, %s1732_s15  ;;  %612 = vrot.lane.b32.xlu0 %v604_v4, %s1727_s12 }
  0xab   :  { %v332_v16 = vsel %vm40_vm0, %v327_v55, %v328_v13  ;;  %v308_v17 = vsel %vm40_vm0, %v303_v48, %v304_v14  ;;  %1320 = vmatprep.subr.bf16.mxu0 %v1595_v12  ;;  %1346 = vmatprep.mubr.bf16.mxu0 %v1576_v25  ;;  %v508_v12 = vld [vmem:[%s2451_s0 + $0x10] sm:$0xf] }
  0xac   :  { %1321 = vmatpush1.bf16.msra.mxu0 %v1594_v11  ;;  %v2071_v18 = vpop.permute.xlu1 %154  ;;  %v153_v20 = vpop.permute.xlu0 %152  ;;  %v309_v23 = vsel %vm306_vm5, %v1942_v44, %v308_v17  ;;  %v333_v26 = vsel %vm330_vm6, %v1950_v52, %v332_v16  ;;  %v532_v44 = vld [vmem:[%s2451_s0 + $0x10] sm:$0xf]  ;;  %1428 = vmatprep.mubr.bf16.mxu1 %v1576_v25  ;;  %vm66_vm5 = vcmask 1031168   ;;  %vm90_vm6 = vcmask 1022976  }
  0xad   :  { %v159_v29 = vrot.slane %v2071_v18, 4  ;;  %v158_v30 = vrot.slane %v153_v20, 4  ;;  %v1604_v33 = vcombine.low %v309_v23, %v333_v26  ;;  %v1605_v55 = vcombine.high %v309_v23, %v333_v26  ;;  %v436_v11 = vld [vmem:[%s2451_s0 + $0x10] sm:$0xf] }
  0xae   :  { %464 = vrot.lane.b32.xlu1 %v1769_v0, %s1733_s11  ;;  %442 = vrot.lane.b32.xlu0 %v1778_v1, %s1732_s15 }
  0xaf   :  { %1398 = vmatprep.subr.bf16.mxu1 %v1605_v55  ;;  %v161_v34 = vsel %vm40_vm0, %v158_v30, %v159_v29  ;;  %v820_v55 = vld [vmem:[%s2451_s0 + $0x10] sm:$0xf] }
  0xb0   :  { %1399 = vmatpush1.bf16.msra.mxu1 %v1604_v33  ;;  %v2085_v48 = vpop.permute.xlu1 %178  ;;  %v177_v52 = vpop.permute.xlu0 %176  ;;  %v163_v41 = vsel %vm162_vm14, %v153_v20, %v161_v34 }
  0xb1   :  { %v183_v35 = vrot.slane %v2085_v48, 4  ;;  %v182_v36 = vrot.slane %v177_v52, 4 }
  0xb2   :  { %540 = vrot.lane.b32.xlu1 %v532_v44, %s1728_s22  ;;  %466 = vrot.lane.b32.xlu0 %v1778_v1, %s1733_s11  ;;  %v460_v44 = vld [vmem:[%s2451_s0 + $0x10] sm:$0xf] }
  0xb3   :  { %v185_v38 = vsel %vm40_vm0, %v182_v36, %v183_v35 }
  0xb4   :  { %v187_v42 = vsel %vm186_vm15, %v177_v52, %v185_v38  ;;  %v277_v43 = vpop.permute.xlu1 %276  ;;  %v253_v45 = vpop.permute.xlu0 %252 }
  0xb5   :  { %v1590_v46 = vcombine.low %v163_v41, %v187_v42  ;;  %v1591_v47 = vcombine.high %v163_v41, %v187_v42  ;;  %v280_v49 = vrot.slane %v277_v43, 4  ;;  %v256_v51 = vrot.slane %v253_v45, 4  ;;  %v388_v42 = vld [vmem:[%s2451_s0 + $0x10] sm:$0xf] }
  0xb6   :  { %392 = vrot.lane.b32.xlu1 %v1769_v0, %s1734_s21  ;;  %564 = vrot.lane.b32.xlu0 %v556_v40, %s1729_s17  ;;  %s1735_s17 = smov 93  }
  0xb7   :  { %v284_v53 = vsel %vm40_vm0, %v279_v31, %v280_v49  ;;  %v260_v54 = vsel %vm40_vm0, %v255_v19, %v256_v51  ;;  %1322 = vmatprep.subr.bf16.mxu0 %v1591_v47  ;;  %v772_v51 = vld [vmem:[%s2451_s0 + $0x10] sm:$0xf] }
  0xb8   :  { %1323 = vmatpush1.bf16.msra.mxu0 %v1590_v46  ;;  %v2116_v58 = vpop.permute.xlu1 %106  ;;  %v105_v24 = vpop.permute.xlu0 %104  ;;  %v261_v22 = vsel %vm258_vm9, %v1991_v15, %v260_v54  ;;  %v285_v31 = vsel %vm282_vm11, %v2004_v27, %v284_v53  ;;  %v484_v15 = vld [vmem:[%s2451_s0 + $0x10] sm:$0xf]  ;;  %vm42_vm9 = vcmask 1039360   ;;  %vm738_vm11 = vcmask 433152  }
  0xb9   :  { %v111_v19 = vrot.slane %v2116_v58, 4  ;;  %v110_v59 = vrot.slane %v105_v24, 4  ;;  %v1600_v62 = vcombine.low %v261_v22, %v285_v31  ;;  %v1601_v3 = vcombine.high %v261_v22, %v285_v31  ;;  %v412_v53 = vld [vmem:[%s2451_s0 + $0x10] sm:$0xf] }
  0xba   :  { %416 = vrot.lane.b32.xlu1 %v1769_v0, %s1735_s17  ;;  %394 = vrot.lane.b32.xlu0 %v1778_v1, %s1734_s21 }
  0xbb   :  { %1400 = vmatprep.subr.bf16.mxu1 %v1601_v3  ;;  %v113_v5 = vsel %vm40_vm0, %v110_v59, %v111_v19 }
  0xbc   :  { %1401 = vmatpush1.bf16.msra.mxu1 %v1600_v62  ;;  %v2132_v27 = vpop.permute.xlu1 %130  ;;  %v129_v4 = vpop.permute.xlu0 %128  ;;  %v115_v13 = vsel %vm114_vm1, %v105_v24, %v113_v5  ;;  %v796_v5 = vld [vmem:[%s2451_s0 + $0x10] sm:$0xf] }
  0xbd   :  { %v135_v6 = vrot.slane %v2132_v27, 4  ;;  %v134_v8 = vrot.slane %v129_v4, 4 }
  0xbe   :  { %492 = vrot.lane.b32.xlu1 %v484_v15, %s1730_s9  ;;  %418 = vrot.lane.b32.xlu0 %v1778_v1, %s1735_s17 }
  0xbf   :  { %v137_v9 = vsel %vm40_vm0, %v134_v8, %v135_v6 }
  0xc0   :  { %v139_v14 = vsel %vm138_vm2, %v129_v4, %v137_v9  ;;  %v229_v16 = vpop.permute.xlu1 %228  ;;  %v205_v17 = vpop.permute.xlu0 %204 }
  0xc1   :  { %v1586_v20 = vcombine.low %v115_v13, %v139_v14  ;;  %v1587_v1 = vcombine.high %v115_v13, %v139_v14  ;;  %v232_v23 = vrot.slane %v229_v16, 4  ;;  %v208_v26 = vrot.slane %v205_v17, 4 }
  0xc2   :  { %444 = vrot.lane.b32.xlu1 %v436_v11, %s1732_s15  ;;  %516 = vrot.lane.b32.xlu0 %v508_v12, %s1731_s30 }
  0xc3   :  { %v236_v30 = vsel %vm40_vm0, %v231_v60, %v232_v23  ;;  %v212_v33 = vsel %vm40_vm0, %v207_v56, %v208_v26  ;;  %1324 = vmatprep.subr.bf16.mxu0 %v1587_v1 }
  0xc4   :  { %1325 = vmatpush1.bf16.msra.mxu0 %v1586_v20  ;;  %v2166_v52 = vpop.permute.xlu1 %58  ;;  %v57_v34 = vpop.permute.xlu0 %56  ;;  %v213_v60 = vsel %vm210_vm12, %v2031_v50, %v212_v33  ;;  %v237_v36 = vsel %vm234_vm13, %v2045_v21, %v236_v30  ;;  %v844_v50 = vld [vmem:[%s2451_s0 + $0x10] sm:$0xf]  ;;  %vm762_vm12 = vcmask 424960   ;;  %vm690_vm13 = vcmask 523264  }
  0xc5   :  { %v63_v56 = vrot.slane %v2166_v52, 4  ;;  %v62_v38 = vrot.slane %v57_v34, 4  ;;  %v1596_v40 = vcombine.low %v213_v60, %v237_v36  ;;  %v1597_v41 = vcombine.high %v213_v60, %v237_v36 }
  0xc6   :  { %828 = vrot.lane.b32.xlu1 %v820_v55, %s1702_s24  ;;  %468 = vrot.lane.b32.xlu0 %v460_v44, %s1733_s11 }
  0xc7   :  { %1402 = vmatprep.subr.bf16.mxu1 %v1597_v41  ;;  %v65_v45 = vsel %vm40_vm0, %v62_v38, %v63_v56 }
  0xc8   :  { %1403 = vmatpush1.bf16.msra.mxu1 %v1596_v40  ;;  %v2181_v21 = vpop.permute.xlu1 %82  ;;  %v81_v43 = vpop.permute.xlu0 %80  ;;  %v67_v54 = vsel %vm66_vm5, %v57_v34, %v65_v45 }
  0xc9   :  { %v87_v46 = vrot.slane %v2181_v21, 4  ;;  %v86_v47 = vrot.slane %v81_v43, 4 }
  0xca   :  { %396 = vrot.lane.b32.xlu1 %v388_v42, %s1734_s21  ;;  %852 = vrot.lane.b32.xlu0 %v844_v50, %s1703_s25 }
  0xcb   :  { %v89_v49 = vsel %vm40_vm0, %v86_v47, %v87_v46 }
  0xcc   :  { %v91_v24 = vsel %vm90_vm6, %v81_v43, %v89_v49  ;;  %v181_v22 = vpop.permute.xlu1 %180  ;;  %v157_v31 = vpop.permute.xlu0 %156 }
  0xcd   :  { %v1582_v25 = vcombine.low %v67_v54, %v91_v24  ;;  %v1583_v59 = vcombine.high %v67_v54, %v91_v24  ;;  %v184_v62 = vrot.slane %v181_v22, 4  ;;  %v160_v3 = vrot.slane %v157_v31, 4 }
  0xce   :  { %780 = vrot.lane.b32.xlu1 %v772_v51, %s1706_s28  ;;  %420 = vrot.lane.b32.xlu0 %v412_v53, %s1735_s17 }
  0xcf   :  { %v188_v15 = vsel %vm40_vm0, %v183_v35, %v184_v62  ;;  %v164_v4 = vsel %vm40_vm0, %v159_v29, %v160_v3  ;;  %1326 = vmatprep.subr.bf16.mxu0 %v1583_v59  ;;  %v22_v62 = vld [vmem:[%s2451_s0 + $0x8] sm:$0xff] }
  0xd0   :  { %1327 = vmatpush1.bf16.msra.mxu0 %v1582_v25  ;;  %v2209_v8 = vpop.permute.xlu1 %33  ;;  %v32_v9 = vpop.permute.xlu0 %31  ;;  %v165_v11 = vsel %vm162_vm14, %v2071_v18, %v164_v4  ;;  %v189_v35 = vsel %vm186_vm15, %v2085_v48, %v188_v15  ;;  %vm714_vm14 = vcmask 515072   ;;  %vm642_vm15 = vcmask 539648  }
  0xd1   :  { %v38_v12 = vrot.slane %v2209_v8, 4  ;;  %v37_v13 = vrot.slane %v32_v9, 4  ;;  %v1592_v29 = vcombine.low %v165_v11, %v189_v35  ;;  %v1593_v14 = vcombine.high %v165_v11, %v189_v35 }
  0xd2   :  { %804 = vrot.lane.b32.xlu0 %v796_v5, %s1707_s29 }
  0xd3   :  { %v41_v16 = vsel %vm40_vm0, %v37_v13, %v38_v12  ;;  %1404 = vmatprep.subr.bf16.mxu1 %v1593_v14 }
  0xd4   :  { %v43_v17 = vsel %vm42_vm9, %v32_v9, %v41_v16  ;;  %1405 = vmatpush1.bf16.msra.mxu1 %v1592_v29  ;;  %v133_v20 = vpop.permute.xlu1 %132  ;;  %v109_v1 = vpop.permute.xlu0 %108 }
  0xd5   :  { %v1578_v18 = vcombine.low %v1769_v0, %v43_v17  ;;  %v1579_v23 = vcombine.high %v1769_v0, %v43_v17  ;;  %v136_v48 = vrot.slane %v133_v20, 4  ;;  %v112_v26 = vrot.slane %v109_v1, 4 }
  0xd7   :  { %v140_v30 = vsel %vm40_vm0, %v135_v6, %v136_v48  ;;  %v116_v33 = vsel %vm40_vm0, %v111_v19, %v112_v26  ;;  %1328 = vmatprep.subr.bf16.mxu0 %v1579_v23 }
  0xd8   :  { %v85_v55 = vpop.permute.xlu1 %84  ;;  %v61_v44 = vpop.permute.xlu0 %60  ;;  %1329 = vmatpush1.bf16.msra.mxu0 %v1578_v18  ;;  %v117_v34 = vsel %vm114_vm1, %v2116_v58, %v116_v33  ;;  %v141_v0 = vsel %vm138_vm2, %v2132_v27, %v140_v30  ;;  %vm666_vm1 = vcmask 531456   ;;  %vm594_vm2 = vcmask 556032  }
  0xd9   :  { %v88_v60 = vrot.slane %v85_v55, 4  ;;  %v64_v36 = vrot.slane %v61_v44, 4  ;;  %v1588_v38 = vcombine.low %v117_v34, %v141_v0  ;;  %v1589_v40 = vcombine.high %v117_v34, %v141_v0 }
  0xdb   :  { %v92_v6 = vsel %vm40_vm0, %v87_v46, %v88_v60  ;;  %v68_v19 = vsel %vm40_vm0, %v63_v56, %v64_v36  ;;  %1406 = vmatprep.subr.bf16.mxu1 %v1589_v40 }
  0xdc   :  { %v2235_v41 = vpop.permute.xlu1 %730  ;;  %1407 = vmatpush1.bf16.msra.mxu1 %v1588_v38  ;;  %v729_v42 = vpop.permute.xlu0 %728  ;;  %v69_v58 = vsel %vm66_vm5, %v2166_v52, %v68_v19  ;;  %v93_v27 = vsel %vm90_vm6, %v2181_v21, %v92_v6  ;;  %vm618_vm5 = vcmask 547840   ;;  %vm546_vm6 = vcmask 646144  }
  0xdd   :  { %v735_v50 = vrot.slane %v2235_v41, 4  ;;  %v734_v43 = vrot.slane %v729_v42, 4  ;;  %v1584_v45 = vcombine.low %v69_v58, %v93_v27  ;;  %v1585_v46 = vcombine.high %v69_v58, %v93_v27 }
  0xdf   :  { %1408 = vmatprep.subr.bf16.mxu1 %v1585_v46  ;;  %v737_v49 = vsel %vm40_vm0, %v734_v43, %v735_v50 }
  0xe0   :  { %v2242_v47 = vpop.permute.xlu1 %754  ;;  %1409 = vmatpush1.bf16.msra.mxu1 %v1584_v45  ;;  %v753_v56 = vpop.permute.xlu0 %752  ;;  %v739_v53 = vsel %vm738_vm11, %v729_v42, %v737_v49 }
  0xe1   :  { %v759_v52 = vrot.slane %v2242_v47, 4  ;;  %v758_v51 = vrot.slane %v753_v56, 4 }
  0xe3   :  { %v761_v21 = vsel %vm40_vm0, %v758_v51, %v759_v52 }
  0xe4   :  { %v763_v54 = vsel %vm762_vm12, %v753_v56, %v761_v21  ;;  %v681_v24 = vpop.permute.xlu1 %680  ;;  %v36_v22 = vpop.permute.xlu0 %35 }
  0xe5   :  { %v1638_v31 = vcombine.low %v739_v53, %v763_v54  ;;  %v1639_v25 = vcombine.high %v739_v53, %v763_v54  ;;  %v39_v59 = vrot.slane %v36_v22, 4  ;;  %v686_v9 = vrot.slane %v681_v24, 4 }
  0xe7   :  { %v44_v3 = vsel %vm40_vm0, %v38_v12, %v39_v59  ;;  %1330 = vmatprep.subr.bf16.mxu0 %v1639_v25 }
  0xe8   :  { %v705_v15 = vpop.permute.xlu1 %704  ;;  %v2255_v4 = vpop.permute.xlu0 %682  ;;  %1331 = vmatpush2.bf16.msra.mxu0 %v1638_v31  ;;  %v45_v5 = vsel %vm42_vm9, %v2209_v8, %v44_v3  ;;  %vm570_vm9 = vcmask 637952  }
  0xe9   :  { %v687_v11 = vrot.slane %v2255_v4, 4  ;;  %v1580_v35 = vcombine.low %v22_v62, %v45_v5  ;;  %v1581_v13 = vcombine.high %v22_v62, %v45_v5  ;;  %v710_v29 = vrot.slane %v705_v15, 4 }
  0xeb   :  { %1410 = vmatprep.subr.bf16.mxu1 %v1581_v13  ;;  %v689_v12 = vsel %vm40_vm0, %v686_v9, %v687_v11 }
  0xec   :  { %v633_v14 = vpop.permute.xlu1 %632  ;;  %v2260_v16 = vpop.permute.xlu0 %706  ;;  %1411 = vmatpush1.bf16.msra.mxu1 %v1580_v35  ;;  %v691_v18 = vsel %vm690_vm13, %v681_v24, %v689_v12 }
  0xed   :  { %v711_v17 = vrot.slane %v2260_v16, 4  ;;  %v638_v48 = vrot.slane %v633_v14, 4 }
  0xef   :  { %v713_v8 = vsel %vm40_vm0, %v710_v29, %v711_v17 }
  0xf0   :  { %v657_v20 = vpop.permute.xlu1 %656  ;;  %v2267_v1 = vpop.permute.xlu0 %634  ;;  %v715_v23 = vsel %vm714_vm14, %v705_v15, %v713_v8 }
  0xf1   :  { %v639_v26 = vrot.slane %v2267_v1, 4  ;;  %v1635_v30 = vcombine.high %v691_v18, %v715_v23  ;;  %v1634_v33 = vcombine.low %v691_v18, %v715_v23  ;;  %v662_v55 = vrot.slane %v657_v20, 4 }
  0xf3   :  { %1332 = vmatprep.subr.bf16.mxu0 %v1635_v30  ;;  %v641_v0 = vsel %vm40_vm0, %v638_v48, %v639_v26 }
  0xf4   :  { %v733_v44 = vpop.permute.xlu1 %732  ;;  %v2272_v34 = vpop.permute.xlu0 %658  ;;  %1333 = vmatpush2.bf16.msra.mxu0 %v1634_v33  ;;  %v643_v19 = vsel %vm642_vm15, %v633_v14, %v641_v0 }
  0xf5   :  { %v736_v60 = vrot.slane %v733_v44, 4  ;;  %v663_v36 = vrot.slane %v2272_v34, 4 }
  0xf7   :  { %v665_v38 = vsel %vm40_vm0, %v662_v55, %v663_v36  ;;  %v740_v58 = vsel %vm40_vm0, %v735_v50, %v736_v60 }
  0xf8   :  { %v585_v40 = vpop.permute.xlu1 %584  ;;  %v757_v6 = vpop.permute.xlu0 %756  ;;  %v667_v42 = vsel %vm666_vm1, %v657_v20, %v665_v38  ;;  %v741_v51 = vsel %vm738_vm11, %v2235_v41, %v740_v58  ;;  %vm498_vm11 = vcmask 662528  }
  0xf9   :  { %v760_v27 = vrot.slane %v757_v6, 4  ;;  %v1631_v43 = vcombine.high %v643_v19, %v667_v42  ;;  %v1630_v45 = vcombine.low %v643_v19, %v667_v42  ;;  %v590_v53 = vrot.slane %v585_v40, 4 }
  0xfb   :  { %v764_v46 = vsel %vm40_vm0, %v759_v52, %v760_v27  ;;  %1334 = vmatprep.subr.bf16.mxu0 %v1631_v43 }
  0xfc   :  { %v609_v56 = vpop.permute.xlu1 %608  ;;  %v2287_v49 = vpop.permute.xlu0 %586  ;;  %1335 = vmatpush2.bf16.msra.mxu0 %v1630_v45  ;;  %v765_v21 = vsel %vm762_vm12, %v2242_v47, %v764_v46  ;;  %vm522_vm12 = vcmask 654336  }
  0xfd   :  { %v591_v54 = vrot.slane %v2287_v49, 4  ;;  %v1640_v50 = vcombine.low %v741_v51, %v765_v21  ;;  %v1641_v24 = vcombine.high %v741_v51, %v765_v21  ;;  %v614_v22 = vrot.slane %v609_v56, 4 }
  0xff   :  { %1412 = vmatprep.subr.bf16.mxu1 %v1641_v24  ;;  %v593_v25 = vsel %vm40_vm0, %v590_v53, %v591_v54 }
 0x100   :  { %v685_v31 = vpop.permute.xlu1 %684  ;;  %v2294_v52 = vpop.permute.xlu0 %610  ;;  %1413 = vmatpush2.bf16.msra.mxu1 %v1640_v50  ;;  %v595_v15 = vsel %vm594_vm2, %v585_v40, %v593_v25 }
 0x101   :  { %v688_v41 = vrot.slane %v685_v31, 4  ;;  %v615_v59 = vrot.slane %v2294_v52, 4 }
 0x103   :  { %v617_v47 = vsel %vm40_vm0, %v614_v22, %v615_v59  ;;  %v692_v9 = vsel %vm40_vm0, %v687_v11, %v688_v41 }
 0x104   :  { %v537_v62 = vpop.permute.xlu1 %536  ;;  %v709_v3 = vpop.permute.xlu0 %708  ;;  %v619_v5 = vsel %vm618_vm5, %v609_v56, %v617_v47  ;;  %v693_v20 = vsel %vm690_vm13, %v2255_v4, %v692_v9  ;;  %vm450_vm13 = vcmask 678912  }
 0x105   :  { %v712_v35 = vrot.slane %v709_v3, 4  ;;  %v1627_v13 = vcombine.high %v595_v15, %v619_v5  ;;  %v1626_v29 = vcombine.low %v595_v15, %v619_v5  ;;  %v542_v23 = vrot.slane %v537_v62, 4 }
 0x107   :  { %v716_v14 = vsel %vm40_vm0, %v711_v17, %v712_v35  ;;  %1336 = vmatprep.subr.bf16.mxu0 %v1627_v13 }
 0x108   :  { %v561_v12 = vpop.permute.xlu1 %560  ;;  %v2309_v8 = vpop.permute.xlu0 %538  ;;  %1337 = vmatpush2.bf16.msra.mxu0 %v1626_v29  ;;  %v717_v18 = vsel %vm714_vm14, %v2260_v16, %v716_v14  ;;  %vm474_vm14 = vcmask 670720  }
 0x109   :  { %v543_v48 = vrot.slane %v2309_v8, 4  ;;  %v1636_v11 = vcombine.low %v693_v20, %v717_v18  ;;  %v1637_v30 = vcombine.high %v693_v20, %v717_v18  ;;  %v566_v33 = vrot.slane %v561_v12, 4 }
 0x10b   :  { %1414 = vmatprep.subr.bf16.mxu1 %v1637_v30  ;;  %v545_v44 = vsel %vm40_vm0, %v542_v23, %v543_v48 }
 0x10c   :  { %v637_v55 = vpop.permute.xlu1 %636  ;;  %v2316_v17 = vpop.permute.xlu0 %562  ;;  %1415 = vmatpush2.bf16.msra.mxu1 %v1636_v11  ;;  %v547_v40 = vsel %vm546_vm6, %v537_v62, %v545_v44 }
 0x10d   :  { %v640_v4 = vrot.slane %v637_v55, 4  ;;  %v567_v0 = vrot.slane %v2316_v17, 4 }
 0x10f   :  { %v569_v16 = vsel %vm40_vm0, %v566_v33, %v567_v0  ;;  %v644_v19 = vsel %vm40_vm0, %v639_v26, %v640_v4 }
 0x110   :  { %v489_v60 = vpop.permute.xlu1 %488  ;;  %v661_v38 = vpop.permute.xlu0 %660  ;;  %v571_v6 = vsel %vm570_vm9, %v561_v12, %v569_v16  ;;  %v645_v56 = vsel %vm642_vm15, %v2267_v1, %v644_v19  ;;  %vm402_vm15 = vcmask 769024  }
 0x111   :  { %v664_v42 = vrot.slane %v661_v38, 4  ;;  %v1623_v58 = vcombine.high %v547_v40, %v571_v6  ;;  %v1622_v27 = vcombine.low %v547_v40, %v571_v6  ;;  %v494_v21 = vrot.slane %v489_v60, 4 }
 0x113   :  { %v668_v43 = vsel %vm40_vm0, %v663_v36, %v664_v42  ;;  %1338 = vmatprep.subr.bf16.mxu0 %v1623_v58 }
 0x114   :  { %v513_v45 = vpop.permute.xlu1 %512  ;;  %v2333_v46 = vpop.permute.xlu0 %490  ;;  %1339 = vmatpush2.bf16.msra.mxu0 %v1622_v27  ;;  %v669_v51 = vsel %vm666_vm1, %v2272_v34, %v668_v43  ;;  %vm426_vm1 = vcmask 760832  }
 0x115   :  { %v495_v26 = vrot.slane %v2333_v46, 4  ;;  %v1632_v53 = vcombine.low %v645_v56, %v669_v51  ;;  %v1633_v50 = vcombine.high %v645_v56, %v669_v51  ;;  %v518_v24 = vrot.slane %v513_v45, 4 }
 0x117   :  { %1416 = vmatprep.subr.bf16.mxu1 %v1633_v50  ;;  %v497_v31 = vsel %vm40_vm0, %v494_v21, %v495_v26 }
 0x118   :  { %v589_v22 = vpop.permute.xlu1 %588  ;;  %v2340_v36 = vpop.permute.xlu0 %514  ;;  %1417 = vmatpush2.bf16.msra.mxu1 %v1632_v53  ;;  %v499_v62 = vsel %vm498_vm11, %v489_v60, %v497_v31 }
 0x119   :  { %v592_v1 = vrot.slane %v589_v22, 4  ;;  %v519_v25 = vrot.slane %v2340_v36, 4 }
 0x11b   :  { %v521_v34 = vsel %vm40_vm0, %v518_v24, %v519_v25  ;;  %v596_v15 = vsel %vm40_vm0, %v591_v54, %v592_v1 }
 0x11c   :  { %v441_v41 = vpop.permute.xlu1 %440  ;;  %v613_v47 = vpop.permute.xlu0 %612  ;;  %v523_v3 = vsel %vm522_vm12, %v513_v45, %v521_v34  ;;  %v597_v12 = vsel %vm594_vm2, %v2287_v49, %v596_v15 }
 0x11d   :  { %v616_v5 = vrot.slane %v613_v47, 4  ;;  %v1619_v9 = vcombine.high %v499_v62, %v523_v3  ;;  %v1618_v35 = vcombine.low %v499_v62, %v523_v3  ;;  %v446_v18 = vrot.slane %v441_v41, 4 }
 0x11f   :  { %v620_v13 = vsel %vm40_vm0, %v615_v59, %v616_v5  ;;  %1340 = vmatprep.subr.bf16.mxu0 %v1619_v9 }
 0x120   :  { %v465_v29 = vpop.permute.xlu1 %464  ;;  %v2357_v14 = vpop.permute.xlu0 %442  ;;  %1341 = vmatpush2.bf16.msra.mxu0 %v1618_v35  ;;  %v621_v20 = vsel %vm618_vm5, %v2294_v52, %v620_v13  ;;  %v1575_v13 = vcombine.low %v2114_v57, %v2114_v57 }
 0x121   :  { %v447_v54 = vrot.slane %v2357_v14, 4  ;;  %v1628_v23 = vcombine.low %v597_v12, %v621_v20  ;;  %v1629_v11 = vcombine.high %v597_v12, %v621_v20  ;;  %v470_v30 = vrot.slane %v465_v29, 4 }
 0x123   :  { %1418 = vmatprep.subr.bf16.mxu1 %v1629_v11  ;;  %v449_v55 = vsel %vm40_vm0, %v446_v18, %v447_v54 }
 0x124   :  { %v541_v33 = vpop.permute.xlu1 %540  ;;  %v2364_v59 = vpop.permute.xlu0 %466  ;;  %1419 = vmatpush2.bf16.msra.mxu1 %v1628_v23  ;;  %v451_v60 = vsel %vm450_vm13, %v441_v41, %v449_v55 }
 0x125   :  { %v544_v44 = vrot.slane %v541_v33, 4  ;;  %v471_v49 = vrot.slane %v2364_v59, 4 }
 0x127   :  { %v473_v52 = vsel %vm40_vm0, %v470_v30, %v471_v49  ;;  %v548_v40 = vsel %vm40_vm0, %v543_v48, %v544_v44 }
 0x128   :  { %v393_v4 = vpop.permute.xlu1 %392  ;;  %v565_v16 = vpop.permute.xlu0 %564  ;;  %v475_v38 = vsel %vm474_vm14, %v465_v29, %v473_v52  ;;  %v549_v45 = vsel %vm546_vm6, %v2309_v8, %v548_v40 }
 0x129   :  { %v568_v6 = vrot.slane %v565_v16, 4  ;;  %v1615_v19 = vcombine.high %v451_v60, %v475_v38  ;;  %v1614_v42 = vcombine.low %v451_v60, %v475_v38  ;;  %v398_v51 = vrot.slane %v393_v4, 4 }
 0x12b   :  { %v572_v58 = vsel %vm40_vm0, %v567_v0, %v568_v6  ;;  %1342 = vmatprep.subr.bf16.mxu0 %v1615_v19 }
 0x12c   :  { %v417_v27 = vpop.permute.xlu1 %416  ;;  %v2377_v43 = vpop.permute.xlu0 %394  ;;  %1343 = vmatpush2.bf16.msra.mxu0 %v1614_v42  ;;  %v573_v56 = vsel %vm570_vm9, %v2316_v17, %v572_v58 }
 0x12d   :  { %v399_v48 = vrot.slane %v2377_v43, 4  ;;  %v1624_v21 = vcombine.low %v549_v45, %v573_v56  ;;  %v1625_v53 = vcombine.high %v549_v45, %v573_v56  ;;  %v422_v50 = vrot.slane %v417_v27, 4 }
 0x12f   :  { %1420 = vmatprep.subr.bf16.mxu1 %v1625_v53  ;;  %v401_v22 = vsel %vm40_vm0, %v398_v51, %v399_v48 }
 0x130   :  { %v493_v24 = vpop.permute.xlu1 %492  ;;  %v419_v0 = vpop.permute.xlu0 %418  ;;  %1421 = vmatpush2.bf16.msra.mxu1 %v1624_v21  ;;  %v403_v47 = vsel %vm402_vm15, %v393_v4, %v401_v22 }
 0x131   :  { %v496_v31 = vrot.slane %v493_v24, 4  ;;  %v423_v1 = vrot.slane %v419_v0, 4 }
 0x133   :  { %v425_v8 = vsel %vm40_vm0, %v422_v50, %v423_v1  ;;  %v500_v17 = vsel %vm40_vm0, %v495_v26, %v496_v31  ;;  %v1480_v31 = vlaneseq }
 0x134   :  { %v445_v34 = vpop.permute.xlu1 %444  ;;  %v517_v41 = vpop.permute.xlu0 %516  ;;  %v427_v62 = vsel %vm426_vm1, %v417_v27, %v425_v8  ;;  %v501_v20 = vsel %vm498_vm11, %v2333_v46, %v500_v17 }
 0x135   :  { %v448_v3 = vrot.slane %v445_v34, 4  ;;  %v520_v15 = vrot.slane %v517_v41, 4  ;;  %v1611_v5 = vcombine.high %v403_v47, %v427_v62  ;;  %v1610_v9 = vcombine.low %v403_v47, %v427_v62  ;;  %v1478_v41 = vld [vmem:[%s2453_s4] sm:$0xf] }
 0x136   :  { %v1481_v8 = vshrl.u32 %v1480_v31, 7 }
 0x137   :  { %v524_v35 = vsel %vm40_vm0, %v519_v25, %v520_v15  ;;  %1344 = vmatprep.subr.bf16.mxu0 %v1611_v5  ;;  %v452_v26 = vsel %vm40_vm0, %v447_v54, %v448_v3 }
 0x138   :  { %v829_v29 = vpop.permute.xlu1 %828  ;;  %v469_v12 = vpop.permute.xlu0 %468  ;;  %1345 = vmatpush2.bf16.msra.mxu0 %v1610_v9  ;;  %v525_v18 = vsel %vm522_vm12, %v2340_v36, %v524_v35  ;;  %v453_v46 = vsel %vm450_vm13, %v2357_v14, %v452_v26  ;;  %v1486_v17 = vsub.s32 1, %v1481_v8  ;;  %v1482_v34 = vsub.s32 0, %v1481_v8 }
 0x139   :  { %v832_v23 = vrot.slane %v829_v29, 4  ;;  %v472_v11 = vrot.slane %v469_v12, 4  ;;  %v1620_v30 = vcombine.low %v501_v20, %v525_v18  ;;  %v1621_v33 = vcombine.high %v501_v20, %v525_v18 }
 0x13a   :  { %v1487_v62 = vrot.slane %v1478_v41, %v1486_v17  ;;  %v1483_v15 = vrot.slane %v1478_v41, %v1482_v34  ;;  %v1490_v5 = vsub.s32 2, %v1481_v8 }
 0x13b   :  { %v476_v25 = vsel %vm40_vm0, %v471_v49, %v472_v11  ;;  %1347 = vmatmul.mubr.bf16.vlgmr.msra.gmra.mxu0 %v1575_v13  ;;  %1422 = vmatprep.subr.bf16.mxu1 %v1621_v33  ;;  %v836_v57 = vsel %vm40_vm0, %v831_v32, %v832_v23 }
 0x13c   :  { %v397_v54 = vpop.permute.xlu1 %396  ;;  %v853_v55 = vpop.permute.xlu0 %852  ;;  %1423 = vmatpush2.bf16.msra.mxu1 %v1620_v30  ;;  %v477_v36 = vsel %vm474_vm14, %v2364_v59, %v476_v25  ;;  %1469 = vmatprep.mubr.bf16.mxu0 %v1709_v2  ;;  %v837_v14 = vsel %vm834_vm3, %v1915_v28, %v836_v57  ;;  %v1491_v12 = vrot.slane %v1478_v41, %v1490_v5 }
 0x13d   :  { %v400_v44 = vrot.slane %v397_v54, 4  ;;  %v856_v52 = vrot.slane %v853_v55, 4  ;;  %v1616_v49 = vcombine.low %v453_v46, %v477_v36  ;;  %v1617_v4 = vcombine.high %v453_v46, %v477_v36 }
 0x13f   :  { %v860_v16 = vsel %vm40_vm0, %v855_v39, %v856_v52  ;;  %1424 = vmatprep.subr.bf16.mxu1 %v1617_v4  ;;  %v404_v32 = vsel %vm40_vm0, %v399_v48, %v400_v44 }
 0x140   :  { %v781_v60 = vpop.permute.xlu1 %780  ;;  %v421_v38 = vpop.permute.xlu0 %420  ;;  %1425 = vmatpush2.bf16.msra.mxu1 %v1616_v49  ;;  %v861_v2 = vsel %vm858_vm4, %v1927_v37, %v860_v16  ;;  %v405_v58 = vsel %vm402_vm15, %v2377_v43, %v404_v32 }
 0x141   :  { %v784_v59 = vrot.slane %v781_v60, 4  ;;  %v424_v40 = vrot.slane %v421_v38, 4  ;;  %v1648_v6 = vcombine.low %v837_v14, %v861_v2  ;;  %v1649_v19 = vcombine.high %v837_v14, %v861_v2 }
 0x143   :  { %v428_v42 = vsel %vm40_vm0, %v423_v1, %v424_v40  ;;  %1449 = vmatprep.subr.bf16.mxu0 %v1649_v19  ;;  %v788_v28 = vsel %vm40_vm0, %v783_v63, %v784_v59  ;;  %v1699_v63 = vld [vmem:[%s2452_s1 + $0x8] ss:$0 sps:$4 sm:$0xff]  }
 0x144   :  { %v805_v39 = vpop.permute.xlu0 %804  ;;  %1450 = vmatpush1.bf16.msra.mxu0 %v1648_v6  ;;  %v429_v27 = vsel %vm426_vm1, %v419_v0, %v428_v42  ;;  %v789_v48 = vsel %vm786_vm7, %v1968_v61, %v788_v28 }
 0x145   :  { %v808_v45 = vrot.slane %v805_v39, 4  ;;  %v1612_v37 = vcombine.low %v405_v58, %v429_v27  ;;  %v1613_v56 = vcombine.high %v405_v58, %v429_v27  ;;  %v1524_v27 = vld [vmem:[%s2454_s2] sm:$0xff] }
 0x147   :  { %v812_v51 = vsel %vm40_vm0, %v807_v10, %v808_v45  ;;  %1426 = vmatprep.subr.bf16.mxu1 %v1613_v56 }
 0x148   :  { %1427 = vmatpush2.bf16.msra.mxu1 %v1612_v37  ;;  %v813_v43 = vsel %vm810_vm8, %v1977_v7, %v812_v51  ;;  %v1528_v37 = vld [vmem:[%s2455_s3] sm:$0xff] }
 0x149   :  { %v1644_v21 = vcombine.low %v789_v48, %v813_v43  ;;  %v1645_v53 = vcombine.high %v789_v48, %v813_v43 }
 0x14b   :  { %1429 = vmatmul.mubr.bf16.vlgmr.msra.gmra.mxu1 %v1575_v13  ;;  %1451 = vmatprep.subr.bf16.mxu0 %v1645_v53  ;;  %v1494_v13 = vsub.s32 3, %v1481_v8 }
 0x14c   :  { %1452 = vmatpush1.bf16.msra.mxu0 %v1644_v21 }
 0x14d   :  { %v1495_v30 = vrot.slane %v1478_v41, %v1494_v13 }
 0x14f   :  { %1651 = vmatmul.mubr.msk.bf16.vlgmr.msra.gmra.mxu0 %vm1310_vm10, %v1699_v63 }
 0x15b   :  { %v1389_v10 = vpop.f32.mrf.mxu1 }
 0x15d   :  { %v1391_v50 = vpop.f32.mrf.mxu1 }
 0x15f   :  { %v1393_v24 = vpop.f32.mrf.mxu1 }
 0x161   :  { %v1394_v0 = vpop.f32.mrf.mxu1 }
 0x1fb   :  { %v1348_v22 = vpop.f32.mrf.mxu0 }
 0x1fc   :  { %v1390_v3 = vadd.f32 %v1389_v10, %v1348_v22 }
 0x1fd   :  { %v1350_v61 = vpop.f32.mrf.mxu0 }
 0x1fe   :  { %v1392_v47 = vadd.f32 %v1391_v50, %v1350_v61  ;;  %v1500_v29 = vmul.f32 %v1483_v15, %v1390_v3 }
 0x1ff   :  { %v1352_v1 = vpop.f32.mrf.mxu0 }
 0x200   :  { %v1501_v35 = vmul.f32 %v1487_v62, %v1392_v47  ;;  %v1511_v57 = vmul.f32 %v1500_v29, %v1390_v3 }
 0x201   :  { %v1353_v7 = vpop.f32.mrf.mxu0 }
 0x202   :  { %v1512_v23 = vmul.f32 %v1501_v35, %v1392_v47  ;;  %v1504_v54 = vadd.f32 %v1501_v35, %v1500_v29 }
 0x204   :  { %v1515_v44 = vadd.f32 %v1512_v23, %v1511_v57 }
 0x20b   :  { %v1430_v9 = vpop.f32.mrf.mxu1 }
 0x20d   :  { %v1432_v26 = vpop.f32.mrf.mxu1 }
 0x20f   :  { %v1434_v20 = vpop.f32.mrf.mxu1  ;;  %v1471_v18 = vpop.f32.mrf.mxu0 }
 0x210   :  { %v1472_v11 = vadd.f32 %v1471_v18, %v1430_v9 }
 0x211   :  { %v1435_v33 = vpop.f32.mrf.mxu1  ;;  %v1473_v25 = vpop.f32.mrf.mxu0 }
 0x212   :  { %v1502_v55 = vmul.f32 %v1491_v12, %v1472_v11  ;;  %v1474_v46 = vadd.f32 %v1473_v25, %v1432_v26 }
 0x213   :  { %v1475_v36 = vpop.f32.mrf.mxu0 }
 0x214   :  { %v1513_v52 = vmul.f32 %v1502_v55, %v1472_v11  ;;  %v1503_v49 = vmul.f32 %v1495_v30, %v1474_v46  ;;  %v1505_v4 = vadd.f32 %v1504_v54, %v1502_v55 }
 0x215   :  { %v1476_v16 = vpop.f32.mrf.mxu0 }
 0x216   :  { %v1514_v32 = vmul.f32 %v1503_v49, %v1474_v46  ;;  %v1506_v60 = vadd.f32 %v1505_v4, %v1503_v49  ;;  %v1516_v38 = vadd.f32 %v1515_v44, %v1513_v52 }
 0x218   :  { %1507 = vadd.xlane.f32.xlu1 %v1506_v60  ;;  %v1517_v14 = vadd.f32 %v1516_v38, %v1514_v32 }
 0x21a   :  { %1518 = vadd.xlane.f32.xlu0 %v1517_v14 }
 0x2a1   :  { %v1508_v2 = vpop.xlane.xlu1 %1507 }
 0x2a2   :  { %v1510_v59 = vmul.f32 0.005, %v1508_v2 }
 0x2a3   :  { %v1519_v40 = vpop.xlane.xlu0 %1518 }
 0x2a4   :  { %v1521_v6 = vmul.f32 %v1510_v59, %v1510_v59  ;;  %v1520_v19 = vmul.f32 0.005, %v1519_v40 }
 0x2a6   :  { %v1522_v42 = vsub.f32 %v1520_v19, %v1521_v6 }
 0x2a8   :  { %v1523_v39 = vmax.f32 %v1522_v42, 0.0 }
 0x2aa   :  { %v1525_v58 = vadd.f32 1e-05, %v1523_v39 }
 0x2ac   :  { %1697 = vrsqrt.f32 %v1525_v58 }
 0x2b9   :  { %v1698_v28 = vpop.eup %1697 }
 0x2ba   :  { %v1527_v45 = vmul.f32 %v1698_v28, %v1524_v27 }
 0x2bc   :  { %1533 = vperm.xlu0 %1692, %v1527_v45   ;;  %v1529_v56 = vmul.f32 %v1527_v45, %v1510_v59 }
 0x2be   :  { %v1530_v51 = vsub.f32 %v1528_v37, %v1529_v56 }
 0x2c0   :  { %1542 = vperm.xlu1 %1693, %v1530_v51  }
 0x337   :  { %v1534_v48 = vpop.permute.xlu0 %1533 }
 0x338   :  { %v1536_v43 = vmul.f32 %v1534_v48, %v1390_v3  ;;  %v1537_v21 = vmul.f32 %v1534_v48, %v1392_v47  ;;  %v1538_v53 = vmul.f32 %v1534_v48, %v1472_v11  ;;  %v1539_v63 = vmul.f32 %v1534_v48, %v1474_v46 }
 0x33b   :  { %v1543_v10 = vpop.permute.xlu1 %1542 }
 0x33c   :  { %v1545_v50 = vadd.f32 %v1543_v10, %v1536_v43  ;;  %v1546_v24 = vadd.f32 %v1543_v10, %v1537_v21  ;;  %v1547_v0 = vadd.f32 %v1543_v10, %v1538_v53  ;;  %v1548_v22 = vadd.f32 %v1543_v10, %v1539_v63 }
 0x33e   :  { %v1549_v61 = vmax.f32 %v1545_v50, 0.0  ;;  %v1550_v31 = vmax.f32 %v1546_v24, 0.0  ;;  %v1551_v1 = vmax.f32 %v1547_v0, 0.0  ;;  %v1552_v7 = vmax.f32 %v1548_v22, 0.0 }
 0x340   :  { %v1654_v8 = vpack.c.bf16 %v1550_v31, %v1549_v61  ;;  %v1655_v17 = vpack.c.bf16 %v1552_v7, %v1551_v1 }
 0x342   :  { %1569 = vst [vmem:[%s2456_s5] sm:$0xff] %v1654_v8  ;;  %1570 = vst [vmem:[%s2456_s5 + $0x8] sm:$0xff] %v1655_v17 }

// kernel: vae_forward.9
= control target key start
LH: loop header
LB: loop body
LE: loop exit
PB: predicated region body
PF: predicated region fallthrough
CT: control target
= control target key end

     0   :  { %s4478_s20 = smov 71   ;;  %s4479_s21 = smov 72   ;;  %v7254_v4 = vmov 0   ;;  %vm68_vm0 = vcmask 1043456   ;;  %vm850_vm1 = vcmask 588800   ;;  %vm910_vm2 = vcmask 580608   ;;  %s7150_s0 = inlined_call_operand.vmem [shape: bf16[8,1792], index: 0, kind: input, shape index: {}]   ;;  %s7151_s1 = inlined_call_operand.vmem [shape: bf16[4,288], index: 1, kind: input, shape index: {}]   ;;  %s7152_s4 = inlined_call_operand.vmem [shape: f32[1,1536], index: 4, kind: input, shape index: {}]   ;;  %s7153_s2 = inlined_call_operand.vmem [shape: f32[4,1], index: 2, kind: input, shape index: {}]   ;;  %s7154_s3 = inlined_call_operand.vmem [shape: f32[4,1], index: 3, kind: input, shape index: {}]   ;;  %s7155_s5 = inlined_call_operand.vmem [shape: f32[4,1536], index: 5, kind: output, shape index: {}]  }
   0x1   :  { %v4548_v0 = vld [vmem:[%s7150_s0] sm:$0xff]  ;;  %v4557_v1 = vld [vmem:[%s7150_s0 + $0x8] sm:$0xff]  ;;  %s4480_s28 = smov 117   ;;  %s4481_s29 = smov 116   ;;  %3527 = vmatprep.mubr.bf16.mxu1 %v7254_v4  ;;  %4449 = vset.pattern.permute.xlu0 %v7254_v4  ;;  %v4611_v5 = vld [vmem:[%s7150_s0 + $0x10] sm:$0xff]  ;;  %vm2050_vm3 = vcmask 957440   ;;  %v2356_v47 = vlaneseq }
   0x2   :  { %888 = vrot.lane.b32.xlu1 %v4548_v0, %s4478_s20  ;;  %828 = vrot.lane.b32.xlu0 %v4548_v0, %s4479_s21  ;;  %v4566_v2 = vld [vmem:[%s7150_s0 + $0xc] sm:$0xff]  ;;  %v4571_v3 = vld [vmem:[%s7150_s0 + $0x4] sm:$0xff]  ;;  %s4482_s30 = smov 74   ;;  %s4483_s6 = smov 73   ;;  %vm7252_vm4 = vcmask 949248   ;;  %vm730_vm5 = vcmask 605184  }
   0x3   :  { %s4484_s7 = smov 119   ;;  %s7272_s8 = smov 118   ;;  %4450 = vset.pattern.permute.xlu1 %v7254_v4  ;;  %v4721_v24 = vld [vmem:[%s7150_s0 + $0x14] sm:$0xff]  ;;  %vm7174_vm6 = vcmask 596992   ;;  %v4506_v45 = vmov 1983009808  }
   0x4   :  { %s4486_s9 = smov 97   ;;  %s4488_s10 = smov 96   ;;  %v2354_v46 = vunpack.c.l.s4 %v4506_v45  ;;  %v4767_v57 = vshrl.u32 %v2356_v47, 7  ;;  %vm1930_vm7 = vcmask 973824   ;;  %v4774_v60 = vld [vmem:[%s7151_s1] sm:$0x3f] }
   0x5   :  { %s4489_s13 = smov 99   ;;  %s7232_s14 = smov 98   ;;  %vm7261_vm8 = vcmask 965632   ;;  %vm7182_vm9 = vcmask 793600   ;;  %vm3450_vm10 = vcmask 261120   ;;  %vm7175_vm11 = vcmask 785408  }
   0x6   :  { %890 = vrot.lane.b32.xlu1 %v4557_v1, %s4478_s20  ;;  %830 = vrot.lane.b32.xlu0 %v4557_v1, %s4479_s21  ;;  %s7223_s15 = smov 101   ;;  %s7221_s16 = smov 100   ;;  %v2355_v56 = vunpack.c.0.s8 %v2354_v46  ;;  %vm7176_vm12 = vcmask 809984   ;;  %vm7177_vm13 = vcmask 801792   ;;  %vm370_vm14 = vcmask 826368  }
   0x7   :  { %s7217_s17 = smov 124   ;;  %s7212_s18 = smov 123   ;;  %vm7194_vm15 = vcmask 818176  }
   0x8   :  { %s7210_s19 = smov 126   ;;  %s7158_s22 = smov 125  }
   0x9   :  { %s7156_s23 = smov 127   ;;  %s7160_s24 = smov 121  }
   0xa   :  { %2030 = vrot.lane.b32.xlu1 %v4566_v2, %s4480_s28  ;;  %2028 = vrot.lane.b32.xlu0 %v4571_v3, %s4480_s28  ;;  %s7162_s25 = smov 120   ;;  %s7164_s26 = smov 16  }
   0xb   :  { %s7237_s27 = smov 15   ;;  %s7248_s11 = smov 18  }
   0xc   :  { %s7245_s12 = smov 17   ;;  %s7172_s1 = smov 42  }
   0xe   :  { %2090 = vrot.lane.b32.xlu1 %v4566_v2, %s4481_s29  ;;  %2088 = vrot.lane.b32.xlu0 %v4571_v3, %s4481_s29 }
  0x12   :  { %710 = vrot.lane.b32.xlu1 %v4557_v1, %s4482_s30  ;;  %708 = vrot.lane.b32.xlu0 %v4548_v0, %s4482_s30 }
  0x16   :  { %770 = vrot.lane.b32.xlu1 %v4557_v1, %s4483_s6  ;;  %768 = vrot.lane.b32.xlu0 %v4548_v0, %s4483_s6 }
  0x1a   :  { %1910 = vrot.lane.b32.xlu1 %v4566_v2, %s4484_s7  ;;  %1908 = vrot.lane.b32.xlu0 %v4571_v3, %s4484_s7 }
  0x1e   :  { %1970 = vrot.lane.b32.xlu1 %v4566_v2, %s7272_s8  ;;  %1968 = vrot.lane.b32.xlu0 %v4571_v3, %s7272_s8 }
  0x22   :  { %590 = vrot.lane.b32.xlu1 %v4557_v1, %s4486_s9  ;;  %588 = vrot.lane.b32.xlu0 %v4548_v0, %s4486_s9 }
  0x26   :  { %650 = vrot.lane.b32.xlu1 %v4557_v1, %s4488_s10  ;;  %648 = vrot.lane.b32.xlu0 %v4548_v0, %s4488_s10 }
  0x2a   :  { %892 = vrot.lane.b32.xlu1 %v4611_v5, %s4478_s20  ;;  %832 = vrot.lane.b32.xlu0 %v4611_v5, %s4479_s21 }
  0x2e   :  { %470 = vrot.lane.b32.xlu1 %v4557_v1, %s4489_s13  ;;  %468 = vrot.lane.b32.xlu0 %v4548_v0, %s4489_s13 }
  0x32   :  { %530 = vrot.lane.b32.xlu1 %v4557_v1, %s7232_s14  ;;  %528 = vrot.lane.b32.xlu0 %v4548_v0, %s7232_s14 }
  0x36   :  { %772 = vrot.lane.b32.xlu1 %v4611_v5, %s4483_s6  ;;  %712 = vrot.lane.b32.xlu0 %v4611_v5, %s4482_s30 }
  0x3a   :  { %350 = vrot.lane.b32.xlu1 %v4557_v1, %s7223_s15  ;;  %348 = vrot.lane.b32.xlu0 %v4548_v0, %s7223_s15 }
  0x3e   :  { %410 = vrot.lane.b32.xlu1 %v4557_v1, %s7221_s16  ;;  %408 = vrot.lane.b32.xlu0 %v4548_v0, %s7221_s16 }
  0x42   :  { %652 = vrot.lane.b32.xlu1 %v4611_v5, %s4488_s10  ;;  %592 = vrot.lane.b32.xlu0 %v4611_v5, %s4486_s9 }
  0x46   :  { %230 = vrot.lane.b32.xlu1 %v4557_v1, %s7217_s17  ;;  %228 = vrot.lane.b32.xlu0 %v4548_v0, %s7217_s17 }
  0x4a   :  { %290 = vrot.lane.b32.xlu1 %v4557_v1, %s7212_s18  ;;  %288 = vrot.lane.b32.xlu0 %v4548_v0, %s7212_s18 }
  0x4e   :  { %532 = vrot.lane.b32.xlu1 %v4611_v5, %s7232_s14  ;;  %472 = vrot.lane.b32.xlu0 %v4611_v5, %s4489_s13 }
  0x52   :  { %110 = vrot.lane.b32.xlu1 %v4557_v1, %s7210_s19  ;;  %108 = vrot.lane.b32.xlu0 %v4548_v0, %s7210_s19 }
  0x56   :  { %170 = vrot.lane.b32.xlu1 %v4557_v1, %s7158_s22  ;;  %168 = vrot.lane.b32.xlu0 %v4548_v0, %s7158_s22 }
  0x5a   :  { %412 = vrot.lane.b32.xlu1 %v4611_v5, %s7221_s16  ;;  %352 = vrot.lane.b32.xlu0 %v4611_v5, %s7223_s15 }
  0x5e   :  { %49 = vrot.lane.b32.xlu1 %v4557_v1, %s7156_s23  ;;  %47 = vrot.lane.b32.xlu0 %v4548_v0, %s7156_s23 }
  0x62   :  { %292 = vrot.lane.b32.xlu1 %v4611_v5, %s7212_s18  ;;  %232 = vrot.lane.b32.xlu0 %v4611_v5, %s7217_s17 }
  0x66   :  { %172 = vrot.lane.b32.xlu1 %v4611_v5, %s7158_s22  ;;  %112 = vrot.lane.b32.xlu0 %v4611_v5, %s7210_s19  ;;  %s7166_s22 = smov 20  }
  0x6a   :  { %1790 = vrot.lane.b32.xlu1 %v4566_v2, %s7160_s24  ;;  %1788 = vrot.lane.b32.xlu0 %v4571_v3, %s7160_s24 }
  0x6e   :  { %1850 = vrot.lane.b32.xlu1 %v4566_v2, %s7162_s25  ;;  %1848 = vrot.lane.b32.xlu0 %v4571_v3, %s7162_s25  ;;  %v2352_v3 = vcombine.high %v4774_v60, %v4774_v60 }
  0x72   :  { %1668 = vrot.lane.b32.xlu1 %v4548_v0, %s7164_s26  ;;  %51 = vrot.lane.b32.xlu0 %v4611_v5, %s7156_s23  ;;  %s7168_s23 = smov 19  }
  0x74   :  { %v889_v6 = vpop.permute.xlu1 %888  ;;  %v829_v7 = vpop.permute.xlu0 %828 }
  0x75   :  { %v902_v8 = vrot.slane %v889_v6, 4  ;;  %v842_v11 = vrot.slane %v829_v7, 4 }
  0x76   :  { %1728 = vrot.lane.b32.xlu1 %v4548_v0, %s7237_s27  ;;  %1670 = vrot.lane.b32.xlu0 %v4557_v1, %s7164_s26 }
  0x78   :  { %v4693_v9 = vpop.permute.xlu1 %890  ;;  %v4695_v10 = vpop.permute.xlu0 %830 }
  0x79   :  { %v903_v12 = vrot.slane %v4693_v9, 4  ;;  %v843_v13 = vrot.slane %v4695_v10, 4 }
  0x7a   :  { %1548 = vrot.lane.b32.xlu1 %v4548_v0, %s7248_s11  ;;  %1730 = vrot.lane.b32.xlu0 %v4557_v1, %s7237_s27 }
  0x7b   :  { %v849_v14 = vsel %vm68_vm0, %v842_v11, %v843_v13  ;;  %v909_v15 = vsel %vm68_vm0, %v902_v8, %v903_v12 }
  0x7c   :  { %v4709_v16 = vpop.permute.xlu1 %2030  ;;  %v2029_v17 = vpop.permute.xlu0 %2028  ;;  %v851_v18 = vsel %vm850_vm1, %v829_v7, %v849_v14  ;;  %v911_v19 = vsel %vm910_vm2, %v889_v6, %v909_v15  ;;  %v4790_v6 = vsub.s32 %v2355_v56, %v4767_v57 }
  0x7d   :  { %v2043_v20 = vrot.slane %v4709_v16, 4  ;;  %v2042_v21 = vrot.slane %v2029_v17, 4  ;;  %v4275_v22 = vcombine.high %v851_v18, %v911_v19  ;;  %v4274_v23 = vcombine.low %v851_v18, %v911_v19 }
  0x7e   :  { %1608 = vrot.lane.b32.xlu1 %v4548_v0, %s7245_s12  ;;  %1550 = vrot.lane.b32.xlu0 %v4557_v1, %s7248_s11 }
  0x7f   :  { %3454 = vmatprep.subr.bf16.mxu0 %v4275_v22  ;;  %v2049_v29 = vsel %vm68_vm0, %v2042_v21, %v2043_v20  ;;  %v4802_v21 = vrot.slane %v2352_v3, %v4790_v6 }
  0x80   :  { %v4723_v25 = vpop.permute.xlu1 %2090  ;;  %3455 = vmatpush1.bf16.msra.mxu0 %v4274_v23  ;;  %v2089_v26 = vpop.permute.xlu0 %2088  ;;  %v2051_v33 = vsel %vm2050_vm3, %v2029_v17, %v2049_v29 }
  0x81   :  { %v7241_v27 = vrot.slane %v4723_v25, 4  ;;  %v2102_v28 = vrot.slane %v2089_v26, 4 }
  0x82   :  { %1792 = vrot.lane.b32.xlu1 %v4721_v24, %s7160_s24  ;;  %1610 = vrot.lane.b32.xlu0 %v4557_v1, %s7245_s12  ;;  %s4509_s24 = smov 45  }
  0x83   :  { %v2109_v30 = vsel %vm68_vm0, %v2102_v28, %v7241_v27 }
  0x84   :  { %v4736_v31 = vpop.permute.xlu1 %710  ;;  %v709_v32 = vpop.permute.xlu0 %708  ;;  %v2111_v34 = vsel %vm7252_vm4, %v2089_v26, %v2109_v30 }
  0x85   :  { %v723_v35 = vrot.slane %v4736_v31, 4  ;;  %v722_v36 = vrot.slane %v709_v32, 4  ;;  %v4395_v37 = vcombine.high %v2051_v33, %v2111_v34  ;;  %v4394_v38 = vcombine.low %v2051_v33, %v2111_v34 }
  0x86   :  { %1428 = vrot.lane.b32.xlu1 %v4548_v0, %s7166_s22  ;;  %1852 = vrot.lane.b32.xlu0 %v4721_v24, %s7162_s25  ;;  %s7259_s25 = smov 44  }
  0x87   :  { %3507 = vmatprep.subr.bf16.mxu1 %v4395_v37  ;;  %v729_v41 = vsel %vm68_vm0, %v722_v36, %v723_v35 }
  0x88   :  { %3508 = vmatpush1.bf16.msra.mxu1 %v4394_v38  ;;  %v4745_v39 = vpop.permute.xlu1 %770  ;;  %v769_v40 = vpop.permute.xlu0 %768  ;;  %v731_v48 = vsel %vm730_vm5, %v709_v32, %v729_v41 }
  0x89   :  { %v783_v42 = vrot.slane %v4745_v39, 4  ;;  %v782_v43 = vrot.slane %v769_v40, 4 }
  0x8a   :  { %1488 = vrot.lane.b32.xlu1 %v4548_v0, %s7168_s23  ;;  %1430 = vrot.lane.b32.xlu0 %v4557_v1, %s7166_s22 }
  0x8b   :  { %v789_v44 = vsel %vm68_vm0, %v782_v43, %v783_v42 }
  0x8c   :  { %v791_v49 = vsel %vm7174_vm6, %v769_v40, %v789_v44  ;;  %v4760_v50 = vpop.permute.xlu1 %1910  ;;  %v1909_v51 = vpop.permute.xlu0 %1908 }
  0x8d   :  { %v7231_v52 = vrot.slane %v4760_v50, 4  ;;  %v1922_v53 = vrot.slane %v1909_v51, 4  ;;  %v4263_v54 = vcombine.high %v731_v48, %v791_v49  ;;  %v4262_v55 = vcombine.low %v731_v48, %v791_v49 }
  0x8e   :  { %1672 = vrot.lane.b32.xlu1 %v4611_v5, %s7164_s26  ;;  %1490 = vrot.lane.b32.xlu0 %v4557_v1, %s7168_s23  ;;  %s7170_s26 = smov 43  }
  0x8f   :  { %3456 = vmatprep.subr.bf16.mxu0 %v4263_v54  ;;  %v1929_v61 = vsel %vm68_vm0, %v1922_v53, %v7231_v52 }
  0x90   :  { %v4769_v58 = vpop.permute.xlu1 %1970  ;;  %3457 = vmatpush1.bf16.msra.mxu0 %v4262_v55  ;;  %v1969_v59 = vpop.permute.xlu0 %1968  ;;  %v1931_v7 = vsel %vm1930_vm7, %v1909_v51, %v1929_v61 }
  0x91   :  { %v7230_v62 = vrot.slane %v4769_v58, 4  ;;  %v1982_v63 = vrot.slane %v1969_v59, 4 }
  0x92   :  { %1308 = vrot.lane.b32.xlu1 %v4548_v0, %s7170_s26  ;;  %1732 = vrot.lane.b32.xlu0 %v4611_v5, %s7237_s27 }
  0x93   :  { %v1989_v2 = vsel %vm68_vm0, %v1982_v63, %v7230_v62 }
  0x94   :  { %v1991_v8 = vsel %vm7261_vm8, %v1969_v59, %v1989_v2  ;;  %v4794_v11 = vpop.permute.xlu1 %590  ;;  %v589_v14 = vpop.permute.xlu0 %588 }
  0x95   :  { %v603_v15 = vrot.slane %v4794_v11, 4  ;;  %v602_v17 = vrot.slane %v589_v14, 4  ;;  %v4383_v18 = vcombine.high %v1931_v7, %v1991_v8  ;;  %v4382_v19 = vcombine.low %v1931_v7, %v1991_v8 }
  0x96   :  { %1368 = vrot.lane.b32.xlu1 %v4548_v0, %s7172_s1  ;;  %1310 = vrot.lane.b32.xlu0 %v4557_v1, %s7170_s26 }
  0x97   :  { %3509 = vmatprep.subr.bf16.mxu1 %v4383_v18  ;;  %v609_v26 = vsel %vm68_vm0, %v602_v17, %v603_v15 }
  0x98   :  { %3510 = vmatpush1.bf16.msra.mxu1 %v4382_v19  ;;  %v4804_v22 = vpop.permute.xlu1 %650  ;;  %v649_v23 = vpop.permute.xlu0 %648  ;;  %v611_v32 = vsel %vm7182_vm9, %v589_v14, %v609_v26 }
  0x99   :  { %v663_v28 = vrot.slane %v4804_v22, 4  ;;  %v662_v29 = vrot.slane %v649_v23, 4 }
  0x9a   :  { %1552 = vrot.lane.b32.xlu1 %v4611_v5, %s7248_s11  ;;  %1370 = vrot.lane.b32.xlu0 %v4557_v1, %s7172_s1 }
  0x9b   :  { %v669_v30 = vsel %vm68_vm0, %v662_v29, %v663_v28  ;;  %4406 = vmatmul.mubr.msk.bf16.vlgmr.msra.gmra.mxu1 %vm3450_vm10, %v4802_v21 }
  0x9c   :  { %v671_v33 = vsel %vm7175_vm11, %v649_v23, %v669_v30  ;;  %v4821_v34 = vpop.permute.xlu1 %892  ;;  %v4823_v36 = vpop.permute.xlu0 %832 }
  0x9d   :  { %v7220_v37 = vrot.slane %v4821_v34, 4  ;;  %v7229_v38 = vrot.slane %v4823_v36, 4  ;;  %v4251_v40 = vcombine.high %v611_v32, %v671_v33  ;;  %v4250_v41 = vcombine.low %v611_v32, %v671_v33 }
  0x9e   :  { %1188 = vrot.lane.b32.xlu1 %v4548_v0, %s4509_s24  ;;  %1612 = vrot.lane.b32.xlu0 %v4611_v5, %s7245_s12 }
  0x9f   :  { %3458 = vmatprep.subr.bf16.mxu0 %v4251_v40  ;;  %v852_v43 = vsel %vm68_vm0, %v843_v13, %v7229_v38  ;;  %v912_v44 = vsel %vm68_vm0, %v903_v12, %v7220_v37 }
  0xa0   :  { %3459 = vmatpush1.bf16.msra.mxu0 %v4250_v41  ;;  %v4841_v45 = vpop.permute.xlu1 %470  ;;  %v469_v46 = vpop.permute.xlu0 %468  ;;  %v853_v47 = vsel %vm850_vm1, %v4695_v10, %v852_v43  ;;  %v913_v48 = vsel %vm910_vm2, %v4693_v9, %v912_v44 }
  0xa1   :  { %v483_v49 = vrot.slane %v4841_v45, 4  ;;  %v482_v51 = vrot.slane %v469_v46, 4  ;;  %v4276_v13 = vcombine.low %v853_v47, %v913_v48  ;;  %v4277_v53 = vcombine.high %v853_v47, %v913_v48 }
  0xa2   :  { %1248 = vrot.lane.b32.xlu1 %v4548_v0, %s7259_s25  ;;  %1190 = vrot.lane.b32.xlu0 %v4557_v1, %s4509_s24 }
  0xa3   :  { %3536 = vmatprep.subr.bf16.mxu1 %v4277_v53  ;;  %v489_v9 = vsel %vm68_vm0, %v482_v51, %v483_v49 }
  0xa4   :  { %3537 = vmatpush1.bf16.msra.mxu1 %v4276_v13  ;;  %v4852_v12 = vpop.permute.xlu1 %530  ;;  %v529_v10 = vpop.permute.xlu0 %528  ;;  %v491_v59 = vsel %vm7176_vm12, %v469_v46, %v489_v9 }
  0xa5   :  { %v543_v54 = vrot.slane %v4852_v12, 4  ;;  %v542_v55 = vrot.slane %v529_v10, 4 }
  0xa6   :  { %1432 = vrot.lane.b32.xlu1 %v4611_v5, %s7166_s22  ;;  %1250 = vrot.lane.b32.xlu0 %v4557_v1, %s7259_s25  ;;  %s7257_s22 = smov 47  }
  0xa7   :  { %v549_v56 = vsel %vm68_vm0, %v542_v55, %v543_v54 }
  0xa8   :  { %v551_v61 = vsel %vm7177_vm13, %v529_v10, %v549_v56  ;;  %v4867_v63 = vpop.permute.xlu1 %772  ;;  %v4869_v2 = vpop.permute.xlu0 %712 }
  0xa9   :  { %v7208_v3 = vrot.slane %v4867_v63, 4  ;;  %v7209_v7 = vrot.slane %v4869_v2, 4  ;;  %v4239_v8 = vcombine.high %v491_v59, %v551_v61  ;;  %v4238_v14 = vcombine.low %v491_v59, %v551_v61 }
  0xaa   :  { %1068 = vrot.lane.b32.xlu1 %v4548_v0, %s7257_s22  ;;  %1492 = vrot.lane.b32.xlu0 %v4611_v5, %s7168_s23  ;;  %s7180_s23 = smov 46  }
  0xab   :  { %3460 = vmatprep.subr.bf16.mxu0 %v4239_v8  ;;  %v732_v17 = vsel %vm68_vm0, %v723_v35, %v7209_v7  ;;  %v792_v18 = vsel %vm68_vm0, %v783_v42, %v7208_v3 }
  0xac   :  { %3461 = vmatpush1.bf16.msra.mxu0 %v4238_v14  ;;  %v4887_v19 = vpop.permute.xlu1 %350  ;;  %v349_v23 = vpop.permute.xlu0 %348  ;;  %v733_v26 = vsel %vm730_vm5, %v4736_v31, %v732_v17  ;;  %v793_v29 = vsel %vm7174_vm6, %v4745_v39, %v792_v18  ;;  %vm7193_vm6 = vcmask 1014784  }
  0xad   :  { %v363_v30 = vrot.slane %v4887_v19, 4  ;;  %v362_v32 = vrot.slane %v349_v23, 4  ;;  %v4264_v35 = vcombine.low %v733_v26, %v793_v29  ;;  %v4265_v33 = vcombine.high %v733_v26, %v793_v29 }
  0xae   :  { %1128 = vrot.lane.b32.xlu1 %v4548_v0, %s7180_s23  ;;  %1070 = vrot.lane.b32.xlu0 %v4557_v1, %s7257_s22  ;;  %v4952_v29 = vrot.slane %v4774_v60, %v4790_v6 }
  0xaf   :  { %3538 = vmatprep.subr.bf16.mxu1 %v4265_v33  ;;  %v369_v39 = vsel %vm68_vm0, %v362_v32, %v363_v30 }
  0xb0   :  { %3539 = vmatpush1.bf16.msra.mxu1 %v4264_v35  ;;  %v4898_v42 = vpop.permute.xlu1 %410  ;;  %v409_v31 = vpop.permute.xlu0 %408  ;;  %v371_v44 = vsel %vm370_vm14, %v349_v23, %v369_v39 }
  0xb1   :  { %v423_v40 = vrot.slane %v4898_v42, 4  ;;  %v422_v41 = vrot.slane %v409_v31, 4 }
  0xb2   :  { %1312 = vrot.lane.b32.xlu1 %v4611_v5, %s7170_s26  ;;  %1130 = vrot.lane.b32.xlu0 %v4557_v1, %s7180_s23  ;;  %s7178_s26 = smov 70  }
  0xb3   :  { %v429_v43 = vsel %vm68_vm0, %v422_v41, %v423_v40 }
  0xb4   :  { %v431_v46 = vsel %vm7194_vm15, %v409_v31, %v429_v43  ;;  %v4913_v47 = vpop.permute.xlu1 %652  ;;  %v4915_v48 = vpop.permute.xlu0 %592 }
  0xb5   :  { %v7202_v51 = vrot.slane %v4913_v47, 4  ;;  %v7203_v13 = vrot.slane %v4915_v48, 4  ;;  %v4227_v53 = vcombine.high %v371_v44, %v431_v46  ;;  %v4226_v10 = vcombine.low %v371_v44, %v431_v46 }
  0xb6   :  { %948 = vrot.lane.b32.xlu1 %v4548_v0, %s7178_s26  ;;  %1372 = vrot.lane.b32.xlu0 %v4611_v5, %s7172_s1  ;;  %s4514_s1 = smov 69  }
  0xb7   :  { %3462 = vmatprep.subr.bf16.mxu0 %v4227_v53  ;;  %v612_v9 = vsel %vm68_vm0, %v603_v15, %v7203_v13  ;;  %v672_v55 = vsel %vm68_vm0, %v663_v28, %v7202_v51 }
  0xb8   :  { %3463 = vmatpush1.bf16.msra.mxu0 %v4226_v10  ;;  %v4933_v56 = vpop.permute.xlu1 %230  ;;  %v229_v59 = vpop.permute.xlu0 %228  ;;  %v613_v61 = vsel %vm7182_vm9, %v4794_v11, %v612_v9  ;;  %v673_v8 = vsel %vm7175_vm11, %v4804_v22, %v672_v55  ;;  %vm7183_vm11 = vcmask 1006592   ;;  %vm7186_vm9 = vcmask 1039360  }
  0xb9   :  { %v243_v14 = vrot.slane %v4933_v56, 4  ;;  %v242_v17 = vrot.slane %v229_v59, 4  ;;  %v4252_v15 = vcombine.low %v613_v61, %v673_v8  ;;  %v4253_v18 = vcombine.high %v613_v61, %v673_v8 }
  0xba   :  { %1008 = vrot.lane.b32.xlu1 %v4548_v0, %s4514_s1  ;;  %950 = vrot.lane.b32.xlu0 %v4557_v1, %s7178_s26 }
  0xbb   :  { %3540 = vmatprep.subr.bf16.mxu1 %v4253_v18  ;;  %v249_v22 = vsel %vm68_vm0, %v242_v17, %v243_v14 }
  0xbc   :  { %3541 = vmatpush1.bf16.msra.mxu1 %v4252_v15  ;;  %v4944_v28 = vpop.permute.xlu1 %290  ;;  %v289_v11 = vpop.permute.xlu0 %288  ;;  %v251_v35 = vsel %vm7193_vm6, %v229_v59, %v249_v22 }
  0xbd   :  { %v303_v23 = vrot.slane %v4944_v28, 4  ;;  %v302_v26 = vrot.slane %v289_v11, 4 }
  0xbe   :  { %1192 = vrot.lane.b32.xlu1 %v4611_v5, %s4509_s24  ;;  %1010 = vrot.lane.b32.xlu0 %v4557_v1, %s4514_s1  ;;  %v4975_v1 = vcombine.high %v4952_v29, %v4952_v29 }
  0xbf   :  { %v309_v32 = vsel %vm68_vm0, %v302_v26, %v303_v23 }
  0xc0   :  { %v311_v33 = vsel %vm7183_vm11, %v289_v11, %v309_v32  ;;  %v4963_v31 = vpop.permute.xlu1 %532  ;;  %v4965_v39 = vpop.permute.xlu0 %472  ;;  %3486 = vmatprep.mubr.bf16.mxu0 %v4975_v1  ;;  %3568 = vmatprep.mubr.bf16.mxu1 %v4975_v1 }
  0xc1   :  { %v7196_v60 = vrot.slane %v4963_v31, 4  ;;  %v7197_v6 = vrot.slane %v4965_v39, 4  ;;  %v4215_v41 = vcombine.high %v251_v35, %v311_v33  ;;  %v4214_v43 = vcombine.low %v251_v35, %v311_v33 }
  0xc2   :  { %1072 = vrot.lane.b32.xlu1 %v4611_v5, %s7257_s22  ;;  %1252 = vrot.lane.b32.xlu0 %v4611_v5, %s7259_s25 }
  0xc3   :  { %3464 = vmatprep.subr.bf16.mxu0 %v4215_v41  ;;  %v492_v44 = vsel %vm68_vm0, %v483_v49, %v7197_v6  ;;  %v552_v46 = vsel %vm68_vm0, %v543_v54, %v7196_v60 }
  0xc4   :  { %3465 = vmatpush1.bf16.msra.mxu0 %v4214_v43  ;;  %v4987_v53 = vpop.permute.xlu1 %110  ;;  %v109_v10 = vpop.permute.xlu0 %108  ;;  %v493_v9 = vsel %vm7176_vm12, %v4841_v45, %v492_v44  ;;  %v553_v55 = vsel %vm7177_vm13, %v4852_v12, %v552_v46  ;;  %vm7187_vm12 = vcmask 1031168   ;;  %vm7184_vm13 = vcmask 1022976   ;;  %v5026_v44 = vld [vmem:[%s7150_s0 + $0x18] sm:$0xff] }
  0xc5   :  { %v123_v49 = vrot.slane %v4987_v53, 4  ;;  %v122_v59 = vrot.slane %v109_v10, 4  ;;  %v4240_v61 = vcombine.low %v493_v9, %v553_v55  ;;  %v4241_v8 = vcombine.high %v493_v9, %v553_v55 }
  0xc6   :  { %2032 = vrot.lane.b32.xlu1 %v4721_v24, %s4480_s28  ;;  %1132 = vrot.lane.b32.xlu0 %v4611_v5, %s7180_s23  ;;  %s7306_s23 = smov 127  }
  0xc7   :  { %3542 = vmatprep.subr.bf16.mxu1 %v4241_v8  ;;  %v129_v54 = vsel %vm68_vm0, %v122_v59, %v123_v49 }
  0xc8   :  { %3543 = vmatpush1.bf16.msra.mxu1 %v4240_v61  ;;  %v5000_v45 = vpop.permute.xlu1 %170  ;;  %v169_v12 = vpop.permute.xlu0 %168  ;;  %v131_v11 = vsel %vm7187_vm12, %v109_v10, %v129_v54 }
  0xc9   :  { %v183_v17 = vrot.slane %v5000_v45, 4  ;;  %v182_v15 = vrot.slane %v169_v12, 4 }
  0xca   :  { %952 = vrot.lane.b32.xlu1 %v4611_v5, %s7178_s26  ;;  %2092 = vrot.lane.b32.xlu0 %v4721_v24, %s4481_s29  ;;  %s7305_s26 = smov 125  }
  0xcb   :  { %v189_v18 = vsel %vm68_vm0, %v182_v15, %v183_v17 }
  0xcc   :  { %v191_v22 = vsel %vm7184_vm13, %v169_v12, %v189_v18  ;;  %v5013_v26 = vpop.permute.xlu1 %412  ;;  %v5015_v32 = vpop.permute.xlu0 %352 }
  0xcd   :  { %v7192_v35 = vrot.slane %v5013_v26, 4  ;;  %v7195_v33 = vrot.slane %v5015_v32, 4  ;;  %v4203_v41 = vcombine.high %v131_v11, %v191_v22  ;;  %v4202_v43 = vcombine.low %v131_v11, %v191_v22 }
  0xce   :  { %1912 = vrot.lane.b32.xlu1 %v4721_v24, %s4484_s7  ;;  %1012 = vrot.lane.b32.xlu0 %v4611_v5, %s4514_s1 }
  0xcf   :  { %3466 = vmatprep.subr.bf16.mxu0 %v4203_v41  ;;  %v372_v46 = vsel %vm68_vm0, %v363_v30, %v7195_v33  ;;  %v432_v10 = vsel %vm68_vm0, %v423_v40, %v7192_v35 }
  0xd0   :  { %3467 = vmatpush1.bf16.msra.mxu0 %v4202_v43  ;;  %v5038_v5 = vpop.permute.xlu1 %49  ;;  %v48_v9 = vpop.permute.xlu0 %47  ;;  %v373_v55 = vsel %vm370_vm14, %v4887_v19, %v372_v46  ;;  %v433_v59 = vsel %vm7194_vm15, %v4898_v42, %v432_v10  ;;  %v5055_v19 = vld [vmem:[%s7150_s0 + $0x1c] sm:$0xff]  ;;  %vm7216_vm15 = vcmask 138240  }
  0xd1   :  { %v62_v61 = vrot.slane %v5038_v5, 4  ;;  %v61_v30 = vrot.slane %v48_v9, 4  ;;  %v4228_v8 = vcombine.low %v373_v55, %v433_v59  ;;  %v4229_v12 = vcombine.high %v373_v55, %v433_v59 }
  0xd2   :  { %834 = vrot.lane.b32.xlu1 %v5026_v44, %s4479_s21  ;;  %1972 = vrot.lane.b32.xlu0 %v4721_v24, %s7272_s8 }
  0xd3   :  { %v69_v40 = vsel %vm68_vm0, %v61_v30, %v62_v61  ;;  %3544 = vmatprep.subr.bf16.mxu1 %v4229_v12 }
  0xd4   :  { %v71_v42 = vsel %vm7186_vm9, %v48_v9, %v69_v40  ;;  %3545 = vmatpush1.bf16.msra.mxu1 %v4228_v8  ;;  %v5058_v54 = vpop.permute.xlu1 %292  ;;  %v5060_v15 = vpop.permute.xlu0 %232 }
  0xd5   :  { %v7190_v18 = vrot.slane %v5058_v54, 4  ;;  %v7191_v24 = vrot.slane %v5060_v15, 4  ;;  %v4191_v11 = vcombine.high %v4548_v0, %v71_v42  ;;  %v4190_v22 = vcombine.low %v4548_v0, %v71_v42 }
  0xd6   :  { %2034 = vrot.lane.b32.xlu1 %v5055_v19, %s4480_s28  ;;  %894 = vrot.lane.b32.xlu0 %v5026_v44, %s4478_s20 }
  0xd7   :  { %3468 = vmatprep.subr.bf16.mxu0 %v4191_v11  ;;  %v252_v41 = vsel %vm68_vm0, %v243_v14, %v7191_v24  ;;  %v312_v43 = vsel %vm68_vm0, %v303_v23, %v7190_v18 }
  0xd8   :  { %v5080_v0 = vpop.permute.xlu1 %172  ;;  %v5082_v46 = vpop.permute.xlu0 %112  ;;  %3469 = vmatpush1.bf16.msra.mxu0 %v4190_v22  ;;  %v253_v10 = vsel %vm7193_vm6, %v4933_v56, %v252_v41  ;;  %v313_v9 = vsel %vm7183_vm11, %v4944_v28, %v312_v43  ;;  %vm7199_vm11 = vcmask 990208   ;;  %vm7215_vm6 = vcmask 146432  }
  0xd9   :  { %v7188_v55 = vrot.slane %v5080_v0, 4  ;;  %v7189_v14 = vrot.slane %v5082_v46, 4  ;;  %v4216_v59 = vcombine.low %v253_v10, %v313_v9  ;;  %v4217_v30 = vcombine.high %v253_v10, %v313_v9  ;;  %v5129_v9 = vld [vmem:[%s7150_s0 + $0x20] sm:$0xff] }
  0xda   :  { %714 = vrot.lane.b32.xlu1 %v5026_v44, %s4482_s30  ;;  %2094 = vrot.lane.b32.xlu0 %v5055_v19, %s4481_s29 }
  0xdb   :  { %3546 = vmatprep.subr.bf16.mxu1 %v4217_v30  ;;  %v132_v56 = vsel %vm68_vm0, %v123_v49, %v7189_v14  ;;  %v192_v28 = vsel %vm68_vm0, %v183_v17, %v7188_v55 }
  0xdc   :  { %v5102_v23 = vpop.permute.xlu1 %1790  ;;  %3547 = vmatpush1.bf16.msra.mxu1 %v4216_v59  ;;  %v1789_v8 = vpop.permute.xlu0 %1788  ;;  %v133_v12 = vsel %vm7187_vm12, %v4987_v53, %v132_v56  ;;  %v193_v40 = vsel %vm7184_vm13, %v5000_v45, %v192_v28  ;;  %vm7200_vm13 = vcmask 982016   ;;  %vm7206_vm12 = vcmask 121856  }
  0xdd   :  { %v1803_v42 = vrot.slane %v5102_v23, 4  ;;  %v1802_v11 = vrot.slane %v1789_v8, 4  ;;  %v4204_v22 = vcombine.low %v133_v12, %v193_v40  ;;  %v4205_v41 = vcombine.high %v133_v12, %v193_v40 }
  0xde   :  { %1914 = vrot.lane.b32.xlu1 %v5055_v19, %s4484_s7  ;;  %774 = vrot.lane.b32.xlu0 %v5026_v44, %s4483_s6 }
  0xdf   :  { %3548 = vmatprep.subr.bf16.mxu1 %v4205_v41  ;;  %v1809_v45 = vsel %vm68_vm0, %v1802_v11, %v1803_v42 }
  0xe0   :  { %v5113_v49 = vpop.permute.xlu1 %1850  ;;  %3549 = vmatpush1.bf16.msra.mxu1 %v4204_v22  ;;  %v1849_v53 = vpop.permute.xlu0 %1848  ;;  %v1811_v59 = vsel %vm7199_vm11, %v1789_v8, %v1809_v45  ;;  %v22_v22 = vld [vmem:[%s7150_s0 + $0x8] sm:$0xff] }
  0xe1   :  { %v1863_v17 = vrot.slane %v5113_v49, 4  ;;  %v1862_v43 = vrot.slane %v1849_v53, 4 }
  0xe2   :  { %594 = vrot.lane.b32.xlu1 %v5026_v44, %s4486_s9  ;;  %1974 = vrot.lane.b32.xlu0 %v5055_v19, %s7272_s8 }
  0xe3   :  { %v1869_v10 = vsel %vm68_vm0, %v1862_v43, %v1863_v17 }
  0xe4   :  { %v1871_v30 = vsel %vm7200_vm13, %v1849_v53, %v1869_v10  ;;  %v1669_v56 = vpop.permute.xlu1 %1668  ;;  %v5133_v28 = vpop.permute.xlu0 %51 }
  0xe5   :  { %v7185_v12 = vrot.slane %v5133_v28, 4  ;;  %v4371_v40 = vcombine.high %v1811_v59, %v1871_v30  ;;  %v4370_v11 = vcombine.low %v1811_v59, %v1871_v30  ;;  %v1682_v43 = vrot.slane %v1669_v56, 4 }
  0xe6   :  { %836 = vrot.lane.b32.xlu1 %v5129_v9, %s4479_s21  ;;  %654 = vrot.lane.b32.xlu0 %v5026_v44, %s4488_s10 }
  0xe7   :  { %3470 = vmatprep.subr.bf16.mxu0 %v4371_v40  ;;  %v72_v8 = vsel %vm68_vm0, %v62_v61, %v7185_v12 }
  0xe8   :  { %v1729_v41 = vpop.permute.xlu1 %1728  ;;  %v5148_v53 = vpop.permute.xlu0 %1670  ;;  %3471 = vmatpush2.bf16.msra.mxu0 %v4370_v11  ;;  %v73_v45 = vsel %vm7186_vm9, %v5038_v5, %v72_v8  ;;  %vm7205_vm9 = vcmask 130048  }
  0xe9   :  { %v1683_v10 = vrot.slane %v5148_v53, 4  ;;  %v4192_v59 = vcombine.low %v22_v22, %v73_v45  ;;  %v4193_v30 = vcombine.high %v22_v22, %v73_v45  ;;  %v1742_v40 = vrot.slane %v1729_v41, 4 }
  0xea   :  { %474 = vrot.lane.b32.xlu1 %v5026_v44, %s4489_s13  ;;  %896 = vrot.lane.b32.xlu0 %v5129_v9, %s4478_s20 }
  0xeb   :  { %3550 = vmatprep.subr.bf16.mxu1 %v4193_v30  ;;  %v1689_v5 = vsel %vm68_vm0, %v1682_v43, %v1683_v10 }
  0xec   :  { %v1549_v61 = vpop.permute.xlu1 %1548  ;;  %v5157_v12 = vpop.permute.xlu0 %1730  ;;  %3551 = vmatpush1.bf16.msra.mxu1 %v4192_v59  ;;  %v1691_v59 = vsel %vm7205_vm9, %v1669_v56, %v1689_v5 }
  0xed   :  { %v1743_v11 = vrot.slane %v5157_v12, 4  ;;  %v1562_v43 = vrot.slane %v1549_v61, 4 }
  0xee   :  { %716 = vrot.lane.b32.xlu1 %v5129_v9, %s4482_s30  ;;  %534 = vrot.lane.b32.xlu0 %v5026_v44, %s7232_s14 }
  0xef   :  { %v1749_v22 = vsel %vm68_vm0, %v1742_v40, %v1743_v11 }
  0xf0   :  { %v1609_v8 = vpop.permute.xlu1 %1608  ;;  %v5170_v45 = vpop.permute.xlu0 %1550  ;;  %v1751_v30 = vsel %vm7206_vm12, %v1729_v41, %v1749_v22 }
  0xf1   :  { %v1563_v55 = vrot.slane %v5170_v45, 4  ;;  %v4359_v14 = vcombine.high %v1691_v59, %v1751_v30  ;;  %v4358_v18 = vcombine.low %v1691_v59, %v1751_v30  ;;  %v1622_v24 = vrot.slane %v1609_v8, 4 }
  0xf2   :  { %354 = vrot.lane.b32.xlu1 %v5026_v44, %s7223_s15  ;;  %776 = vrot.lane.b32.xlu0 %v5129_v9, %s4483_s6 }
  0xf3   :  { %3472 = vmatprep.subr.bf16.mxu0 %v4359_v14  ;;  %v1569_v5 = vsel %vm68_vm0, %v1562_v43, %v1563_v55 }
  0xf4   :  { %v5179_v40 = vpop.permute.xlu1 %1792  ;;  %v5181_v35 = vpop.permute.xlu0 %1610  ;;  %3473 = vmatpush2.bf16.msra.mxu0 %v4358_v18  ;;  %v1571_v59 = vsel %vm7215_vm6, %v1549_v61, %v1569_v5 }
  0xf5   :  { %v7201_v56 = vrot.slane %v5179_v40, 4  ;;  %v1623_v41 = vrot.slane %v5181_v35, 4 }
  0xf6   :  { %596 = vrot.lane.b32.xlu1 %v5129_v9, %s4486_s9  ;;  %414 = vrot.lane.b32.xlu0 %v5026_v44, %s7221_s16 }
  0xf7   :  { %v1629_v18 = vsel %vm68_vm0, %v1622_v24, %v1623_v41  ;;  %v1812_v6 = vsel %vm68_vm0, %v1803_v42, %v7201_v56 }
  0xf8   :  { %v1429_v14 = vpop.permute.xlu1 %1428  ;;  %v5195_v22 = vpop.permute.xlu0 %1852  ;;  %v1631_v30 = vsel %vm7216_vm15, %v1609_v8, %v1629_v18  ;;  %v1813_v42 = vsel %vm7199_vm11, %v5102_v23, %v1812_v6  ;;  %vm7227_vm11 = vcmask 162816  }
  0xf9   :  { %v7198_v43 = vrot.slane %v5195_v22, 4  ;;  %v4347_v33 = vcombine.high %v1571_v59, %v1631_v30  ;;  %v4346_v60 = vcombine.low %v1571_v59, %v1631_v30  ;;  %v1442_v18 = vrot.slane %v1429_v14, 4 }
  0xfa   :  { %234 = vrot.lane.b32.xlu1 %v5026_v44, %s7217_s17  ;;  %656 = vrot.lane.b32.xlu0 %v5129_v9, %s4488_s10 }
  0xfb   :  { %3474 = vmatprep.subr.bf16.mxu0 %v4347_v33  ;;  %v1872_v24 = vsel %vm68_vm0, %v1863_v17, %v7198_v43 }
  0xfc   :  { %v1489_v61 = vpop.permute.xlu1 %1488  ;;  %v5214_v8 = vpop.permute.xlu0 %1430  ;;  %3475 = vmatpush2.bf16.msra.mxu0 %v4346_v60  ;;  %v1873_v5 = vsel %vm7200_vm13, %v5113_v49, %v1872_v24  ;;  %vm7228_vm13 = vcmask 154624  }
  0xfd   :  { %v1443_v59 = vrot.slane %v5214_v8, 4  ;;  %v4372_v33 = vcombine.low %v1813_v42, %v1873_v5  ;;  %v4373_v30 = vcombine.high %v1813_v42, %v1873_v5  ;;  %v1502_v17 = vrot.slane %v1489_v61, 4 }
  0xfe   :  { %476 = vrot.lane.b32.xlu1 %v5129_v9, %s4489_s13  ;;  %294 = vrot.lane.b32.xlu0 %v5026_v44, %s7212_s18 }
  0xff   :  { %3552 = vmatprep.subr.bf16.mxu1 %v4373_v30  ;;  %v1449_v49 = vsel %vm68_vm0, %v1442_v18, %v1443_v59 }
 0x100   :  { %v5225_v60 = vpop.permute.xlu1 %1672  ;;  %v5227_v43 = vpop.permute.xlu0 %1490  ;;  %3553 = vmatpush2.bf16.msra.mxu1 %v4372_v33  ;;  %v1451_v33 = vsel %vm7227_vm11, %v1429_v14, %v1449_v49 }
 0x101   :  { %v7207_v6 = vrot.slane %v5225_v60, 4  ;;  %v1503_v23 = vrot.slane %v5227_v43, 4 }
 0x102   :  { %114 = vrot.lane.b32.xlu1 %v5026_v44, %s7210_s19  ;;  %536 = vrot.lane.b32.xlu0 %v5129_v9, %s7232_s14  ;;  %s7312_s14 = smov 43  }
 0x103   :  { %v1509_v24 = vsel %vm68_vm0, %v1502_v17, %v1503_v23  ;;  %v1692_v13 = vsel %vm68_vm0, %v1683_v10, %v7207_v6 }
 0x104   :  { %v1309_v42 = vpop.permute.xlu1 %1308  ;;  %v5241_v5 = vpop.permute.xlu0 %1732  ;;  %v1511_v30 = vsel %vm7228_vm13, %v1489_v61, %v1509_v24  ;;  %v1693_v10 = vsel %vm7205_vm9, %v5148_v53, %v1692_v13  ;;  %vm7235_vm9 = vcmask 351232  }
 0x105   :  { %v7204_v18 = vrot.slane %v5241_v5, 4  ;;  %v4335_v56 = vcombine.high %v1451_v33, %v1511_v30  ;;  %v4334_v51 = vcombine.low %v1451_v33, %v1511_v30  ;;  %v1322_v24 = vrot.slane %v1309_v42, 4 }
 0x106   :  { %356 = vrot.lane.b32.xlu1 %v5129_v9, %s7223_s15  ;;  %174 = vrot.lane.b32.xlu0 %v5026_v44, %s7305_s26  ;;  %s7310_s15 = smov 20  }
 0x107   :  { %3476 = vmatprep.subr.bf16.mxu0 %v4335_v56  ;;  %v1752_v14 = vsel %vm68_vm0, %v1743_v11, %v7204_v18 }
 0x108   :  { %v1369_v61 = vpop.permute.xlu1 %1368  ;;  %v5260_v17 = vpop.permute.xlu0 %1310  ;;  %3477 = vmatpush2.bf16.msra.mxu0 %v4334_v51  ;;  %v1753_v49 = vsel %vm7206_vm12, %v5157_v12, %v1752_v14  ;;  %vm7236_vm12 = vcmask 343040  }
 0x109   :  { %v1323_v33 = vrot.slane %v5260_v17, 4  ;;  %v4360_v56 = vcombine.low %v1693_v10, %v1753_v49  ;;  %v4361_v30 = vcombine.high %v1693_v10, %v1753_v49  ;;  %v1382_v11 = vrot.slane %v1369_v61, 4 }
 0x10a   :  { %53 = vrot.lane.b32.xlu1 %v5026_v44, %s7306_s23  ;;  %416 = vrot.lane.b32.xlu0 %v5129_v9, %s7221_s16  ;;  %s7311_s16 = smov 19  }
 0x10b   :  { %3554 = vmatprep.subr.bf16.mxu1 %v4361_v30  ;;  %v1329_v53 = vsel %vm68_vm0, %v1322_v24, %v1323_v33 }
 0x10c   :  { %v5271_v51 = vpop.permute.xlu1 %1552  ;;  %v5273_v18 = vpop.permute.xlu0 %1370  ;;  %3555 = vmatpush2.bf16.msra.mxu1 %v4360_v56  ;;  %v1331_v56 = vsel %vm7235_vm9, %v1309_v42, %v1329_v53 }
 0x10d   :  { %v7219_v13 = vrot.slane %v5271_v51, 4  ;;  %v1383_v12 = vrot.slane %v5273_v18, 4 }
 0x10e   :  { %296 = vrot.lane.b32.xlu1 %v5129_v9, %s7212_s18  ;;  %236 = vrot.lane.b32.xlu0 %v5129_v9, %s7217_s17  ;;  %s7308_s18 = smov 121   ;;  %s7309_s17 = smov 16  }
 0x10f   :  { %v1389_v14 = vsel %vm68_vm0, %v1382_v11, %v1383_v12  ;;  %v1572_v7 = vsel %vm68_vm0, %v1563_v55, %v7219_v13 }
 0x110   :  { %v1189_v10 = vpop.permute.xlu1 %1188  ;;  %v5287_v49 = vpop.permute.xlu0 %1612  ;;  %v1391_v30 = vsel %vm7236_vm12, %v1369_v61, %v1389_v14  ;;  %v1573_v55 = vsel %vm7215_vm6, %v5170_v45, %v1572_v7  ;;  %vm1210_vm6 = vcmask 367616  }
 0x111   :  { %v7214_v24 = vrot.slane %v5287_v49, 4  ;;  %v4323_v6 = vcombine.high %v1331_v56, %v1391_v30  ;;  %v4322_v3 = vcombine.low %v1331_v56, %v1391_v30  ;;  %v1202_v14 = vrot.slane %v1189_v10, 4 }
 0x112   :  { %176 = vrot.lane.b32.xlu1 %v5129_v9, %s7305_s26  ;;  %116 = vrot.lane.b32.xlu0 %v5129_v9, %s7210_s19  ;;  %s7307_s19 = smov 120  }
 0x113   :  { %3478 = vmatprep.subr.bf16.mxu0 %v4323_v6  ;;  %v1632_v42 = vsel %vm68_vm0, %v1623_v41, %v7214_v24 }
 0x114   :  { %v1249_v61 = vpop.permute.xlu1 %1248  ;;  %v5306_v11 = vpop.permute.xlu0 %1190  ;;  %3479 = vmatpush2.bf16.msra.mxu0 %v4322_v3  ;;  %v1633_v53 = vsel %vm7216_vm15, %v5181_v35, %v1632_v42  ;;  %vm1270_vm15 = vcmask 359424  }
 0x115   :  { %v1203_v56 = vrot.slane %v5306_v11, 4  ;;  %v4348_v6 = vcombine.low %v1573_v55, %v1633_v53  ;;  %v4349_v30 = vcombine.high %v1573_v55, %v1633_v53  ;;  %v1262_v41 = vrot.slane %v1249_v61, 4 }
 0x116   :  { %1854 = vrot.lane.b32.xlu1 %v5055_v19, %s7307_s19  ;;  %1794 = vrot.lane.b32.xlu0 %v5055_v19, %s7308_s18 }
 0x117   :  { %3556 = vmatprep.subr.bf16.mxu1 %v4349_v30  ;;  %v1209_v45 = vsel %vm68_vm0, %v1202_v14, %v1203_v56 }
 0x118   :  { %v5317_v3 = vpop.permute.xlu1 %1432  ;;  %v5319_v24 = vpop.permute.xlu0 %1250  ;;  %3557 = vmatpush2.bf16.msra.mxu1 %v4348_v6  ;;  %v1211_v53 = vsel %vm1210_vm6, %v1189_v10, %v1209_v45  ;;  %v5350_v10 = vld [vmem:[%s7150_s0 + $0x24] sm:$0xff] }
 0x119   :  { %v7225_v7 = vrot.slane %v5317_v3, 4  ;;  %v1263_v35 = vrot.slane %v5319_v24, 4 }
 0x11a   :  { %1674 = vrot.lane.b32.xlu1 %v5026_v44, %s7309_s17  ;;  %55 = vrot.lane.b32.xlu0 %v5129_v9, %s7306_s23 }
 0x11b   :  { %v1269_v19 = vsel %vm68_vm0, %v1262_v41, %v1263_v35  ;;  %v1452_v37 = vsel %vm68_vm0, %v1443_v59, %v7225_v7 }
 0x11c   :  { %v1069_v42 = vpop.permute.xlu1 %1068  ;;  %v5333_v55 = vpop.permute.xlu0 %1492  ;;  %v1271_v6 = vsel %vm1270_vm15, %v1249_v61, %v1269_v19  ;;  %v1453_v45 = vsel %vm7227_vm11, %v5214_v8, %v1452_v37  ;;  %vm1090_vm11 = vcmask 384000  }
 0x11d   :  { %v7226_v14 = vrot.slane %v5333_v55, 4  ;;  %v4311_v30 = vcombine.high %v1211_v53, %v1271_v6  ;;  %v4310_v13 = vcombine.low %v1211_v53, %v1271_v6  ;;  %v1082_v53 = vrot.slane %v1069_v42, 4 }
 0x11e   :  { %1554 = vrot.lane.b32.xlu1 %v5026_v44, %s7248_s11  ;;  %1734 = vrot.lane.b32.xlu0 %v5026_v44, %s7237_s27 }
 0x11f   :  { %3480 = vmatprep.subr.bf16.mxu0 %v4311_v30  ;;  %v1512_v61 = vsel %vm68_vm0, %v1503_v23, %v7226_v14 }
 0x120   :  { %v1129_v41 = vpop.permute.xlu1 %1128  ;;  %v5357_v59 = vpop.permute.xlu0 %1070  ;;  %3481 = vmatpush2.bf16.msra.mxu0 %v4310_v13  ;;  %v1513_v19 = vsel %vm7228_vm13, %v5227_v43, %v1512_v61  ;;  %vm1150_vm13 = vcmask 375808  }
 0x121   :  { %v1083_v6 = vrot.slane %v5357_v59, 4  ;;  %v4336_v30 = vcombine.low %v1453_v45, %v1513_v19  ;;  %v4337_v7 = vcombine.high %v1453_v45, %v1513_v19  ;;  %v1142_v23 = vrot.slane %v1129_v41, 4 }
 0x122   :  { %1796 = vrot.lane.b32.xlu1 %v5350_v10, %s7308_s18  ;;  %1614 = vrot.lane.b32.xlu0 %v5026_v44, %s7245_s12 }
 0x123   :  { %3558 = vmatprep.subr.bf16.mxu1 %v4337_v7  ;;  %v1089_v8 = vsel %vm68_vm0, %v1082_v53, %v1083_v6 }
 0x124   :  { %v5368_v13 = vpop.permute.xlu1 %1312  ;;  %v5370_v14 = vpop.permute.xlu0 %1130  ;;  %3559 = vmatpush2.bf16.msra.mxu1 %v4336_v30  ;;  %v1091_v19 = vsel %vm1090_vm11, %v1069_v42, %v1089_v8 }
 0x125   :  { %v7239_v37 = vrot.slane %v5368_v13, 4  ;;  %v1143_v43 = vrot.slane %v5370_v14, 4 }
 0x126   :  { %1434 = vrot.lane.b32.xlu1 %v5026_v44, %s7310_s15  ;;  %1856 = vrot.lane.b32.xlu0 %v5350_v10, %s7307_s19 }
 0x127   :  { %v1149_v7 = vsel %vm68_vm0, %v1142_v23, %v1143_v43  ;;  %v1332_v52 = vsel %vm68_vm0, %v1323_v33, %v7239_v37 }
 0x128   :  { %v949_v61 = vpop.permute.xlu1 %948  ;;  %v5384_v45 = vpop.permute.xlu0 %1372  ;;  %v1151_v30 = vsel %vm1150_vm13, %v1129_v41, %v1149_v7  ;;  %v1333_v33 = vsel %vm7235_vm9, %v5260_v17, %v1332_v52  ;;  %vm970_vm9 = vcmask 572416  }
 0x129   :  { %v7234_v53 = vrot.slane %v5384_v45, 4  ;;  %v4299_v38 = vcombine.high %v1091_v19, %v1151_v30  ;;  %v4298_v62 = vcombine.low %v1091_v19, %v1151_v30  ;;  %v962_v7 = vrot.slane %v949_v61, 4 }
 0x12a   :  { %1676 = vrot.lane.b32.xlu1 %v5129_v9, %s7309_s17  ;;  %1494 = vrot.lane.b32.xlu0 %v5026_v44, %s7311_s16 }
 0x12b   :  { %3482 = vmatprep.subr.bf16.mxu0 %v4299_v38  ;;  %v1392_v42 = vsel %vm68_vm0, %v1383_v12, %v7234_v53 }
 0x12c   :  { %v1009_v41 = vpop.permute.xlu1 %1008  ;;  %v5403_v23 = vpop.permute.xlu0 %950  ;;  %3483 = vmatpush2.bf16.msra.mxu0 %v4298_v62  ;;  %v1393_v8 = vsel %vm7236_vm12, %v5273_v18, %v1392_v42  ;;  %vm1030_vm12 = vcmask 564224  }
 0x12d   :  { %v7240_v19 = vrot.slane %v5403_v23, 4  ;;  %v4324_v38 = vcombine.low %v1333_v33, %v1393_v8  ;;  %v4325_v30 = vcombine.high %v1333_v33, %v1393_v8  ;;  %v1022_v12 = vrot.slane %v1009_v41, 4 }
 0x12e   :  { %1314 = vrot.lane.b32.xlu1 %v5026_v44, %s7312_s14  ;;  %1736 = vrot.lane.b32.xlu0 %v5129_v9, %s7237_s27  ;;  %s7313_s27 = smov 42  }
 0x12f   :  { %3560 = vmatprep.subr.bf16.mxu1 %v4325_v30  ;;  %v969_v17 = vsel %vm68_vm0, %v962_v7, %v7240_v19 }
 0x130   :  { %v5414_v62 = vpop.permute.xlu1 %1192  ;;  %v5416_v53 = vpop.permute.xlu0 %1010  ;;  %3561 = vmatpush2.bf16.msra.mxu1 %v4324_v38  ;;  %v971_v38 = vsel %vm970_vm9, %v949_v61, %v969_v17 }
 0x131   :  { %v7251_v52 = vrot.slane %v5414_v62, 4  ;;  %v1023_v18 = vrot.slane %v5416_v53, 4 }
 0x132   :  { %1556 = vrot.lane.b32.xlu1 %v5129_v9, %s7248_s11  ;;  %1374 = vrot.lane.b32.xlu0 %v5026_v44, %s7313_s27  ;;  %s7318_s11 = smov 70  }
 0x133   :  { %v1029_v42 = vsel %vm68_vm0, %v1022_v12, %v1023_v18  ;;  %v1212_v7 = vsel %vm68_vm0, %v1203_v56, %v7251_v52 }
 0x134   :  { %v5430_v33 = vpop.permute.xlu1 %1072  ;;  %v5432_v8 = vpop.permute.xlu0 %1252  ;;  %v1031_v30 = vsel %vm1030_vm12, %v1009_v41, %v1029_v42  ;;  %v1213_v17 = vsel %vm1210_vm6, %v5306_v11, %v1212_v7 }
 0x135   :  { %v7244_v37 = vrot.slane %v5430_v33, 4  ;;  %v7242_v19 = vrot.slane %v5432_v8, 4  ;;  %v4287_v27 = vcombine.high %v971_v38, %v1031_v30  ;;  %v4286_v12 = vcombine.low %v971_v38, %v1031_v30 }
 0x136   :  { %1194 = vrot.lane.b32.xlu1 %v5026_v44, %s4509_s24  ;;  %1616 = vrot.lane.b32.xlu0 %v5129_v9, %s7245_s12  ;;  %s7316_s12 = smov 46  }
 0x137   :  { %3484 = vmatprep.subr.bf16.mxu0 %v4287_v27  ;;  %v1272_v61 = vsel %vm68_vm0, %v1263_v35, %v7242_v19  ;;  %v1092_v27 = vsel %vm68_vm0, %v1083_v6, %v7244_v37 }
 0x138   :  { %v5452_v56 = vpop.permute.xlu1 %2032  ;;  %v5454_v41 = vpop.permute.xlu0 %1132  ;;  %3485 = vmatpush2.bf16.msra.mxu0 %v4286_v12  ;;  %v1273_v42 = vsel %vm1270_vm15, %v5319_v24, %v1272_v61  ;;  %v1093_v7 = vsel %vm1090_vm11, %v5357_v59, %v1092_v27 }
 0x139   :  { %v2044_v38 = vrot.slane %v5452_v56, 4  ;;  %v7243_v35 = vrot.slane %v5454_v41, 4  ;;  %v4312_v30 = vcombine.low %v1213_v17, %v1273_v42  ;;  %v4313_v19 = vcombine.high %v1213_v17, %v1273_v42 }
 0x13a   :  { %1436 = vrot.lane.b32.xlu1 %v5129_v9, %s7310_s15  ;;  %1254 = vrot.lane.b32.xlu0 %v5026_v44, %s7259_s25 }
 0x13b   :  { %3562 = vmatprep.subr.bf16.mxu1 %v4313_v19  ;;  %v1152_v24 = vsel %vm68_vm0, %v1143_v43, %v7243_v35  ;;  %3487 = vmatmul.mubr.bf16.vlgmr.msra.gmra.mxu0 %v4952_v29  ;;  %v2052_v19 = vsel %vm68_vm0, %v2043_v20, %v2044_v38 }
 0x13c   :  { %v5477_v11 = vpop.permute.xlu1 %952  ;;  %v5479_v6 = vpop.permute.xlu0 %2092  ;;  %3563 = vmatpush2.bf16.msra.mxu1 %v4312_v30  ;;  %v1153_v12 = vsel %vm1150_vm13, %v5370_v14, %v1152_v24  ;;  %3609 = vmatprep.mubr.bf16.mxu0 %v7254_v4  ;;  %v7314_v14 = vrot.slane %v4723_v25, 4  ;;  %v2053_v30 = vsel %vm2050_vm3, %v4709_v16, %v2052_v19 }
 0x13d   :  { %v7250_v43 = vrot.slane %v5477_v11, 4  ;;  %v2104_v61 = vrot.slane %v5479_v6, 4  ;;  %v4300_v17 = vcombine.low %v1093_v7, %v1153_v12  ;;  %v4301_v42 = vcombine.high %v1093_v7, %v1153_v12 }
 0x13e   :  { %1074 = vrot.lane.b32.xlu1 %v5026_v44, %s7257_s22  ;;  %1496 = vrot.lane.b32.xlu0 %v5129_v9, %s7311_s16  ;;  %v7315_v7 = vrot.slane %v5403_v23, 4 }
 0x13f   :  { %3564 = vmatprep.subr.bf16.mxu1 %v4301_v42  ;;  %v2112_v20 = vsel %vm68_vm0, %v7314_v14, %v2104_v61 }
 0x140   :  { %v5502_v59 = vpop.permute.xlu1 %1912  ;;  %v5504_v27 = vpop.permute.xlu0 %1012  ;;  %3565 = vmatpush2.bf16.msra.mxu1 %v4300_v17  ;;  %v2113_v24 = vsel %vm7252_vm4, %v4723_v25, %v2112_v20  ;;  %v972_v12 = vsel %vm68_vm0, %v7315_v7, %v7250_v43 }
 0x141   :  { %v1924_v42 = vrot.slane %v5502_v59, 4  ;;  %v7247_v14 = vrot.slane %v5504_v27, 4  ;;  %v4396_v35 = vcombine.low %v2053_v30, %v2113_v24  ;;  %v4397_v37 = vcombine.high %v2053_v30, %v2113_v24 }
 0x142   :  { %1316 = vrot.lane.b32.xlu1 %v5129_v9, %s7312_s14  ;;  %1134 = vrot.lane.b32.xlu0 %v5026_v44, %s7316_s12  ;;  %v973_v17 = vsel %vm970_vm9, %v5403_v23, %v972_v12 }
 0x143   :  { %3589 = vmatprep.subr.bf16.mxu0 %v4397_v37  ;;  %v1032_v16 = vsel %vm68_vm0, %v1023_v18, %v7247_v14  ;;  %v7317_v37 = vrot.slane %v4760_v50, 4 }
 0x144   :  { %v5526_v25 = vpop.permute.xlu1 %834  ;;  %v5528_v19 = vpop.permute.xlu0 %1972  ;;  %3590 = vmatpush1.bf16.msra.mxu0 %v4396_v35  ;;  %v1033_v20 = vsel %vm1030_vm12, %v5416_v53, %v1032_v16  ;;  %v7319_v53 = vrot.slane %v4769_v58, 4 }
 0x145   :  { %v1932_v30 = vsel %vm68_vm0, %v7317_v37, %v1924_v42  ;;  %v845_v24 = vrot.slane %v5526_v25, 4  ;;  %v1984_v18 = vrot.slane %v5528_v19, 4  ;;  %v4288_v7 = vcombine.low %v973_v17, %v1033_v20 }
 0x146   :  { %v4289_v14 = vcombine.high %v973_v17, %v1033_v20  ;;  %954 = vrot.lane.b32.xlu1 %v5026_v44, %s7318_s11  ;;  %1376 = vrot.lane.b32.xlu0 %v5129_v9, %s7313_s27  ;;  %v1933_v16 = vsel %vm1930_vm7, %v4760_v50, %v1932_v30  ;;  %v7321_v50 = vrot.slane %v4821_v34, 4 }
 0x147   :  { %v1992_v23 = vsel %vm68_vm0, %v7319_v53, %v1984_v18 }
 0x148   :  { %3566 = vmatprep.subr.bf16.mxu1 %v4289_v14  ;;  %v5550_v35 = vpop.permute.xlu1 %2034  ;;  %v5552_v12 = vpop.permute.xlu0 %894  ;;  %v1993_v17 = vsel %vm7261_vm8, %v4769_v58, %v1992_v23  ;;  %v7320_v14 = vrot.slane %v4823_v36, 4 }
 0x149   :  { %3567 = vmatpush2.bf16.msra.mxu1 %v4288_v7  ;;  %v7269_v37 = vrot.slane %v5550_v35, 4  ;;  %v905_v53 = vrot.slane %v5552_v12, 4  ;;  %v4384_v43 = vcombine.low %v1933_v16, %v1993_v17  ;;  %v4385_v52 = vcombine.high %v1933_v16, %v1993_v17 }
 0x14a   :  { %v854_v20 = vsel %vm68_vm0, %v7320_v14, %v845_v24  ;;  %1196 = vrot.lane.b32.xlu1 %v5129_v9, %s4509_s24  ;;  %1014 = vrot.lane.b32.xlu0 %v5026_v44, %s4514_s1 }
 0x14b   :  { %3591 = vmatprep.subr.bf16.mxu0 %v4385_v52  ;;  %v914_v58 = vsel %vm68_vm0, %v7321_v50, %v905_v53  ;;  %v855_v23 = vsel %vm850_vm1, %v4823_v36, %v854_v20  ;;  %v2054_v52 = vsel %vm68_vm0, %v2044_v38, %v7269_v37 }
 0x14c   :  { %3569 = vmatmul.mubr.bf16.vlgmr.msra.gmra.mxu1 %v4952_v29  ;;  %v5575_v30 = vpop.permute.xlu1 %714  ;;  %v5577_v7 = vpop.permute.xlu0 %2094  ;;  %3592 = vmatpush1.bf16.msra.mxu0 %v4384_v43  ;;  %v915_v44 = vsel %vm910_vm2, %v4821_v34, %v914_v58  ;;  %v2055_v20 = vsel %vm2050_vm3, %v5452_v56, %v2054_v52  ;;  %v7322_v58 = vrot.slane %v4869_v2, 4  ;;  %v7323_v56 = vrot.slane %v4867_v63, 4 }
 0x14d   :  { %3691 = vmatprep.mubr.bf16.mxu1 %v7254_v4  ;;  %v725_v16 = vrot.slane %v5575_v30, 4  ;;  %v7253_v17 = vrot.slane %v5577_v7, 4  ;;  %v4278_v14 = vcombine.low %v855_v23, %v915_v44  ;;  %v4279_v43 = vcombine.high %v855_v23, %v915_v44 }
 0x14e   :  { %1076 = vrot.lane.b32.xlu1 %v5129_v9, %s7257_s22  ;;  %1256 = vrot.lane.b32.xlu0 %v5129_v9, %s7259_s25 }
 0x14f   :  { %3618 = vmatprep.subr.bf16.mxu0 %v4279_v43  ;;  %4407 = vmatmul.mubr.msk.bf16.vlgmr.msra.gmra.mxu0 %vm3450_vm10, %v4802_v21  ;;  %v2114_v34 = vsel %vm68_vm0, %v2104_v61, %v7253_v17  ;;  %v734_v23 = vsel %vm68_vm0, %v7322_v58, %v725_v16 }
 0x150   :  { %v5602_v36 = vpop.permute.xlu1 %1914  ;;  %v5604_v38 = vpop.permute.xlu0 %774  ;;  %3619 = vmatpush1.bf16.msra.mxu0 %v4278_v14  ;;  %v2115_v50 = vsel %vm7252_vm4, %v5479_v6, %v2114_v34  ;;  %3650 = vmatprep.mubr.bf16.mxu0 %v4975_v1  ;;  %vm7324_vm4 = vcmask 596992  }
 0x151   :  { %v7262_v61 = vrot.slane %v5602_v36, 4  ;;  %v785_v44 = vrot.slane %v5604_v38, 4  ;;  %v4398_v43 = vcombine.low %v2055_v20, %v2115_v50  ;;  %v4399_v14 = vcombine.high %v2055_v20, %v2115_v50 }
 0x152   :  { %2036 = vrot.lane.b32.xlu1 %v5350_v10, %s4480_s28  ;;  %1136 = vrot.lane.b32.xlu0 %v5129_v9, %s7316_s12  ;;  %v735_v20 = vsel %vm730_vm5, %v4869_v2, %v734_v23 }
 0x153   :  { %3671 = vmatprep.subr.bf16.mxu1 %v4399_v14  ;;  %v794_v6 = vsel %vm68_vm0, %v7323_v56, %v785_v44  ;;  %v1934_v58 = vsel %vm68_vm0, %v1924_v42, %v7262_v61 }
 0x154   :  { %v5627_v52 = vpop.permute.xlu1 %594  ;;  %v5629_v34 = vpop.permute.xlu0 %1974  ;;  %3672 = vmatpush1.bf16.msra.mxu1 %v4398_v43  ;;  %v795_v50 = vsel %vm7324_vm4, %v4867_v63, %v794_v6  ;;  %v1935_v23 = vsel %vm1930_vm7, %v5502_v59, %v1934_v58  ;;  %v5673_v59 = vld [vmem:[%s7150_s0 + $0x28] sm:$0xff]  ;;  %vm7327_vm4 = vcmask 793600  }
 0x155   :  { %v605_v14 = vrot.slane %v5627_v52, 4  ;;  %v7256_v56 = vrot.slane %v5629_v34, 4  ;;  %v4266_v17 = vcombine.low %v735_v20, %v795_v50  ;;  %v4267_v4 = vcombine.high %v735_v20, %v795_v50 }
 0x156   :  { %956 = vrot.lane.b32.xlu1 %v5129_v9, %s7318_s11  ;;  %2096 = vrot.lane.b32.xlu0 %v5350_v10, %s4481_s29 }
 0x157   :  { %3620 = vmatprep.subr.bf16.mxu0 %v4267_v4  ;;  %v1994_v63 = vsel %vm68_vm0, %v1984_v18, %v7256_v56  ;;  %v7325_v4 = vrot.slane %v4915_v48, 4 }
 0x158   :  { %v5651_v2 = vpop.permute.xlu1 %836  ;;  %v5653_v42 = vpop.permute.xlu0 %654  ;;  %3621 = vmatpush1.bf16.msra.mxu0 %v4266_v17  ;;  %v1995_v43 = vsel %vm7261_vm8, %v5528_v19, %v1994_v63  ;;  %v7326_v19 = vrot.slane %v4913_v47, 4  ;;  %vm7328_vm8 = vcmask 785408  }
 0x159   :  { %v614_v6 = vsel %vm68_vm0, %v7325_v4, %v605_v14  ;;  %v7264_v20 = vrot.slane %v5651_v2, 4  ;;  %v665_v18 = vrot.slane %v5653_v42, 4  ;;  %v4386_v50 = vcombine.low %v1935_v23, %v1995_v43 }
 0x15a   :  { %v4387_v56 = vcombine.high %v1935_v23, %v1995_v43  ;;  %1916 = vrot.lane.b32.xlu1 %v5350_v10, %s4484_s7  ;;  %1016 = vrot.lane.b32.xlu0 %v5129_v9, %s4514_s1  ;;  %v615_v9 = vsel %vm7327_vm4, %v4915_v48, %v614_v6  ;;  %vm7332_vm4 = vcmask 801792  }
 0x15b   :  { %v674_v17 = vsel %vm68_vm0, %v7326_v19, %v665_v18  ;;  %v856_v23 = vsel %vm68_vm0, %v845_v24, %v7264_v20 }
 0x15c   :  { %3673 = vmatprep.subr.bf16.mxu1 %v4387_v56  ;;  %v5680_v58 = vpop.permute.xlu1 %474  ;;  %v5682_v63 = vpop.permute.xlu0 %896  ;;  %v675_v56 = vsel %vm7328_vm8, %v4913_v47, %v674_v17  ;;  %v5702_v47 = vld [vmem:[%s7150_s0 + $0x2c] sm:$0xff]  ;;  %vm7331_vm8 = vcmask 809984  }
 0x15d   :  { %3674 = vmatpush1.bf16.msra.mxu1 %v4386_v50  ;;  %v485_v43 = vrot.slane %v5680_v58, 4  ;;  %v7263_v4 = vrot.slane %v5682_v63, 4  ;;  %v4254_v19 = vcombine.low %v615_v9, %v675_v56  ;;  %v4255_v61 = vcombine.high %v615_v9, %v675_v56 }
 0x15e   :  { %838 = vrot.lane.b32.xlu1 %v5673_v59, %s4479_s21  ;;  %1976 = vrot.lane.b32.xlu0 %v5350_v10, %s7272_s8  ;;  %v857_v10 = vsel %vm850_vm1, %v5526_v25, %v856_v23  ;;  %v7329_v50 = vrot.slane %v4965_v39, 4  ;;  %v7330_v25 = vrot.slane %v4963_v31, 4 }
 0x15f   :  { %3622 = vmatprep.subr.bf16.mxu0 %v4255_v61  ;;  %v916_v48 = vsel %vm68_vm0, %v905_v53, %v7263_v4 }
 0x160   :  { %4408 = vmatmul.mubr.msk.bf16.vlgmr.msra.gmra.mxu1 %vm3450_vm10, %v4802_v21  ;;  %v5711_v24 = vpop.permute.xlu1 %716  ;;  %v5713_v6 = vpop.permute.xlu0 %534  ;;  %3623 = vmatpush1.bf16.msra.mxu0 %v4254_v19  ;;  %v917_v61 = vsel %vm910_vm2, %v5552_v12, %v916_v48  ;;  %v494_v53 = vsel %vm68_vm0, %v7329_v50, %v485_v43 }
 0x161   :  { %3732 = vmatprep.mubr.bf16.mxu1 %v4975_v1  ;;  %v7266_v17 = vrot.slane %v5711_v24, 4  ;;  %v545_v9 = vrot.slane %v5713_v6, 4  ;;  %v4280_v56 = vcombine.low %v857_v10, %v917_v61  ;;  %v4281_v19 = vcombine.high %v857_v10, %v917_v61 }
 0x162   :  { %2038 = vrot.lane.b32.xlu1 %v5702_v47, %s4480_s28  ;;  %898 = vrot.lane.b32.xlu0 %v5673_v59, %s4478_s20  ;;  %v495_v10 = vsel %vm7331_vm8, %v4965_v39, %v494_v53  ;;  %vm7333_vm8 = vcmask 596992  }
 0x163   :  { %3700 = vmatprep.subr.bf16.mxu1 %v4281_v19  ;;  %v554_v12 = vsel %vm68_vm0, %v7330_v25, %v545_v9  ;;  %v736_v50 = vsel %vm68_vm0, %v725_v16, %v7266_v17 }
 0x164   :  { %v5736_v23 = vpop.permute.xlu1 %354  ;;  %v5738_v48 = vpop.permute.xlu0 %776  ;;  %3701 = vmatpush1.bf16.msra.mxu1 %v4280_v56  ;;  %v555_v61 = vsel %vm7332_vm4, %v4963_v31, %v554_v12  ;;  %v737_v53 = vsel %vm730_vm5, %v5575_v30, %v736_v50  ;;  %v7335_v30 = vrot.slane %v5013_v26, 4  ;;  %vm7336_vm4 = vcmask 818176  }
 0x165   :  { %v365_v19 = vrot.slane %v5736_v23, 4  ;;  %v7265_v25 = vrot.slane %v5738_v48, 4  ;;  %v4242_v4 = vcombine.low %v495_v10, %v555_v61  ;;  %v4243_v20 = vcombine.high %v495_v10, %v555_v61 }
 0x166   :  { %718 = vrot.lane.b32.xlu1 %v5673_v59, %s4482_s30  ;;  %2098 = vrot.lane.b32.xlu0 %v5702_v47, %s4481_s29 }
 0x167   :  { %3624 = vmatprep.subr.bf16.mxu0 %v4243_v20  ;;  %v796_v31 = vsel %vm68_vm0, %v785_v44, %v7265_v25  ;;  %v7334_v20 = vrot.slane %v5015_v32, 4 }
 0x168   :  { %v5760_v39 = vpop.permute.xlu1 %596  ;;  %v5762_v16 = vpop.permute.xlu0 %414  ;;  %3625 = vmatpush1.bf16.msra.mxu0 %v4242_v4  ;;  %v797_v56 = vsel %vm7333_vm8, %v5604_v38, %v796_v31  ;;  %vm7337_vm8 = vcmask 793600  }
 0x169   :  { %v374_v12 = vsel %vm68_vm0, %v7334_v20, %v365_v19  ;;  %v7268_v10 = vrot.slane %v5760_v39, 4  ;;  %v425_v44 = vrot.slane %v5762_v16, 4  ;;  %v4268_v61 = vcombine.low %v737_v53, %v797_v56 }
 0x16a   :  { %v4269_v25 = vcombine.high %v737_v53, %v797_v56  ;;  %1918 = vrot.lane.b32.xlu1 %v5702_v47, %s4484_s7  ;;  %778 = vrot.lane.b32.xlu0 %v5673_v59, %s4483_s6  ;;  %v375_v31 = vsel %vm370_vm14, %v5015_v32, %v374_v12 }
 0x16b   :  { %v434_v38 = vsel %vm68_vm0, %v7335_v30, %v425_v44 }
 0x16c   :  { %3702 = vmatprep.subr.bf16.mxu1 %v4269_v25  ;;  %v5784_v4 = vpop.permute.xlu1 %234  ;;  %v5786_v50 = vpop.permute.xlu0 %656  ;;  %v435_v53 = vsel %vm7336_vm4, %v5013_v26, %v434_v38  ;;  %v616_v25 = vsel %vm68_vm0, %v605_v14, %v7268_v10  ;;  %v820_v26 = vld [vmem:[%s7150_s0 + $0x30] sm:$0xf]  ;;  %vm7338_vm4 = vcmask 785408   ;;  %v7339_v38 = vrot.slane %v5060_v15, 4 }
 0x16d   :  { %3703 = vmatpush1.bf16.msra.mxu1 %v4268_v61  ;;  %v245_v56 = vrot.slane %v5784_v4, 4  ;;  %v7267_v20 = vrot.slane %v5786_v50, 4  ;;  %v4230_v30 = vcombine.low %v375_v31, %v435_v53  ;;  %v4231_v17 = vcombine.high %v375_v31, %v435_v53 }
 0x16e   :  { %598 = vrot.lane.b32.xlu1 %v5673_v59, %s4486_s9  ;;  %1978 = vrot.lane.b32.xlu0 %v5702_v47, %s7272_s8  ;;  %v617_v61 = vsel %vm7337_vm8, %v5627_v52, %v616_v25  ;;  %v880_v52 = vld [vmem:[%s7150_s0 + $0x30] sm:$0xf]  ;;  %vm7341_vm8 = vcmask 1014784   ;;  %s7394_s8 = smov 17  }
 0x16f   :  { %3626 = vmatprep.subr.bf16.mxu0 %v4231_v17  ;;  %v676_v32 = vsel %vm68_vm0, %v665_v18, %v7267_v20  ;;  %v254_v31 = vsel %vm68_vm0, %v7339_v38, %v245_v56 }
 0x170   :  { %v5811_v14 = vpop.permute.xlu1 %476  ;;  %v5813_v12 = vpop.permute.xlu0 %294  ;;  %3627 = vmatpush1.bf16.msra.mxu0 %v4230_v30  ;;  %v677_v17 = vsel %vm7338_vm4, %v5653_v42, %v676_v32  ;;  %v7340_v42 = vrot.slane %v5058_v54, 4  ;;  %vm7342_vm4 = vcmask 1006592  }
 0x171   :  { %v7271_v53 = vrot.slane %v5811_v14, 4  ;;  %v305_v18 = vrot.slane %v5813_v12, 4  ;;  %v4256_v20 = vcombine.low %v617_v61, %v677_v17  ;;  %v4257_v10 = vcombine.high %v617_v61, %v677_v17 }
 0x172   :  { %840 = vrot.lane.b32.xlu1 %v820_v26, %s4479_s21  ;;  %658 = vrot.lane.b32.xlu0 %v5673_v59, %s4488_s10  ;;  %v255_v26 = vsel %vm7341_vm8, %v5060_v15, %v254_v31  ;;  %vm7343_vm8 = vcmask 809984  }
 0x173   :  { %3704 = vmatprep.subr.bf16.mxu1 %v4257_v10  ;;  %v314_v25 = vsel %vm68_vm0, %v7340_v42, %v305_v18  ;;  %v496_v61 = vsel %vm68_vm0, %v485_v43, %v7271_v53 }
 0x174   :  { %v5837_v30 = vpop.permute.xlu1 %114  ;;  %v5839_v32 = vpop.permute.xlu0 %536  ;;  %3705 = vmatpush1.bf16.msra.mxu1 %v4256_v20  ;;  %v315_v10 = vsel %vm7342_vm4, %v5058_v54, %v314_v25  ;;  %v700_v54 = vld [vmem:[%s7150_s0 + $0x30] sm:$0xf]  ;;  %v497_v31 = vsel %vm7343_vm8, %v5680_v58, %v496_v61  ;;  %vm7344_vm4 = vcmask 801792   ;;  %vm7348_vm8 = vcmask 1031168  }
 0x175   :  { %v125_v17 = vrot.slane %v5837_v30, 4  ;;  %v7270_v38 = vrot.slane %v5839_v32, 4  ;;  %v4218_v42 = vcombine.low %v255_v26, %v315_v10  ;;  %v4219_v37 = vcombine.high %v255_v26, %v315_v10  ;;  %v760_v58 = vld [vmem:[%s7150_s0 + $0x30] sm:$0xf] }
 0x176   :  { %478 = vrot.lane.b32.xlu1 %v5673_v59, %s4489_s13  ;;  %900 = vrot.lane.b32.xlu0 %v880_v52, %s4478_s20  ;;  %v7345_v52 = vrot.slane %v5082_v46, 4  ;;  %s7346_s20 = smov 98  }
 0x177   :  { %3628 = vmatprep.subr.bf16.mxu0 %v4219_v37  ;;  %v556_v15 = vsel %vm68_vm0, %v545_v9, %v7270_v38 }
 0x178   :  { %v5863_v43 = vpop.permute.xlu1 %356  ;;  %v5865_v20 = vpop.permute.xlu0 %174  ;;  %3629 = vmatpush1.bf16.msra.mxu0 %v4218_v42  ;;  %v557_v37 = vsel %vm7344_vm4, %v5713_v6, %v556_v15  ;;  %v134_v25 = vsel %vm68_vm0, %v7345_v52, %v125_v17  ;;  %v7347_v6 = vrot.slane %v5080_v0, 4  ;;  %vm7349_vm4 = vcmask 1022976  }
 0x179   :  { %v7273_v26 = vrot.slane %v5863_v43, 4  ;;  %v185_v9 = vrot.slane %v5865_v20, 4  ;;  %v4244_v10 = vcombine.low %v497_v31, %v557_v37  ;;  %v4245_v38 = vcombine.high %v497_v31, %v557_v37 }
 0x17a   :  { %720 = vrot.lane.b32.xlu1 %v700_v54, %s4482_s30  ;;  %538 = vrot.lane.b32.xlu0 %v5673_v59, %s7346_s20  ;;  %v135_v54 = vsel %vm7348_vm8, %v5082_v46, %v134_v25  ;;  %s7350_s30 = smov 101   ;;  %v580_v46 = vld [vmem:[%s7150_s0 + $0x30] sm:$0xf]  ;;  %vm7352_vm8 = vcmask 1039360  }
 0x17b   :  { %3706 = vmatprep.subr.bf16.mxu1 %v4245_v38  ;;  %v194_v61 = vsel %vm68_vm0, %v7347_v6, %v185_v9  ;;  %v376_v38 = vsel %vm68_vm0, %v365_v19, %v7273_v26  ;;  %v7351_v19 = vrot.slane %v5133_v28, 4 }
 0x17c   :  { %v5887_v42 = vpop.permute.xlu1 %53  ;;  %v5889_v15 = vpop.permute.xlu0 %416  ;;  %3707 = vmatpush1.bf16.msra.mxu1 %v4244_v10  ;;  %v195_v31 = vsel %vm7349_vm4, %v5080_v0, %v194_v61  ;;  %v23_v0 = vld [vmem:[%s7150_s0 + $0x10] sm:$0xff]  ;;  %vm7353_vm4 = vcmask 818176  }
 0x17d   :  { %v7274_v37 = vrot.slane %v5887_v42, 4  ;;  %v7275_v52 = vrot.slane %v5889_v15, 4  ;;  %v4206_v6 = vcombine.low %v135_v54, %v195_v31  ;;  %v4207_v53 = vcombine.high %v135_v54, %v195_v31 }
 0x17e   :  { %358 = vrot.lane.b32.xlu1 %v5673_v59, %s7350_s30  ;;  %780 = vrot.lane.b32.xlu0 %v760_v58, %s4483_s6  ;;  %v377_v54 = vsel %vm370_vm14, %v5736_v23, %v376_v38  ;;  %s7354_s6 = smov 100  }
 0x17f   :  { %3630 = vmatprep.subr.bf16.mxu0 %v4207_v53  ;;  %v74_v25 = vsel %vm68_vm0, %v7351_v19, %v7274_v37  ;;  %v436_v10 = vsel %vm68_vm0, %v425_v44, %v7275_v52 }
 0x180   :  { %v5921_v58 = vpop.permute.xlu1 %296  ;;  %v5923_v61 = vpop.permute.xlu0 %236  ;;  %3631 = vmatpush1.bf16.msra.mxu0 %v4206_v6  ;;  %v75_v53 = vsel %vm7352_vm8, %v5133_v28, %v74_v25  ;;  %v437_v31 = vsel %vm7353_vm4, %v5762_v16, %v436_v10  ;;  %v640_v28 = vld [vmem:[%s7150_s0 + $0x30] sm:$0xf]  ;;  %vm7355_vm8 = vcmask 1014784   ;;  %vm7356_vm4 = vcmask 1006592  }
 0x181   :  { %v7279_v19 = vrot.slane %v5921_v58, 4  ;;  %v7280_v26 = vrot.slane %v5923_v61, 4  ;;  %v4194_v37 = vcombine.low %v23_v0, %v75_v53  ;;  %v4195_v44 = vcombine.high %v23_v0, %v75_v53 }
 0x182   :  { %600 = vrot.lane.b32.xlu1 %v580_v46, %s4486_s9  ;;  %418 = vrot.lane.b32.xlu0 %v5673_v59, %s7354_s6  ;;  %v4232_v6 = vcombine.low %v377_v54, %v437_v31  ;;  %v4233_v52 = vcombine.high %v377_v54, %v437_v31  ;;  %s7357_s9 = smov 124  }
 0x183   :  { %3632 = vmatprep.subr.bf16.mxu0 %v4195_v44  ;;  %v256_v23 = vsel %vm68_vm0, %v245_v56, %v7280_v26  ;;  %v316_v16 = vsel %vm68_vm0, %v305_v18, %v7279_v19 }
 0x184   :  { %3708 = vmatprep.subr.bf16.mxu1 %v4233_v52  ;;  %v5949_v38 = vpop.permute.xlu1 %176  ;;  %v5951_v0 = vpop.permute.xlu0 %116  ;;  %3633 = vmatpush1.bf16.msra.mxu0 %v4194_v37  ;;  %v257_v46 = vsel %vm7355_vm8, %v5784_v4, %v256_v23  ;;  %v317_v25 = vsel %vm7356_vm4, %v5813_v12, %v316_v16  ;;  %v460_v4 = vld [vmem:[%s7150_s0 + $0x30] sm:$0xf]  ;;  %vm7358_vm8 = vcmask 1031168   ;;  %vm7359_vm4 = vcmask 1022976  }
 0x185   :  { %v7277_v56 = vrot.slane %v5949_v38, 4  ;;  %v7278_v10 = vrot.slane %v5951_v0, 4  ;;  %3709 = vmatpush1.bf16.msra.mxu1 %v4232_v6  ;;  %v4220_v53 = vcombine.low %v257_v46, %v317_v25  ;;  %v4221_v54 = vcombine.high %v257_v46, %v317_v25 }
 0x186   :  { %238 = vrot.lane.b32.xlu1 %v5673_v59, %s7357_s9  ;;  %660 = vrot.lane.b32.xlu0 %v640_v28, %s4488_s10  ;;  %s7360_s10 = smov 123   ;;  %v7362_v16 = vrot.slane %v5195_v22, 4 }
 0x187   :  { %3710 = vmatprep.subr.bf16.mxu1 %v4221_v54  ;;  %v136_v12 = vsel %vm68_vm0, %v125_v17, %v7278_v10  ;;  %v196_v18 = vsel %vm68_vm0, %v185_v9, %v7277_v56  ;;  %v7361_v9 = vrot.slane %v5179_v40, 4 }
 0x188   :  { %v5973_v37 = vpop.permute.xlu1 %1854  ;;  %v5975_v52 = vpop.permute.xlu0 %1794  ;;  %v137_v31 = vsel %vm7358_vm8, %v5837_v30, %v136_v12  ;;  %v197_v44 = vsel %vm7359_vm4, %v5865_v20, %v196_v18  ;;  %v520_v30 = vld [vmem:[%s7150_s0 + $0x30] sm:$0xf]  ;;  %vm7363_vm8 = vcmask 990208   ;;  %vm7364_vm4 = vcmask 982016  }
 0x189   :  { %v1865_v6 = vrot.slane %v5973_v37, 4  ;;  %v1805_v28 = vrot.slane %v5975_v52, 4  ;;  %3711 = vmatpush1.bf16.msra.mxu1 %v4220_v53  ;;  %v4208_v17 = vcombine.low %v137_v31, %v197_v44  ;;  %v4209_v23 = vcombine.high %v137_v31, %v197_v44 }
 0x18a   :  { %480 = vrot.lane.b32.xlu1 %v460_v4, %s4489_s13  ;;  %298 = vrot.lane.b32.xlu0 %v5673_v59, %s7360_s10  ;;  %s7365_s13 = smov 126  }
 0x18b   :  { %3712 = vmatprep.subr.bf16.mxu1 %v4209_v23  ;;  %v1814_v20 = vsel %vm68_vm0, %v7361_v9, %v1805_v28  ;;  %v1874_v46 = vsel %vm68_vm0, %v7362_v16, %v1865_v6  ;;  %v24_v23 = vld [vmem:[%s7150_s0 + $0x18] sm:$0xff]  ;;  %v7368_v16 = vrot.slane %v5225_v60, 4 }
 0x18c   :  { %v5997_v25 = vpop.permute.xlu1 %1674  ;;  %v5999_v53 = vpop.permute.xlu0 %55  ;;  %v1815_v54 = vsel %vm7363_vm8, %v5179_v40, %v1814_v20  ;;  %v1875_v4 = vsel %vm7364_vm4, %v5195_v22, %v1874_v46  ;;  %v340_v40 = vld [vmem:[%s7150_s0 + $0x30] sm:$0xf]  ;;  %v7366_v22 = vrot.slane %v5887_v42, 4  ;;  %vm7367_vm8 = vcmask 1039360  }
 0x18d   :  { %v1685_v12 = vrot.slane %v5997_v25, 4  ;;  %v7276_v18 = vrot.slane %v5999_v53, 4  ;;  %3713 = vmatpush1.bf16.msra.mxu1 %v4208_v17  ;;  %v4374_v31 = vcombine.low %v1815_v54, %v1875_v4  ;;  %v4375_v44 = vcombine.high %v1815_v54, %v1875_v4 }
 0x18e   :  { %118 = vrot.lane.b32.xlu1 %v5673_v59, %s7365_s13  ;;  %540 = vrot.lane.b32.xlu0 %v520_v30, %s7346_s20  ;;  %vm7370_vm4 = vcmask 130048  }
 0x18f   :  { %3634 = vmatprep.subr.bf16.mxu0 %v4375_v44  ;;  %v76_v17 = vsel %vm68_vm0, %v7366_v22, %v7276_v18  ;;  %v1694_v46 = vsel %vm68_vm0, %v7368_v16, %v1685_v12 }
 0x190   :  { %v6021_v9 = vpop.permute.xlu1 %1554  ;;  %v6023_v20 = vpop.permute.xlu0 %1734  ;;  %3635 = vmatpush2.bf16.msra.mxu0 %v4374_v31  ;;  %v77_v30 = vsel %vm7367_vm8, %v5887_v42, %v76_v17  ;;  %v400_v42 = vld [vmem:[%s7150_s0 + $0x30] sm:$0xf]  ;;  %v7369_v31 = vrot.slane %v5241_v5, 4  ;;  %vm7371_vm8 = vcmask 121856  }
 0x191   :  { %v1565_v54 = vrot.slane %v6021_v9, 4  ;;  %v1745_v4 = vrot.slane %v6023_v20, 4  ;;  %v4196_v44 = vcombine.low %v24_v23, %v77_v30  ;;  %v4197_v22 = vcombine.high %v24_v23, %v77_v30 }
 0x192   :  { %360 = vrot.lane.b32.xlu1 %v340_v40, %s7350_s30  ;;  %178 = vrot.lane.b32.xlu0 %v5673_v59, %s7305_s26  ;;  %v1695_v23 = vsel %vm7370_vm4, %v5225_v60, %v1694_v46  ;;  %v7372_v30 = vrot.slane %v5271_v51, 4  ;;  %v280_v60 = vld [vmem:[%s7150_s0 + $0x30] sm:$0xf]  ;;  %v7373_v46 = vrot.slane %v5287_v49, 4  ;;  %vm7374_vm4 = vcmask 146432  }
 0x193   :  { %3714 = vmatprep.subr.bf16.mxu1 %v4197_v22  ;;  %v1754_v17 = vsel %vm68_vm0, %v7369_v31, %v1745_v4 }
 0x194   :  { %v6045_v16 = vpop.permute.xlu1 %1796  ;;  %v6047_v18 = vpop.permute.xlu0 %1614  ;;  %3715 = vmatpush1.bf16.msra.mxu1 %v4196_v44  ;;  %v1755_v40 = vsel %vm7371_vm8, %v5241_v5, %v1754_v17  ;;  %v1574_v22 = vsel %vm68_vm0, %v7372_v30, %v1565_v54  ;;  %v220_v5 = vld [vmem:[%s7150_s0 + $0x30] sm:$0xf]  ;;  %vm7375_vm8 = vcmask 138240  }
 0x195   :  { %v7282_v56 = vrot.slane %v6045_v16, 4  ;;  %v7281_v31 = vrot.slane %v6047_v18, 4  ;;  %v4362_v10 = vcombine.low %v1695_v23, %v1755_v40  ;;  %v4363_v19 = vcombine.high %v1695_v23, %v1755_v40 }
 0x196   :  { %57 = vrot.lane.b32.xlu1 %v5673_v59, %s7306_s23  ;;  %420 = vrot.lane.b32.xlu0 %v400_v42, %s7354_s6 }
 0x197   :  { %3636 = vmatprep.subr.bf16.mxu0 %v4363_v19  ;;  %v1634_v44 = vsel %vm68_vm0, %v7373_v46, %v7281_v31  ;;  %v1575_v19 = vsel %vm7374_vm4, %v5271_v51, %v1574_v22  ;;  %v1816_v40 = vsel %vm68_vm0, %v1805_v28, %v7282_v56  ;;  %v160_v51 = vld [vmem:[%s7150_s0 + $0x30] sm:$0xf]  ;;  %vm7376_vm4 = vcmask 990208  }
 0x198   :  { %v6074_v17 = vpop.permute.xlu1 %1434  ;;  %v6076_v23 = vpop.permute.xlu0 %1856  ;;  %3637 = vmatpush2.bf16.msra.mxu0 %v4362_v10  ;;  %v1635_v42 = vsel %vm7375_vm8, %v5287_v49, %v1634_v44  ;;  %v100_v49 = vld [vmem:[%s7150_s0 + $0x30] sm:$0xf]  ;;  %vm7377_vm8 = vcmask 982016  }
 0x199   :  { %v1445_v30 = vrot.slane %v6074_v17, 4  ;;  %v7297_v26 = vrot.slane %v6076_v23, 4  ;;  %v4350_v46 = vcombine.low %v1575_v19, %v1635_v42  ;;  %v4351_v31 = vcombine.high %v1575_v19, %v1635_v42 }
 0x19a   :  { %300 = vrot.lane.b32.xlu1 %v280_v60, %s7360_s10  ;;  %240 = vrot.lane.b32.xlu0 %v220_v5, %s7357_s9  ;;  %v7378_v5 = vrot.slane %v5317_v3, 4  ;;  %s7389_s10 = smov 15  }
 0x19b   :  { %3638 = vmatprep.subr.bf16.mxu0 %v4351_v31  ;;  %v1876_v10 = vsel %vm68_vm0, %v1865_v6, %v7297_v26  ;;  %v1817_v31 = vsel %vm7376_vm4, %v5975_v52, %v1816_v40  ;;  %vm7380_vm4 = vcmask 162816  }
 0x19c   :  { %v6100_v28 = vpop.permute.xlu1 %1676  ;;  %v6102_v22 = vpop.permute.xlu0 %1494  ;;  %3639 = vmatpush2.bf16.msra.mxu0 %v4350_v46  ;;  %v1877_v60 = vsel %vm7377_vm8, %v5973_v37, %v1876_v10  ;;  %v1454_v44 = vsel %vm68_vm0, %v7378_v5, %v1445_v30  ;;  %v7379_v37 = vrot.slane %v5333_v55, 4  ;;  %vm7381_vm8 = vcmask 154624  }
 0x19d   :  { %v7286_v19 = vrot.slane %v6100_v28, 4  ;;  %v1505_v6 = vrot.slane %v6102_v22, 4  ;;  %v4376_v42 = vcombine.low %v1817_v31, %v1877_v60  ;;  %v4377_v56 = vcombine.high %v1817_v31, %v1877_v60 }
 0x19e   :  { %180 = vrot.lane.b32.xlu1 %v160_v51, %s7305_s26  ;;  %120 = vrot.lane.b32.xlu0 %v100_v49, %s7365_s13  ;;  %v1455_v10 = vsel %vm7380_vm4, %v5317_v3, %v1454_v44  ;;  %v39_v3 = vld [vmem:[%s7150_s0 + $0x30] sm:$0xf]  ;;  %vm7383_vm4 = vcmask 130048   ;;  %s7404_s13 = smov 44  }
 0x19f   :  { %3716 = vmatprep.subr.bf16.mxu1 %v4377_v56  ;;  %v1514_v52 = vsel %vm68_vm0, %v7379_v37, %v1505_v6  ;;  %v1696_v56 = vsel %vm68_vm0, %v1685_v12, %v7286_v19  ;;  %v7382_v12 = vrot.slane %v5368_v13, 4 }
 0x1a0   :  { %v6122_v40 = vpop.permute.xlu1 %1314  ;;  %v6124_v46 = vpop.permute.xlu0 %1736  ;;  %3717 = vmatpush2.bf16.msra.mxu1 %v4376_v42  ;;  %v1515_v51 = vsel %vm7381_vm8, %v5333_v55, %v1514_v52  ;;  %v1697_v37 = vsel %vm7383_vm4, %v5997_v25, %v1696_v56  ;;  %vm7384_vm8 = vcmask 121856   ;;  %vm7386_vm4 = vcmask 351232  }
 0x1a1   :  { %v1325_v49 = vrot.slane %v6122_v40, 4  ;;  %v7285_v31 = vrot.slane %v6124_v46, 4  ;;  %v4338_v60 = vcombine.low %v1455_v10, %v1515_v51  ;;  %v4339_v5 = vcombine.high %v1455_v10, %v1515_v51 }
 0x1a2   :  { %1858 = vrot.lane.b32.xlu1 %v5702_v47, %s7307_s19  ;;  %1798 = vrot.lane.b32.xlu0 %v5702_v47, %s7308_s18 }
 0x1a3   :  { %3640 = vmatprep.subr.bf16.mxu0 %v4339_v5  ;;  %v1756_v55 = vsel %vm68_vm0, %v1745_v4, %v7285_v31  ;;  %v1334_v44 = vsel %vm68_vm0, %v7382_v12, %v1325_v49 }
 0x1a4   :  { %v6154_v42 = vpop.permute.xlu1 %1556  ;;  %v6156_v47 = vpop.permute.xlu0 %1374  ;;  %3641 = vmatpush2.bf16.msra.mxu0 %v4338_v60  ;;  %v1757_v52 = vsel %vm7384_vm8, %v6023_v20, %v1756_v55  ;;  %v7385_v60 = vrot.slane %v5384_v45, 4  ;;  %vm7387_vm8 = vcmask 343040  }
 0x1a5   :  { %v7284_v10 = vrot.slane %v6154_v42, 4  ;;  %v1385_v4 = vrot.slane %v6156_v47, 4  ;;  %v4364_v51 = vcombine.low %v1697_v37, %v1757_v52  ;;  %v4365_v5 = vcombine.high %v1697_v37, %v1757_v52 }
 0x1a6   :  { %1678 = vrot.lane.b32.xlu1 %v5673_v59, %s7309_s17  ;;  %59 = vrot.lane.b32.xlu0 %v39_v3, %s7306_s23  ;;  %v1335_v3 = vsel %vm7386_vm4, %v5368_v13, %v1334_v44  ;;  %s7388_s23 = smov 18   ;;  %v7391_v44 = vrot.slane %v5414_v62, 4  ;;  %vm7392_vm4 = vcmask 146432  }
 0x1a7   :  { %v1394_v25 = vsel %vm68_vm0, %v7385_v60, %v1385_v4  ;;  %3718 = vmatprep.subr.bf16.mxu1 %v4365_v5  ;;  %v1576_v20 = vsel %vm68_vm0, %v1565_v54, %v7284_v10  ;;  %v7390_v54 = vrot.slane %v6047_v18, 4 }
 0x1a8   :  { %v6177_v56 = vpop.permute.xlu1 %1194  ;;  %v6179_v55 = vpop.permute.xlu0 %1616  ;;  %3719 = vmatpush2.bf16.msra.mxu1 %v4364_v51  ;;  %v1395_v12 = vsel %vm7387_vm8, %v5384_v45, %v1394_v25  ;;  %v1780_v45 = vld [vmem:[%s7150_s0 + $0x34] sm:$0xf]  ;;  %vm7393_vm8 = vcmask 138240  }
 0x1a9   :  { %v1205_v37 = vrot.slane %v6177_v56, 4  ;;  %v7283_v52 = vrot.slane %v6179_v55, 4  ;;  %v4326_v5 = vcombine.low %v1335_v3, %v1395_v12  ;;  %v4327_v60 = vcombine.high %v1335_v3, %v1395_v12 }
 0x1aa   :  { %1558 = vrot.lane.b32.xlu1 %v5673_v59, %s7388_s23  ;;  %1738 = vrot.lane.b32.xlu0 %v5673_v59, %s7389_s10  ;;  %v1577_v12 = vsel %vm7392_vm4, %v6021_v9, %v1576_v20  ;;  %vm7397_vm4 = vcmask 162816  }
 0x1ab   :  { %v1636_v13 = vsel %vm68_vm0, %v7390_v54, %v7283_v52  ;;  %3642 = vmatprep.subr.bf16.mxu0 %v4327_v60  ;;  %v1214_v51 = vsel %vm68_vm0, %v7391_v44, %v1205_v37 }
 0x1ac   :  { %v6204_v25 = vpop.permute.xlu1 %1436  ;;  %v6206_v3 = vpop.permute.xlu0 %1254  ;;  %3643 = vmatpush2.bf16.msra.mxu0 %v4326_v5  ;;  %v1637_v60 = vsel %vm7393_vm8, %v6047_v18, %v1636_v13  ;;  %v7395_v5 = vrot.slane %v5432_v8, 4  ;;  %v1840_v18 = vld [vmem:[%s7150_s0 + $0x34] sm:$0xf]  ;;  %v1215_v44 = vsel %vm1210_vm6, %v5414_v62, %v1214_v51  ;;  %vm7398_vm8 = vcmask 154624  }
 0x1ad   :  { %v7288_v54 = vrot.slane %v6204_v25, 4  ;;  %v1265_v52 = vrot.slane %v6206_v3, 4  ;;  %v4352_v10 = vcombine.low %v1577_v12, %v1637_v60  ;;  %v4353_v31 = vcombine.high %v1577_v12, %v1637_v60 }
 0x1ae   :  { %1800 = vrot.lane.b32.xlu1 %v1780_v45, %s7308_s18  ;;  %1618 = vrot.lane.b32.xlu0 %v5673_v59, %s7394_s8 }
 0x1af   :  { %v1274_v9 = vsel %vm68_vm0, %v7395_v5, %v1265_v52  ;;  %3720 = vmatprep.subr.bf16.mxu1 %v4353_v31  ;;  %v1456_v20 = vsel %vm68_vm0, %v1445_v30, %v7288_v54  ;;  %v7396_v30 = vrot.slane %v5430_v33, 4 }
 0x1b0   :  { %v6230_v13 = vpop.permute.xlu1 %1074  ;;  %v6232_v45 = vpop.permute.xlu0 %1496  ;;  %3721 = vmatpush2.bf16.msra.mxu1 %v4352_v10  ;;  %v1275_v31 = vsel %vm1270_vm15, %v5432_v8, %v1274_v9  ;;  %v1660_v8 = vld [vmem:[%s7150_s0 + $0x30] sm:$0xf] }
 0x1b1   :  { %v1085_v12 = vrot.slane %v6230_v13, 4  ;;  %v7287_v60 = vrot.slane %v6232_v45, 4  ;;  %v4314_v5 = vcombine.low %v1215_v44, %v1275_v31  ;;  %v4315_v19 = vcombine.high %v1215_v44, %v1275_v31 }
 0x1b2   :  { %1438 = vrot.lane.b32.xlu1 %v5673_v59, %s7310_s15  ;;  %1860 = vrot.lane.b32.xlu0 %v1840_v18, %s7307_s19  ;;  %v1457_v18 = vsel %vm7397_vm4, %v6074_v17, %v1456_v20  ;;  %vm7401_vm4 = vcmask 351232  }
 0x1b3   :  { %v1516_v62 = vsel %vm68_vm0, %v1505_v6, %v7287_v60  ;;  %3644 = vmatprep.subr.bf16.mxu0 %v4315_v19  ;;  %v1094_v10 = vsel %vm68_vm0, %v7396_v30, %v1085_v12 }
 0x1b4   :  { %v6256_v51 = vpop.permute.xlu1 %1316  ;;  %v6258_v9 = vpop.permute.xlu0 %1134  ;;  %3645 = vmatpush2.bf16.msra.mxu0 %v4314_v5  ;;  %v1517_v19 = vsel %vm7398_vm8, %v6102_v22, %v1516_v62  ;;  %v7399_v5 = vrot.slane %v5454_v41, 4  ;;  %v1720_v22 = vld [vmem:[%s7150_s0 + $0x30] sm:$0xf]  ;;  %v1095_v30 = vsel %vm1090_vm11, %v5430_v33, %v1094_v10  ;;  %vm7402_vm8 = vcmask 343040  }
 0x1b5   :  { %v7290_v6 = vrot.slane %v6256_v51, 4  ;;  %v1145_v44 = vrot.slane %v6258_v9, 4  ;;  %v4340_v31 = vcombine.low %v1457_v18, %v1517_v19  ;;  %v4341_v60 = vcombine.high %v1457_v18, %v1517_v19 }
 0x1b6   :  { %1680 = vrot.lane.b32.xlu1 %v1660_v8, %s7309_s17  ;;  %1498 = vrot.lane.b32.xlu0 %v5673_v59, %s7311_s16 }
 0x1b7   :  { %v1154_v17 = vsel %vm68_vm0, %v7399_v5, %v1145_v44  ;;  %3722 = vmatprep.subr.bf16.mxu1 %v4341_v60  ;;  %v1336_v20 = vsel %vm68_vm0, %v1325_v49, %v7290_v6  ;;  %v7400_v49 = vrot.slane %v5477_v11, 4 }
 0x1b8   :  { %v6282_v62 = vpop.permute.xlu1 %954  ;;  %v6284_v8 = vpop.permute.xlu0 %1376  ;;  %3723 = vmatpush2.bf16.msra.mxu1 %v4340_v31  ;;  %v1155_v60 = vsel %vm1150_vm13, %v5454_v41, %v1154_v17  ;;  %v1540_v41 = vld [vmem:[%s7150_s0 + $0x30] sm:$0xf] }
 0x1b9   :  { %v965_v18 = vrot.slane %v6282_v62, 4  ;;  %v7289_v19 = vrot.slane %v6284_v8, 4  ;;  %v4302_v5 = vcombine.low %v1095_v30, %v1155_v60  ;;  %v4303_v54 = vcombine.high %v1095_v30, %v1155_v60 }
 0x1ba   :  { %1318 = vrot.lane.b32.xlu1 %v5673_v59, %s7312_s14  ;;  %1740 = vrot.lane.b32.xlu0 %v1720_v22, %s7389_s10  ;;  %v1337_v22 = vsel %vm7401_vm4, %v6122_v40, %v1336_v20  ;;  %vm7409_vm4 = vcmask 949248  }
 0x1bb   :  { %v1396_v33 = vsel %vm68_vm0, %v1385_v4, %v7289_v19  ;;  %3646 = vmatprep.subr.bf16.mxu0 %v4303_v54  ;;  %v974_v10 = vsel %vm68_vm0, %v7400_v49, %v965_v18 }
 0x1bc   :  { %v6308_v31 = vpop.permute.xlu1 %1196  ;;  %v6310_v17 = vpop.permute.xlu0 %1014  ;;  %3647 = vmatpush2.bf16.msra.mxu0 %v4302_v5  ;;  %v1397_v4 = vsel %vm7402_vm8, %v6156_v47, %v1396_v33  ;;  %v7403_v5 = vrot.slane %v5504_v27, 4  ;;  %v1600_v47 = vld [vmem:[%s7150_s0 + $0x30] sm:$0xf]  ;;  %v975_v49 = vsel %vm970_vm9, %v5477_v11, %v974_v10  ;;  %vm7413_vm8 = vcmask 965632  }
 0x1bd   :  { %v7296_v54 = vrot.slane %v6308_v31, 4  ;;  %v1025_v30 = vrot.slane %v6310_v17, 4  ;;  %v4328_v60 = vcombine.low %v1337_v22, %v1397_v4  ;;  %v4329_v19 = vcombine.high %v1337_v22, %v1397_v4 }
 0x1be   :  { %1560 = vrot.lane.b32.xlu1 %v1540_v41, %s7388_s23  ;;  %1378 = vrot.lane.b32.xlu0 %v5673_v59, %s7313_s27 }
 0x1bf   :  { %v1034_v40 = vsel %vm68_vm0, %v7403_v5, %v1025_v30  ;;  %3724 = vmatprep.subr.bf16.mxu1 %v4329_v19  ;;  %v1216_v20 = vsel %vm68_vm0, %v1205_v37, %v7296_v54 }
 0x1c0   :  { %v6334_v33 = vpop.permute.xlu1 %1076  ;;  %v6336_v41 = vpop.permute.xlu0 %1256  ;;  %3725 = vmatpush2.bf16.msra.mxu1 %v4328_v60  ;;  %v1035_v19 = vsel %vm1030_vm12, %v5504_v27, %v1034_v40  ;;  %v1420_v27 = vld [vmem:[%s7150_s0 + $0x30] sm:$0xf]  ;;  %v1217_v40 = vsel %vm1210_vm6, %v6177_v56, %v1216_v20 }
 0x1c1   :  { %v7292_v22 = vrot.slane %v6334_v33, 4  ;;  %v7293_v4 = vrot.slane %v6336_v41, 4  ;;  %v4290_v5 = vcombine.low %v975_v49, %v1035_v19  ;;  %v4291_v6 = vcombine.high %v975_v49, %v1035_v19 }
 0x1c2   :  { %1198 = vrot.lane.b32.xlu1 %v5673_v59, %s4509_s24  ;;  %1620 = vrot.lane.b32.xlu0 %v1600_v47, %s7394_s8 }
 0x1c3   :  { %v1276_v11 = vsel %vm68_vm0, %v1265_v52, %v7293_v4  ;;  %3648 = vmatprep.subr.bf16.mxu0 %v4291_v6  ;;  %v1096_v37 = vsel %vm68_vm0, %v1085_v12, %v7292_v22  ;;  %v7405_v12 = vrot.slane %v5550_v35, 4 }
 0x1c4   :  { %v6360_v10 = vpop.permute.xlu1 %2036  ;;  %v6362_v60 = vpop.permute.xlu0 %1136  ;;  %3649 = vmatpush2.bf16.msra.mxu0 %v4290_v5  ;;  %v1277_v52 = vsel %vm1270_vm15, %v6206_v3, %v1276_v11  ;;  %v1480_v3 = vld [vmem:[%s7150_s0 + $0x30] sm:$0xf] }
 0x1c5   :  { %v2046_v6 = vrot.slane %v6360_v10, 4  ;;  %v7291_v47 = vrot.slane %v6362_v60, 4  ;;  %v4316_v49 = vcombine.low %v1217_v40, %v1277_v52  ;;  %v4317_v19 = vcombine.high %v1217_v40, %v1277_v52 }
 0x1c6   :  { %1440 = vrot.lane.b32.xlu1 %v1420_v27, %s7310_s15  ;;  %1258 = vrot.lane.b32.xlu0 %v5673_v59, %s7404_s13  ;;  %v7406_v40 = vmov 0   ;;  %s7407_s15 = smov 47  }
 0x1c7   :  { %v1156_v56 = vsel %vm68_vm0, %v1145_v44, %v7291_v47  ;;  %3651 = vmatmul.mubr.bf16.vlgmr.msra.gmra.mxu0 %v4952_v29  ;;  %3726 = vmatprep.subr.bf16.mxu1 %v4317_v19  ;;  %v2056_v20 = vsel %vm68_vm0, %v7405_v12, %v2046_v6  ;;  %v1097_v44 = vsel %vm1090_vm11, %v6230_v13, %v1096_v37  ;;  %v7408_v13 = vrot.slane %v5577_v7, 4 }
 0x1c8   :  { %v6387_v5 = vpop.permute.xlu1 %956  ;;  %v6389_v11 = vpop.permute.xlu0 %2096  ;;  %3727 = vmatpush2.bf16.msra.mxu1 %v4316_v49  ;;  %v1157_v27 = vsel %vm1150_vm13, %v6258_v9, %v1156_v56  ;;  %3773 = vmatprep.mubr.bf16.mxu0 %v7406_v40  ;;  %v1300_v9 = vld [vmem:[%s7150_s0 + $0x30] sm:$0xf]  ;;  %v2057_v12 = vsel %vm2050_vm3, %v5550_v35, %v2056_v20 }
 0x1c9   :  { %v7295_v52 = vrot.slane %v6387_v5, 4  ;;  %v2106_v19 = vrot.slane %v6389_v11, 4  ;;  %v4304_v47 = vcombine.low %v1097_v44, %v1157_v27  ;;  %v4305_v22 = vcombine.high %v1097_v44, %v1157_v27 }
 0x1ca   :  { %1078 = vrot.lane.b32.xlu1 %v5673_v59, %s7407_s15  ;;  %1500 = vrot.lane.b32.xlu0 %v1480_v3, %s7311_s16 }
 0x1cb   :  { %v2116_v37 = vsel %vm68_vm0, %v7408_v13, %v2106_v19  ;;  %3728 = vmatprep.subr.bf16.mxu1 %v4305_v22  ;;  %v976_v49 = vsel %vm68_vm0, %v965_v18, %v7295_v52  ;;  %v7410_v18 = vrot.slane %v5602_v36, 4  ;;  %v6450_v52 = vpop.f32.mrf.mxu1 }
 0x1cc   :  { %v6414_v56 = vpop.permute.xlu1 %1916  ;;  %v6416_v3 = vpop.permute.xlu0 %1016  ;;  %3729 = vmatpush2.bf16.msra.mxu1 %v4304_v47  ;;  %v2117_v22 = vsel %vm7409_vm4, %v5577_v7, %v2116_v37  ;;  %v1360_v7 = vld [vmem:[%s7150_s0 + $0x30] sm:$0xf] }
 0x1cd   :  { %v7299_v44 = vrot.slane %v6414_v56, 4  ;;  %v7294_v27 = vrot.slane %v6416_v3, 4  ;;  %v4400_v13 = vcombine.low %v2057_v12, %v2117_v22  ;;  %v4401_v4 = vcombine.high %v2057_v12, %v2117_v22 }
 0x1ce   :  { %1320 = vrot.lane.b32.xlu1 %v1300_v9, %s7312_s14  ;;  %1138 = vrot.lane.b32.xlu0 %v5673_v59, %s7316_s12  ;;  %v977_v9 = vsel %vm970_vm9, %v6282_v62, %v976_v49  ;;  %v7411_v62 = vrot.slane %v5629_v34, 4 }
 0x1cf   :  { %v1036_v35 = vsel %vm68_vm0, %v1025_v30, %v7294_v27  ;;  %3753 = vmatprep.subr.bf16.mxu0 %v4401_v4  ;;  %v1936_v47 = vsel %vm68_vm0, %v7410_v18, %v7299_v44 }
 0x1d0   :  { %v6440_v20 = vpop.permute.xlu1 %838  ;;  %v6442_v37 = vpop.permute.xlu0 %1976  ;;  %3754 = vmatpush1.bf16.msra.mxu0 %v4400_v13  ;;  %v1037_v30 = vsel %vm1030_vm12, %v6310_v17, %v1036_v35  ;;  %v1180_v17 = vld [vmem:[%s7150_s0 + $0x30] sm:$0xf]  ;;  %v7412_v35 = vrot.slane %v5651_v2, 4 }
 0x1d1   :  { %v847_v4 = vrot.slane %v6440_v20, 4  ;;  %v7298_v12 = vrot.slane %v6442_v37, 4  ;;  %v4292_v22 = vcombine.low %v977_v9, %v1037_v30  ;;  %v4293_v27 = vcombine.high %v977_v9, %v1037_v30  ;;  %v6463_v13 = vpop.f32.mrf.mxu1 }
 0x1d2   :  { %958 = vrot.lane.b32.xlu1 %v5673_v59, %s7318_s11  ;;  %1380 = vrot.lane.b32.xlu0 %v1360_v7, %s7313_s27 }
 0x1d3   :  { %v1996_v49 = vsel %vm68_vm0, %v7411_v62, %v7298_v12  ;;  %3730 = vmatprep.subr.bf16.mxu1 %v4293_v27  ;;  %v858_v18 = vsel %vm68_vm0, %v7412_v35, %v847_v4  ;;  %v1937_v27 = vsel %vm1930_vm7, %v5602_v36, %v1936_v47  ;;  %v3533_v44 = vpop.f32.mrf.mxu1 }
 0x1d4   :  { %v6470_v7 = vpop.permute.xlu1 %2038  ;;  %v6472_v9 = vpop.permute.xlu0 %898  ;;  %3731 = vmatpush2.bf16.msra.mxu1 %v4292_v22  ;;  %v1997_v30 = vsel %vm7413_vm8, %v5629_v34, %v1996_v49  ;;  %v7414_v22 = vrot.slane %v5682_v63, 4  ;;  %v1060_v34 = vld [vmem:[%s7150_s0 + $0x30] sm:$0xf]  ;;  %vm7418_vm8 = vcmask 596992  }
 0x1d5   :  { %v7301_v62 = vrot.slane %v6470_v7, 4  ;;  %v907_v54 = vrot.slane %v6472_v9, 4  ;;  %v4388_v26 = vcombine.low %v1937_v27, %v1997_v30  ;;  %v4389_v12 = vcombine.high %v1937_v27, %v1997_v30  ;;  %v1240_v44 = vld [vmem:[%s7150_s0 + $0x30] sm:$0xf]  ;;  %v3534_v47 = vpop.f32.mrf.mxu1 }
 0x1d6   :  { %1200 = vrot.lane.b32.xlu1 %v1180_v17, %s4509_s24  ;;  %1018 = vrot.lane.b32.xlu0 %v5673_v59, %s4514_s1  ;;  %v859_v17 = vsel %vm850_vm1, %v5651_v2, %v858_v18 }
 0x1d7   :  { %v918_v36 = vsel %vm68_vm0, %v7414_v22, %v907_v54  ;;  %3755 = vmatprep.subr.bf16.mxu0 %v4389_v12  ;;  %3733 = vmatmul.mubr.bf16.vlgmr.msra.gmra.mxu1 %v4952_v29  ;;  %v2058_v59 = vsel %vm68_vm0, %v2046_v6, %v7301_v62  ;;  %v7415_v6 = vrot.slane %v5711_v24, 4 }
 0x1d8   :  { %v6500_v49 = vpop.permute.xlu1 %718  ;;  %v6502_v12 = vpop.permute.xlu0 %2098  ;;  %3756 = vmatpush1.bf16.msra.mxu0 %v4388_v26  ;;  %v919_v35 = vsel %vm910_vm2, %v5682_v63, %v918_v36  ;;  %3855 = vmatprep.mubr.bf16.mxu1 %v7406_v40  ;;  %v2020_v63 = vld [vmem:[%s7150_s0 + $0x34] sm:$0xf]  ;;  %v1120_v26 = vld [vmem:[%s7150_s0 + $0x30] sm:$0xf] }
 0x1d9   :  { %v727_v27 = vrot.slane %v6500_v49, 4  ;;  %v7300_v30 = vrot.slane %v6502_v12, 4  ;;  %v4282_v22 = vcombine.low %v859_v17, %v919_v35  ;;  %v4283_v47 = vcombine.high %v859_v17, %v919_v35 }
 0x1da   :  { %1080 = vrot.lane.b32.xlu1 %v1060_v34, %s7407_s15  ;;  %1260 = vrot.lane.b32.xlu0 %v1240_v44, %s7404_s13  ;;  %v2059_v34 = vsel %vm2050_vm3, %v6360_v10, %v2058_v59  ;;  %v2080_v59 = vld [vmem:[%s7150_s0 + $0x34] sm:$0xf] }
 0x1db   :  { %v2118_v2 = vsel %vm68_vm0, %v2106_v19, %v7300_v30  ;;  %4409 = vmatmul.mubr.msk.bf16.vlgmr.msra.gmra.mxu0 %vm3450_vm10, %v4802_v21  ;;  %3782 = vmatprep.subr.bf16.mxu0 %v4283_v47  ;;  %v738_v18 = vsel %vm68_vm0, %v7415_v6, %v727_v27 }
 0x1dc   :  { %v6531_v36 = vpop.permute.xlu1 %1918  ;;  %v6533_v19 = vpop.permute.xlu0 %778  ;;  %3783 = vmatpush1.bf16.msra.mxu0 %v4282_v22  ;;  %v2119_v44 = vsel %vm7409_vm4, %v6389_v11, %v2118_v2  ;;  %3814 = vmatprep.mubr.bf16.mxu0 %v4975_v1  ;;  %v7416_v22 = vrot.slane %v5738_v48, 4  ;;  %v940_v11 = vld [vmem:[%s7150_s0 + $0x30] sm:$0xf]  ;;  %v7417_v2 = vrot.slane %v6414_v56, 4  ;;  %vm7421_vm4 = vcmask 965632  }
 0x1dd   :  { %v7304_v17 = vrot.slane %v6531_v36, 4  ;;  %v7302_v35 = vrot.slane %v6533_v19, 4  ;;  %v4402_v47 = vcombine.low %v2059_v34, %v2119_v44  ;;  %v4403_v30 = vcombine.high %v2059_v34, %v2119_v44 }
 0x1de   :  { %2040 = vrot.lane.b32.xlu1 %v2020_v63, %s4480_s28  ;;  %1140 = vrot.lane.b32.xlu0 %v1120_v26, %s7316_s12 }
 0x1df   :  { %v798_v10 = vsel %vm68_vm0, %v7416_v22, %v7302_v35  ;;  %3835 = vmatprep.subr.bf16.mxu1 %v4403_v30  ;;  %v1938_v63 = vsel %vm68_vm0, %v7417_v2, %v7304_v17  ;;  %v739_v30 = vsel %vm730_vm5, %v5711_v24, %v738_v18  ;;  %v1900_v24 = vld [vmem:[%s7150_s0 + $0x34] sm:$0xf]  ;;  %v7420_v18 = vrot.slane %v5760_v39, 4 }
 0x1e0   :  { %v6560_v26 = vpop.permute.xlu1 %598  ;;  %v6562_v6 = vpop.permute.xlu0 %1978  ;;  %3836 = vmatpush1.bf16.msra.mxu1 %v4402_v47  ;;  %v799_v34 = vsel %vm7418_vm8, %v5738_v48, %v798_v10  ;;  %v7419_v47 = vrot.slane %v6442_v37, 4  ;;  %v1000_v48 = vld [vmem:[%s7150_s0 + $0x30] sm:$0xf]  ;;  %vm7423_vm8 = vcmask 793600  }
 0x1e1   :  { %v607_v44 = vrot.slane %v6560_v26, 4  ;;  %v7303_v22 = vrot.slane %v6562_v6, 4  ;;  %v4270_v62 = vcombine.low %v739_v30, %v799_v34  ;;  %v4271_v35 = vcombine.high %v739_v30, %v799_v34 }
 0x1e2   :  { %960 = vrot.lane.b32.xlu1 %v940_v11, %s7318_s11  ;;  %2100 = vrot.lane.b32.xlu0 %v2080_v59, %s4481_s29 }
 0x1e3   :  { %v1998_v2 = vsel %vm68_vm0, %v7419_v47, %v7303_v22  ;;  %3784 = vmatprep.subr.bf16.mxu0 %v4271_v35  ;;  %v618_v10 = vsel %vm68_vm0, %v7420_v18, %v607_v44  ;;  %v1939_v35 = vsel %vm1930_vm7, %v6414_v56, %v1938_v63  ;;  %v7422_v18 = vrot.slane %v5786_v50, 4  ;;  %v1960_v56 = vld [vmem:[%s7150_s0 + $0x34] sm:$0xf] }
 0x1e4   :  { %v841_v11 = vpop.permute.xlu1 %840  ;;  %v6588_v59 = vpop.permute.xlu0 %658  ;;  %3785 = vmatpush1.bf16.msra.mxu0 %v4270_v62  ;;  %v1999_v30 = vsel %vm7421_vm4, %v6442_v37, %v1998_v2  ;;  %vm7424_vm4 = vcmask 785408  }
 0x1e5   :  { %v848_v34 = vrot.slane %v841_v11, 4  ;;  %v667_v47 = vrot.slane %v6588_v59, 4  ;;  %v4390_v22 = vcombine.low %v1939_v35, %v1999_v30  ;;  %v4391_v17 = vcombine.high %v1939_v35, %v1999_v30 }
 0x1e6   :  { %1920 = vrot.lane.b32.xlu1 %v1900_v24, %s4484_s7  ;;  %1020 = vrot.lane.b32.xlu0 %v1000_v48, %s4514_s1  ;;  %v619_v24 = vsel %vm7423_vm8, %v5760_v39, %v618_v10  ;;  %s7425_s7 = smov 118   ;;  %v7426_v39 = vrot.slane %v5811_v14, 4  ;;  %vm7432_vm8 = vcmask 596992  }
 0x1e7   :  { %v678_v62 = vsel %vm68_vm0, %v7422_v18, %v667_v47  ;;  %3837 = vmatprep.subr.bf16.mxu1 %v4391_v17  ;;  %v860_v37 = vsel %vm68_vm0, %v847_v4, %v848_v34 }
 0x1e8   :  { %v6608_v63 = vpop.permute.xlu1 %478  ;;  %v901_v2 = vpop.permute.xlu0 %900  ;;  %3838 = vmatpush1.bf16.msra.mxu1 %v4390_v22  ;;  %v679_v48 = vsel %vm7424_vm4, %v5786_v50, %v678_v62  ;;  %v861_v34 = vsel %vm850_vm1, %v6440_v20, %v860_v37  ;;  %vm7428_vm1 = vcmask 809984   ;;  %vm7436_vm4 = vcmask 793600  }
 0x1e9   :  { %v487_v17 = vrot.slane %v6608_v63, 4  ;;  %v908_v11 = vrot.slane %v901_v2, 4  ;;  %v4258_v35 = vcombine.low %v619_v24, %v679_v48  ;;  %v4259_v30 = vcombine.high %v619_v24, %v679_v48 }
 0x1ea   :  { %1980 = vrot.lane.b32.xlu0 %v1960_v56, %s7425_s7  ;;  %v7427_v24 = vrot.slane %v5839_v32, 4 }
 0x1eb   :  { %v920_v4 = vsel %vm68_vm0, %v907_v54, %v908_v11  ;;  %3786 = vmatprep.subr.bf16.mxu0 %v4259_v30  ;;  %4410 = vmatmul.mubr.msk.bf16.vlgmr.msra.gmra.mxu1 %vm3450_vm10, %v4802_v21  ;;  %v498_v50 = vsel %vm68_vm0, %v7426_v39, %v487_v17 }
 0x1ec   :  { %v721_v22 = vpop.permute.xlu1 %720  ;;  %v6626_v10 = vpop.permute.xlu0 %538  ;;  %3787 = vmatpush1.bf16.msra.mxu0 %v4258_v35  ;;  %v921_v54 = vsel %vm910_vm2, %v6472_v9, %v920_v4  ;;  %3896 = vmatprep.mubr.bf16.mxu1 %v4975_v1  ;;  %v499_v1 = vsel %vm7428_vm1, %v5811_v14, %v498_v50  ;;  %vm7429_vm2 = vcmask 801792   ;;  %vm7437_vm1 = vcmask 785408  }
 0x1ed   :  { %v728_v18 = vrot.slane %v721_v22, 4  ;;  %v547_v62 = vrot.slane %v6626_v10, 4  ;;  %v4284_v56 = vcombine.low %v861_v34, %v921_v54  ;;  %v4285_v2 = vcombine.high %v861_v34, %v921_v54 }
 0x1ee   :  { %v7430_v22 = vrot.slane %v6533_v19, 4 }
 0x1ef   :  { %v558_v48 = vsel %vm68_vm0, %v7427_v24, %v547_v62  ;;  %3864 = vmatprep.subr.bf16.mxu1 %v4285_v2  ;;  %v740_v20 = vsel %vm68_vm0, %v727_v27, %v728_v18  ;;  %v7431_v27 = vrot.slane %v5863_v43, 4 }
 0x1f0   :  { %v6642_v37 = vpop.permute.xlu1 %358  ;;  %v781_v9 = vpop.permute.xlu0 %780  ;;  %3865 = vmatpush1.bf16.msra.mxu1 %v4284_v56  ;;  %v559_v11 = vsel %vm7429_vm2, %v5839_v32, %v558_v48  ;;  %v741_v32 = vsel %vm730_vm5, %v6500_v49, %v740_v20  ;;  %vm7434_vm5 = vcmask 818176   ;;  %vm7439_vm2 = vcmask 1014784  }
 0x1f1   :  { %v367_v35 = vrot.slane %v6642_v37, 4  ;;  %v788_v30 = vrot.slane %v781_v9, 4  ;;  %v4246_v4 = vcombine.low %v499_v1, %v559_v11  ;;  %v4247_v39 = vcombine.high %v499_v1, %v559_v11 }
 0x1f2   :  { %v7433_v9 = vrot.slane %v5889_v15, 4 }
 0x1f3   :  { %v800_v34 = vsel %vm68_vm0, %v7430_v22, %v788_v30  ;;  %3788 = vmatprep.subr.bf16.mxu0 %v4247_v39  ;;  %v378_v54 = vsel %vm68_vm0, %v7431_v27, %v367_v35 }
 0x1f4   :  { %v601_v14 = vpop.permute.xlu1 %600  ;;  %v6657_v50 = vpop.permute.xlu0 %418  ;;  %3789 = vmatpush1.bf16.msra.mxu0 %v4246_v4  ;;  %v801_v18 = vsel %vm7432_vm8, %v6533_v19, %v800_v34  ;;  %v379_v19 = vsel %vm370_vm14, %v5863_v43, %v378_v54  ;;  %vm7440_vm8 = vcmask 1006592  }
 0x1f5   :  { %v608_v56 = vrot.slane %v601_v14, 4  ;;  %v427_v2 = vrot.slane %v6657_v50, 4  ;;  %v4272_v24 = vcombine.low %v741_v32, %v801_v18  ;;  %v4273_v48 = vcombine.high %v741_v32, %v801_v18 }
 0x1f6   :  { %v7435_v14 = vrot.slane %v5923_v61, 4 }
 0x1f7   :  { %v438_v1 = vsel %vm68_vm0, %v7433_v9, %v427_v2  ;;  %3866 = vmatprep.subr.bf16.mxu1 %v4273_v48  ;;  %v620_v11 = vsel %vm68_vm0, %v607_v44, %v608_v56 }
 0x1f8   :  { %v6672_v49 = vpop.permute.xlu1 %238  ;;  %v661_v20 = vpop.permute.xlu0 %660  ;;  %3867 = vmatpush1.bf16.msra.mxu1 %v4272_v24  ;;  %v439_v30 = vsel %vm7434_vm5, %v5889_v15, %v438_v1  ;;  %v621_v15 = vsel %vm7436_vm4, %v6560_v26, %v620_v11  ;;  %vm7442_vm5 = vcmask 809984   ;;  %vm7443_vm4 = vcmask 801792  }
 0x1f9   :  { %v247_v4 = vrot.slane %v6672_v49, 4  ;;  %v668_v39 = vrot.slane %v661_v20, 4  ;;  %v4234_v22 = vcombine.low %v379_v19, %v439_v30  ;;  %v4235_v34 = vcombine.high %v379_v19, %v439_v30 }
 0x1fa   :  { %v7438_v19 = vrot.slane %v5921_v58, 4 }
 0x1fb   :  { %v680_v27 = vsel %vm68_vm0, %v667_v47, %v668_v39  ;;  %3790 = vmatprep.subr.bf16.mxu0 %v4235_v34  ;;  %v3488_v44 = vpop.f32.mrf.mxu0  ;;  %v258_v43 = vsel %vm68_vm0, %v7435_v14, %v247_v4 }
 0x1fc   :  { %v481_v54 = vpop.permute.xlu1 %480  ;;  %v6687_v32 = vpop.permute.xlu0 %298  ;;  %3791 = vmatpush1.bf16.msra.mxu0 %v4234_v22  ;;  %v681_v18 = vsel %vm7437_vm1, %v6588_v59, %v680_v27  ;;  %v6694_v47 = vadd.f32 %v6450_v52, %v3488_v44  ;;  %v259_v39 = vsel %vm7439_vm2, %v5923_v61, %v258_v43  ;;  %vm7445_vm1 = vcmask 1031168  }
 0x1fd   :  { %v488_v56 = vrot.slane %v481_v54, 4  ;;  %v307_v24 = vrot.slane %v6687_v32, 4  ;;  %v4260_v48 = vcombine.low %v621_v15, %v681_v18  ;;  %v4261_v9 = vcombine.high %v621_v15, %v681_v18  ;;  %v3490_v1 = vpop.f32.mrf.mxu0 }
 0x1fe   :  { %v6698_v20 = vadd.f32 %v6463_v13, %v3490_v1  ;;  %v7441_v54 = vrot.slane %v5951_v0, 4  ;;  %v7444_v1 = vrot.slane %v5949_v38, 4  ;;  %vm7446_vm2 = vcmask 1022976  }
 0x1ff   :  { %v318_v30 = vsel %vm68_vm0, %v7438_v19, %v307_v24  ;;  %3868 = vmatprep.subr.bf16.mxu1 %v4261_v9  ;;  %v3492_v26 = vpop.f32.mrf.mxu0  ;;  %v500_v52 = vsel %vm68_vm0, %v487_v17, %v488_v56 }
 0x200   :  { %v6706_v59 = vpop.permute.xlu1 %118  ;;  %v541_v11 = vpop.permute.xlu0 %540  ;;  %3869 = vmatpush1.bf16.msra.mxu1 %v4260_v48  ;;  %v319_v13 = vsel %vm7440_vm8, %v5921_v58, %v318_v30  ;;  %v501_v58 = vsel %vm7442_vm5, %v6608_v63, %v500_v52  ;;  %vm7448_vm8 = vcmask 1039360   ;;  %vm7449_vm5 = vcmask 818176  }
 0x201   :  { %v127_v22 = vrot.slane %v6706_v59, 4  ;;  %v548_v34 = vrot.slane %v541_v11, 4  ;;  %v4222_v27 = vcombine.low %v259_v39, %v319_v13  ;;  %v4223_v44 = vcombine.high %v259_v39, %v319_v13  ;;  %v3493_v14 = vpop.f32.mrf.mxu0 }
 0x203   :  { %v560_v17 = vsel %vm68_vm0, %v547_v62, %v548_v34  ;;  %3792 = vmatprep.subr.bf16.mxu0 %v4223_v44  ;;  %v138_v61 = vsel %vm68_vm0, %v7441_v54, %v127_v22 }
 0x204   :  { %v361_v43 = vpop.permute.xlu1 %360  ;;  %v6721_v15 = vpop.permute.xlu0 %178  ;;  %3793 = vmatpush1.bf16.msra.mxu0 %v4222_v27  ;;  %v561_v18 = vsel %vm7443_vm4, %v6626_v10, %v560_v17  ;;  %v139_v10 = vsel %vm7445_vm1, %v5951_v0, %v138_v61  ;;  %v25_v27 = vld [vmem:[%s7150_s0 + $0x20] sm:$0xff]  ;;  %vm7451_vm4 = vcmask 1006592  }
 0x205   :  { %v368_v56 = vrot.slane %v361_v43, 4  ;;  %v187_v62 = vrot.slane %v6721_v15, 4  ;;  %v4248_v48 = vcombine.low %v501_v58, %v561_v18  ;;  %v4249_v9 = vcombine.high %v501_v58, %v561_v18 }
 0x207   :  { %v198_v19 = vsel %vm68_vm0, %v7444_v1, %v187_v62  ;;  %3870 = vmatprep.subr.bf16.mxu1 %v4249_v9  ;;  %v380_v30 = vsel %vm68_vm0, %v367_v35, %v368_v56  ;;  %v7447_v35 = vrot.slane %v5999_v53, 4 }
 0x208   :  { %v6734_v26 = vpop.permute.xlu1 %57  ;;  %v421_v63 = vpop.permute.xlu0 %420  ;;  %3871 = vmatpush1.bf16.msra.mxu1 %v4248_v48  ;;  %v199_v52 = vsel %vm7446_vm2, %v5949_v38, %v198_v19  ;;  %v381_v61 = vsel %vm370_vm14, %v6642_v37, %v380_v30  ;;  %vm7450_vm14 = vcmask 1014784  }
 0x209   :  { %v66_v11 = vrot.slane %v6734_v26, 4  ;;  %v428_v39 = vrot.slane %v421_v63, 4  ;;  %v4210_v13 = vcombine.low %v139_v10, %v199_v52  ;;  %v4211_v34 = vcombine.high %v139_v10, %v199_v52 }
 0x20b   :  { %v78_v44 = vsel %vm68_vm0, %v7447_v35, %v66_v11  ;;  %v440_v0 = vsel %vm68_vm0, %v427_v2, %v428_v39  ;;  %3794 = vmatprep.subr.bf16.mxu0 %v4211_v34 }
 0x20c   :  { %v3570_v38 = vpop.f32.mrf.mxu1  ;;  %v301_v14 = vpop.permute.xlu1 %300  ;;  %3795 = vmatpush1.bf16.msra.mxu0 %v4210_v13  ;;  %v79_v54 = vsel %vm7448_vm8, %v5999_v53, %v78_v44  ;;  %v441_v43 = vsel %vm7449_vm5, %v6657_v50, %v440_v0  ;;  %vm7454_vm8 = vcmask 990208   ;;  %vm7455_vm5 = vcmask 982016  }
 0x20d   :  { %v241_v17 = vpop.permute.xlu0 %240  ;;  %v308_v58 = vrot.slane %v301_v14, 4  ;;  %v4198_v56 = vcombine.low %v25_v27, %v79_v54  ;;  %v4199_v48 = vcombine.high %v25_v27, %v79_v54  ;;  %v4236_v2 = vcombine.low %v381_v61, %v441_v43 }
 0x20e   :  { %v248_v18 = vrot.slane %v241_v17, 4  ;;  %v3572_v9 = vpop.f32.mrf.mxu1  ;;  %v4237_v1 = vcombine.high %v381_v61, %v441_v43 }
 0x20f   :  { %v320_v19 = vsel %vm68_vm0, %v307_v24, %v308_v58  ;;  %3796 = vmatprep.subr.bf16.mxu0 %v4199_v48  ;;  %v3611_v53 = vpop.f32.mrf.mxu0  ;;  %v7453_v48 = vrot.slane %v6045_v16, 4 }
 0x210   :  { %v260_v63 = vsel %vm68_vm0, %v247_v4, %v248_v18  ;;  %v3574_v10 = vpop.f32.mrf.mxu1  ;;  %3872 = vmatprep.subr.bf16.mxu1 %v4237_v1  ;;  %v181_v37 = vpop.permute.xlu1 %180  ;;  %3797 = vmatpush1.bf16.msra.mxu0 %v4198_v56  ;;  %v321_v52 = vsel %vm7451_vm4, %v6687_v32, %v320_v19  ;;  %v6766_v39 = vadd.f32 %v3611_v53, %v3570_v38  ;;  %v7452_v18 = vrot.slane %v6076_v23, 4 }
 0x211   :  { %v121_v30 = vpop.permute.xlu0 %120  ;;  %v261_v50 = vsel %vm7450_vm14, %v6672_v49, %v260_v63  ;;  %v188_v24 = vrot.slane %v181_v37, 4  ;;  %3873 = vmatpush1.bf16.msra.mxu1 %v4236_v2  ;;  %v3613_v27 = vpop.f32.mrf.mxu0  ;;  %v26_v37 = vld [vmem:[%s7150_s0 + $0x28] sm:$0xff]  ;;  %vm7457_vm14 = vcmask 1039360   ;;  %vm7460_vm4 = vcmask 130048  }
 0x212   :  { %v128_v13 = vrot.slane %v121_v30, 4  ;;  %v4224_v34 = vcombine.low %v261_v50, %v321_v52  ;;  %v4225_v4 = vcombine.high %v261_v50, %v321_v52  ;;  %v3575_v35 = vpop.f32.mrf.mxu1  ;;  %v6768_v44 = vadd.f32 %v3613_v27, %v3572_v9 }
 0x213   :  { %v200_v0 = vsel %vm68_vm0, %v187_v62, %v188_v24  ;;  %v3615_v14 = vpop.f32.mrf.mxu0 }
 0x214   :  { %v140_v49 = vsel %vm68_vm0, %v127_v22, %v128_v13  ;;  %3874 = vmatprep.subr.bf16.mxu1 %v4225_v4  ;;  %v6774_v32 = vpop.permute.xlu1 %1858  ;;  %v201_v54 = vsel %vm7446_vm2, %v6721_v15, %v200_v0  ;;  %vm7463_vm2 = vcmask 146432  }
 0x215   :  { %v6776_v38 = vpop.permute.xlu0 %1798  ;;  %v141_v17 = vsel %vm7445_vm1, %v6706_v59, %v140_v49  ;;  %v1867_v61 = vrot.slane %v6774_v32, 4  ;;  %3875 = vmatpush1.bf16.msra.mxu1 %v4224_v34  ;;  %v3616_v22 = vpop.f32.mrf.mxu0  ;;  %v7459_v49 = vrot.slane %v6154_v42, 4  ;;  %vm7461_vm1 = vcmask 121856  }
 0x216   :  { %v1807_v62 = vrot.slane %v6776_v38, 4  ;;  %v4212_v43 = vcombine.low %v141_v17, %v201_v54  ;;  %v4213_v58 = vcombine.high %v141_v17, %v201_v54 }
 0x217   :  { %v1878_v56 = vsel %vm68_vm0, %v7452_v18, %v1867_v61 }
 0x218   :  { %v1818_v9 = vsel %vm68_vm0, %v7453_v48, %v1807_v62  ;;  %3876 = vmatprep.subr.bf16.mxu1 %v4213_v58  ;;  %v6790_v59 = vpop.permute.xlu1 %1678  ;;  %v1879_v1 = vsel %vm7455_vm5, %v6076_v23, %v1878_v56  ;;  %vm7466_vm5 = vcmask 990208  }
 0x219   :  { %v60_v15 = vpop.permute.xlu0 %59  ;;  %v1819_v2 = vsel %vm7454_vm8, %v6045_v16, %v1818_v9  ;;  %v1687_v19 = vrot.slane %v6790_v59, 4  ;;  %3877 = vmatpush1.bf16.msra.mxu1 %v4212_v43  ;;  %v7456_v16 = vrot.slane %v6100_v28, 4  ;;  %v7462_v9 = vrot.slane %v6179_v55, 4 }
 0x21a   :  { %v67_v63 = vrot.slane %v60_v15, 4  ;;  %v4378_v53 = vcombine.low %v1819_v2, %v1879_v1  ;;  %v4379_v10 = vcombine.high %v1819_v2, %v1879_v1  ;;  %vm7464_vm8 = vcmask 138240  }
 0x21b   :  { %v1698_v50 = vsel %vm68_vm0, %v7456_v16, %v1687_v19 }
 0x21c   :  { %v80_v30 = vsel %vm68_vm0, %v66_v11, %v67_v63  ;;  %3798 = vmatprep.subr.bf16.mxu0 %v4379_v10  ;;  %v6806_v23 = vpop.permute.xlu1 %1558  ;;  %v7458_v11 = vrot.slane %v6124_v46, 4  ;;  %v1699_v54 = vsel %vm7460_vm4, %v6100_v28, %v1698_v50  ;;  %vm7469_vm4 = vcmask 162816  }
 0x21d   :  { %v6808_v52 = vpop.permute.xlu0 %1738  ;;  %3799 = vmatpush2.bf16.msra.mxu0 %v4378_v53  ;;  %v81_v24 = vsel %vm7457_vm14, %v6734_v26, %v80_v30  ;;  %v1567_v13 = vrot.slane %v6806_v23, 4  ;;  %vm7467_vm14 = vcmask 982016  }
 0x21e   :  { %v1747_v34 = vrot.slane %v6808_v52, 4  ;;  %v4200_v4 = vcombine.low %v26_v37, %v81_v24  ;;  %v4201_v27 = vcombine.high %v26_v37, %v81_v24 }
 0x21f   :  { %v1578_v14 = vsel %vm68_vm0, %v7459_v49, %v1567_v13 }
 0x220   :  { %v1758_v35 = vsel %vm68_vm0, %v7458_v11, %v1747_v34  ;;  %3878 = vmatprep.subr.bf16.mxu1 %v4201_v27  ;;  %v6817_v0 = vpop.f32.mrf.mxu1  ;;  %v1801_v26 = vpop.permute.xlu1 %1800  ;;  %v1579_v63 = vsel %vm7463_vm2, %v6154_v42, %v1578_v14  ;;  %vm7472_vm2 = vcmask 130048  }
 0x221   :  { %v6824_v17 = vpop.permute.xlu0 %1618  ;;  %3879 = vmatpush1.bf16.msra.mxu1 %v4200_v4  ;;  %v1759_v43 = vsel %vm7461_vm1, %v6124_v46, %v1758_v35  ;;  %v1808_v58 = vrot.slane %v1801_v26, 4  ;;  %v7468_v26 = vrot.slane %v6232_v45, 4  ;;  %vm7470_vm1 = vcmask 154624  }
 0x222   :  { %v1627_v22 = vrot.slane %v6824_v17, 4  ;;  %v4366_v18 = vcombine.low %v1699_v54, %v1759_v43  ;;  %v4367_v56 = vcombine.high %v1699_v54, %v1759_v43  ;;  %v6831_v48 = vpop.f32.mrf.mxu1 }
 0x223   :  { %v1820_v28 = vsel %vm68_vm0, %v1807_v62, %v1808_v58  ;;  %v7465_v62 = vrot.slane %v6204_v25, 4 }
 0x224   :  { %v1638_v15 = vsel %vm68_vm0, %v7462_v9, %v1627_v22  ;;  %3800 = vmatprep.subr.bf16.mxu0 %v4367_v56  ;;  %v3697_v2 = vpop.f32.mrf.mxu1  ;;  %v6839_v1 = vpop.permute.xlu1 %1438 }
 0x225   :  { %v1861_v46 = vpop.permute.xlu0 %1860  ;;  %3801 = vmatpush2.bf16.msra.mxu0 %v4366_v18  ;;  %v1639_v53 = vsel %vm7464_vm8, %v6179_v55, %v1638_v15  ;;  %v1447_v10 = vrot.slane %v6839_v1, 4  ;;  %v1821_v55 = vsel %vm7466_vm5, %v6776_v38, %v1820_v28  ;;  %vm7473_vm8 = vcmask 121856  }
 0x226   :  { %v1868_v37 = vrot.slane %v1861_v46, 4  ;;  %v4354_v30 = vcombine.low %v1579_v63, %v1639_v53  ;;  %v4355_v16 = vcombine.high %v1579_v63, %v1639_v53  ;;  %v3698_v50 = vpop.f32.mrf.mxu1  ;;  %vm7475_vm5 = vcmask 351232  }
 0x227   :  { %v1458_v4 = vsel %vm68_vm0, %v7465_v62, %v1447_v10  ;;  %v7474_v50 = vrot.slane %v6284_v8, 4 }
 0x228   :  { %v1880_v24 = vsel %vm68_vm0, %v1867_v61, %v1868_v37  ;;  %3802 = vmatprep.subr.bf16.mxu0 %v4355_v16  ;;  %v1681_v27 = vpop.permute.xlu1 %1680 }
 0x229   :  { %v6852_v42 = vpop.permute.xlu0 %1498  ;;  %3803 = vmatpush2.bf16.msra.mxu0 %v4354_v30  ;;  %v1881_v11 = vsel %vm7467_vm14, %v6774_v32, %v1880_v24  ;;  %v1688_v35 = vrot.slane %v1681_v27, 4  ;;  %v1459_v32 = vsel %vm7469_vm4, %v6204_v25, %v1458_v4  ;;  %vm7476_vm14 = vcmask 343040  }
 0x22a   :  { %v1507_v61 = vrot.slane %v6852_v42, 4  ;;  %v4380_v49 = vcombine.low %v1821_v55, %v1881_v11  ;;  %v4381_v14 = vcombine.high %v1821_v55, %v1881_v11  ;;  %vm7478_vm4 = vcmask 146432  }
 0x22b   :  { %v1700_v43 = vsel %vm68_vm0, %v1687_v19, %v1688_v35  ;;  %v7471_v19 = vrot.slane %v6256_v51, 4 }
 0x22c   :  { %v1518_v54 = vsel %vm68_vm0, %v7468_v26, %v1507_v61  ;;  %3880 = vmatprep.subr.bf16.mxu1 %v4381_v14  ;;  %v6865_v58 = vpop.permute.xlu1 %1318  ;;  %v1701_v25 = vsel %vm7472_vm2, %v6790_v59, %v1700_v43  ;;  %vm7482_vm2 = vcmask 162816  }
 0x22d   :  { %v1741_v38 = vpop.permute.xlu0 %1740  ;;  %3881 = vmatpush2.bf16.msra.mxu1 %v4380_v49  ;;  %v1519_v18 = vsel %vm7470_vm1, %v6232_v45, %v1518_v54  ;;  %v1327_v56 = vrot.slane %v6865_v58, 4  ;;  %vm7479_vm1 = vcmask 138240  }
 0x22e   :  { %v1748_v9 = vrot.slane %v1741_v38, 4  ;;  %v4342_v15 = vcombine.low %v1459_v32, %v1519_v18  ;;  %v4343_v2 = vcombine.high %v1459_v32, %v1519_v18 }
 0x22f   :  { %v1338_v46 = vsel %vm68_vm0, %v7471_v19, %v1327_v56 }
 0x230   :  { %v1760_v28 = vsel %vm68_vm0, %v1747_v34, %v1748_v9  ;;  %3804 = vmatprep.subr.bf16.mxu0 %v4343_v2  ;;  %v1561_v63 = vpop.permute.xlu1 %1560  ;;  %v7480_v9 = vrot.slane %v6336_v41, 4 }
 0x231   :  { %v6878_v53 = vpop.permute.xlu0 %1378  ;;  %3805 = vmatpush2.bf16.msra.mxu0 %v4342_v15  ;;  %v1761_v45 = vsel %vm7473_vm8, %v6808_v52, %v1760_v28  ;;  %v1568_v37 = vrot.slane %v1561_v63, 4  ;;  %v1339_v52 = vsel %vm7475_vm5, %v6256_v51, %v1338_v46  ;;  %vm7483_vm8 = vcmask 154624  }
 0x232   :  { %v1387_v34 = vrot.slane %v6878_v53, 4  ;;  %v4368_v30 = vcombine.low %v1701_v25, %v1761_v45  ;;  %v4369_v16 = vcombine.high %v1701_v25, %v1761_v45 }
 0x233   :  { %v1580_v62 = vsel %vm68_vm0, %v1567_v13, %v1568_v37  ;;  %v7477_v13 = vrot.slane %v6308_v31, 4 }
 0x234   :  { %v1398_v24 = vsel %vm68_vm0, %v7474_v50, %v1387_v34  ;;  %3882 = vmatprep.subr.bf16.mxu1 %v4369_v16  ;;  %v6893_v59 = vpop.permute.xlu1 %1198 }
 0x235   :  { %v1621_v4 = vpop.permute.xlu0 %1620  ;;  %3883 = vmatpush2.bf16.msra.mxu1 %v4368_v30  ;;  %v1399_v27 = vsel %vm7476_vm14, %v6284_v8, %v1398_v24  ;;  %v1207_v55 = vrot.slane %v6893_v59, 4  ;;  %v1581_v8 = vsel %vm7478_vm4, %v6806_v23, %v1580_v62 }
 0x236   :  { %v1628_v11 = vrot.slane %v1621_v4, 4  ;;  %v4330_v35 = vcombine.low %v1339_v52, %v1399_v27  ;;  %v4331_v49 = vcombine.high %v1339_v52, %v1399_v27  ;;  %v7484_v52 = vrot.slane %v6362_v60, 4 }
 0x237   :  { %v1218_v26 = vsel %vm68_vm0, %v7477_v13, %v1207_v55 }
 0x238   :  { %v1640_v14 = vsel %vm68_vm0, %v1627_v22, %v1628_v11  ;;  %3806 = vmatprep.subr.bf16.mxu0 %v4331_v49  ;;  %v1441_v51 = vpop.permute.xlu1 %1440 }
 0x239   :  { %v6908_v54 = vpop.permute.xlu0 %1258  ;;  %3807 = vmatpush2.bf16.msra.mxu0 %v4330_v35  ;;  %v1641_v43 = vsel %vm7479_vm1, %v6824_v17, %v1640_v14  ;;  %v1448_v38 = vrot.slane %v1441_v51, 4  ;;  %v1219_v17 = vsel %vm1210_vm6, %v6308_v31, %v1218_v26 }
 0x23a   :  { %v1267_v22 = vrot.slane %v6908_v54, 4  ;;  %v4356_v32 = vcombine.low %v1581_v8, %v1641_v43  ;;  %v4357_v18 = vcombine.high %v1581_v8, %v1641_v43 }
 0x23b   :  { %v1460_v2 = vsel %vm68_vm0, %v1447_v10, %v1448_v38  ;;  %v7481_v10 = vrot.slane %v6334_v33, 4 }
 0x23c   :  { %v1278_v15 = vsel %vm68_vm0, %v7480_v9, %v1267_v22  ;;  %3884 = vmatprep.subr.bf16.mxu1 %v4357_v18  ;;  %v6923_v23 = vpop.permute.xlu1 %1078  ;;  %v1461_v31 = vsel %vm7482_vm2, %v6839_v1, %v1460_v2  ;;  %v7486_v2 = vrot.slane %v6416_v3, 4 }
 0x23d   :  { %v1501_v28 = vpop.permute.xlu0 %1500  ;;  %3885 = vmatpush2.bf16.msra.mxu1 %v4356_v32  ;;  %v1279_v19 = vsel %vm1270_vm15, %v6336_v41, %v1278_v15  ;;  %v1087_v46 = vrot.slane %v6923_v23, 4 }
 0x23e   :  { %v1508_v63 = vrot.slane %v1501_v28, 4  ;;  %v4318_v25 = vcombine.low %v1219_v17, %v1279_v19  ;;  %v4319_v45 = vcombine.high %v1219_v17, %v1279_v19 }
 0x23f   :  { %v1098_v30 = vsel %vm68_vm0, %v7481_v10, %v1087_v46 }
 0x240   :  { %v1520_v37 = vsel %vm68_vm0, %v1507_v61, %v1508_v63  ;;  %3808 = vmatprep.subr.bf16.mxu0 %v4319_v45  ;;  %v1321_v16 = vpop.permute.xlu1 %1320 }
 0x241   :  { %v6936_v50 = vpop.permute.xlu0 %1138  ;;  %3809 = vmatpush2.bf16.msra.mxu0 %v4318_v25  ;;  %v1521_v41 = vsel %vm7483_vm8, %v6852_v42, %v1520_v37  ;;  %v1328_v24 = vrot.slane %v1321_v16, 4  ;;  %v1099_v42 = vsel %vm1090_vm11, %v6334_v33, %v1098_v30 }
 0x242   :  { %v1147_v62 = vrot.slane %v6936_v50, 4  ;;  %v4344_v4 = vcombine.low %v1461_v31, %v1521_v41  ;;  %v4345_v61 = vcombine.high %v1461_v31, %v1521_v41 }
 0x243   :  { %v1340_v11 = vsel %vm68_vm0, %v1327_v56, %v1328_v24  ;;  %v7485_v56 = vrot.slane %v6387_v5, 4 }
 0x244   :  { %v1158_v27 = vsel %vm68_vm0, %v7484_v52, %v1147_v62  ;;  %3886 = vmatprep.subr.bf16.mxu1 %v4345_v61  ;;  %v6949_v35 = vpop.permute.xlu1 %958  ;;  %v1341_v33 = vsel %vm7475_vm5, %v6865_v58, %v1340_v11 }
 0x245   :  { %v1381_v1 = vpop.permute.xlu0 %1380  ;;  %3887 = vmatpush2.bf16.msra.mxu1 %v4344_v4  ;;  %v1159_v49 = vsel %vm1150_vm13, %v6362_v60, %v1158_v27  ;;  %v967_v14 = vrot.slane %v6949_v35, 4 }
 0x246   :  { %v1388_v13 = vrot.slane %v1381_v1, 4  ;;  %v4306_v26 = vcombine.low %v1099_v42, %v1159_v49  ;;  %v4307_v51 = vcombine.high %v1099_v42, %v1159_v49 }
 0x247   :  { %v978_v43 = vsel %vm68_vm0, %v7485_v56, %v967_v14 }
 0x248   :  { %v1400_v8 = vsel %vm68_vm0, %v1387_v34, %v1388_v13  ;;  %3810 = vmatprep.subr.bf16.mxu0 %v4307_v51  ;;  %v1201_v38 = vpop.permute.xlu1 %1200  ;;  %v979_v58 = vsel %vm970_vm9, %v6387_v5, %v978_v43  ;;  %v7488_v13 = vrot.slane %v6502_v12, 4 }
 0x249   :  { %v6962_v32 = vpop.permute.xlu0 %1018  ;;  %3811 = vmatpush2.bf16.msra.mxu0 %v4306_v26  ;;  %v1401_v60 = vsel %vm7476_vm14, %v6878_v53, %v1400_v8  ;;  %v1208_v18 = vrot.slane %v1201_v38, 4 }
 0x24a   :  { %v1027_v9 = vrot.slane %v6962_v32, 4  ;;  %v4332_v15 = vcombine.low %v1341_v33, %v1401_v60  ;;  %v4333_v34 = vcombine.high %v1341_v33, %v1401_v60 }
 0x24b   :  { %v1220_v17 = vsel %vm68_vm0, %v1207_v55, %v1208_v18 }
 0x24c   :  { %v1038_v28 = vsel %vm68_vm0, %v7486_v2, %v1027_v9  ;;  %3888 = vmatprep.subr.bf16.mxu1 %v4333_v34  ;;  %v1081_v19 = vpop.permute.xlu1 %1080  ;;  %v1221_v5 = vsel %vm1210_vm6, %v6893_v59, %v1220_v17  ;;  %vm7489_vm6 = vcmask 949248   ;;  %v7491_v17 = vrot.slane %v6562_v6, 4 }
 0x24d   :  { %v1261_v63 = vpop.permute.xlu0 %1260  ;;  %3889 = vmatpush2.bf16.msra.mxu1 %v4332_v15  ;;  %v1039_v53 = vsel %vm1030_vm12, %v6416_v3, %v1038_v28  ;;  %v1088_v25 = vrot.slane %v1081_v19, 4 }
 0x24e   :  { %v1268_v45 = vrot.slane %v1261_v63, 4  ;;  %v4294_v37 = vcombine.low %v979_v58, %v1039_v53  ;;  %v4295_v10 = vcombine.high %v979_v58, %v1039_v53 }
 0x24f   :  { %v1100_v55 = vsel %vm68_vm0, %v1087_v46, %v1088_v25 }
 0x250   :  { %v1280_v30 = vsel %vm68_vm0, %v1267_v22, %v1268_v45  ;;  %3812 = vmatprep.subr.bf16.mxu0 %v4295_v10  ;;  %v2041_v16 = vpop.permute.xlu1 %2040  ;;  %v7487_v22 = vrot.slane %v6470_v7, 4  ;;  %v1101_v59 = vsel %vm1090_vm11, %v6923_v23, %v1100_v55 }
 0x251   :  { %v1141_v31 = vpop.permute.xlu0 %1140  ;;  %3813 = vmatpush2.bf16.msra.mxu0 %v4294_v37  ;;  %v1281_v3 = vsel %vm1270_vm15, %v6908_v54, %v1280_v30  ;;  %v2048_v41 = vrot.slane %v2041_v16, 4 }
 0x252   :  { %v1148_v24 = vrot.slane %v1141_v31, 4  ;;  %v4320_v4 = vcombine.low %v1221_v5, %v1281_v3  ;;  %v4321_v61 = vcombine.high %v1221_v5, %v1281_v3 }
 0x253   :  { %v2060_v46 = vsel %vm68_vm0, %v7487_v22, %v2048_v41 }
 0x254   :  { %v1160_v52 = vsel %vm68_vm0, %v1147_v62, %v1148_v24  ;;  %3815 = vmatmul.mubr.bf16.vlgmr.msra.gmra.mxu0 %v4952_v29  ;;  %3890 = vmatprep.subr.bf16.mxu1 %v4321_v61  ;;  %v961_v27 = vpop.permute.xlu1 %960  ;;  %v2061_v23 = vsel %vm2050_vm3, %v6470_v7, %v2060_v46  ;;  %v7490_v7 = vrot.slane %v6531_v36, 4  ;;  %vm7492_vm3 = vcmask 965632   ;;  %v3946_v61 = vld [vmem:[%s7152_s4] sm:$0xff] }
 0x255   :  { %v2101_v11 = vpop.permute.xlu0 %2100  ;;  %3891 = vmatpush2.bf16.msra.mxu1 %v4320_v4  ;;  %v1161_v54 = vsel %vm1150_vm13, %v6936_v50, %v1160_v52  ;;  %3937 = vmatprep.mubr.bf16.mxu0 %v7406_v40  ;;  %v968_v1 = vrot.slane %v961_v27, 4  ;;  %v3952_v4 = vsub.s32 0, %v4767_v57  ;;  %v3956_v52 = vsub.s32 1, %v4767_v57 }
 0x256   :  { %v2108_v62 = vrot.slane %v2101_v11, 4  ;;  %v4308_v42 = vcombine.low %v1101_v59, %v1161_v54  ;;  %v4309_v49 = vcombine.high %v1101_v59, %v1161_v54  ;;  %v3960_v27 = vsub.s32 2, %v4767_v57 }
 0x257   :  { %v980_v51 = vsel %vm68_vm0, %v967_v14, %v968_v1  ;;  %v3953_v22 = vrot.slane %v3946_v61, %v3952_v4  ;;  %v3957_v46 = vrot.slane %v3946_v61, %v3956_v52  ;;  %v3964_v1 = vsub.s32 3, %v4767_v57 }
 0x258   :  { %v2120_v26 = vsel %vm68_vm0, %v7488_v13, %v2108_v62  ;;  %3892 = vmatprep.subr.bf16.mxu1 %v4309_v49  ;;  %v1921_v8 = vpop.permute.xlu1 %1920  ;;  %v981_v14 = vsel %vm970_vm9, %v6949_v35, %v980_v51  ;;  %v3961_v54 = vrot.slane %v3946_v61, %v3960_v27  ;;  %v3968_v62 = vsub.s32 4, %v4767_v57 }
 0x259   :  { %v1021_v56 = vpop.permute.xlu0 %1020  ;;  %3893 = vmatpush2.bf16.msra.mxu1 %v4308_v42  ;;  %v2121_v40 = vsel %vm7489_vm6, %v6502_v12, %v2120_v26  ;;  %v1928_v50 = vrot.slane %v1921_v8, 4  ;;  %v4010_v11 = vmul.f32 %v3953_v22, %v6694_v47  ;;  %v4011_v59 = vmul.f32 %v3957_v46, %v6698_v20 }
 0x25a   :  { %v1028_v43 = vrot.slane %v1021_v56, 4  ;;  %v4404_v38 = vcombine.low %v2061_v23, %v2121_v40  ;;  %v4405_v33 = vcombine.high %v2061_v23, %v2121_v40  ;;  %v4012_v13 = vmul.f32 %v3961_v54, %v6766_v39 }
 0x25b   :  { %v1940_v34 = vsel %vm68_vm0, %v7490_v7, %v1928_v50  ;;  %v4050_v42 = vmul.f32 %v4010_v11, %v6694_v47  ;;  %v4051_v49 = vmul.f32 %v4011_v59, %v6698_v20  ;;  %v3965_v26 = vrot.slane %v3946_v61, %v3964_v1 }
 0x25c   :  { %v1040_v60 = vsel %vm68_vm0, %v1027_v9, %v1028_v43  ;;  %3917 = vmatprep.subr.bf16.mxu0 %v4405_v33  ;;  %v1941_v19 = vsel %vm1930_vm7, %v6531_v36, %v1940_v34  ;;  %v3972_v51 = vsub.s32 5, %v4767_v57  ;;  %v4023_v8 = vsel %vm68_vm0, %v4010_v11, 0.0 }
 0x25d   :  { %v1981_v18 = vpop.permute.xlu0 %1980  ;;  %3918 = vmatpush1.bf16.msra.mxu0 %v4404_v38  ;;  %v1041_v15 = vsel %vm1030_vm12, %v6962_v32, %v1040_v60  ;;  %v4024_v56 = vsel %vm68_vm0, %v4011_v59, 0.0  ;;  %v3969_v40 = vrot.slane %v3946_v61, %v3968_v62  ;;  %v4062_v50 = vsel %vm68_vm0, %v4050_v42, 0.0 }
 0x25e   :  { %v1988_v12 = vrot.slane %v1981_v18, 4  ;;  %v4296_v2 = vcombine.low %v981_v14, %v1041_v15  ;;  %v4297_v28 = vcombine.high %v981_v14, %v1041_v15  ;;  %v4063_v43 = vsel %vm68_vm0, %v4051_v49, 0.0 }
 0x25f   :  { %v4052_v38 = vmul.f32 %v4012_v13, %v6766_v39  ;;  %v4013_v33 = vmul.f32 %v3965_v26, %v6768_v44  ;;  %v3976_v60 = vsub.s32 6, %v4767_v57  ;;  %v4025_v18 = vadd.f32 %v4024_v56, %v4023_v8 }
 0x260   :  { %v2000_v9 = vsel %vm68_vm0, %v7491_v17, %v1988_v12  ;;  %3894 = vmatprep.subr.bf16.mxu1 %v4297_v28  ;;  %v3973_v15 = vrot.slane %v3946_v61, %v3972_v51  ;;  %v4026_v7 = vsel %vm68_vm0, %v4012_v13, 0.0  ;;  %v4064_v34 = vadd.f32 %v4063_v43, %v4062_v50 }
 0x261   :  { %3895 = vmatpush2.bf16.msra.mxu1 %v4296_v2  ;;  %v2001_v35 = vsel %vm7492_vm3, %v6562_v6, %v2000_v9  ;;  %v4065_v2 = vsel %vm68_vm0, %v4052_v38, 0.0  ;;  %v4053_v28 = vmul.f32 %v4013_v33, %v6768_v44  ;;  %v3977_v17 = vrot.slane %v3946_v61, %v3976_v60 }
 0x262   :  { %v4392_v32 = vcombine.low %v1941_v19, %v2001_v35  ;;  %v4393_v63 = vcombine.high %v1941_v19, %v2001_v35  ;;  %v3980_v9 = vsub.s32 7, %v4767_v57  ;;  %v4027_v19 = vadd.f32 %v4026_v7, %v4025_v18 }
 0x264   :  { %3897 = vmatmul.mubr.bf16.vlgmr.msra.gmra.mxu1 %v4952_v29  ;;  %3919 = vmatprep.subr.bf16.mxu0 %v4393_v63 }
 0x265   :  { %3920 = vmatpush1.bf16.msra.mxu0 %v4392_v32 }
 0x268   :  { %4411 = vmatmul.mubr.msk.bf16.vlgmr.msra.gmra.mxu0 %vm3450_vm10, %v4802_v21 }
 0x287   :  { %v3652_v58 = vpop.f32.mrf.mxu0 }
 0x288   :  { %v7050_v23 = vadd.f32 %v6817_v0, %v3652_v58  ;;  %v4066_v58 = vadd.f32 %v4065_v2, %v4064_v34 }
 0x289   :  { %v3654_v53 = vpop.f32.mrf.mxu0 }
 0x28a   :  { %v7058_v14 = vadd.f32 %v6831_v48, %v3654_v53  ;;  %v4014_v0 = vmul.f32 %v3969_v40, %v7050_v23  ;;  %v4028_v48 = vsel %vm68_vm0, %v4013_v33, 0.0  ;;  %v3947_v53 = vld [vmem:[%s7152_s4 + $0x8] sm:$0xf] }
 0x28b   :  { %v3656_v25 = vpop.f32.mrf.mxu0  ;;  %v3993_v7 = vrot.slane %v3947_v53, %v3960_v27 }
 0x28c   :  { %v4015_v35 = vmul.f32 %v3973_v15, %v7058_v14  ;;  %v4054_v63 = vmul.f32 %v4014_v0, %v7050_v23 }
 0x28d   :  { %v3657_v45 = vpop.f32.mrf.mxu0 }
 0x28e   :  { %v4067_v45 = vsel %vm68_vm0, %v4053_v28, 0.0  ;;  %v4032_v46 = vsel %vm68_vm0, %v4015_v35, 0.0 }
 0x297   :  { %v3734_v37 = vpop.f32.mrf.mxu1 }
 0x299   :  { %v3736_v10 = vpop.f32.mrf.mxu1 }
 0x29b   :  { %v3775_v30 = vpop.f32.mrf.mxu0  ;;  %v3738_v36 = vpop.f32.mrf.mxu1 }
 0x29c   :  { %v7023_v55 = vadd.f32 %v3775_v30, %v3734_v37  ;;  %v4030_v37 = vsel %vm68_vm0, %v4014_v0, 0.0  ;;  %v3981_v30 = vrot.slane %v3946_v61, %v3980_v9  ;;  %v4029_v36 = vadd.f32 %v4028_v48, %v4027_v19 }
 0x29d   :  { %v3777_v6 = vpop.f32.mrf.mxu0  ;;  %v3739_v16 = vpop.f32.mrf.mxu1  ;;  %v3997_v9 = vrot.slane %v3947_v53, %v3964_v1 }
 0x29e   :  { %v7025_v31 = vadd.f32 %v3777_v6, %v3736_v10  ;;  %v4016_v10 = vmul.f32 %v3977_v17, %v7023_v55  ;;  %v4055_v6 = vmul.f32 %v4015_v35, %v7058_v14  ;;  %v4031_v22 = vadd.f32 %v4030_v37, %v4029_v36 }
 0x29f   :  { %v3779_v29 = vpop.f32.mrf.mxu0 }
 0x2a0   :  { %v4069_v29 = vsel %vm68_vm0, %v4054_v63, 0.0  ;;  %v4056_v11 = vmul.f32 %v4016_v10, %v7023_v55  ;;  %v4017_v59 = vmul.f32 %v3981_v30, %v7025_v31  ;;  %v4071_v61 = vsel %vm68_vm0, %v4055_v6, 0.0 }
 0x2a1   :  { %v3780_v5 = vpop.f32.mrf.mxu0  ;;  %v4034_v62 = vsel %vm68_vm0, %v4016_v10, 0.0 }
 0x2a2   :  { %v4073_v13 = vsel %vm68_vm0, %v4056_v11, 0.0  ;;  %v4057_v26 = vmul.f32 %v4017_v59, %v7025_v31  ;;  %v4036_v56 = vsel %vm68_vm0, %v4017_v59, 0.0 }
 0x2a4   :  { %v4075_v33 = vsel %vm68_vm0, %v4057_v26, 0.0  ;;  %v4095_v26 = vld [vmem:[%s7154_s3] sm:$0xf] }
 0x2ab   :  { %v3857_v3 = vpop.f32.mrf.mxu1 }
 0x2ad   :  { %v7027_v41 = vpop.f32.mrf.mxu1 }
 0x2af   :  { %v3861_v21 = vpop.f32.mrf.mxu1 }
 0x2b0   :  { %v3985_v21 = vrot.slane %v3947_v53, %v3952_v4  ;;  %v4033_v4 = vadd.f32 %v4032_v46, %v4031_v22 }
 0x2b1   :  { %v3862_v24 = vpop.f32.mrf.mxu1 }
 0x2b2   :  { %v4068_v24 = vadd.f32 %v4067_v45, %v4066_v58  ;;  %v4035_v8 = vadd.f32 %v4034_v62, %v4033_v4 }
 0x2b4   :  { %v4070_v54 = vadd.f32 %v4069_v29, %v4068_v24 }
 0x2b6   :  { %v4072_v51 = vadd.f32 %v4071_v61, %v4070_v54 }
 0x2b8   :  { %v4074_v43 = vadd.f32 %v4073_v13, %v4072_v51 }
 0x2ba   :  { %v4076_v0 = vadd.f32 %v4075_v33, %v4074_v43 }
 0x314   :  { %v3816_v12 = vpop.f32.mrf.mxu0 }
 0x315   :  { %v7076_v5 = vadd.f32 %v3857_v3, %v3816_v12  ;;  %v3989_v3 = vrot.slane %v3947_v53, %v3956_v52  ;;  %v4037_v52 = vadd.f32 %v4036_v56, %v4035_v8 }
 0x316   :  { %v3818_v32 = vpop.f32.mrf.mxu0 }
 0x317   :  { %v4018_v42 = vmul.f32 %v3985_v21, %v7076_v5  ;;  %v7085_v49 = vadd.f32 %v7027_v41, %v3818_v32 }
 0x318   :  { %v3820_v25 = vpop.f32.mrf.mxu0 }
 0x319   :  { %v4058_v40 = vmul.f32 %v4018_v42, %v7076_v5  ;;  %v4019_v50 = vmul.f32 %v3989_v3, %v7085_v49  ;;  %v4038_v41 = vsel %vm68_vm0, %v4018_v42, 0.0  ;;  %v4091_v3 = vld [vmem:[%s7153_s2] sm:$0xf] }
 0x31a   :  { %v3821_v16 = vpop.f32.mrf.mxu0  ;;  %v4039_v34 = vadd.f32 %v4038_v41, %v4037_v52 }
 0x31b   :  { %v4077_v18 = vsel %vm68_vm0, %v4058_v40, 0.0  ;;  %v4059_v15 = vmul.f32 %v4019_v50, %v7085_v49  ;;  %v4040_v28 = vsel %vm68_vm0, %v4019_v50, 0.0 }
 0x31c   :  { %v4078_v19 = vadd.f32 %v4077_v18, %v4076_v0  ;;  %v4041_v25 = vadd.f32 %v4040_v28, %v4039_v34 }
 0x31d   :  { %v4079_v48 = vsel %vm68_vm0, %v4059_v15, 0.0 }
 0x31e   :  { %v4080_v1 = vadd.f32 %v4079_v48, %v4078_v19 }
 0x324   :  { %v3898_v38 = vpop.f32.mrf.mxu1 }
 0x326   :  { %v3900_v60 = vpop.f32.mrf.mxu1 }
 0x328   :  { %v3902_v12 = vpop.f32.mrf.mxu1  ;;  %v3939_v2 = vpop.f32.mrf.mxu0 }
 0x329   :  { %v7099_v17 = vadd.f32 %v3939_v2, %v3898_v38 }
 0x32a   :  { %v3903_v35 = vpop.f32.mrf.mxu1  ;;  %v3941_v32 = vpop.f32.mrf.mxu0 }
 0x32b   :  { %v4020_v63 = vmul.f32 %v3993_v7, %v7099_v17  ;;  %v7105_v58 = vadd.f32 %v3941_v32, %v3900_v60 }
 0x32c   :  { %v3943_v27 = vpop.f32.mrf.mxu0 }
 0x32d   :  { %v4060_v45 = vmul.f32 %v4020_v63, %v7099_v17  ;;  %v4021_v37 = vmul.f32 %v3997_v9, %v7105_v58  ;;  %v4042_v10 = vsel %vm68_vm0, %v4020_v63, 0.0 }
 0x32e   :  { %v3944_v30 = vpop.f32.mrf.mxu0  ;;  %v4043_v57 = vadd.f32 %v4042_v10, %v4041_v25 }
 0x32f   :  { %v4061_v53 = vmul.f32 %v4021_v37, %v7105_v58  ;;  %v4044_v36 = vsel %vm68_vm0, %v4021_v37, 0.0  ;;  %v4081_v6 = vsel %vm68_vm0, %v4060_v45, 0.0 }
 0x330   :  { %v4045_v16 = vadd.f32 %v4044_v36, %v4043_v57  ;;  %v4082_v29 = vadd.f32 %v4081_v6, %v4080_v1 }
 0x331   :  { %v4083_v21 = vsel %vm68_vm0, %v4061_v53, 0.0 }
 0x332   :  { %4046 = vadd.xlane.f32.xlu1 %v4045_v16  ;;  %v4084_v24 = vadd.f32 %v4083_v21, %v4082_v29 }
 0x334   :  { %4085 = vadd.xlane.f32.xlu0 %v4084_v24 }
 0x3bb   :  { %v4047_v22 = vpop.xlane.xlu1 %4046 }
 0x3bc   :  { %v4049_v46 = vmul.f32 0.0010330578, %v4047_v22 }
 0x3bd   :  { %v4086_v11 = vpop.xlane.xlu0 %4085 }
 0x3be   :  { %v4088_v59 = vmul.f32 %v4049_v46, %v4049_v46  ;;  %v4087_v54 = vmul.f32 0.0010330578, %v4086_v11 }
 0x3c0   :  { %v4089_v61 = vsub.f32 %v4087_v54, %v4088_v59 }
 0x3c2   :  { %v4090_v62 = vmax.f32 %v4089_v61, 0.0 }
 0x3c4   :  { %v4092_v42 = vadd.f32 1e-05, %v4090_v62 }
 0x3c6   :  { %4452 = vrsqrt.f32 %v4092_v42 }
 0x3d3   :  { %v4453_v4 = vpop.eup %4452 }
 0x3d4   :  { %v4094_v13 = vmul.f32 %v4453_v4, %v4091_v3 }
 0x3d6   :  { %4100 = vperm.xlu0 %4449, %v4094_v13   ;;  %v4096_v51 = vmul.f32 %v4094_v13, %v4049_v46 }
 0x3d8   :  { %v4097_v8 = vsub.f32 %v4095_v26, %v4096_v51 }
 0x3da   :  { %4117 = vperm.xlu1 %4450, %v4097_v8  }
 0x451   :  { %v4101_v56 = vpop.permute.xlu0 %4100 }
 0x452   :  { %v4103_v40 = vmul.f32 %v4101_v56, %v6694_v47  ;;  %v4104_v50 = vmul.f32 %v4101_v56, %v6698_v20  ;;  %v4105_v43 = vmul.f32 %v4101_v56, %v6766_v39  ;;  %v4106_v38 = vmul.f32 %v4101_v56, %v6768_v44 }
 0x453   :  { %v4107_v41 = vmul.f32 %v4101_v56, %v7050_v23  ;;  %v4108_v15 = vmul.f32 %v4101_v56, %v7058_v14  ;;  %v4109_v0 = vmul.f32 %v4101_v56, %v7023_v55  ;;  %v4110_v47 = vmul.f32 %v4101_v56, %v7025_v31 }
 0x454   :  { %v4111_v39 = vmul.f32 %v4101_v56, %v7076_v5  ;;  %v4112_v23 = vmul.f32 %v4101_v56, %v7085_v49  ;;  %v4113_v35 = vmul.f32 %v4101_v56, %v7099_v17  ;;  %v4114_v55 = vmul.f32 %v4101_v56, %v7105_v58 }
 0x455   :  { %v4118_v33 = vpop.permute.xlu1 %4117 }
 0x456   :  { %v4120_v52 = vadd.f32 %v4118_v33, %v4103_v40  ;;  %v4121_v60 = vadd.f32 %v4118_v33, %v4104_v50  ;;  %v4122_v18 = vadd.f32 %v4118_v33, %v4105_v43  ;;  %v4123_v7 = vadd.f32 %v4118_v33, %v4106_v38 }
 0x457   :  { %v4124_v34 = vadd.f32 %v4118_v33, %v4107_v41  ;;  %v4125_v12 = vadd.f32 %v4118_v33, %v4108_v15  ;;  %v4126_v44 = vadd.f32 %v4118_v33, %v4109_v0  ;;  %v4127_v9 = vadd.f32 %v4118_v33, %v4110_v47 }
 0x458   :  { %v4132_v20 = vmax.f32 %v4120_v52, 0.0  ;;  %v4133_v2 = vmax.f32 %v4121_v60, 0.0  ;;  %v4134_v28 = vmax.f32 %v4122_v18, 0.0  ;;  %v4135_v19 = vmax.f32 %v4123_v7, 0.0 }
 0x459   :  { %v4128_v14 = vadd.f32 %v4118_v33, %v4111_v39  ;;  %v4136_v32 = vmax.f32 %v4124_v34, 0.0  ;;  %v4129_v48 = vadd.f32 %v4118_v33, %v4112_v23  ;;  %v4137_v31 = vmax.f32 %v4125_v12, 0.0 }
 0x45a   :  { %4454 = vtanh.f32 %v4132_v20  ;;  %v4130_v63 = vadd.f32 %v4118_v33, %v4113_v35  ;;  %v4138_v27 = vmax.f32 %v4126_v44, 0.0  ;;  %v4131_v5 = vadd.f32 %v4118_v33, %v4114_v55 }
 0x45b   :  { %4456 = vtanh.f32 %v4133_v2  ;;  %v4139_v25 = vmax.f32 %v4127_v9, 0.0  ;;  %v4140_v45 = vmax.f32 %v4128_v14, 0.0  ;;  %v4141_v49 = vmax.f32 %v4129_v48, 0.0 }
 0x45c   :  { %4458 = vtanh.f32 %v4134_v28  ;;  %v4142_v37 = vmax.f32 %v4130_v63, 0.0  ;;  %v4143_v17 = vmax.f32 %v4131_v5, 0.0 }
 0x45d   :  { %4460 = vtanh.f32 %v4135_v19 }
 0x45e   :  { %4462 = vtanh.f32 %v4136_v32 }
 0x45f   :  { %4464 = vtanh.f32 %v4137_v31 }
 0x460   :  { %4466 = vtanh.f32 %v4138_v27 }
 0x461   :  { %4468 = vtanh.f32 %v4139_v25 }
 0x462   :  { %4470 = vtanh.f32 %v4140_v45 }
 0x463   :  { %4472 = vtanh.f32 %v4141_v49 }
 0x464   :  { %4474 = vtanh.f32 %v4142_v37 }
 0x465   :  { %4476 = vtanh.f32 %v4143_v17 }
 0x467   :  { %v4455_v58 = vpop.eup %4454 }
 0x468   :  { %v4457_v10 = vpop.eup %4456 }
 0x469   :  { %v4459_v30 = vpop.eup %4458  ;;  %v4168_v57 = vcombine.low %v4455_v58, %v4457_v10 }
 0x46a   :  { %v4461_v1 = vpop.eup %4460 }
 0x46b   :  { %v4463_v53 = vpop.eup %4462  ;;  %v4169_v36 = vcombine.low %v4459_v30, %v4461_v1  ;;  %4180 = vst [vmem:[%s7155_s5] sm:$0xff] %v4168_v57 }
 0x46c   :  { %v4465_v6 = vpop.eup %4464 }
 0x46d   :  { %v4467_v16 = vpop.eup %4466  ;;  %v4170_v29 = vcombine.low %v4463_v53, %v4465_v6  ;;  %4181 = vst [vmem:[%s7155_s5 + $0x8] sm:$0xff] %v4169_v36 }
 0x46e   :  { %v4469_v21 = vpop.eup %4468 }
 0x46f   :  { %v4471_v24 = vpop.eup %4470  ;;  %v4171_v22 = vcombine.low %v4467_v16, %v4469_v21  ;;  %4182 = vst [vmem:[%s7155_s5 + $0x10] sm:$0xff] %v4170_v29 }
 0x470   :  { %v4473_v46 = vpop.eup %4472 }
 0x471   :  { %v4475_v11 = vpop.eup %4474  ;;  %v4172_v59 = vcombine.low %v4471_v24, %v4473_v46  ;;  %4183 = vst [vmem:[%s7155_s5 + $0x18] sm:$0xff] %v4171_v22 }
 0x472   :  { %v4477_v54 = vpop.eup %4476 }
 0x473   :  { %v4173_v61 = vcombine.low %v4475_v11, %v4477_v54  ;;  %4184 = vst [vmem:[%s7155_s5 + $0x20] sm:$0xff] %v4172_v59 }
 0x475   :  { %4185 = vst [vmem:[%s7155_s5 + $0x28] sm:$0xff] %v4173_v61 }

</bundles_post_ra>
